<compile_context>
chip_gen: v7x
topology: tpu7x:2x2x1
jax: 0.10.0
libtpu: 0.0.40
codegen_flags: <defaults>
</compile_context>

<pallas_src>
import functools

import jax
import jax.numpy as jnp
from jax import lax
from jax.experimental import pallas as pl
from jax.experimental.pallas import tpu as pltpu


# ----------------------------------------------------------------------------
# Pallas kernel: single invocation, in-kernel time loop with vreg carries.
# ----------------------------------------------------------------------------
def rnn_kernel(x_ref,                               # (S*B, F)  time-major, flattened
               wih1_ref, b1_ref, whh1_ref,          # layer 1 (input proj hoisted)
               w2_ref, b2_ref,                      # layer 2 fused [W_ih; W_hh]
               w3_ref, b3_ref,                      # layer 3 fused [W_ih; W_hh]
               wout_ref, bout_ref,                  # output head
               out_ref,                             # (S*B, O)
               g1_ref, h3s_ref,                     # VMEM scratch
               *, seq_len, batch):
    H = whh1_ref.shape[0]
    B = batch
    bf = jnp.bfloat16
    f32 = jnp.float32

    # ---- prologue: layer-1 input projection for ALL timesteps (M = S*B) ------
    g1_ref[...] = (jnp.dot(x_ref[...].astype(bf), wih1_ref[...],
                           preferred_element_type=f32)
                   + b1_ref[...])

    def gate_act(gates, c_prev):
        # packed gate order [i, f, o, g]: one wide sigmoid + one tanh.
        s = jax.nn.sigmoid(gates[:, :3 * H])
        i_g = s[:, 0 * H:1 * H]
        f_g = s[:, 1 * H:2 * H]
        o_g = s[:, 2 * H:3 * H]
        g_g = jnp.tanh(gates[:, 3 * H:4 * H])
        c_new = f_g * c_prev + i_g * g_g
        h_new = o_g * jnp.tanh(c_new)
        return h_new, c_new

    def step(t, carry):
        h1, c1, h2, c2, h3, c3 = carry
        row = pl.multiple_of(t * B, B)

        # layer 1: input projection already in g1_ref; only the recurrent matmul.
        gates1 = g1_ref[pl.ds(row, B), :] + jnp.dot(
            h1.astype(bf), whh1_ref[...], preferred_element_type=f32)
        h1, c1 = gate_act(gates1, c1)

        # layer 2: fused [x_in ; h] @ [W_ih ; W_hh]
        xh2 = jnp.concatenate([h1, h2], axis=-1).astype(bf)
        gates2 = jnp.dot(xh2, w2_ref[...], preferred_element_type=f32) + b2_ref[...]
        h2, c2 = gate_act(gates2, c2)

        # layer 3: fused [x_in ; h] @ [W_ih ; W_hh]
        xh3 = jnp.concatenate([h2, h3], axis=-1).astype(bf)
        gates3 = jnp.dot(xh3, w3_ref[...], preferred_element_type=f32) + b3_ref[...]
        h3, c3 = gate_act(gates3, c3)

        # stage h3 for the hoisted output head.
        h3s_ref[pl.ds(row, B), :] = h3
        return (h1, c1, h2, c2, h3, c3)

    z = jnp.zeros((B, H), f32)
    # t = 0 is never computed (PyTorch loop starts at i=1); keep its slab defined.
    h3s_ref[pl.ds(0, B), :] = z
    lax.fori_loop(1, seq_len, step, (z, z, z, z, z, z), unroll=True)

    # ---- epilogue: output head for ALL timesteps (M = S*B) -------------------
    y = (jnp.dot(h3s_ref[...].astype(bf), wout_ref[...],
                 preferred_element_type=f32)
         + bout_ref[...])
    out_ref[...] = y.astype(out_ref.dtype)
    # out[:, 0, :] must stay exactly zero (PyTorch loop starts at i=1).
    out_ref[pl.ds(0, B), :] = jnp.zeros((B, out_ref.shape[-1]), out_ref.dtype)


# ----------------------------------------------------------------------------
# Wrapper
# ----------------------------------------------------------------------------
def rnn_forward(x, kp):
    """x: (B, S, F) float32.  Returns (B, S, O)."""
    B, S, F = x.shape
    H = kp["whh1"].shape[0]
    O = kp["wout"].shape[1]

    # time-major, flattened rows: row = t*B + b
    x_flat = jnp.transpose(x, (1, 0, 2)).reshape(S * B, F)

    def const(i):
        return (0, 0)

    in_specs = [
        pl.BlockSpec((S * B, F), const),        # x (time-major, flattened)
        pl.BlockSpec((F, 4 * H), const),        # W_ih1  (bf16, gate order i,f,o,g)
        pl.BlockSpec((1, 4 * H), const),        # b1 = b_ih1 + b_hh1 (fp32)
        pl.BlockSpec((H, 4 * H), const),        # W_hh1  (bf16)
        pl.BlockSpec((2 * H, 4 * H), const),    # [W_ih2; W_hh2] fused (bf16)
        pl.BlockSpec((1, 4 * H), const),        # b2 (fp32)
        pl.BlockSpec((2 * H, 4 * H), const),    # [W_ih3; W_hh3] fused (bf16)
        pl.BlockSpec((1, 4 * H), const),        # b3 (fp32)
        pl.BlockSpec((H, O), const),            # W_h2o (bf16, pre-transposed)
        pl.BlockSpec((1, O), const),            # b_h2o (fp32)
    ]

    kernel = functools.partial(rnn_kernel, seq_len=S, batch=B)

    out_flat = pl.pallas_call(
        kernel,
        out_shape=jax.ShapeDtypeStruct((S * B, O), x.dtype),
        grid_spec=pltpu.PrefetchScalarGridSpec(
            num_scalar_prefetch=0,
            grid=(1,),                           # single step; recurrence is in-kernel
            in_specs=in_specs,
            out_specs=pl.BlockSpec((S * B, O), const),
            scratch_shapes=[
                pltpu.VMEM((S * B, 4 * H), jnp.float32),   # hoisted layer-1 gates
                pltpu.VMEM((S * B, H), jnp.float32),       # staged h3 per timestep
            ],
        ),
        compiler_params=pltpu.CompilerParams(
            dimension_semantics=("arbitrary",)),
    )(
        x_flat,
        kp["wih1"], kp["b1"], kp["whh1"],
        kp["w2"], kp["b2"],
        kp["w3"], kp["b3"],
        kp["wout"], kp["bout"],
    )
    return out_flat.reshape(S, B, O).transpose(1, 0, 2)   # (B, S, O)


# ----------------------------------------------------------------------------
# Deterministic parameter init (PyTorch-style U(-1/sqrt(H), 1/sqrt(H)))
# ----------------------------------------------------------------------------
def init_params(key, input_size, hidden_size, output_size):
    H, F, O = hidden_size, input_size, output_size
    k = 1.0 / jnp.sqrt(jnp.float32(H))
    keys = jax.random.split(key, 14)
    u = lambda kk, shape: jax.random.uniform(kk, shape, jnp.float32, -k, k)

    torch_params = {
        # LSTMCell 1
        "w_ih1": u(keys[0], (4 * H, F)),  "w_hh1": u(keys[1], (4 * H, H)),
        "b_ih1": u(keys[2], (4 * H,)),    "b_hh1": u(keys[3], (4 * H,)),
        # LSTMCell 2
        "w_ih2": u(keys[4], (4 * H, H)),  "w_hh2": u(keys[5], (4 * H, H)),
        "b_ih2": u(keys[6], (4 * H,)),    "b_hh2": u(keys[7], (4 * H,)),
        # LSTMCell 3
        "w_ih3": u(keys[8], (4 * H, H)),  "w_hh3": u(keys[9], (4 * H, H)),
        "b_ih3": u(keys[10], (4 * H,)),   "b_hh3": u(keys[11], (4 * H,)),
        # h2o Linear
        "w_out": u(keys[12], (O, H)),     "b_out": u(keys[13], (O,)),
    }
    tp = torch_params

    def perm(w):
        # last-dim gate order: PyTorch [i, f, g, o] -> kernel [i, f, o, g]
        i, f, g, o = jnp.split(w, 4, axis=-1)
        return jnp.concatenate([i, f, o, g], axis=-1)

    bf = jnp.bfloat16
    kparams = {
        # layer 1: input projection hoisted in kernel; bias folded into it.
        "wih1": perm(tp["w_ih1"].T).astype(bf),
        "b1":   perm((tp["b_ih1"] + tp["b_hh1"])[None, :]),
        "whh1": perm(tp["w_hh1"].T).astype(bf),
        # layers 2/3: fused [W_ih; W_hh] so one matmul per cell per step.
        "w2": perm(jnp.concatenate([tp["w_ih2"].T, tp["w_hh2"].T], axis=0)).astype(bf),
        "b2": perm((tp["b_ih2"] + tp["b_hh2"])[None, :]),
        "w3": perm(jnp.concatenate([tp["w_ih3"].T, tp["w_hh3"].T], axis=0)).astype(bf),
        "b3": perm((tp["b_ih3"] + tp["b_hh3"])[None, :]),
        # output head
        "wout": tp["w_out"].T.astype(bf),
        "bout": tp["b_out"][None, :],
    }
    return torch_params, kparams


# ----------------------------------------------------------------------------
# Pure-JAX reference (mirrors the PyTorch forward exactly, fp32) for verification
# ----------------------------------------------------------------------------
def reference_forward(x, p, hidden_size, output_size):
    B, S, F = x.shape
    H = hidden_size

    def cell(x_t, h, c, w_ih, w_hh, b_ih, b_hh):
        gates = x_t @ w_ih.T + b_ih + h @ w_hh.T + b_hh
        i_g, f_g, g_g, o_g = jnp.split(gates, 4, axis=-1)
        i_g, f_g, o_g = jax.nn.sigmoid(i_g), jax.nn.sigmoid(f_g), jax.nn.sigmoid(o_g)
        g_g = jnp.tanh(g_g)
        c_new = f_g * c + i_g * g_g
        h_new = o_g * jnp.tanh(c_new)
        return h_new, c_new

    out = jnp.zeros((B, S, output_size), jnp.float32)
    h1 = c1 = h2 = c2 = h3 = c3 = jnp.zeros((B, H), jnp.float32)
    for t in range(1, S):
        h1, c1 = cell(x[:, t, :], h1, c1, p["w_ih1"], p["w_hh1"], p["b_ih1"], p["b_hh1"])
        h2, c2 = cell(h1, h2, c2, p["w_ih2"], p["w_hh2"], p["b_ih2"], p["b_hh2"])
        h3, c3 = cell(h2, h3, c3, p["w_ih3"], p["w_hh3"], p["b_ih3"], p["b_hh3"])
        y = h3 @ p["w_out"].T + p["b_out"]
        out = out.at[:, t, :].set(y)
    return out


if __name__ == "__main__":
    # Small, hardware-friendly shapes implied by the module's forward:
    # x is (batch, seq, features); 3 stacked LSTMCells of size H; Linear H->O.
    BATCH, SEQ, FEAT, HIDDEN, OUT = 8, 8, 64, 128, 128

    key = jax.random.PRNGKey(0)
    k_x, k_p = jax.random.split(key)
    x = jax.random.normal(k_x, (BATCH, SEQ, FEAT), jnp.float32)
    torch_params, kparams = init_params(k_p, FEAT, HIDDEN, OUT)

    run = jax.jit(rnn_forward)
    out = run(x, kparams)
    out = jax.block_until_ready(out)

    ref = reference_forward(x, torch_params, HIDDEN, OUT)
    assert out.shape == (BATCH, SEQ, OUT)
    # bf16 MXU inputs (fp32 accumulation) -> relaxed tolerance vs fp32 reference.
    assert jnp.allclose(out, ref, atol=2e-2, rtol=2e-2), "mismatch vs reference"
    # timestep 0 must be all zeros (loop starts at i=1 in the PyTorch code)
    assert jnp.all(out[:, 0, :] == 0.0)

    print("KERNEL_OK")
</pallas_src>

<mosaic_0001>
module attributes {stable_mosaic.version = 11 : i64} {
  func.func @rnn_kernel(%arg0: i32, %arg1: memref<64x64xf32, #tpu.memory_space<vmem>>, %arg2: memref<64x512xbf16, #tpu.memory_space<vmem>>, %arg3: memref<1x512xf32, #tpu.memory_space<vmem>>, %arg4: memref<128x512xbf16, #tpu.memory_space<vmem>>, %arg5: memref<256x512xbf16, #tpu.memory_space<vmem>>, %arg6: memref<1x512xf32, #tpu.memory_space<vmem>>, %arg7: memref<256x512xbf16, #tpu.memory_space<vmem>>, %arg8: memref<1x512xf32, #tpu.memory_space<vmem>>, %arg9: memref<128x128xbf16, #tpu.memory_space<vmem>>, %arg10: memref<1x128xf32, #tpu.memory_space<vmem>>, %arg11: memref<64x128xf32, #tpu.memory_space<vmem>>, %arg12: memref<64x512xf32, #tpu.memory_space<vmem>>, %arg13: memref<64x128xf32, #tpu.memory_space<vmem>>) attributes {dimension_semantics = [#tpu.dimension_semantics<arbitrary>], iteration_bounds = array<i64: 1>, scalar_prefetch = 0 : i64, scratch_operands = 2 : i64, tpu.core_type = #tpu.core_type<tc>, window_params = [{pipeline_mode = #tpu.pipeline_mode<synchronous>, transform_indices = @transform_0, window_bounds = array<i64: 64, 64>}, {pipeline_mode = #tpu.pipeline_mode<synchronous>, transform_indices = @transform_1, window_bounds = array<i64: 64, 512>}, {pipeline_mode = #tpu.pipeline_mode<synchronous>, transform_indices = @transform_2, window_bounds = array<i64: 1, 512>}, {pipeline_mode = #tpu.pipeline_mode<synchronous>, transform_indices = @transform_3, window_bounds = array<i64: 128, 512>}, {pipeline_mode = #tpu.pipeline_mode<synchronous>, transform_indices = @transform_4, window_bounds = array<i64: 256, 512>}, {pipeline_mode = #tpu.pipeline_mode<synchronous>, transform_indices = @transform_5, window_bounds = array<i64: 1, 512>}, {pipeline_mode = #tpu.pipeline_mode<synchronous>, transform_indices = @transform_6, window_bounds = array<i64: 256, 512>}, {pipeline_mode = #tpu.pipeline_mode<synchronous>, transform_indices = @transform_7, window_bounds = array<i64: 1, 512>}, {pipeline_mode = #tpu.pipeline_mode<synchronous>, transform_indices = @transform_8, window_bounds = array<i64: 128, 128>}, {pipeline_mode = #tpu.pipeline_mode<synchronous>, transform_indices = @transform_9, window_bounds = array<i64: 1, 128>}, {pipeline_mode = #tpu.pipeline_mode<synchronous>, transform_indices = @transform_10, window_bounds = array<i64: 64, 128>}]} {
    %c0 = arith.constant 0 : index
    %c0_0 = arith.constant 0 : index
    %0 = vector.load %arg1[%c0, %c0_0] : memref<64x64xf32, #tpu.memory_space<vmem>>, vector<64x64xf32>
    %1 = arith.truncf %0 : vector<64x64xf32> to vector<64x64xbf16>
    %c0_1 = arith.constant 0 : index
    %c0_2 = arith.constant 0 : index
    %2 = vector.load %arg2[%c0_1, %c0_2] : memref<64x512xbf16, #tpu.memory_space<vmem>>, vector<64x512xbf16>
    %cst = arith.constant dense<0.000000e+00> : vector<64x512xf32>
    %3 = tpu.matmul %1, %2, %cst {dimension_numbers = #tpu.dot_dimension_numbers<[1], [0], [0], [1], [0, 0, 1, 1], [], []>} : vector<64x64xbf16>, vector<64x512xbf16>, vector<64x512xf32> -> vector<64x512xf32>
    %c0_3 = arith.constant 0 : index
    %c0_4 = arith.constant 0 : index
    %4 = vector.load %arg3[%c0_3, %c0_4] : memref<1x512xf32, #tpu.memory_space<vmem>>, vector<1x512xf32>
    %5 = vector.broadcast %4 : vector<1x512xf32> to vector<64x512xf32>
    %6 = arith.addf %3, %5 : vector<64x512xf32>
    %c0_5 = arith.constant 0 : index
    %c0_6 = arith.constant 0 : index
    %7 = vector.load %arg12[%c0_5, %c0_6] : memref<64x512xf32, #tpu.memory_space<vmem>>, vector<64x512xf32>
    tpu.vector_store %arg12[%c0_5, %c0_6], %6 {strides = array<i32>} : memref<64x512xf32, #tpu.memory_space<vmem>>, vector<64x512xf32>,
    %cst_7 = arith.constant 0.000000e+00 : f32
    %8 = vector.broadcast %cst_7 : f32 to vector<8x128xf32>
    %c0_8 = arith.constant 0 : index
    %c0_9 = arith.constant 0 : index
    %9 = vector.load %arg13[%c0_8, %c0_9] : memref<64x128xf32, #tpu.memory_space<vmem>>, vector<8x128xf32>
    tpu.vector_store %arg13[%c0_8, %c0_9], %8 {strides = array<i32>} : memref<64x128xf32, #tpu.memory_space<vmem>>, vector<8x128xf32>,
    %c1_i32 = arith.constant 1 : i32
    %c8_i32 = arith.constant 8 : i32
    %10 = arith.muli %c1_i32, %c8_i32 : i32
    %11 = tpu.assume_multiple %10, 8 : i32
    %12 = arith.index_cast %11 : i32 to index
    %c0_10 = arith.constant 0 : index
    %13 = vector.load %arg12[%12, %c0_10] : memref<64x512xf32, #tpu.memory_space<vmem>>, vector<8x512xf32>
    %14 = arith.truncf %8 : vector<8x128xf32> to vector<8x128xbf16>
    %c0_11 = arith.constant 0 : index
    %c0_12 = arith.constant 0 : index
    %15 = vector.load %arg4[%c0_11, %c0_12] : memref<128x512xbf16, #tpu.memory_space<vmem>>, vector<128x512xbf16>
    %cst_13 = arith.constant dense<0.000000e+00> : vector<8x512xf32>
    %16 = tpu.matmul %14, %15, %cst_13 {dimension_numbers = #tpu.dot_dimension_numbers<[1], [0], [0], [1], [0, 0, 1, 1], [], []>} : vector<8x128xbf16>, vector<128x512xbf16>, vector<8x512xf32> -> vector<8x512xf32>
    %17 = arith.addf %13, %16 : vector<8x512xf32>
    %18 = vector.extract_strided_slice %17 {offsets = [0, 0], sizes = [8, 384], strides = [1, 1]} : vector<8x512xf32> to vector<8x384xf32>
    %19 = arith.negf %18 : vector<8x384xf32>
    %20 = math.exp %19 : vector<8x384xf32>
    %cst_14 = arith.constant 1.000000e+00 : f32
    %21 = vector.broadcast %cst_14 : f32 to vector<8x384xf32>
    %22 = arith.addf %21, %20 : vector<8x384xf32>
    %23 = arith.divf %21, %22 : vector<8x384xf32>
    %24 = vector.extract_strided_slice %23 {offsets = [0, 0], sizes = [8, 128], strides = [1, 1]} : vector<8x384xf32> to vector<8x128xf32>
    %25 = vector.extract_strided_slice %23 {offsets = [0, 128], sizes = [8, 128], strides = [1, 1]} : vector<8x384xf32> to vector<8x128xf32>
    %26 = vector.extract_strided_slice %23 {offsets = [0, 256], sizes = [8, 128], strides = [1, 1]} : vector<8x384xf32> to vector<8x128xf32>
    %27 = vector.extract_strided_slice %17 {offsets = [0, 384], sizes = [8, 128], strides = [1, 1]} : vector<8x512xf32> to vector<8x128xf32>
    %28 = math.tanh %27 : vector<8x128xf32>
    %29 = arith.mulf %25, %8 : vector<8x128xf32>
    %30 = arith.mulf %24, %28 : vector<8x128xf32>
    %31 = arith.addf %29, %30 : vector<8x128xf32>
    %32 = math.tanh %31 : vector<8x128xf32>
    %33 = arith.mulf %26, %32 : vector<8x128xf32>
    %34 = tpu.concatenate %33, %8 in 1 : vector<8x128xf32>, vector<8x128xf32> -> vector<8x256xf32>
    %35 = arith.truncf %34 : vector<8x256xf32> to vector<8x256xbf16>
    %c0_15 = arith.constant 0 : index
    %c0_16 = arith.constant 0 : index
    %36 = vector.load %arg5[%c0_15, %c0_16] : memref<256x512xbf16, #tpu.memory_space<vmem>>, vector<256x512xbf16>
    %cst_17 = arith.constant dense<0.000000e+00> : vector<8x512xf32>
    %37 = tpu.matmul %35, %36, %cst_17 {dimension_numbers = #tpu.dot_dimension_numbers<[1], [0], [0], [1], [0, 0, 1, 1], [], []>} : vector<8x256xbf16>, vector<256x512xbf16>, vector<8x512xf32> -> vector<8x512xf32>
    %c0_18 = arith.constant 0 : index
    %c0_19 = arith.constant 0 : index
    %38 = vector.load %arg6[%c0_18, %c0_19] : memref<1x512xf32, #tpu.memory_space<vmem>>, vector<1x512xf32>
    %39 = vector.broadcast %38 : vector<1x512xf32> to vector<8x512xf32>
    %40 = arith.addf %37, %39 : vector<8x512xf32>
    %41 = vector.extract_strided_slice %40 {offsets = [0, 0], sizes = [8, 384], strides = [1, 1]} : vector<8x512xf32> to vector<8x384xf32>
    %42 = arith.negf %41 : vector<8x384xf32>
    %43 = math.exp %42 : vector<8x384xf32>
    %cst_20 = arith.constant 1.000000e+00 : f32
    %44 = vector.broadcast %cst_20 : f32 to vector<8x384xf32>
    %45 = arith.addf %44, %43 : vector<8x384xf32>
    %46 = arith.divf %44, %45 : vector<8x384xf32>
    %47 = vector.extract_strided_slice %46 {offsets = [0, 0], sizes = [8, 128], strides = [1, 1]} : vector<8x384xf32> to vector<8x128xf32>
    %48 = vector.extract_strided_slice %46 {offsets = [0, 128], sizes = [8, 128], strides = [1, 1]} : vector<8x384xf32> to vector<8x128xf32>
    %49 = vector.extract_strided_slice %46 {offsets = [0, 256], sizes = [8, 128], strides = [1, 1]} : vector<8x384xf32> to vector<8x128xf32>
    %50 = vector.extract_strided_slice %40 {offsets = [0, 384], sizes = [8, 128], strides = [1, 1]} : vector<8x512xf32> to vector<8x128xf32>
    %51 = math.tanh %50 : vector<8x128xf32>
    %52 = arith.mulf %48, %8 : vector<8x128xf32>
    %53 = arith.mulf %47, %51 : vector<8x128xf32>
    %54 = arith.addf %52, %53 : vector<8x128xf32>
    %55 = math.tanh %54 : vector<8x128xf32>
    %56 = arith.mulf %49, %55 : vector<8x128xf32>
    %57 = tpu.concatenate %56, %8 in 1 : vector<8x128xf32>, vector<8x128xf32> -> vector<8x256xf32>
    %58 = arith.truncf %57 : vector<8x256xf32> to vector<8x256xbf16>
    %c0_21 = arith.constant 0 : index
    %c0_22 = arith.constant 0 : index
    %59 = vector.load %arg7[%c0_21, %c0_22] : memref<256x512xbf16, #tpu.memory_space<vmem>>, vector<256x512xbf16>
    %cst_23 = arith.constant dense<0.000000e+00> : vector<8x512xf32>
    %60 = tpu.matmul %58, %59, %cst_23 {dimension_numbers = #tpu.dot_dimension_numbers<[1], [0], [0], [1], [0, 0, 1, 1], [], []>} : vector<8x256xbf16>, vector<256x512xbf16>, vector<8x512xf32> -> vector<8x512xf32>
    %c0_24 = arith.constant 0 : index
    %c0_25 = arith.constant 0 : index
    %61 = vector.load %arg8[%c0_24, %c0_25] : memref<1x512xf32, #tpu.memory_space<vmem>>, vector<1x512xf32>
    %62 = vector.broadcast %61 : vector<1x512xf32> to vector<8x512xf32>
    %63 = arith.addf %60, %62 : vector<8x512xf32>
    %64 = vector.extract_strided_slice %63 {offsets = [0, 0], sizes = [8, 384], strides = [1, 1]} : vector<8x512xf32> to vector<8x384xf32>
    %65 = arith.negf %64 : vector<8x384xf32>
    %66 = math.exp %65 : vector<8x384xf32>
    %cst_26 = arith.constant 1.000000e+00 : f32
    %67 = vector.broadcast %cst_26 : f32 to vector<8x384xf32>
    %68 = arith.addf %67, %66 : vector<8x384xf32>
    %69 = arith.divf %67, %68 : vector<8x384xf32>
    %70 = vector.extract_strided_slice %69 {offsets = [0, 0], sizes = [8, 128], strides = [1, 1]} : vector<8x384xf32> to vector<8x128xf32>
    %71 = vector.extract_strided_slice %69 {offsets = [0, 128], sizes = [8, 128], strides = [1, 1]} : vector<8x384xf32> to vector<8x128xf32>
    %72 = vector.extract_strided_slice %69 {offsets = [0, 256], sizes = [8, 128], strides = [1, 1]} : vector<8x384xf32> to vector<8x128xf32>
    %73 = vector.extract_strided_slice %63 {offsets = [0, 384], sizes = [8, 128], strides = [1, 1]} : vector<8x512xf32> to vector<8x128xf32>
    %74 = math.tanh %73 : vector<8x128xf32>
    %75 = arith.mulf %71, %8 : vector<8x128xf32>
    %76 = arith.mulf %70, %74 : vector<8x128xf32>
    %77 = arith.addf %75, %76 : vector<8x128xf32>
    %78 = math.tanh %77 : vector<8x128xf32>
    %79 = arith.mulf %72, %78 : vector<8x128xf32>
    %80 = arith.index_cast %11 : i32 to index
    %c0_27 = arith.constant 0 : index
    %81 = vector.load %arg13[%80, %c0_27] : memref<64x128xf32, #tpu.memory_space<vmem>>, vector<8x128xf32>
    tpu.vector_store %arg13[%80, %c0_27], %79 {strides = array<i32>} : memref<64x128xf32, #tpu.memory_space<vmem>>, vector<8x128xf32>,
    %c2_i32 = arith.constant 2 : i32
    %c8_i32_28 = arith.constant 8 : i32
    %82 = arith.muli %c2_i32, %c8_i32_28 : i32
    %83 = tpu.assume_multiple %82, 8 : i32
    %84 = arith.index_cast %83 : i32 to index
    %c0_29 = arith.constant 0 : index
    %85 = vector.load %arg12[%84, %c0_29] : memref<64x512xf32, #tpu.memory_space<vmem>>, vector<8x512xf32>
    %86 = arith.truncf %33 : vector<8x128xf32> to vector<8x128xbf16>
    %c0_30 = arith.constant 0 : index
    %c0_31 = arith.constant 0 : index
    %87 = vector.load %arg4[%c0_30, %c0_31] : memref<128x512xbf16, #tpu.memory_space<vmem>>, vector<128x512xbf16>
    %cst_32 = arith.constant dense<0.000000e+00> : vector<8x512xf32>
    %88 = tpu.matmul %86, %87, %cst_32 {dimension_numbers = #tpu.dot_dimension_numbers<[1], [0], [0], [1], [0, 0, 1, 1], [], []>} : vector<8x128xbf16>, vector<128x512xbf16>, vector<8x512xf32> -> vector<8x512xf32>
    %89 = arith.addf %85, %88 : vector<8x512xf32>
    %90 = vector.extract_strided_slice %89 {offsets = [0, 0], sizes = [8, 384], strides = [1, 1]} : vector<8x512xf32> to vector<8x384xf32>
    %91 = arith.negf %90 : vector<8x384xf32>
    %92 = math.exp %91 : vector<8x384xf32>
    %cst_33 = arith.constant 1.000000e+00 : f32
    %93 = vector.broadcast %cst_33 : f32 to vector<8x384xf32>
    %94 = arith.addf %93, %92 : vector<8x384xf32>
    %95 = arith.divf %93, %94 : vector<8x384xf32>
    %96 = vector.extract_strided_slice %95 {offsets = [0, 0], sizes = [8, 128], strides = [1, 1]} : vector<8x384xf32> to vector<8x128xf32>
    %97 = vector.extract_strided_slice %95 {offsets = [0, 128], sizes = [8, 128], strides = [1, 1]} : vector<8x384xf32> to vector<8x128xf32>
    %98 = vector.extract_strided_slice %95 {offsets = [0, 256], sizes = [8, 128], strides = [1, 1]} : vector<8x384xf32> to vector<8x128xf32>
    %99 = vector.extract_strided_slice %89 {offsets = [0, 384], sizes = [8, 128], strides = [1, 1]} : vector<8x512xf32> to vector<8x128xf32>
    %100 = math.tanh %99 : vector<8x128xf32>
    %101 = arith.mulf %97, %31 : vector<8x128xf32>
    %102 = arith.mulf %96, %100 : vector<8x128xf32>
    %103 = arith.addf %101, %102 : vector<8x128xf32>
    %104 = math.tanh %103 : vector<8x128xf32>
    %105 = arith.mulf %98, %104 : vector<8x128xf32>
    %106 = tpu.concatenate %105, %56 in 1 : vector<8x128xf32>, vector<8x128xf32> -> vector<8x256xf32>
    %107 = arith.truncf %106 : vector<8x256xf32> to vector<8x256xbf16>
    %c0_34 = arith.constant 0 : index
    %c0_35 = arith.constant 0 : index
    %108 = vector.load %arg5[%c0_34, %c0_35] : memref<256x512xbf16, #tpu.memory_space<vmem>>, vector<256x512xbf16>
    %cst_36 = arith.constant dense<0.000000e+00> : vector<8x512xf32>
    %109 = tpu.matmul %107, %108, %cst_36 {dimension_numbers = #tpu.dot_dimension_numbers<[1], [0], [0], [1], [0, 0, 1, 1], [], []>} : vector<8x256xbf16>, vector<256x512xbf16>, vector<8x512xf32> -> vector<8x512xf32>
    %c0_37 = arith.constant 0 : index
    %c0_38 = arith.constant 0 : index
    %110 = vector.load %arg6[%c0_37, %c0_38] : memref<1x512xf32, #tpu.memory_space<vmem>>, vector<1x512xf32>
    %111 = vector.broadcast %110 : vector<1x512xf32> to vector<8x512xf32>
    %112 = arith.addf %109, %111 : vector<8x512xf32>
    %113 = vector.extract_strided_slice %112 {offsets = [0, 0], sizes = [8, 384], strides = [1, 1]} : vector<8x512xf32> to vector<8x384xf32>
    %114 = arith.negf %113 : vector<8x384xf32>
    %115 = math.exp %114 : vector<8x384xf32>
    %cst_39 = arith.constant 1.000000e+00 : f32
    %116 = vector.broadcast %cst_39 : f32 to vector<8x384xf32>
    %117 = arith.addf %116, %115 : vector<8x384xf32>
    %118 = arith.divf %116, %117 : vector<8x384xf32>
    %119 = vector.extract_strided_slice %118 {offsets = [0, 0], sizes = [8, 128], strides = [1, 1]} : vector<8x384xf32> to vector<8x128xf32>
    %120 = vector.extract_strided_slice %118 {offsets = [0, 128], sizes = [8, 128], strides = [1, 1]} : vector<8x384xf32> to vector<8x128xf32>
    %121 = vector.extract_strided_slice %118 {offsets = [0, 256], sizes = [8, 128], strides = [1, 1]} : vector<8x384xf32> to vector<8x128xf32>
    %122 = vector.extract_strided_slice %112 {offsets = [0, 384], sizes = [8, 128], strides = [1, 1]} : vector<8x512xf32> to vector<8x128xf32>
    %123 = math.tanh %122 : vector<8x128xf32>
    %124 = arith.mulf %120, %54 : vector<8x128xf32>
    %125 = arith.mulf %119, %123 : vector<8x128xf32>
    %126 = arith.addf %124, %125 : vector<8x128xf32>
    %127 = math.tanh %126 : vector<8x128xf32>
    %128 = arith.mulf %121, %127 : vector<8x128xf32>
    %129 = tpu.concatenate %128, %79 in 1 : vector<8x128xf32>, vector<8x128xf32> -> vector<8x256xf32>
    %130 = arith.truncf %129 : vector<8x256xf32> to vector<8x256xbf16>
    %c0_40 = arith.constant 0 : index
    %c0_41 = arith.constant 0 : index
    %131 = vector.load %arg7[%c0_40, %c0_41] : memref<256x512xbf16, #tpu.memory_space<vmem>>, vector<256x512xbf16>
    %cst_42 = arith.constant dense<0.000000e+00> : vector<8x512xf32>
    %132 = tpu.matmul %130, %131, %cst_42 {dimension_numbers = #tpu.dot_dimension_numbers<[1], [0], [0], [1], [0, 0, 1, 1], [], []>} : vector<8x256xbf16>, vector<256x512xbf16>, vector<8x512xf32> -> vector<8x512xf32>
    %c0_43 = arith.constant 0 : index
    %c0_44 = arith.constant 0 : index
    %133 = vector.load %arg8[%c0_43, %c0_44] : memref<1x512xf32, #tpu.memory_space<vmem>>, vector<1x512xf32>
    %134 = vector.broadcast %133 : vector<1x512xf32> to vector<8x512xf32>
    %135 = arith.addf %132, %134 : vector<8x512xf32>
    %136 = vector.extract_strided_slice %135 {offsets = [0, 0], sizes = [8, 384], strides = [1, 1]} : vector<8x512xf32> to vector<8x384xf32>
    %137 = arith.negf %136 : vector<8x384xf32>
    %138 = math.exp %137 : vector<8x384xf32>
    %cst_45 = arith.constant 1.000000e+00 : f32
    %139 = vector.broadcast %cst_45 : f32 to vector<8x384xf32>
    %140 = arith.addf %139, %138 : vector<8x384xf32>
    %141 = arith.divf %139, %140 : vector<8x384xf32>
    %142 = vector.extract_strided_slice %141 {offsets = [0, 0], sizes = [8, 128], strides = [1, 1]} : vector<8x384xf32> to vector<8x128xf32>
    %143 = vector.extract_strided_slice %141 {offsets = [0, 128], sizes = [8, 128], strides = [1, 1]} : vector<8x384xf32> to vector<8x128xf32>
    %144 = vector.extract_strided_slice %141 {offsets = [0, 256], sizes = [8, 128], strides = [1, 1]} : vector<8x384xf32> to vector<8x128xf32>
    %145 = vector.extract_strided_slice %135 {offsets = [0, 384], sizes = [8, 128], strides = [1, 1]} : vector<8x512xf32> to vector<8x128xf32>
    %146 = math.tanh %145 : vector<8x128xf32>
    %147 = arith.mulf %143, %77 : vector<8x128xf32>
    %148 = arith.mulf %142, %146 : vector<8x128xf32>
    %149 = arith.addf %147, %148 : vector<8x128xf32>
    %150 = math.tanh %149 : vector<8x128xf32>
    %151 = arith.mulf %144, %150 : vector<8x128xf32>
    %152 = arith.index_cast %83 : i32 to index
    %c0_46 = arith.constant 0 : index
    %153 = vector.load %arg13[%152, %c0_46] : memref<64x128xf32, #tpu.memory_space<vmem>>, vector<8x128xf32>
    tpu.vector_store %arg13[%152, %c0_46], %151 {strides = array<i32>} : memref<64x128xf32, #tpu.memory_space<vmem>>, vector<8x128xf32>,
    %c3_i32 = arith.constant 3 : i32
    %c8_i32_47 = arith.constant 8 : i32
    %154 = arith.muli %c3_i32, %c8_i32_47 : i32
    %155 = tpu.assume_multiple %154, 8 : i32
    %156 = arith.index_cast %155 : i32 to index
    %c0_48 = arith.constant 0 : index
    %157 = vector.load %arg12[%156, %c0_48] : memref<64x512xf32, #tpu.memory_space<vmem>>, vector<8x512xf32>
    %158 = arith.truncf %105 : vector<8x128xf32> to vector<8x128xbf16>
    %c0_49 = arith.constant 0 : index
    %c0_50 = arith.constant 0 : index
    %159 = vector.load %arg4[%c0_49, %c0_50] : memref<128x512xbf16, #tpu.memory_space<vmem>>, vector<128x512xbf16>
    %cst_51 = arith.constant dense<0.000000e+00> : vector<8x512xf32>
    %160 = tpu.matmul %158, %159, %cst_51 {dimension_numbers = #tpu.dot_dimension_numbers<[1], [0], [0], [1], [0, 0, 1, 1], [], []>} : vector<8x128xbf16>, vector<128x512xbf16>, vector<8x512xf32> -> vector<8x512xf32>
    %161 = arith.addf %157, %160 : vector<8x512xf32>
    %162 = vector.extract_strided_slice %161 {offsets = [0, 0], sizes = [8, 384], strides = [1, 1]} : vector<8x512xf32> to vector<8x384xf32>
    %163 = arith.negf %162 : vector<8x384xf32>
    %164 = math.exp %163 : vector<8x384xf32>
    %cst_52 = arith.constant 1.000000e+00 : f32
    %165 = vector.broadcast %cst_52 : f32 to vector<8x384xf32>
    %166 = arith.addf %165, %164 : vector<8x384xf32>
    %167 = arith.divf %165, %166 : vector<8x384xf32>
    %168 = vector.extract_strided_slice %167 {offsets = [0, 0], sizes = [8, 128], strides = [1, 1]} : vector<8x384xf32> to vector<8x128xf32>
    %169 = vector.extract_strided_slice %167 {offsets = [0, 128], sizes = [8, 128], strides = [1, 1]} : vector<8x384xf32> to vector<8x128xf32>
    %170 = vector.extract_strided_slice %167 {offsets = [0, 256], sizes = [8, 128], strides = [1, 1]} : vector<8x384xf32> to vector<8x128xf32>
    %171 = vector.extract_strided_slice %161 {offsets = [0, 384], sizes = [8, 128], strides = [1, 1]} : vector<8x512xf32> to vector<8x128xf32>
    %172 = math.tanh %171 : vector<8x128xf32>
    %173 = arith.mulf %169, %103 : vector<8x128xf32>
    %174 = arith.mulf %168, %172 : vector<8x128xf32>
    %175 = arith.addf %173, %174 : vector<8x128xf32>
    %176 = math.tanh %175 : vector<8x128xf32>
    %177 = arith.mulf %170, %176 : vector<8x128xf32>
    %178 = tpu.concatenate %177, %128 in 1 : vector<8x128xf32>, vector<8x128xf32> -> vector<8x256xf32>
    %179 = arith.truncf %178 : vector<8x256xf32> to vector<8x256xbf16>
    %c0_53 = arith.constant 0 : index
    %c0_54 = arith.constant 0 : index
    %180 = vector.load %arg5[%c0_53, %c0_54] : memref<256x512xbf16, #tpu.memory_space<vmem>>, vector<256x512xbf16>
    %cst_55 = arith.constant dense<0.000000e+00> : vector<8x512xf32>
    %181 = tpu.matmul %179, %180, %cst_55 {dimension_numbers = #tpu.dot_dimension_numbers<[1], [0], [0], [1], [0, 0, 1, 1], [], []>} : vector<8x256xbf16>, vector<256x512xbf16>, vector<8x512xf32> -> vector<8x512xf32>
    %c0_56 = arith.constant 0 : index
    %c0_57 = arith.constant 0 : index
    %182 = vector.load %arg6[%c0_56, %c0_57] : memref<1x512xf32, #tpu.memory_space<vmem>>, vector<1x512xf32>
    %183 = vector.broadcast %182 : vector<1x512xf32> to vector<8x512xf32>
    %184 = arith.addf %181, %183 : vector<8x512xf32>
    %185 = vector.extract_strided_slice %184 {offsets = [0, 0], sizes = [8, 384], strides = [1, 1]} : vector<8x512xf32> to vector<8x384xf32>
    %186 = arith.negf %185 : vector<8x384xf32>
    %187 = math.exp %186 : vector<8x384xf32>
    %cst_58 = arith.constant 1.000000e+00 : f32
    %188 = vector.broadcast %cst_58 : f32 to vector<8x384xf32>
    %189 = arith.addf %188, %187 : vector<8x384xf32>
    %190 = arith.divf %188, %189 : vector<8x384xf32>
    %191 = vector.extract_strided_slice %190 {offsets = [0, 0], sizes = [8, 128], strides = [1, 1]} : vector<8x384xf32> to vector<8x128xf32>
    %192 = vector.extract_strided_slice %190 {offsets = [0, 128], sizes = [8, 128], strides = [1, 1]} : vector<8x384xf32> to vector<8x128xf32>
    %193 = vector.extract_strided_slice %190 {offsets = [0, 256], sizes = [8, 128], strides = [1, 1]} : vector<8x384xf32> to vector<8x128xf32>
    %194 = vector.extract_strided_slice %184 {offsets = [0, 384], sizes = [8, 128], strides = [1, 1]} : vector<8x512xf32> to vector<8x128xf32>
    %195 = math.tanh %194 : vector<8x128xf32>
    %196 = arith.mulf %192, %126 : vector<8x128xf32>
    %197 = arith.mulf %191, %195 : vector<8x128xf32>
    %198 = arith.addf %196, %197 : vector<8x128xf32>
    %199 = math.tanh %198 : vector<8x128xf32>
    %200 = arith.mulf %193, %199 : vector<8x128xf32>
    %201 = tpu.concatenate %200, %151 in 1 : vector<8x128xf32>, vector<8x128xf32> -> vector<8x256xf32>
    %202 = arith.truncf %201 : vector<8x256xf32> to vector<8x256xbf16>
    %c0_59 = arith.constant 0 : index
    %c0_60 = arith.constant 0 : index
    %203 = vector.load %arg7[%c0_59, %c0_60] : memref<256x512xbf16, #tpu.memory_space<vmem>>, vector<256x512xbf16>
    %cst_61 = arith.constant dense<0.000000e+00> : vector<8x512xf32>
    %204 = tpu.matmul %202, %203, %cst_61 {dimension_numbers = #tpu.dot_dimension_numbers<[1], [0], [0], [1], [0, 0, 1, 1], [], []>} : vector<8x256xbf16>, vector<256x512xbf16>, vector<8x512xf32> -> vector<8x512xf32>
    %c0_62 = arith.constant 0 : index
    %c0_63 = arith.constant 0 : index
    %205 = vector.load %arg8[%c0_62, %c0_63] : memref<1x512xf32, #tpu.memory_space<vmem>>, vector<1x512xf32>
    %206 = vector.broadcast %205 : vector<1x512xf32> to vector<8x512xf32>
    %207 = arith.addf %204, %206 : vector<8x512xf32>
    %208 = vector.extract_strided_slice %207 {offsets = [0, 0], sizes = [8, 384], strides = [1, 1]} : vector<8x512xf32> to vector<8x384xf32>
    %209 = arith.negf %208 : vector<8x384xf32>
    %210 = math.exp %209 : vector<8x384xf32>
    %cst_64 = arith.constant 1.000000e+00 : f32
    %211 = vector.broadcast %cst_64 : f32 to vector<8x384xf32>
    %212 = arith.addf %211, %210 : vector<8x384xf32>
    %213 = arith.divf %211, %212 : vector<8x384xf32>
    %214 = vector.extract_strided_slice %213 {offsets = [0, 0], sizes = [8, 128], strides = [1, 1]} : vector<8x384xf32> to vector<8x128xf32>
    %215 = vector.extract_strided_slice %213 {offsets = [0, 128], sizes = [8, 128], strides = [1, 1]} : vector<8x384xf32> to vector<8x128xf32>
    %216 = vector.extract_strided_slice %213 {offsets = [0, 256], sizes = [8, 128], strides = [1, 1]} : vector<8x384xf32> to vector<8x128xf32>
    %217 = vector.extract_strided_slice %207 {offsets = [0, 384], sizes = [8, 128], strides = [1, 1]} : vector<8x512xf32> to vector<8x128xf32>
    %218 = math.tanh %217 : vector<8x128xf32>
    %219 = arith.mulf %215, %149 : vector<8x128xf32>
    %220 = arith.mulf %214, %218 : vector<8x128xf32>
    %221 = arith.addf %219, %220 : vector<8x128xf32>
    %222 = math.tanh %221 : vector<8x128xf32>
    %223 = arith.mulf %216, %222 : vector<8x128xf32>
    %224 = arith.index_cast %155 : i32 to index
    %c0_65 = arith.constant 0 : index
    %225 = vector.load %arg13[%224, %c0_65] : memref<64x128xf32, #tpu.memory_space<vmem>>, vector<8x128xf32>
    tpu.vector_store %arg13[%224, %c0_65], %223 {strides = array<i32>} : memref<64x128xf32, #tpu.memory_space<vmem>>, vector<8x128xf32>,
    %c4_i32 = arith.constant 4 : i32
    %c8_i32_66 = arith.constant 8 : i32
    %226 = arith.muli %c4_i32, %c8_i32_66 : i32
    %227 = tpu.assume_multiple %226, 8 : i32
    %228 = arith.index_cast %227 : i32 to index
    %c0_67 = arith.constant 0 : index
    %229 = vector.load %arg12[%228, %c0_67] : memref<64x512xf32, #tpu.memory_space<vmem>>, vector<8x512xf32>
    %230 = arith.truncf %177 : vector<8x128xf32> to vector<8x128xbf16>
    %c0_68 = arith.constant 0 : index
    %c0_69 = arith.constant 0 : index
    %231 = vector.load %arg4[%c0_68, %c0_69] : memref<128x512xbf16, #tpu.memory_space<vmem>>, vector<128x512xbf16>
    %cst_70 = arith.constant dense<0.000000e+00> : vector<8x512xf32>
    %232 = tpu.matmul %230, %231, %cst_70 {dimension_numbers = #tpu.dot_dimension_numbers<[1], [0], [0], [1], [0, 0, 1, 1], [], []>} : vector<8x128xbf16>, vector<128x512xbf16>, vector<8x512xf32> -> vector<8x512xf32>
    %233 = arith.addf %229, %232 : vector<8x512xf32>
    %234 = vector.extract_strided_slice %233 {offsets = [0, 0], sizes = [8, 384], strides = [1, 1]} : vector<8x512xf32> to vector<8x384xf32>
    %235 = arith.negf %234 : vector<8x384xf32>
    %236 = math.exp %235 : vector<8x384xf32>
    %cst_71 = arith.constant 1.000000e+00 : f32
    %237 = vector.broadcast %cst_71 : f32 to vector<8x384xf32>
    %238 = arith.addf %237, %236 : vector<8x384xf32>
    %239 = arith.divf %237, %238 : vector<8x384xf32>
    %240 = vector.extract_strided_slice %239 {offsets = [0, 0], sizes = [8, 128], strides = [1, 1]} : vector<8x384xf32> to vector<8x128xf32>
    %241 = vector.extract_strided_slice %239 {offsets = [0, 128], sizes = [8, 128], strides = [1, 1]} : vector<8x384xf32> to vector<8x128xf32>
    %242 = vector.extract_strided_slice %239 {offsets = [0, 256], sizes = [8, 128], strides = [1, 1]} : vector<8x384xf32> to vector<8x128xf32>
    %243 = vector.extract_strided_slice %233 {offsets = [0, 384], sizes = [8, 128], strides = [1, 1]} : vector<8x512xf32> to vector<8x128xf32>
    %244 = math.tanh %243 : vector<8x128xf32>
    %245 = arith.mulf %241, %175 : vector<8x128xf32>
    %246 = arith.mulf %240, %244 : vector<8x128xf32>
    %247 = arith.addf %245, %246 : vector<8x128xf32>
    %248 = math.tanh %247 : vector<8x128xf32>
    %249 = arith.mulf %242, %248 : vector<8x128xf32>
    %250 = tpu.concatenate %249, %200 in 1 : vector<8x128xf32>, vector<8x128xf32> -> vector<8x256xf32>
    %251 = arith.truncf %250 : vector<8x256xf32> to vector<8x256xbf16>
    %c0_72 = arith.constant 0 : index
    %c0_73 = arith.constant 0 : index
    %252 = vector.load %arg5[%c0_72, %c0_73] : memref<256x512xbf16, #tpu.memory_space<vmem>>, vector<256x512xbf16>
    %cst_74 = arith.constant dense<0.000000e+00> : vector<8x512xf32>
    %253 = tpu.matmul %251, %252, %cst_74 {dimension_numbers = #tpu.dot_dimension_numbers<[1], [0], [0], [1], [0, 0, 1, 1], [], []>} : vector<8x256xbf16>, vector<256x512xbf16>, vector<8x512xf32> -> vector<8x512xf32>
    %c0_75 = arith.constant 0 : index
    %c0_76 = arith.constant 0 : index
    %254 = vector.load %arg6[%c0_75, %c0_76] : memref<1x512xf32, #tpu.memory_space<vmem>>, vector<1x512xf32>
    %255 = vector.broadcast %254 : vector<1x512xf32> to vector<8x512xf32>
    %256 = arith.addf %253, %255 : vector<8x512xf32>
    %257 = vector.extract_strided_slice %256 {offsets = [0, 0], sizes = [8, 384], strides = [1, 1]} : vector<8x512xf32> to vector<8x384xf32>
    %258 = arith.negf %257 : vector<8x384xf32>
    %259 = math.exp %258 : vector<8x384xf32>
    %cst_77 = arith.constant 1.000000e+00 : f32
    %260 = vector.broadcast %cst_77 : f32 to vector<8x384xf32>
    %261 = arith.addf %260, %259 : vector<8x384xf32>
    %262 = arith.divf %260, %261 : vector<8x384xf32>
    %263 = vector.extract_strided_slice %262 {offsets = [0, 0], sizes = [8, 128], strides = [1, 1]} : vector<8x384xf32> to vector<8x128xf32>
    %264 = vector.extract_strided_slice %262 {offsets = [0, 128], sizes = [8, 128], strides = [1, 1]} : vector<8x384xf32> to vector<8x128xf32>
    %265 = vector.extract_strided_slice %262 {offsets = [0, 256], sizes = [8, 128], strides = [1, 1]} : vector<8x384xf32> to vector<8x128xf32>
    %266 = vector.extract_strided_slice %256 {offsets = [0, 384], sizes = [8, 128], strides = [1, 1]} : vector<8x512xf32> to vector<8x128xf32>
    %267 = math.tanh %266 : vector<8x128xf32>
    %268 = arith.mulf %264, %198 : vector<8x128xf32>
    %269 = arith.mulf %263, %267 : vector<8x128xf32>
    %270 = arith.addf %268, %269 : vector<8x128xf32>
    %271 = math.tanh %270 : vector<8x128xf32>
    %272 = arith.mulf %265, %271 : vector<8x128xf32>
    %273 = tpu.concatenate %272, %223 in 1 : vector<8x128xf32>, vector<8x128xf32> -> vector<8x256xf32>
    %274 = arith.truncf %273 : vector<8x256xf32> to vector<8x256xbf16>
    %c0_78 = arith.constant 0 : index
    %c0_79 = arith.constant 0 : index
    %275 = vector.load %arg7[%c0_78, %c0_79] : memref<256x512xbf16, #tpu.memory_space<vmem>>, vector<256x512xbf16>
    %cst_80 = arith.constant dense<0.000000e+00> : vector<8x512xf32>
    %276 = tpu.matmul %274, %275, %cst_80 {dimension_numbers = #tpu.dot_dimension_numbers<[1], [0], [0], [1], [0, 0, 1, 1], [], []>} : vector<8x256xbf16>, vector<256x512xbf16>, vector<8x512xf32> -> vector<8x512xf32>
    %c0_81 = arith.constant 0 : index
    %c0_82 = arith.constant 0 : index
    %277 = vector.load %arg8[%c0_81, %c0_82] : memref<1x512xf32, #tpu.memory_space<vmem>>, vector<1x512xf32>
    %278 = vector.broadcast %277 : vector<1x512xf32> to vector<8x512xf32>
    %279 = arith.addf %276, %278 : vector<8x512xf32>
    %280 = vector.extract_strided_slice %279 {offsets = [0, 0], sizes = [8, 384], strides = [1, 1]} : vector<8x512xf32> to vector<8x384xf32>
    %281 = arith.negf %280 : vector<8x384xf32>
    %282 = math.exp %281 : vector<8x384xf32>
    %cst_83 = arith.constant 1.000000e+00 : f32
    %283 = vector.broadcast %cst_83 : f32 to vector<8x384xf32>
    %284 = arith.addf %283, %282 : vector<8x384xf32>
    %285 = arith.divf %283, %284 : vector<8x384xf32>
    %286 = vector.extract_strided_slice %285 {offsets = [0, 0], sizes = [8, 128], strides = [1, 1]} : vector<8x384xf32> to vector<8x128xf32>
    %287 = vector.extract_strided_slice %285 {offsets = [0, 128], sizes = [8, 128], strides = [1, 1]} : vector<8x384xf32> to vector<8x128xf32>
    %288 = vector.extract_strided_slice %285 {offsets = [0, 256], sizes = [8, 128], strides = [1, 1]} : vector<8x384xf32> to vector<8x128xf32>
    %289 = vector.extract_strided_slice %279 {offsets = [0, 384], sizes = [8, 128], strides = [1, 1]} : vector<8x512xf32> to vector<8x128xf32>
    %290 = math.tanh %289 : vector<8x128xf32>
    %291 = arith.mulf %287, %221 : vector<8x128xf32>
    %292 = arith.mulf %286, %290 : vector<8x128xf32>
    %293 = arith.addf %291, %292 : vector<8x128xf32>
    %294 = math.tanh %293 : vector<8x128xf32>
    %295 = arith.mulf %288, %294 : vector<8x128xf32>
    %296 = arith.index_cast %227 : i32 to index
    %c0_84 = arith.constant 0 : index
    %297 = vector.load %arg13[%296, %c0_84] : memref<64x128xf32, #tpu.memory_space<vmem>>, vector<8x128xf32>
    tpu.vector_store %arg13[%296, %c0_84], %295 {strides = array<i32>} : memref<64x128xf32, #tpu.memory_space<vmem>>, vector<8x128xf32>,
    %c5_i32 = arith.constant 5 : i32
    %c8_i32_85 = arith.constant 8 : i32
    %298 = arith.muli %c5_i32, %c8_i32_85 : i32
    %299 = tpu.assume_multiple %298, 8 : i32
    %300 = arith.index_cast %299 : i32 to index
    %c0_86 = arith.constant 0 : index
    %301 = vector.load %arg12[%300, %c0_86] : memref<64x512xf32, #tpu.memory_space<vmem>>, vector<8x512xf32>
    %302 = arith.truncf %249 : vector<8x128xf32> to vector<8x128xbf16>
    %c0_87 = arith.constant 0 : index
    %c0_88 = arith.constant 0 : index
    %303 = vector.load %arg4[%c0_87, %c0_88] : memref<128x512xbf16, #tpu.memory_space<vmem>>, vector<128x512xbf16>
    %cst_89 = arith.constant dense<0.000000e+00> : vector<8x512xf32>
    %304 = tpu.matmul %302, %303, %cst_89 {dimension_numbers = #tpu.dot_dimension_numbers<[1], [0], [0], [1], [0, 0, 1, 1], [], []>} : vector<8x128xbf16>, vector<128x512xbf16>, vector<8x512xf32> -> vector<8x512xf32>
    %305 = arith.addf %301, %304 : vector<8x512xf32>
    %306 = vector.extract_strided_slice %305 {offsets = [0, 0], sizes = [8, 384], strides = [1, 1]} : vector<8x512xf32> to vector<8x384xf32>
    %307 = arith.negf %306 : vector<8x384xf32>
    %308 = math.exp %307 : vector<8x384xf32>
    %cst_90 = arith.constant 1.000000e+00 : f32
    %309 = vector.broadcast %cst_90 : f32 to vector<8x384xf32>
    %310 = arith.addf %309, %308 : vector<8x384xf32>
    %311 = arith.divf %309, %310 : vector<8x384xf32>
    %312 = vector.extract_strided_slice %311 {offsets = [0, 0], sizes = [8, 128], strides = [1, 1]} : vector<8x384xf32> to vector<8x128xf32>
    %313 = vector.extract_strided_slice %311 {offsets = [0, 128], sizes = [8, 128], strides = [1, 1]} : vector<8x384xf32> to vector<8x128xf32>
    %314 = vector.extract_strided_slice %311 {offsets = [0, 256], sizes = [8, 128], strides = [1, 1]} : vector<8x384xf32> to vector<8x128xf32>
    %315 = vector.extract_strided_slice %305 {offsets = [0, 384], sizes = [8, 128], strides = [1, 1]} : vector<8x512xf32> to vector<8x128xf32>
    %316 = math.tanh %315 : vector<8x128xf32>
    %317 = arith.mulf %313, %247 : vector<8x128xf32>
    %318 = arith.mulf %312, %316 : vector<8x128xf32>
    %319 = arith.addf %317, %318 : vector<8x128xf32>
    %320 = math.tanh %319 : vector<8x128xf32>
    %321 = arith.mulf %314, %320 : vector<8x128xf32>
    %322 = tpu.concatenate %321, %272 in 1 : vector<8x128xf32>, vector<8x128xf32> -> vector<8x256xf32>
    %323 = arith.truncf %322 : vector<8x256xf32> to vector<8x256xbf16>
    %c0_91 = arith.constant 0 : index
    %c0_92 = arith.constant 0 : index
    %324 = vector.load %arg5[%c0_91, %c0_92] : memref<256x512xbf16, #tpu.memory_space<vmem>>, vector<256x512xbf16>
    %cst_93 = arith.constant dense<0.000000e+00> : vector<8x512xf32>
    %325 = tpu.matmul %323, %324, %cst_93 {dimension_numbers = #tpu.dot_dimension_numbers<[1], [0], [0], [1], [0, 0, 1, 1], [], []>} : vector<8x256xbf16>, vector<256x512xbf16>, vector<8x512xf32> -> vector<8x512xf32>
    %c0_94 = arith.constant 0 : index
    %c0_95 = arith.constant 0 : index
    %326 = vector.load %arg6[%c0_94, %c0_95] : memref<1x512xf32, #tpu.memory_space<vmem>>, vector<1x512xf32>
    %327 = vector.broadcast %326 : vector<1x512xf32> to vector<8x512xf32>
    %328 = arith.addf %325, %327 : vector<8x512xf32>
    %329 = vector.extract_strided_slice %328 {offsets = [0, 0], sizes = [8, 384], strides = [1, 1]} : vector<8x512xf32> to vector<8x384xf32>
    %330 = arith.negf %329 : vector<8x384xf32>
    %331 = math.exp %330 : vector<8x384xf32>
    %cst_96 = arith.constant 1.000000e+00 : f32
    %332 = vector.broadcast %cst_96 : f32 to vector<8x384xf32>
    %333 = arith.addf %332, %331 : vector<8x384xf32>
    %334 = arith.divf %332, %333 : vector<8x384xf32>
    %335 = vector.extract_strided_slice %334 {offsets = [0, 0], sizes = [8, 128], strides = [1, 1]} : vector<8x384xf32> to vector<8x128xf32>
    %336 = vector.extract_strided_slice %334 {offsets = [0, 128], sizes = [8, 128], strides = [1, 1]} : vector<8x384xf32> to vector<8x128xf32>
    %337 = vector.extract_strided_slice %334 {offsets = [0, 256], sizes = [8, 128], strides = [1, 1]} : vector<8x384xf32> to vector<8x128xf32>
    %338 = vector.extract_strided_slice %328 {offsets = [0, 384], sizes = [8, 128], strides = [1, 1]} : vector<8x512xf32> to vector<8x128xf32>
    %339 = math.tanh %338 : vector<8x128xf32>
    %340 = arith.mulf %336, %270 : vector<8x128xf32>
    %341 = arith.mulf %335, %339 : vector<8x128xf32>
    %342 = arith.addf %340, %341 : vector<8x128xf32>
    %343 = math.tanh %342 : vector<8x128xf32>
    %344 = arith.mulf %337, %343 : vector<8x128xf32>
    %345 = tpu.concatenate %344, %295 in 1 : vector<8x128xf32>, vector<8x128xf32> -> vector<8x256xf32>
    %346 = arith.truncf %345 : vector<8x256xf32> to vector<8x256xbf16>
    %c0_97 = arith.constant 0 : index
    %c0_98 = arith.constant 0 : index
    %347 = vector.load %arg7[%c0_97, %c0_98] : memref<256x512xbf16, #tpu.memory_space<vmem>>, vector<256x512xbf16>
    %cst_99 = arith.constant dense<0.000000e+00> : vector<8x512xf32>
    %348 = tpu.matmul %346, %347, %cst_99 {dimension_numbers = #tpu.dot_dimension_numbers<[1], [0], [0], [1], [0, 0, 1, 1], [], []>} : vector<8x256xbf16>, vector<256x512xbf16>, vector<8x512xf32> -> vector<8x512xf32>
    %c0_100 = arith.constant 0 : index
    %c0_101 = arith.constant 0 : index
    %349 = vector.load %arg8[%c0_100, %c0_101] : memref<1x512xf32, #tpu.memory_space<vmem>>, vector<1x512xf32>
    %350 = vector.broadcast %349 : vector<1x512xf32> to vector<8x512xf32>
    %351 = arith.addf %348, %350 : vector<8x512xf32>
    %352 = vector.extract_strided_slice %351 {offsets = [0, 0], sizes = [8, 384], strides = [1, 1]} : vector<8x512xf32> to vector<8x384xf32>
    %353 = arith.negf %352 : vector<8x384xf32>
    %354 = math.exp %353 : vector<8x384xf32>
    %cst_102 = arith.constant 1.000000e+00 : f32
    %355 = vector.broadcast %cst_102 : f32 to vector<8x384xf32>
    %356 = arith.addf %355, %354 : vector<8x384xf32>
    %357 = arith.divf %355, %356 : vector<8x384xf32>
    %358 = vector.extract_strided_slice %357 {offsets = [0, 0], sizes = [8, 128], strides = [1, 1]} : vector<8x384xf32> to vector<8x128xf32>
    %359 = vector.extract_strided_slice %357 {offsets = [0, 128], sizes = [8, 128], strides = [1, 1]} : vector<8x384xf32> to vector<8x128xf32>
    %360 = vector.extract_strided_slice %357 {offsets = [0, 256], sizes = [8, 128], strides = [1, 1]} : vector<8x384xf32> to vector<8x128xf32>
    %361 = vector.extract_strided_slice %351 {offsets = [0, 384], sizes = [8, 128], strides = [1, 1]} : vector<8x512xf32> to vector<8x128xf32>
    %362 = math.tanh %361 : vector<8x128xf32>
    %363 = arith.mulf %359, %293 : vector<8x128xf32>
    %364 = arith.mulf %358, %362 : vector<8x128xf32>
    %365 = arith.addf %363, %364 : vector<8x128xf32>
    %366 = math.tanh %365 : vector<8x128xf32>
    %367 = arith.mulf %360, %366 : vector<8x128xf32>
    %368 = arith.index_cast %299 : i32 to index
    %c0_103 = arith.constant 0 : index
    %369 = vector.load %arg13[%368, %c0_103] : memref<64x128xf32, #tpu.memory_space<vmem>>, vector<8x128xf32>
    tpu.vector_store %arg13[%368, %c0_103], %367 {strides = array<i32>} : memref<64x128xf32, #tpu.memory_space<vmem>>, vector<8x128xf32>,
    %c6_i32 = arith.constant 6 : i32
    %c8_i32_104 = arith.constant 8 : i32
    %370 = arith.muli %c6_i32, %c8_i32_104 : i32
    %371 = tpu.assume_multiple %370, 8 : i32
    %372 = arith.index_cast %371 : i32 to index
    %c0_105 = arith.constant 0 : index
    %373 = vector.load %arg12[%372, %c0_105] : memref<64x512xf32, #tpu.memory_space<vmem>>, vector<8x512xf32>
    %374 = arith.truncf %321 : vector<8x128xf32> to vector<8x128xbf16>
    %c0_106 = arith.constant 0 : index
    %c0_107 = arith.constant 0 : index
    %375 = vector.load %arg4[%c0_106, %c0_107] : memref<128x512xbf16, #tpu.memory_space<vmem>>, vector<128x512xbf16>
    %cst_108 = arith.constant dense<0.000000e+00> : vector<8x512xf32>
    %376 = tpu.matmul %374, %375, %cst_108 {dimension_numbers = #tpu.dot_dimension_numbers<[1], [0], [0], [1], [0, 0, 1, 1], [], []>} : vector<8x128xbf16>, vector<128x512xbf16>, vector<8x512xf32> -> vector<8x512xf32>
    %377 = arith.addf %373, %376 : vector<8x512xf32>
    %378 = vector.extract_strided_slice %377 {offsets = [0, 0], sizes = [8, 384], strides = [1, 1]} : vector<8x512xf32> to vector<8x384xf32>
    %379 = arith.negf %378 : vector<8x384xf32>
    %380 = math.exp %379 : vector<8x384xf32>
    %cst_109 = arith.constant 1.000000e+00 : f32
    %381 = vector.broadcast %cst_109 : f32 to vector<8x384xf32>
    %382 = arith.addf %381, %380 : vector<8x384xf32>
    %383 = arith.divf %381, %382 : vector<8x384xf32>
    %384 = vector.extract_strided_slice %383 {offsets = [0, 0], sizes = [8, 128], strides = [1, 1]} : vector<8x384xf32> to vector<8x128xf32>
    %385 = vector.extract_strided_slice %383 {offsets = [0, 128], sizes = [8, 128], strides = [1, 1]} : vector<8x384xf32> to vector<8x128xf32>
    %386 = vector.extract_strided_slice %383 {offsets = [0, 256], sizes = [8, 128], strides = [1, 1]} : vector<8x384xf32> to vector<8x128xf32>
    %387 = vector.extract_strided_slice %377 {offsets = [0, 384], sizes = [8, 128], strides = [1, 1]} : vector<8x512xf32> to vector<8x128xf32>
    %388 = math.tanh %387 : vector<8x128xf32>
    %389 = arith.mulf %385, %319 : vector<8x128xf32>
    %390 = arith.mulf %384, %388 : vector<8x128xf32>
    %391 = arith.addf %389, %390 : vector<8x128xf32>
    %392 = math.tanh %391 : vector<8x128xf32>
    %393 = arith.mulf %386, %392 : vector<8x128xf32>
    %394 = tpu.concatenate %393, %344 in 1 : vector<8x128xf32>, vector<8x128xf32> -> vector<8x256xf32>
    %395 = arith.truncf %394 : vector<8x256xf32> to vector<8x256xbf16>
    %c0_110 = arith.constant 0 : index
    %c0_111 = arith.constant 0 : index
    %396 = vector.load %arg5[%c0_110, %c0_111] : memref<256x512xbf16, #tpu.memory_space<vmem>>, vector<256x512xbf16>
    %cst_112 = arith.constant dense<0.000000e+00> : vector<8x512xf32>
    %397 = tpu.matmul %395, %396, %cst_112 {dimension_numbers = #tpu.dot_dimension_numbers<[1], [0], [0], [1], [0, 0, 1, 1], [], []>} : vector<8x256xbf16>, vector<256x512xbf16>, vector<8x512xf32> -> vector<8x512xf32>
    %c0_113 = arith.constant 0 : index
    %c0_114 = arith.constant 0 : index
    %398 = vector.load %arg6[%c0_113, %c0_114] : memref<1x512xf32, #tpu.memory_space<vmem>>, vector<1x512xf32>
    %399 = vector.broadcast %398 : vector<1x512xf32> to vector<8x512xf32>
    %400 = arith.addf %397, %399 : vector<8x512xf32>
    %401 = vector.extract_strided_slice %400 {offsets = [0, 0], sizes = [8, 384], strides = [1, 1]} : vector<8x512xf32> to vector<8x384xf32>
    %402 = arith.negf %401 : vector<8x384xf32>
    %403 = math.exp %402 : vector<8x384xf32>
    %cst_115 = arith.constant 1.000000e+00 : f32
    %404 = vector.broadcast %cst_115 : f32 to vector<8x384xf32>
    %405 = arith.addf %404, %403 : vector<8x384xf32>
    %406 = arith.divf %404, %405 : vector<8x384xf32>
    %407 = vector.extract_strided_slice %406 {offsets = [0, 0], sizes = [8, 128], strides = [1, 1]} : vector<8x384xf32> to vector<8x128xf32>
    %408 = vector.extract_strided_slice %406 {offsets = [0, 128], sizes = [8, 128], strides = [1, 1]} : vector<8x384xf32> to vector<8x128xf32>
    %409 = vector.extract_strided_slice %406 {offsets = [0, 256], sizes = [8, 128], strides = [1, 1]} : vector<8x384xf32> to vector<8x128xf32>
    %410 = vector.extract_strided_slice %400 {offsets = [0, 384], sizes = [8, 128], strides = [1, 1]} : vector<8x512xf32> to vector<8x128xf32>
    %411 = math.tanh %410 : vector<8x128xf32>
    %412 = arith.mulf %408, %342 : vector<8x128xf32>
    %413 = arith.mulf %407, %411 : vector<8x128xf32>
    %414 = arith.addf %412, %413 : vector<8x128xf32>
    %415 = math.tanh %414 : vector<8x128xf32>
    %416 = arith.mulf %409, %415 : vector<8x128xf32>
    %417 = tpu.concatenate %416, %367 in 1 : vector<8x128xf32>, vector<8x128xf32> -> vector<8x256xf32>
    %418 = arith.truncf %417 : vector<8x256xf32> to vector<8x256xbf16>
    %c0_116 = arith.constant 0 : index
    %c0_117 = arith.constant 0 : index
    %419 = vector.load %arg7[%c0_116, %c0_117] : memref<256x512xbf16, #tpu.memory_space<vmem>>, vector<256x512xbf16>
    %cst_118 = arith.constant dense<0.000000e+00> : vector<8x512xf32>
    %420 = tpu.matmul %418, %419, %cst_118 {dimension_numbers = #tpu.dot_dimension_numbers<[1], [0], [0], [1], [0, 0, 1, 1], [], []>} : vector<8x256xbf16>, vector<256x512xbf16>, vector<8x512xf32> -> vector<8x512xf32>
    %c0_119 = arith.constant 0 : index
    %c0_120 = arith.constant 0 : index
    %421 = vector.load %arg8[%c0_119, %c0_120] : memref<1x512xf32, #tpu.memory_space<vmem>>, vector<1x512xf32>
    %422 = vector.broadcast %421 : vector<1x512xf32> to vector<8x512xf32>
    %423 = arith.addf %420, %422 : vector<8x512xf32>
    %424 = vector.extract_strided_slice %423 {offsets = [0, 0], sizes = [8, 384], strides = [1, 1]} : vector<8x512xf32> to vector<8x384xf32>
    %425 = arith.negf %424 : vector<8x384xf32>
    %426 = math.exp %425 : vector<8x384xf32>
    %cst_121 = arith.constant 1.000000e+00 : f32
    %427 = vector.broadcast %cst_121 : f32 to vector<8x384xf32>
    %428 = arith.addf %427, %426 : vector<8x384xf32>
    %429 = arith.divf %427, %428 : vector<8x384xf32>
    %430 = vector.extract_strided_slice %429 {offsets = [0, 0], sizes = [8, 128], strides = [1, 1]} : vector<8x384xf32> to vector<8x128xf32>
    %431 = vector.extract_strided_slice %429 {offsets = [0, 128], sizes = [8, 128], strides = [1, 1]} : vector<8x384xf32> to vector<8x128xf32>
    %432 = vector.extract_strided_slice %429 {offsets = [0, 256], sizes = [8, 128], strides = [1, 1]} : vector<8x384xf32> to vector<8x128xf32>
    %433 = vector.extract_strided_slice %423 {offsets = [0, 384], sizes = [8, 128], strides = [1, 1]} : vector<8x512xf32> to vector<8x128xf32>
    %434 = math.tanh %433 : vector<8x128xf32>
    %435 = arith.mulf %431, %365 : vector<8x128xf32>
    %436 = arith.mulf %430, %434 : vector<8x128xf32>
    %437 = arith.addf %435, %436 : vector<8x128xf32>
    %438 = math.tanh %437 : vector<8x128xf32>
    %439 = arith.mulf %432, %438 : vector<8x128xf32>
    %440 = arith.index_cast %371 : i32 to index
    %c0_122 = arith.constant 0 : index
    %441 = vector.load %arg13[%440, %c0_122] : memref<64x128xf32, #tpu.memory_space<vmem>>, vector<8x128xf32>
    tpu.vector_store %arg13[%440, %c0_122], %439 {strides = array<i32>} : memref<64x128xf32, #tpu.memory_space<vmem>>, vector<8x128xf32>,
    %c7_i32 = arith.constant 7 : i32
    %c8_i32_123 = arith.constant 8 : i32
    %442 = arith.muli %c7_i32, %c8_i32_123 : i32
    %443 = tpu.assume_multiple %442, 8 : i32
    %444 = arith.index_cast %443 : i32 to index
    %c0_124 = arith.constant 0 : index
    %445 = vector.load %arg12[%444, %c0_124] : memref<64x512xf32, #tpu.memory_space<vmem>>, vector<8x512xf32>
    %446 = arith.truncf %393 : vector<8x128xf32> to vector<8x128xbf16>
    %c0_125 = arith.constant 0 : index
    %c0_126 = arith.constant 0 : index
    %447 = vector.load %arg4[%c0_125, %c0_126] : memref<128x512xbf16, #tpu.memory_space<vmem>>, vector<128x512xbf16>
    %cst_127 = arith.constant dense<0.000000e+00> : vector<8x512xf32>
    %448 = tpu.matmul %446, %447, %cst_127 {dimension_numbers = #tpu.dot_dimension_numbers<[1], [0], [0], [1], [0, 0, 1, 1], [], []>} : vector<8x128xbf16>, vector<128x512xbf16>, vector<8x512xf32> -> vector<8x512xf32>
    %449 = arith.addf %445, %448 : vector<8x512xf32>
    %450 = vector.extract_strided_slice %449 {offsets = [0, 0], sizes = [8, 384], strides = [1, 1]} : vector<8x512xf32> to vector<8x384xf32>
    %451 = arith.negf %450 : vector<8x384xf32>
    %452 = math.exp %451 : vector<8x384xf32>
    %cst_128 = arith.constant 1.000000e+00 : f32
    %453 = vector.broadcast %cst_128 : f32 to vector<8x384xf32>
    %454 = arith.addf %453, %452 : vector<8x384xf32>
    %455 = arith.divf %453, %454 : vector<8x384xf32>
    %456 = vector.extract_strided_slice %455 {offsets = [0, 0], sizes = [8, 128], strides = [1, 1]} : vector<8x384xf32> to vector<8x128xf32>
    %457 = vector.extract_strided_slice %455 {offsets = [0, 128], sizes = [8, 128], strides = [1, 1]} : vector<8x384xf32> to vector<8x128xf32>
    %458 = vector.extract_strided_slice %455 {offsets = [0, 256], sizes = [8, 128], strides = [1, 1]} : vector<8x384xf32> to vector<8x128xf32>
    %459 = vector.extract_strided_slice %449 {offsets = [0, 384], sizes = [8, 128], strides = [1, 1]} : vector<8x512xf32> to vector<8x128xf32>
    %460 = math.tanh %459 : vector<8x128xf32>
    %461 = arith.mulf %457, %391 : vector<8x128xf32>
    %462 = arith.mulf %456, %460 : vector<8x128xf32>
    %463 = arith.addf %461, %462 : vector<8x128xf32>
    %464 = math.tanh %463 : vector<8x128xf32>
    %465 = arith.mulf %458, %464 : vector<8x128xf32>
    %466 = tpu.concatenate %465, %416 in 1 : vector<8x128xf32>, vector<8x128xf32> -> vector<8x256xf32>
    %467 = arith.truncf %466 : vector<8x256xf32> to vector<8x256xbf16>
    %c0_129 = arith.constant 0 : index
    %c0_130 = arith.constant 0 : index
    %468 = vector.load %arg5[%c0_129, %c0_130] : memref<256x512xbf16, #tpu.memory_space<vmem>>, vector<256x512xbf16>
    %cst_131 = arith.constant dense<0.000000e+00> : vector<8x512xf32>
    %469 = tpu.matmul %467, %468, %cst_131 {dimension_numbers = #tpu.dot_dimension_numbers<[1], [0], [0], [1], [0, 0, 1, 1], [], []>} : vector<8x256xbf16>, vector<256x512xbf16>, vector<8x512xf32> -> vector<8x512xf32>
    %c0_132 = arith.constant 0 : index
    %c0_133 = arith.constant 0 : index
    %470 = vector.load %arg6[%c0_132, %c0_133] : memref<1x512xf32, #tpu.memory_space<vmem>>, vector<1x512xf32>
    %471 = vector.broadcast %470 : vector<1x512xf32> to vector<8x512xf32>
    %472 = arith.addf %469, %471 : vector<8x512xf32>
    %473 = vector.extract_strided_slice %472 {offsets = [0, 0], sizes = [8, 384], strides = [1, 1]} : vector<8x512xf32> to vector<8x384xf32>
    %474 = arith.negf %473 : vector<8x384xf32>
    %475 = math.exp %474 : vector<8x384xf32>
    %cst_134 = arith.constant 1.000000e+00 : f32
    %476 = vector.broadcast %cst_134 : f32 to vector<8x384xf32>
    %477 = arith.addf %476, %475 : vector<8x384xf32>
    %478 = arith.divf %476, %477 : vector<8x384xf32>
    %479 = vector.extract_strided_slice %478 {offsets = [0, 0], sizes = [8, 128], strides = [1, 1]} : vector<8x384xf32> to vector<8x128xf32>
    %480 = vector.extract_strided_slice %478 {offsets = [0, 128], sizes = [8, 128], strides = [1, 1]} : vector<8x384xf32> to vector<8x128xf32>
    %481 = vector.extract_strided_slice %478 {offsets = [0, 256], sizes = [8, 128], strides = [1, 1]} : vector<8x384xf32> to vector<8x128xf32>
    %482 = vector.extract_strided_slice %472 {offsets = [0, 384], sizes = [8, 128], strides = [1, 1]} : vector<8x512xf32> to vector<8x128xf32>
    %483 = math.tanh %482 : vector<8x128xf32>
    %484 = arith.mulf %480, %414 : vector<8x128xf32>
    %485 = arith.mulf %479, %483 : vector<8x128xf32>
    %486 = arith.addf %484, %485 : vector<8x128xf32>
    %487 = math.tanh %486 : vector<8x128xf32>
    %488 = arith.mulf %481, %487 : vector<8x128xf32>
    %489 = tpu.concatenate %488, %439 in 1 : vector<8x128xf32>, vector<8x128xf32> -> vector<8x256xf32>
    %490 = arith.truncf %489 : vector<8x256xf32> to vector<8x256xbf16>
    %c0_135 = arith.constant 0 : index
    %c0_136 = arith.constant 0 : index
    %491 = vector.load %arg7[%c0_135, %c0_136] : memref<256x512xbf16, #tpu.memory_space<vmem>>, vector<256x512xbf16>
    %cst_137 = arith.constant dense<0.000000e+00> : vector<8x512xf32>
    %492 = tpu.matmul %490, %491, %cst_137 {dimension_numbers = #tpu.dot_dimension_numbers<[1], [0], [0], [1], [0, 0, 1, 1], [], []>} : vector<8x256xbf16>, vector<256x512xbf16>, vector<8x512xf32> -> vector<8x512xf32>
    %c0_138 = arith.constant 0 : index
    %c0_139 = arith.constant 0 : index
    %493 = vector.load %arg8[%c0_138, %c0_139] : memref<1x512xf32, #tpu.memory_space<vmem>>, vector<1x512xf32>
    %494 = vector.broadcast %493 : vector<1x512xf32> to vector<8x512xf32>
    %495 = arith.addf %492, %494 : vector<8x512xf32>
    %496 = vector.extract_strided_slice %495 {offsets = [0, 0], sizes = [8, 384], strides = [1, 1]} : vector<8x512xf32> to vector<8x384xf32>
    %497 = arith.negf %496 : vector<8x384xf32>
    %498 = math.exp %497 : vector<8x384xf32>
    %cst_140 = arith.constant 1.000000e+00 : f32
    %499 = vector.broadcast %cst_140 : f32 to vector<8x384xf32>
    %500 = arith.addf %499, %498 : vector<8x384xf32>
    %501 = arith.divf %499, %500 : vector<8x384xf32>
    %502 = vector.extract_strided_slice %501 {offsets = [0, 0], sizes = [8, 128], strides = [1, 1]} : vector<8x384xf32> to vector<8x128xf32>
    %503 = vector.extract_strided_slice %501 {offsets = [0, 128], sizes = [8, 128], strides = [1, 1]} : vector<8x384xf32> to vector<8x128xf32>
    %504 = vector.extract_strided_slice %501 {offsets = [0, 256], sizes = [8, 128], strides = [1, 1]} : vector<8x384xf32> to vector<8x128xf32>
    %505 = vector.extract_strided_slice %495 {offsets = [0, 384], sizes = [8, 128], strides = [1, 1]} : vector<8x512xf32> to vector<8x128xf32>
    %506 = math.tanh %505 : vector<8x128xf32>
    %507 = arith.mulf %503, %437 : vector<8x128xf32>
    %508 = arith.mulf %502, %506 : vector<8x128xf32>
    %509 = arith.addf %507, %508 : vector<8x128xf32>
    %510 = math.tanh %509 : vector<8x128xf32>
    %511 = arith.mulf %504, %510 : vector<8x128xf32>
    %512 = arith.index_cast %443 : i32 to index
    %c0_141 = arith.constant 0 : index
    %513 = vector.load %arg13[%512, %c0_141] : memref<64x128xf32, #tpu.memory_space<vmem>>, vector<8x128xf32>
    tpu.vector_store %arg13[%512, %c0_141], %511 {strides = array<i32>} : memref<64x128xf32, #tpu.memory_space<vmem>>, vector<8x128xf32>,
    %c7_i32_142 = arith.constant 7 : i32
    %c0_143 = arith.constant 0 : index
    %c0_144 = arith.constant 0 : index
    %514 = vector.load %arg13[%c0_143, %c0_144] : memref<64x128xf32, #tpu.memory_space<vmem>>, vector<64x128xf32>
    %515 = arith.truncf %514 : vector<64x128xf32> to vector<64x128xbf16>
    %c0_145 = arith.constant 0 : index
    %c0_146 = arith.constant 0 : index
    %516 = vector.load %arg9[%c0_145, %c0_146] : memref<128x128xbf16, #tpu.memory_space<vmem>>, vector<128x128xbf16>
    %cst_147 = arith.constant dense<0.000000e+00> : vector<64x128xf32>
    %517 = tpu.matmul %515, %516, %cst_147 {dimension_numbers = #tpu.dot_dimension_numbers<[1], [0], [0], [1], [0, 0, 1, 1], [], []>} : vector<64x128xbf16>, vector<128x128xbf16>, vector<64x128xf32> -> vector<64x128xf32>
    %c0_148 = arith.constant 0 : index
    %c0_149 = arith.constant 0 : index
    %518 = vector.load %arg10[%c0_148, %c0_149] : memref<1x128xf32, #tpu.memory_space<vmem>>, vector<1x128xf32>
    %519 = vector.broadcast %518 : vector<1x128xf32> to vector<64x128xf32>
    %520 = arith.addf %517, %519 : vector<64x128xf32>
    %c0_150 = arith.constant 0 : index
    %c0_151 = arith.constant 0 : index
    %521 = vector.load %arg11[%c0_150, %c0_151] : memref<64x128xf32, #tpu.memory_space<vmem>>, vector<64x128xf32>
    tpu.vector_store %arg11[%c0_150, %c0_151], %520 {strides = array<i32>} : memref<64x128xf32, #tpu.memory_space<vmem>>, vector<64x128xf32>,
    %cst_152 = arith.constant 0.000000e+00 : f32
    %522 = vector.broadcast %cst_152 : f32 to vector<8x128xf32>
    %c0_153 = arith.constant 0 : index
    %c0_154 = arith.constant 0 : index
    %523 = vector.load %arg11[%c0_153, %c0_154] : memref<64x128xf32, #tpu.memory_space<vmem>>, vector<8x128xf32>
    tpu.vector_store %arg11[%c0_153, %c0_154], %522 {strides = array<i32>} : memref<64x128xf32, #tpu.memory_space<vmem>>, vector<8x128xf32>,
    return
  }
  func.func @transform_0(%arg0: i32) -> (i32, i32) {
    %c0_i32 = arith.constant 0 : i32
    %c0_i32_0 = arith.constant 0 : i32
    %c0_i32_1 = arith.constant 0 : i32
    return %c0_i32, %c0_i32_0 : i32, i32
  }
  func.func @transform_1(%arg0: i32) -> (i32, i32) {
    %c0_i32 = arith.constant 0 : i32
    %c0_i32_0 = arith.constant 0 : i32
    %c0_i32_1 = arith.constant 0 : i32
    return %c0_i32, %c0_i32_0 : i32, i32
  }
  func.func @transform_2(%arg0: i32) -> (i32, i32) {
    %c0_i32 = arith.constant 0 : i32
    %c0_i32_0 = arith.constant 0 : i32
    %c0_i32_1 = arith.constant 0 : i32
    return %c0_i32, %c0_i32_0 : i32, i32
  }
  func.func @transform_3(%arg0: i32) -> (i32, i32) {
    %c0_i32 = arith.constant 0 : i32
    %c0_i32_0 = arith.constant 0 : i32
    %c0_i32_1 = arith.constant 0 : i32
    return %c0_i32, %c0_i32_0 : i32, i32
  }
  func.func @transform_4(%arg0: i32) -> (i32, i32) {
    %c0_i32 = arith.constant 0 : i32
    %c0_i32_0 = arith.constant 0 : i32
    %c0_i32_1 = arith.constant 0 : i32
    return %c0_i32, %c0_i32_0 : i32, i32
  }
  func.func @transform_5(%arg0: i32) -> (i32, i32) {
    %c0_i32 = arith.constant 0 : i32
    %c0_i32_0 = arith.constant 0 : i32
    %c0_i32_1 = arith.constant 0 : i32
    return %c0_i32, %c0_i32_0 : i32, i32
  }
  func.func @transform_6(%arg0: i32) -> (i32, i32) {
    %c0_i32 = arith.constant 0 : i32
    %c0_i32_0 = arith.constant 0 : i32
    %c0_i32_1 = arith.constant 0 : i32
    return %c0_i32, %c0_i32_0 : i32, i32
  }
  func.func @transform_7(%arg0: i32) -> (i32, i32) {
    %c0_i32 = arith.constant 0 : i32
    %c0_i32_0 = arith.constant 0 : i32
    %c0_i32_1 = arith.constant 0 : i32
    return %c0_i32, %c0_i32_0 : i32, i32
  }
  func.func @transform_8(%arg0: i32) -> (i32, i32) {
    %c0_i32 = arith.constant 0 : i32
    %c0_i32_0 = arith.constant 0 : i32
    %c0_i32_1 = arith.constant 0 : i32
    return %c0_i32, %c0_i32_0 : i32, i32
  }
  func.func @transform_9(%arg0: i32) -> (i32, i32) {
    %c0_i32 = arith.constant 0 : i32
    %c0_i32_0 = arith.constant 0 : i32
    %c0_i32_1 = arith.constant 0 : i32
    return %c0_i32, %c0_i32_0 : i32, i32
  }
  func.func @transform_10(%arg0: i32) -> (i32, i32) {
    %c0_i32 = arith.constant 0 : i32
    %c0_i32_0 = arith.constant 0 : i32
    %c0_i32_1 = arith.constant 0 : i32
    return %c0_i32, %c0_i32_0 : i32, i32
  }
}

</mosaic_0001>

<bundles_post_ra>
// kernel: rnn_forward.1
= control target key start
LH: loop header
LB: loop body
LE: loop exit
PB: predicated region body
PF: predicated region fallthrough
CT: control target
= control target key end

     0   :  { %15 = vsyncpa [#allocation5], 0  ;;  %s13990_s0 = inlined_call_operand.vmem [shape: f32[64,64], index: 0, kind: input, shape index: {}]   ;;  %s13991_s1 = inlined_call_operand.vmem [shape: bf16[64,512], index: 1, kind: input, shape index: {}]   ;;  %s13992_s2 = inlined_call_operand.vmem [shape: f32[1,512], index: 2, kind: input, shape index: {}]   ;;  %s13993_s3 = inlined_call_operand.hbm [shape: bf16[128,512], index: 3, kind: input, shape index: {}]   ;;  %s13994_s4 = inlined_call_operand.hbm [shape: bf16[256,512], index: 4, kind: input, shape index: {}]   ;;  %s13995_s5 = inlined_call_operand.vmem [shape: f32[1,512], index: 5, kind: input, shape index: {}]   ;;  %s13996_s6 = inlined_call_operand.hbm [shape: bf16[256,512], index: 6, kind: input, shape index: {}]   ;;  %s13997_s7 = inlined_call_operand.vmem [shape: f32[1,512], index: 7, kind: input, shape index: {}]   ;;  %s13998_s8 = inlined_call_operand.hbm [shape: bf16[128,128], index: 8, kind: input, shape index: {}]   ;;  %s13999_s9 = inlined_call_operand.vmem [shape: f32[1,128], index: 9, kind: input, shape index: {}]   ;;  %s14000_s10 = inlined_call_operand.vmem [shape: f32[64,128], index: 10, kind: output, shape index: {}]  }
   0x1   :  { %16 = vsyncpa [#allocation7], 0 }
   0x2   :  { %17 = vsyncpa [#allocation10], 0  ;;  %s13356_s13 = smov [#allocation6]   ;;  %s13357_s15 = smov [#allocation4]  }
   0x3   :  { %s41_s14 = sshll.u32 %s13356_s13, 4  ;;  %s29_s16 = sshll.u32 %s13357_s15, 4  ;;  %s42_s14 = int_to_ptr.vmem [resolvable:$true] %s41_s14  ;;  %s13422_s16 = int_to_ptr.vmem [resolvable:$true] %s29_s16 }
   0x4   :  { %s13262_s19 = scalar_lea.hbm %s13994_s4, 8192 }
   0x5   :  { %p13263_p0 = scmp.ne.s32.totalorder %s13994_s4, %s13262_s19  ;;  %p13266_p1 = scmp.lt.u32.totalorder %s13262_s19, %s13994_s4 }
   0x7   :  { %p13268_p2 = pnand %p13266_p1, %p13263_p0 }
   0x9   :  { %13271 = shalt.err (!%p13268_p2)
}
   0xa   :  { %s13272_s24 = scalar_lea.vmem %s42_s14, 8192  ;;  %p13277_p4 = scmp.lt.s32.totalorder %s42_s14, %s42_s14 }
   0xb   :  { %p13273_p3 = scmp.ne.s32.totalorder %s42_s14, %s13272_s24  ;;  %p13278_p5 = scmp.lt.s32.totalorder %s13272_s24, %s13272_s24 }
   0xd   :  { %p13279_p6 = por %p13278_p5, %p13277_p4 }
   0xf   :  { %p13280_p7 = pnand %p13279_p6, %p13273_p3 }
  0x11   :  { %13283 = shalt.err (!%p13280_p7)
}
  0x12   :  { %s13358_s25 = smov 256   ;;  %s13359_s26 = smov 16  }
  0x13   :  { %47 = dma.hbm_to_vmem [thread:$0]  %s13994_s4, 8192, %s42_s14, [#allocation7], %s13358_s25, %s13358_s25, %s13359_s26  }
  0x14   :  { %s13284_s11 = scalar_lea.hbm %s13993_s3, 4096 }
  0x15   :  { %p13285_p8 = scmp.ne.s32.totalorder %s13993_s3, %s13284_s11  ;;  %p13288_p9 = scmp.lt.u32.totalorder %s13284_s11, %s13993_s3 }
  0x17   :  { %p13290_p10 = pnand %p13288_p9, %p13285_p8 }
  0x19   :  { %13293 = shalt.err (!%p13290_p10)
}
  0x1a   :  { %s13294_s18 = scalar_lea.vmem %s13422_s16, 4096  ;;  %p13299_p12 = scmp.lt.s32.totalorder %s13422_s16, %s13422_s16 }
  0x1b   :  { %p13295_p11 = scmp.ne.s32.totalorder %s13422_s16, %s13294_s18  ;;  %p13300_p13 = scmp.lt.s32.totalorder %s13294_s18, %s13294_s18 }
  0x1d   :  { %p13301_p0 = por %p13300_p13, %p13299_p12 }
  0x1f   :  { %p13302_p1 = pnand %p13301_p0, %p13295_p11 }
  0x21   :  { %13305 = shalt.err (!%p13302_p1)
}
  0x22   :  { %35 = dma.hbm_to_vmem [thread:$0]  %s13993_s3, 4096, %s13422_s16, [#allocation5], %s13358_s25, %s13358_s25, %s13359_s26  }
  0x23   :  { %s13360_s19 = smov [#allocation8]   ;;  %s13361_s21 = smov [#allocation9]  }
  0x24   :  { %s55_s20 = sshll.u32 %s13360_s19, 4  ;;  %s69_s22 = sshll.u32 %s13361_s21, 4  ;;  %s56_s20 = int_to_ptr.vmem [resolvable:$true] %s55_s20  ;;  %s13459_s22 = int_to_ptr.vmem [resolvable:$true] %s69_s22 }
  0x25   :  { %s13306_s27 = scalar_lea.hbm %s13996_s6, 8192 }
  0x26   :  { %p13307_p2 = scmp.ne.s32.totalorder %s13996_s6, %s13306_s27  ;;  %p13310_p3 = scmp.lt.u32.totalorder %s13306_s27, %s13996_s6 }
  0x28   :  { %p13312_p4 = pnand %p13310_p3, %p13307_p2 }
  0x2a   :  { %13315 = shalt.err (!%p13312_p4)
}
  0x2b   :  { %s13316_s3 = scalar_lea.vmem %s56_s20, 8192  ;;  %p13321_p6 = scmp.lt.s32.totalorder %s56_s20, %s56_s20 }
  0x2c   :  { %p13317_p5 = scmp.ne.s32.totalorder %s56_s20, %s13316_s3  ;;  %p13322_p7 = scmp.lt.s32.totalorder %s13316_s3, %s13316_s3 }
  0x2e   :  { %p13323_p8 = por %p13322_p7, %p13321_p6 }
  0x30   :  { %p13324_p9 = pnand %p13323_p8, %p13317_p5 }
  0x32   :  { %13327 = shalt.err (!%p13324_p9)
}
  0x33   :  { %61 = dma.hbm_to_vmem [thread:$0]  %s13996_s6, 8192, %s56_s20, [#allocation7], %s13358_s25, %s13358_s25, %s13359_s26  }
  0x34   :  { %s13328_s17 = scalar_lea.hbm %s13998_s8, 1024 }
  0x35   :  { %p13329_p10 = scmp.ne.s32.totalorder %s13998_s8, %s13328_s17  ;;  %p13332_p11 = scmp.lt.u32.totalorder %s13328_s17, %s13998_s8 }
  0x37   :  { %p13334_p12 = pnand %p13332_p11, %p13329_p10 }
  0x39   :  { %13337 = shalt.err (!%p13334_p12)
}
  0x3a   :  { %s13338_s21 = scalar_lea.vmem %s13459_s22, 1024  ;;  %p13343_p0 = scmp.lt.s32.totalorder %s13459_s22, %s13459_s22 }
  0x3b   :  { %p13339_p13 = scmp.ne.s32.totalorder %s13459_s22, %s13338_s21  ;;  %p13344_p1 = scmp.lt.s32.totalorder %s13338_s21, %s13338_s21 }
  0x3d   :  { %p13345_p2 = por %p13344_p1, %p13343_p0 }
  0x3f   :  { %p13346_p3 = pnand %p13345_p2, %p13339_p13 }
  0x41   :  { %13349 = shalt.err (!%p13346_p3)
}
  0x42   :  { %s13362_s6 = smov 64   ;;  %s13363_s25 = smov 4  }
  0x43   :  { %75 = dma.hbm_to_vmem [thread:$0]  %s13998_s8, 1024, %s13459_s22, [#allocation10], %s13362_s6, %s13362_s6, %s13363_s25  }
  0x44   :  { %13350 = dma.done.wait [#allocation5], 4096  }
  0x45   :  { %13351 = vsyncadd [#allocation5], 4294963200 }
  0x46   :  { %13352 = dma.done.wait [#allocation7], 16384  }
  0x47   :  { %13353 = vsyncadd [#allocation7], 4294950912 }
  0x48   :  { %13354 = dma.done.wait [#allocation10], 1024  }
  0x49   :  { %13355 = vsyncadd [#allocation10], 4294966272  ;;  %v13364_v0 = vmov 0   ;;  %v11213_v1 = vld [vmem:[%s13991_s1 + $0x4] ss:$16 sps:$4 sm:$0xff]   ;;  %v92_v18 = vld [vmem:[%s13990_s0 + $0x8] sm:$0xff] }
  0x4a   :  { %266 = vmatprep.mubr.bf16.mxu1 %v13364_v0  ;;  %644 = vmatprep.mubr.bf16.mxu0 %v13364_v0  ;;  %v11215_v2 = vld [vmem:[#allocation4 + $0x4] ss:$16 sps:$4 sm:$0xff]   ;;  %v11217_v3 = vld [vmem:[%s13991_s1] ss:$16 sps:$4 sm:$0xff]   ;;  %v11239_v19 = vld [vmem:[%s13991_s1 + $0xc] ss:$16 sps:$4 sm:$0xff]  }
  0x4b   :  { %234 = vmatprep.subr.bf16.mxu1 %v11213_v1  ;;  %v11218_v4 = vld [vmem:[#allocation4] ss:$16 sps:$4 sm:$0xff]   ;;  %612 = vmatprep.subr.bf16.mxu0 %v11215_v2  ;;  %v11219_v5 = vld [vmem:[%s13991_s1 + $0x24] ss:$16 sps:$4 sm:$0xff]   ;;  %v11237_v22 = vld [vmem:[%s13991_s1 + $0x8] ss:$16 sps:$4 sm:$0xff]  }
  0x4c   :  { %235 = vmatpush1.bf16.msra.mxu1 %v11217_v3  ;;  %613 = vmatpush1.bf16.msra.mxu0 %v11218_v4  ;;  %v11221_v6 = vld [vmem:[#allocation4 + $0x24] ss:$16 sps:$4 sm:$0xff]   ;;  %v11223_v7 = vld [vmem:[%s13991_s1 + $0x20] ss:$16 sps:$4 sm:$0xff]   ;;  %vm221_vm0 = vcmask 523264   ;;  %v94_v28 = vld [vmem:[%s13990_s0 + $0x18] sm:$0xff] }
  0x4d   :  { %236 = vmatprep.subr.bf16.mxu1 %v11219_v5  ;;  %v11224_v8 = vld [vmem:[#allocation4 + $0x20] ss:$16 sps:$4 sm:$0xff]   ;;  %614 = vmatprep.subr.bf16.mxu0 %v11221_v6  ;;  %v11225_v9 = vld [vmem:[%s13991_s1 + $0x44] ss:$16 sps:$4 sm:$0xff]   ;;  %v11248_v25 = vld [vmem:[%s13991_s1 + $0x2c] ss:$16 sps:$4 sm:$0xff]  }
  0x4e   :  { %v11227_v10 = vld [vmem:[#allocation4 + $0x44] ss:$16 sps:$4 sm:$0xff]   ;;  %v11229_v11 = vld [vmem:[%s13991_s1 + $0x40] ss:$16 sps:$4 sm:$0xff]   ;;  %v11246_v29 = vld [vmem:[%s13991_s1 + $0x28] ss:$16 sps:$4 sm:$0xff]  }
  0x4f   :  { %v11230_v12 = vld [vmem:[#allocation4 + $0x40] ss:$16 sps:$4 sm:$0xff]   ;;  %v11231_v13 = vld [vmem:[%s13991_s1 + $0x64] ss:$16 sps:$4 sm:$0xff]   ;;  %v11257_v31 = vld [vmem:[%s13991_s1 + $0x4c] ss:$16 sps:$4 sm:$0xff]  }
  0x50   :  { %237 = vmatpush1.bf16.msra.mxu1 %v11223_v7  ;;  %615 = vmatpush1.bf16.msra.mxu0 %v11224_v8  ;;  %v11233_v14 = vld [vmem:[#allocation4 + $0x64] ss:$16 sps:$4 sm:$0xff]   ;;  %v11235_v15 = vld [vmem:[%s13991_s1 + $0x60] ss:$16 sps:$4 sm:$0xff]   ;;  %v11255_v35 = vld [vmem:[%s13991_s1 + $0x48] ss:$16 sps:$4 sm:$0xff]  }
  0x51   :  { %238 = vmatprep.subr.bf16.mxu1 %v11225_v9  ;;  %616 = vmatprep.subr.bf16.mxu0 %v11227_v10  ;;  %v11236_v16 = vld [vmem:[#allocation4 + $0x60] ss:$16 sps:$4 sm:$0xff]   ;;  %v11240_v20 = vld [vmem:[#allocation4 + $0x84] ss:$16 sps:$4 sm:$0xff]   ;;  %v11260_v36 = vld [vmem:[%s13991_s1 + $0x6c] ss:$16 sps:$4 sm:$0xff]  }
  0x52   :  { %v91_v17 = vld [vmem:[%s13990_s0] sm:$0xff]  ;;  %v93_v27 = vld [vmem:[%s13990_s0 + $0x10] sm:$0xff]  ;;  %v96_v39 = vld [vmem:[%s13990_s0 + $0x28] sm:$0xff] }
  0x53   :  { %v99_v21 = vpack.c.bf16 %v92_v18, %v91_v17  ;;  %v11242_v23 = vld [vmem:[#allocation4 + $0x80] ss:$16 sps:$4 sm:$0xff]   ;;  %v11243_v24 = vld [vmem:[#allocation4 + $0xa4] ss:$16 sps:$4 sm:$0xff]   ;;  %v100_v32 = vpack.c.bf16 %v94_v28, %v93_v27  ;;  %v11258_v40 = vld [vmem:[%s13991_s1 + $0x68] ss:$16 sps:$4 sm:$0xff]  }
  0x54   :  { %239 = vmatpush1.bf16.msra.mxu1 %v11229_v11  ;;  %617 = vmatpush1.bf16.msra.mxu0 %v11230_v12  ;;  %v11245_v26 = vld [vmem:[#allocation4 + $0xa0] ss:$16 sps:$4 sm:$0xff]   ;;  %v11249_v30 = vld [vmem:[#allocation4 + $0xc4] ss:$16 sps:$4 sm:$0xff]   ;;  %v11263_v41 = vld [vmem:[#allocation4 + $0xc] ss:$16 sps:$4 sm:$0xff]  }
  0x55   :  { %240 = vmatprep.subr.bf16.mxu1 %v11231_v13  ;;  %618 = vmatprep.subr.bf16.mxu0 %v11233_v14  ;;  %v11251_v33 = vld [vmem:[#allocation4 + $0xc0] ss:$16 sps:$4 sm:$0xff]   ;;  %v11252_v34 = vld [vmem:[#allocation4 + $0xe4] ss:$16 sps:$4 sm:$0xff]   ;;  %v98_v44 = vld [vmem:[%s13990_s0 + $0x38] sm:$0xff] }
  0x56   :  { %v11254_v37 = vld [vmem:[#allocation4 + $0xe0] ss:$16 sps:$4 sm:$0xff]   ;;  %v11261_v46 = vld [vmem:[#allocation4 + $0x8] ss:$16 sps:$4 sm:$0xff]   ;;  %v11266_v47 = vld [vmem:[#allocation4 + $0x2c] ss:$16 sps:$4 sm:$0xff]  }
  0x57   :  { %v95_v38 = vld [vmem:[%s13990_s0 + $0x20] sm:$0xff]  ;;  %v97_v43 = vld [vmem:[%s13990_s0 + $0x30] sm:$0xff]  ;;  %v11264_v48 = vld [vmem:[#allocation4 + $0x28] ss:$16 sps:$4 sm:$0xff]  }
  0x58   :  { %241 = vmatpush1.bf16.msra.mxu1 %v11235_v15  ;;  %619 = vmatpush1.bf16.msra.mxu0 %v11236_v16  ;;  %v101_v42 = vpack.c.bf16 %v96_v39, %v95_v38  ;;  %v102_v45 = vpack.c.bf16 %v98_v44, %v97_v43  ;;  %v11269_v49 = vld [vmem:[#allocation4 + $0x4c] ss:$16 sps:$4 sm:$0xff]   ;;  %v11267_v50 = vld [vmem:[#allocation4 + $0x48] ss:$16 sps:$4 sm:$0xff]   ;;  %v11287_v61 = vld [vmem:[#allocation6 + $0x4] ss:$16 sps:$4 sm:$0xff]  }
  0x59   :  { %307 = vmatprep.subr.bf16.mxu1 %v11239_v19  ;;  %620 = vmatprep.subr.bf16.mxu0 %v11240_v20  ;;  %v11272_v51 = vld [vmem:[#allocation4 + $0x6c] ss:$16 sps:$4 sm:$0xff]   ;;  %v11270_v52 = vld [vmem:[#allocation4 + $0x68] ss:$16 sps:$4 sm:$0xff]   ;;  %v11285_v63 = vld [vmem:[#allocation6] ss:$16 sps:$4 sm:$0xff]  }
  0x5a   :  { %v11275_v53 = vld [vmem:[#allocation4 + $0x8c] ss:$16 sps:$4 sm:$0xff]   ;;  %v11273_v54 = vld [vmem:[#allocation4 + $0x88] ss:$16 sps:$4 sm:$0xff]   ;;  %v11293_v2 = vld [vmem:[#allocation6 + $0x24] ss:$16 sps:$4 sm:$0xff]  }
  0x5b   :  { %9966 = vmatmul.mubr.msk.bf16.vlgmr.msra.gmra.mrb[0].mxu1 %vm221_vm0, %v99_v21  ;;  %v11278_v55 = vld [vmem:[#allocation4 + $0xac] ss:$16 sps:$4 sm:$0xff]   ;;  %v11276_v56 = vld [vmem:[#allocation4 + $0xa8] ss:$16 sps:$4 sm:$0xff]   ;;  %v11291_v4 = vld [vmem:[#allocation6 + $0x20] ss:$16 sps:$4 sm:$0xff]  }
  0x5c   :  { %308 = vmatpush1.bf16.msra.mxu1 %v11237_v22  ;;  %621 = vmatpush1.bf16.msra.mxu0 %v11242_v23  ;;  %v11281_v57 = vld [vmem:[#allocation4 + $0xcc] ss:$16 sps:$4 sm:$0xff]   ;;  %v11279_v58 = vld [vmem:[#allocation4 + $0xc8] ss:$16 sps:$4 sm:$0xff]   ;;  %v11299_v6 = vld [vmem:[#allocation6 + $0x44] ss:$16 sps:$4 sm:$0xff]  }
  0x5d   :  { %622 = vmatprep.subr.bf16.mxu0 %v11243_v24  ;;  %276 = vmatprep.mubr.bf16.mxu1 %v13364_v0  ;;  %v11284_v59 = vld [vmem:[#allocation4 + $0xec] ss:$16 sps:$4 sm:$0xff]   ;;  %v11282_v60 = vld [vmem:[#allocation4 + $0xe8] ss:$16 sps:$4 sm:$0xff]   ;;  %v11297_v8 = vld [vmem:[#allocation6 + $0x40] ss:$16 sps:$4 sm:$0xff]  }
  0x5e   :  { %309 = vmatprep.subr.bf16.mxu1 %v11248_v25  ;;  %v11290_v62 = vld [vmem:[#allocation6 + $0xc] ss:$16 sps:$4 sm:$0xff]   ;;  %v11288_v1 = vld [vmem:[#allocation6 + $0x8] ss:$16 sps:$4 sm:$0xff]   ;;  %v11305_v10 = vld [vmem:[#allocation6 + $0x64] ss:$16 sps:$4 sm:$0xff]  }
  0x5f   :  { %v11296_v3 = vld [vmem:[#allocation6 + $0x2c] ss:$16 sps:$4 sm:$0xff]   ;;  %v11294_v5 = vld [vmem:[#allocation6 + $0x28] ss:$16 sps:$4 sm:$0xff]   ;;  %v11303_v12 = vld [vmem:[#allocation6 + $0x60] ss:$16 sps:$4 sm:$0xff]  }
  0x60   :  { %623 = vmatpush1.bf16.msra.mxu0 %v11245_v26  ;;  %310 = vmatpush1.bf16.msra.mxu1 %v11246_v29  ;;  %v11302_v7 = vld [vmem:[#allocation6 + $0x4c] ss:$16 sps:$4 sm:$0xff]   ;;  %v11300_v9 = vld [vmem:[#allocation6 + $0x48] ss:$16 sps:$4 sm:$0xff]   ;;  %v11311_v14 = vld [vmem:[#allocation6 + $0x84] ss:$16 sps:$4 sm:$0xff]  }
  0x61   :  { %624 = vmatprep.subr.bf16.mxu0 %v11249_v30  ;;  %311 = vmatprep.subr.bf16.mxu1 %v11257_v31  ;;  %v11308_v11 = vld [vmem:[#allocation6 + $0x6c] ss:$16 sps:$4 sm:$0xff]   ;;  %v11306_v13 = vld [vmem:[#allocation6 + $0x68] ss:$16 sps:$4 sm:$0xff]   ;;  %v11309_v16 = vld [vmem:[#allocation6 + $0x80] ss:$16 sps:$4 sm:$0xff]  }
  0x62   :  { %v11314_v15 = vld [vmem:[#allocation6 + $0x8c] ss:$16 sps:$4 sm:$0xff]   ;;  %v11312_v17 = vld [vmem:[#allocation6 + $0x88] ss:$16 sps:$4 sm:$0xff]   ;;  %v11315_v18 = vld [vmem:[#allocation6 + $0xa0] ss:$16 sps:$4 sm:$0xff]  }
  0x63   :  { %9967 = vmatmul.mubr.msk.bf16.gmra.mrb[4].mxu1 %vm221_vm0, %v100_v32  ;;  %v11317_v19 = vld [vmem:[#allocation6 + $0xa4] ss:$16 sps:$4 sm:$0xff]   ;;  %v11318_v20 = vld [vmem:[#allocation6 + $0xa8] ss:$16 sps:$4 sm:$0xff]   ;;  %v11326_v23 = vld [vmem:[#allocation6 + $0xcc] ss:$16 sps:$4 sm:$0xff]  }
  0x64   :  { %625 = vmatpush1.bf16.msra.mxu0 %v11251_v33  ;;  %286 = vmatprep.mubr.bf16.mxu1 %v13364_v0  ;;  %v11323_v22 = vld [vmem:[#allocation6 + $0xc4] ss:$16 sps:$4 sm:$0xff]   ;;  %v11321_v24 = vld [vmem:[#allocation6 + $0xc0] ss:$16 sps:$4 sm:$0xff]   ;;  %v11324_v25 = vld [vmem:[#allocation6 + $0xc8] ss:$16 sps:$4 sm:$0xff]  }
  0x65   :  { %626 = vmatprep.subr.bf16.mxu0 %v11252_v34  ;;  %312 = vmatpush1.bf16.msra.mxu1 %v11255_v35  ;;  %v11327_v26 = vld [vmem:[#allocation6 + $0xe0] ss:$16 sps:$4 sm:$0xff]   ;;  %v11329_v27 = vld [vmem:[#allocation6 + $0xe4] ss:$16 sps:$4 sm:$0xff]   ;;  %v11330_v28 = vld [vmem:[#allocation6 + $0xe8] ss:$16 sps:$4 sm:$0xff]  }
  0x66   :  { %313 = vmatprep.subr.bf16.mxu1 %v11260_v36  ;;  %v11332_v29 = vld [vmem:[#allocation6 + $0xec] ss:$16 sps:$4 sm:$0xff]   ;;  %v11335_v30 = vld [vmem:[#allocation6 + $0x104] ss:$16 sps:$4 sm:$0xff]   ;;  %v11336_v33 = vld [vmem:[#allocation6 + $0x108] ss:$16 sps:$4 sm:$0xff]  }
  0x67   :  { %v11338_v31 = vld [vmem:[#allocation6 + $0x10c] ss:$16 sps:$4 sm:$0xff]   ;;  %v11341_v34 = vld [vmem:[#allocation6 + $0x124] ss:$16 sps:$4 sm:$0xff]   ;;  %v11339_v36 = vld [vmem:[#allocation6 + $0x120] ss:$16 sps:$4 sm:$0xff]  }
  0x68   :  { %627 = vmatpush1.bf16.msra.mxu0 %v11254_v37  ;;  %v11344_v35 = vld [vmem:[#allocation6 + $0x12c] ss:$16 sps:$4 sm:$0xff]   ;;  %v11342_v37 = vld [vmem:[#allocation6 + $0x128] ss:$16 sps:$4 sm:$0xff]   ;;  %v11347_v38 = vld [vmem:[#allocation6 + $0x144] ss:$16 sps:$4 sm:$0xff]  }
  0x69   :  { %314 = vmatpush1.bf16.msra.mxu1 %v11258_v40  ;;  %1130 = vmatprep.subr.bf16.mxu0 %v11287_v61  ;;  %v11350_v39 = vld [vmem:[#allocation6 + $0x14c] ss:$16 sps:$4 sm:$0xff]   ;;  %v11345_v40 = vld [vmem:[#allocation6 + $0x140] ss:$16 sps:$4 sm:$0xff]   ;;  %v13365_v61 = vmov 0.0|0.0  }
  0x6a   :  { %653 = vmatprep.subr.bf16.mxu1 %v11263_v41  ;;  %v11348_v41 = vld [vmem:[#allocation6 + $0x148] ss:$16 sps:$4 sm:$0xff]   ;;  %v11356_v43 = vld [vmem:[#allocation6 + $0x16c] ss:$16 sps:$4 sm:$0xff]   ;;  %v11351_v44 = vld [vmem:[#allocation6 + $0x160] ss:$16 sps:$4 sm:$0xff]  }
  0x6b   :  { %9968 = vmatmul.mubr.msk.bf16.gmra.mrb[8].mxu1 %vm221_vm0, %v101_v42  ;;  %645 = vmatmul.mubr.bf16.vlgmr.msra.gmra.mrb[0].mxu0 %v13364_v0 }
  0x6c   :  { %296 = vmatprep.mubr.bf16.mxu1 %v13364_v0  ;;  %1131 = vmatpush1.bf16.msra.mxu0 %v11285_v63  ;;  %v11383_v63 = vld [vmem:[#allocation8 + $0x4] ss:$16 sps:$4 sm:$0xff]  }
  0x6d   :  { %1132 = vmatprep.subr.bf16.mxu0 %v11293_v2  ;;  %1162 = vmatprep.mubr.bf16.mxu0 %v13365_v61  ;;  %v121_v2 = vlaneseq }
  0x70   :  { %1133 = vmatpush1.bf16.msra.mxu0 %v11291_v4 }
  0x71   :  { %1134 = vmatprep.subr.bf16.mxu0 %v11299_v6  ;;  %v119_v6 = vld [vmem:[%s13992_s2] sm:$0xf] }
  0x73   :  { %9969 = vmatmul.mubr.msk.bf16.gmra.mrb[12].mxu1 %vm221_vm0, %v102_v45 }
  0x74   :  { %339 = vmatprep.mubr.bf16.mxu1 %v13364_v0  ;;  %1135 = vmatpush1.bf16.msra.mxu0 %v11297_v8 }
  0x75   :  { %1136 = vmatprep.subr.bf16.mxu0 %v11305_v10 }
  0x78   :  { %1137 = vmatpush1.bf16.msra.mxu0 %v11303_v12 }
  0x79   :  { %1138 = vmatprep.subr.bf16.mxu0 %v11311_v14 }
  0x7b   :  { %9970 = vmatmul.mubr.msk.bf16.vlgmr.msra.gmra.mrb[16].mxu1 %vm221_vm0, %v99_v21  ;;  %v11320_v21 = vld [vmem:[#allocation6 + $0xac] ss:$16 sps:$4 sm:$0xff]  }
  0x7c   :  { %654 = vmatpush1.bf16.msra.mxu1 %v11261_v46  ;;  %349 = vmatprep.mubr.bf16.mxu1 %v13364_v0  ;;  %v11359_v46 = vld [vmem:[#allocation6 + $0x184] ss:$16 sps:$4 sm:$0xff]  }
  0x7d   :  { %655 = vmatprep.subr.bf16.mxu1 %v11266_v47  ;;  %1139 = vmatpush1.bf16.msra.mxu0 %v11309_v16  ;;  %v11362_v47 = vld [vmem:[#allocation6 + $0x18c] ss:$16 sps:$4 sm:$0xff]  }
  0x7e   :  { %1140 = vmatprep.subr.bf16.mxu0 %v11317_v19 }
  0x80   :  { %656 = vmatpush1.bf16.msra.mxu1 %v11264_v48  ;;  %v11357_v48 = vld [vmem:[#allocation6 + $0x180] ss:$16 sps:$4 sm:$0xff]  }
  0x81   :  { %657 = vmatprep.subr.bf16.mxu1 %v11269_v49  ;;  %1141 = vmatpush1.bf16.msra.mxu0 %v11315_v18  ;;  %v11360_v49 = vld [vmem:[#allocation6 + $0x188] ss:$16 sps:$4 sm:$0xff]  }
  0x82   :  { %1142 = vmatprep.subr.bf16.mxu0 %v11323_v22 }
  0x83   :  { %9971 = vmatmul.mubr.msk.bf16.gmra.mrb[20].mxu1 %vm221_vm0, %v100_v32  ;;  %v11333_v32 = vld [vmem:[#allocation6 + $0x100] ss:$16 sps:$4 sm:$0xff]  }
  0x84   :  { %658 = vmatpush1.bf16.msra.mxu1 %v11267_v50  ;;  %359 = vmatprep.mubr.bf16.mxu1 %v13364_v0  ;;  %v11363_v50 = vld [vmem:[#allocation6 + $0x1a0] ss:$16 sps:$4 sm:$0xff]  }
  0x85   :  { %659 = vmatprep.subr.bf16.mxu1 %v11272_v51  ;;  %1143 = vmatpush1.bf16.msra.mxu0 %v11321_v24  ;;  %v11365_v51 = vld [vmem:[#allocation6 + $0x1a4] ss:$16 sps:$4 sm:$0xff]  }
  0x86   :  { %1144 = vmatprep.subr.bf16.mxu0 %v11329_v27 }
  0x88   :  { %660 = vmatpush1.bf16.msra.mxu1 %v11270_v52  ;;  %v11366_v52 = vld [vmem:[#allocation6 + $0x1a8] ss:$16 sps:$4 sm:$0xff]  }
  0x89   :  { %661 = vmatprep.subr.bf16.mxu1 %v11275_v53  ;;  %1145 = vmatpush1.bf16.msra.mxu0 %v11327_v26  ;;  %v11368_v53 = vld [vmem:[#allocation6 + $0x1ac] ss:$16 sps:$4 sm:$0xff]  }
  0x8a   :  { %1146 = vmatprep.subr.bf16.mxu0 %v11335_v30 }
  0x8b   :  { %9972 = vmatmul.mubr.msk.bf16.gmra.mrb[24].mxu1 %vm221_vm0, %v101_v42  ;;  %v11353_v42 = vld [vmem:[#allocation6 + $0x164] ss:$16 sps:$4 sm:$0xff]  }
  0x8c   :  { %662 = vmatpush1.bf16.msra.mxu1 %v11273_v54  ;;  %369 = vmatprep.mubr.bf16.mxu1 %v13364_v0  ;;  %v11371_v54 = vld [vmem:[#allocation6 + $0x1c4] ss:$16 sps:$4 sm:$0xff]  }
  0x8d   :  { %663 = vmatprep.subr.bf16.mxu1 %v11278_v55  ;;  %1147 = vmatpush1.bf16.msra.mxu0 %v11333_v32  ;;  %v11374_v55 = vld [vmem:[#allocation6 + $0x1cc] ss:$16 sps:$4 sm:$0xff]  }
  0x8e   :  { %1148 = vmatprep.subr.bf16.mxu0 %v11341_v34 }
  0x90   :  { %664 = vmatpush1.bf16.msra.mxu1 %v11276_v56  ;;  %v11369_v56 = vld [vmem:[#allocation6 + $0x1c0] ss:$16 sps:$4 sm:$0xff]  }
  0x91   :  { %665 = vmatprep.subr.bf16.mxu1 %v11281_v57  ;;  %1149 = vmatpush1.bf16.msra.mxu0 %v11339_v36  ;;  %v11372_v57 = vld [vmem:[#allocation6 + $0x1c8] ss:$16 sps:$4 sm:$0xff]  }
  0x92   :  { %1150 = vmatprep.subr.bf16.mxu0 %v11347_v38 }
  0x93   :  { %9973 = vmatmul.mubr.msk.bf16.gmra.mrb[28].mxu1 %vm221_vm0, %v102_v45  ;;  %v11354_v45 = vld [vmem:[#allocation6 + $0x168] ss:$16 sps:$4 sm:$0xff]  }
  0x94   :  { %666 = vmatpush1.bf16.msra.mxu1 %v11279_v58  ;;  %685 = vmatprep.mubr.bf16.mxu1 %v13364_v0  ;;  %v11377_v58 = vld [vmem:[#allocation6 + $0x1e4] ss:$16 sps:$4 sm:$0xff]  }
  0x95   :  { %667 = vmatprep.subr.bf16.mxu1 %v11284_v59  ;;  %1151 = vmatpush1.bf16.msra.mxu0 %v11345_v40  ;;  %v11380_v59 = vld [vmem:[#allocation6 + $0x1ec] ss:$16 sps:$4 sm:$0xff]  }
  0x96   :  { %1152 = vmatprep.subr.bf16.mxu0 %v11353_v42 }
  0x98   :  { %668 = vmatpush1.bf16.msra.mxu1 %v11282_v60  ;;  %v11375_v60 = vld [vmem:[#allocation6 + $0x1e0] ss:$16 sps:$4 sm:$0xff]  }
  0x99   :  { %1171 = vmatprep.subr.bf16.mxu1 %v11290_v62  ;;  %1153 = vmatpush1.bf16.msra.mxu0 %v11351_v44  ;;  %v11378_v62 = vld [vmem:[#allocation6 + $0x1e8] ss:$16 sps:$4 sm:$0xff]  }
  0x9a   :  { %1154 = vmatprep.subr.bf16.mxu0 %v11359_v46 }
  0x9b   :  { %686 = vmatmul.mubr.bf16.vlgmr.msra.gmra.mrb[32].mxu1 %v13364_v0 }
  0x9c   :  { %1172 = vmatpush1.bf16.msra.mxu1 %v11288_v1  ;;  %1203 = vmatprep.mubr.bf16.mxu1 %v13365_v61  ;;  %v11386_v1 = vld [vmem:[#allocation8 + $0xc] ss:$16 sps:$4 sm:$0xff]  }
  0x9d   :  { %1173 = vmatprep.subr.bf16.mxu1 %v11296_v3  ;;  %1155 = vmatpush1.bf16.msra.mxu0 %v11357_v48  ;;  %v122_v3 = vshrl.u32 %v121_v2, 7 }
  0x9e   :  { %1156 = vmatprep.subr.bf16.mxu0 %v11365_v51 }
  0x9f   :  { %v13590_v8 = vsub.s32 0, %v122_v3  ;;  %v13592_v10 = vsub.s32 1, %v122_v3  ;;  %v13620_v48 = vsub.s32 2, %v122_v3 }
  0xa0   :  { %1174 = vmatpush1.bf16.msra.mxu1 %v11294_v5 }
  0xa1   :  { %1175 = vmatprep.subr.bf16.mxu1 %v11302_v7  ;;  %1157 = vmatpush1.bf16.msra.mxu0 %v11363_v50  ;;  %v128_v12 = vrot.slane %v119_v6, %v13592_v10  ;;  %v13622_v50 = vsub.s32 3, %v122_v3  ;;  %v132_v51 = vrot.slane %v119_v6, %v13620_v48 }
  0xa2   :  { %1158 = vmatprep.subr.bf16.mxu0 %v11371_v54 }
  0xa4   :  { %1176 = vmatpush1.bf16.msra.mxu1 %v11300_v9 }
  0xa5   :  { %1177 = vmatprep.subr.bf16.mxu1 %v11308_v11  ;;  %1159 = vmatpush1.bf16.msra.mxu0 %v11369_v56  ;;  %v124_v11 = vrot.slane %v119_v6, %v13590_v8 }
  0xa6   :  { %1160 = vmatprep.subr.bf16.mxu0 %v11377_v58 }
  0xa8   :  { %1178 = vmatpush1.bf16.msra.mxu1 %v11306_v13 }
  0xa9   :  { %1179 = vmatprep.subr.bf16.mxu1 %v11314_v15  ;;  %1161 = vmatpush1.bf16.msra.mxu0 %v11375_v60 }
  0xaa   :  { %1643 = vmatprep.subr.bf16.mxu0 %v11383_v63 }
  0xac   :  { %1180 = vmatpush1.bf16.msra.mxu1 %v11312_v17 }
  0xad   :  { %1181 = vmatprep.subr.bf16.mxu1 %v11320_v21 }
  0xb0   :  { %1182 = vmatpush1.bf16.msra.mxu1 %v11318_v20 }
  0xb1   :  { %1183 = vmatprep.subr.bf16.mxu1 %v11326_v23 }
  0xb4   :  { %1184 = vmatpush1.bf16.msra.mxu1 %v11324_v25 }
  0xb5   :  { %1185 = vmatprep.subr.bf16.mxu1 %v11332_v29 }
  0xb8   :  { %1186 = vmatpush1.bf16.msra.mxu1 %v11330_v28 }
  0xb9   :  { %1187 = vmatprep.subr.bf16.mxu1 %v11338_v31 }
  0xbc   :  { %1188 = vmatpush1.bf16.msra.mxu1 %v11336_v33 }
  0xbd   :  { %1189 = vmatprep.subr.bf16.mxu1 %v11344_v35 }
  0xc0   :  { %1190 = vmatpush1.bf16.msra.mxu1 %v11342_v37 }
  0xc1   :  { %1191 = vmatprep.subr.bf16.mxu1 %v11350_v39 }
  0xc4   :  { %1192 = vmatpush1.bf16.msra.mxu1 %v11348_v41 }
  0xc5   :  { %1193 = vmatprep.subr.bf16.mxu1 %v11356_v43 }
  0xc8   :  { %1194 = vmatpush1.bf16.msra.mxu1 %v11354_v45 }
  0xc9   :  { %1195 = vmatprep.subr.bf16.mxu1 %v11362_v47 }
  0xcc   :  { %1196 = vmatpush1.bf16.msra.mxu1 %v11360_v49 }
  0xcd   :  { %1197 = vmatprep.subr.bf16.mxu1 %v11368_v53 }
  0xd0   :  { %1198 = vmatpush1.bf16.msra.mxu1 %v11366_v52  ;;  %v136_v52 = vrot.slane %v119_v6, %v13622_v50 }
  0xd1   :  { %1199 = vmatprep.subr.bf16.mxu1 %v11374_v55 }
  0xd4   :  { %1200 = vmatpush1.bf16.msra.mxu1 %v11372_v57 }
  0xd5   :  { %1201 = vmatprep.subr.bf16.mxu1 %v11380_v59 }
  0xd8   :  { %1202 = vmatpush1.bf16.msra.mxu1 %v11378_v62 }
  0xd9   :  { %1684 = vmatprep.subr.bf16.mxu1 %v11386_v1 }
 0x12e   :  { %v268_v4 = vpop.f32.mrb[0].mxu1 }
 0x12f   :  { %v270_v5 = vpop.f32.mrb[1].mxu1 }
 0x130   :  { %v272_v7 = vpop.f32.mrb[2].mxu1 }
 0x131   :  { %v274_v9 = vpop.f32.mrb[3].mxu1  ;;  %v273_v21 = vadd.f32 %v272_v7, %v124_v11 }
 0x132   :  { %v275_v22 = vadd.f32 %v274_v9, %v128_v12 }
 0x136   :  { %v278_v13 = vpop.f32.mrb[4].mxu1 }
 0x137   :  { %v13596_v14 = vadd.f32 %v278_v13, %v124_v11  ;;  %v280_v15 = vpop.f32.mrb[5].mxu1 }
 0x138   :  { %v13598_v16 = vadd.f32 %v280_v15, %v128_v12  ;;  %v282_v17 = vpop.f32.mrb[6].mxu1 }
 0x139   :  { %v13600_v18 = vadd.f32 %v282_v17, %v124_v11  ;;  %v284_v19 = vpop.f32.mrb[7].mxu1 }
 0x13a   :  { %v13602_v20 = vadd.f32 %v284_v19, %v128_v12 }
 0x13e   :  { %v288_v23 = vpop.f32.mrb[8].mxu1  ;;  %v646_v24 = vpop.f32.mrb[0].mxu0 }
 0x13f   :  { %v13604_v25 = vadd.f32 %v288_v23, %v124_v11  ;;  %v694_v26 = vadd.f32 %v646_v24, %v273_v21  ;;  %v290_v27 = vpop.f32.mrb[9].mxu1  ;;  %v648_v28 = vpop.f32.mrb[1].mxu0 }
 0x140   :  { %v13606_v29 = vadd.f32 %v290_v27, %v128_v12  ;;  %v695_v30 = vadd.f32 %v648_v28, %v275_v22  ;;  %v292_v31 = vpop.f32.mrb[10].mxu1  ;;  %v650_v32 = vpop.f32.mrb[2].mxu0 }
 0x141   :  { %v13608_v33 = vadd.f32 %v292_v31, %v124_v11  ;;  %v294_v34 = vpop.f32.mrb[11].mxu1  ;;  %v651_v35 = vpop.f32.mrb[3].mxu0  ;;  %v10006_v63 = vmul.f32 -1.442695, %v694_v26 }
 0x142   :  { %v13610_v36 = vadd.f32 %v294_v34, %v128_v12  ;;  %v10007_v62 = vmul.f32 -1.442695, %v695_v30 }
 0x144   :  { %12925 = vpow2.f32 %v10007_v62  ;;  %v11384_v62 = vld [vmem:[#allocation8 + $0x8] ss:$16 sps:$4 sm:$0xff]  }
 0x145   :  { %12927 = vpow2.f32 %v10006_v63 }
 0x146   :  { %v298_v37 = vpop.f32.mrb[12].mxu1 }
 0x147   :  { %v13612_v38 = vadd.f32 %v298_v37, %v124_v11  ;;  %v300_v39 = vpop.f32.mrb[13].mxu1 }
 0x148   :  { %v13614_v40 = vadd.f32 %v300_v39, %v128_v12  ;;  %v302_v41 = vpop.f32.mrb[14].mxu1 }
 0x149   :  { %v13616_v42 = vadd.f32 %v302_v41, %v124_v11  ;;  %v304_v43 = vpop.f32.mrb[15].mxu1 }
 0x14a   :  { %v13618_v44 = vadd.f32 %v304_v43, %v128_v12 }
 0x14e   :  { %v341_v45 = vpop.f32.mrb[16].mxu1  ;;  %v12926_v19 = vpop.eup %12925 }
 0x14f   :  { %v343_v46 = vpop.f32.mrb[17].mxu1  ;;  %v12928_v23 = vpop.eup %12927  ;;  %v708_v26 = vadd.f32 1.0, %v12926_v19  ;;  %v11393_v19 = vld [vmem:[#allocation8 + $0x40] ss:$16 sps:$4 sm:$0xff]  }
 0x150   :  { %v345_v47 = vpop.f32.mrb[18].mxu1  ;;  %v707_v27 = vadd.f32 1.0, %v12928_v23  ;;  %v11401_v23 = vld [vmem:[#allocation8 + $0x64] ss:$16 sps:$4 sm:$0xff]  }
 0x151   :  { %v347_v49 = vpop.f32.mrb[19].mxu1  ;;  %v346_v28 = vadd.f32 %v345_v47, %v132_v51  ;;  %12929 = vrcp.f32 %v708_v26  ;;  %v11404_v26 = vld [vmem:[#allocation8 + $0x6c] ss:$16 sps:$4 sm:$0xff]  }
 0x152   :  { %v348_v30 = vadd.f32 %v347_v49, %v136_v52  ;;  %12931 = vrcp.f32 %v707_v27  ;;  %v11399_v27 = vld [vmem:[#allocation8 + $0x60] ss:$16 sps:$4 sm:$0xff]  }
 0x156   :  { %v351_v53 = vpop.f32.mrb[20].mxu1 }
 0x157   :  { %v13626_v54 = vadd.f32 %v351_v53, %v132_v51  ;;  %v353_v55 = vpop.f32.mrb[21].mxu1 }
 0x158   :  { %v13628_v56 = vadd.f32 %v353_v55, %v136_v52  ;;  %v355_v57 = vpop.f32.mrb[22].mxu1 }
 0x159   :  { %v13630_v58 = vadd.f32 %v355_v57, %v132_v51  ;;  %v357_v59 = vpop.f32.mrb[23].mxu1 }
 0x15a   :  { %v13632_v60 = vadd.f32 %v357_v59, %v136_v52 }
 0x15b   :  { %v12930_v43 = vpop.eup %12929 }
 0x15c   :  { %v12932_v45 = vpop.eup %12931  ;;  %v717_v55 = vmul.f32 0.0, %v12930_v43  ;;  %v11422_v43 = vld [vmem:[#allocation8 + $0xcc] ss:$16 sps:$4 sm:$0xff]  }
 0x15e   :  { %v361_v1 = vpop.f32.mrb[24].mxu1 }
 0x15f   :  { %v13634_v2 = vadd.f32 %v361_v1, %v132_v51  ;;  %v363_v3 = vpop.f32.mrb[25].mxu1  ;;  %v11389_v1 = vld [vmem:[#allocation8 + $0x24] ss:$16 sps:$4 sm:$0xff]  }
 0x160   :  { %v13636_v4 = vadd.f32 %v363_v3, %v136_v52  ;;  %v365_v5 = vpop.f32.mrb[26].mxu1  ;;  %v11392_v3 = vld [vmem:[#allocation8 + $0x2c] ss:$16 sps:$4 sm:$0xff]  }
 0x161   :  { %v13638_v6 = vadd.f32 %v365_v5, %v132_v51  ;;  %v367_v7 = vpop.f32.mrb[27].mxu1 }
 0x162   :  { %v13640_v9 = vadd.f32 %v367_v7, %v136_v52  ;;  %v11387_v7 = vld [vmem:[#allocation8 + $0x20] ss:$16 sps:$4 sm:$0xff]  }
 0x166   :  { %v371_v11 = vpop.f32.mrb[28].mxu1 }
 0x167   :  { %v13642_v12 = vadd.f32 %v371_v11, %v132_v51  ;;  %v373_v13 = vpop.f32.mrb[29].mxu1  ;;  %v11390_v11 = vld [vmem:[#allocation8 + $0x28] ss:$16 sps:$4 sm:$0xff]  }
 0x168   :  { %v13644_v15 = vadd.f32 %v373_v13, %v136_v52  ;;  %v375_v17 = vpop.f32.mrb[30].mxu1  ;;  %v11395_v13 = vld [vmem:[#allocation8 + $0x44] ss:$16 sps:$4 sm:$0xff]  }
 0x169   :  { %v13646_v21 = vadd.f32 %v375_v17, %v132_v51  ;;  %v377_v22 = vpop.f32.mrb[31].mxu1  ;;  %v11398_v17 = vld [vmem:[#allocation8 + $0x4c] ss:$16 sps:$4 sm:$0xff]  }
 0x16a   :  { %v13648_v24 = vadd.f32 %v377_v22, %v136_v52  ;;  %v11381_v52 = vld [vmem:[#allocation8] ss:$16 sps:$4 sm:$0xff]   ;;  %v11396_v22 = vld [vmem:[#allocation8 + $0x48] ss:$16 sps:$4 sm:$0xff]  }
 0x16e   :  { %v687_v31 = vpop.f32.mrb[32].mxu1 }
 0x16f   :  { %v696_v32 = vadd.f32 %v687_v31, %v346_v28  ;;  %v689_v34 = vpop.f32.mrb[33].mxu1  ;;  %v11402_v28 = vld [vmem:[#allocation8 + $0x68] ss:$16 sps:$4 sm:$0xff]   ;;  %v11410_v31 = vld [vmem:[#allocation8 + $0x8c] ss:$16 sps:$4 sm:$0xff]  }
 0x170   :  { %v697_v35 = vadd.f32 %v689_v34, %v348_v30  ;;  %v691_v37 = vpop.f32.mrb[34].mxu1  ;;  %v11407_v30 = vld [vmem:[#allocation8 + $0x84] ss:$16 sps:$4 sm:$0xff]   ;;  %v11408_v34 = vld [vmem:[#allocation8 + $0x88] ss:$16 sps:$4 sm:$0xff]  }
 0x171   :  { %v10008_v39 = vmul.f32 -1.442695, %v696_v32  ;;  %v692_v41 = vpop.f32.mrb[35].mxu1  ;;  %v11405_v32 = vld [vmem:[#allocation8 + $0x80] ss:$16 sps:$4 sm:$0xff]  }
 0x172   :  { %12933 = vtanh.f32 %v697_v35  ;;  %v11416_v35 = vld [vmem:[#allocation8 + $0xac] ss:$16 sps:$4 sm:$0xff]   ;;  %v11411_v37 = vld [vmem:[#allocation8 + $0xa0] ss:$16 sps:$4 sm:$0xff]   ;;  %v11419_v41 = vld [vmem:[#allocation8 + $0xc4] ss:$16 sps:$4 sm:$0xff]  }
 0x173   :  { %12935 = vpow2.f32 %v10008_v39  ;;  %v11414_v39 = vld [vmem:[#allocation8 + $0xa8] ss:$16 sps:$4 sm:$0xff]  }
 0x17c   :  { %v12934_v46 = vpop.eup %12933 }
 0x17d   :  { %v12936_v53 = vpop.eup %12935  ;;  %v718_v57 = vmul.f32 %v12934_v46, %v12932_v45  ;;  %v11417_v45 = vld [vmem:[#allocation8 + $0xc0] ss:$16 sps:$4 sm:$0xff]   ;;  %v11420_v46 = vld [vmem:[#allocation8 + $0xc8] ss:$16 sps:$4 sm:$0xff]  }
 0x17e   :  { %v709_v59 = vadd.f32 1.0, %v12936_v53  ;;  %v11425_v53 = vld [vmem:[#allocation8 + $0xe4] ss:$16 sps:$4 sm:$0xff]  }
 0x17f   :  { %v13650_v47 = vadd.f32 %v718_v57, %v717_v55  ;;  %v11428_v55 = vld [vmem:[#allocation8 + $0xec] ss:$16 sps:$4 sm:$0xff]   ;;  %v11423_v57 = vld [vmem:[#allocation8 + $0xe0] ss:$16 sps:$4 sm:$0xff]  }
 0x180   :  { %12937 = vrcp.f32 %v709_v59  ;;  %v11426_v59 = vld [vmem:[#allocation8 + $0xe8] ss:$16 sps:$4 sm:$0xff]  }
 0x181   :  { %12939 = vtanh.f32 %v13650_v47 }
 0x18a   :  { %v12938_v49 = vpop.eup %12937 }
 0x18b   :  { %v12940_v51 = vpop.eup %12939 }
 0x18c   :  { %v721_v63 = vmul.f32 %v12940_v51, %v12938_v49  ;;  %v11431_v49 = vld [vmem:[#allocation8 + $0x104] ss:$16 sps:$4 sm:$0xff]   ;;  %v11434_v51 = vld [vmem:[#allocation8 + $0x10c] ss:$16 sps:$4 sm:$0xff]  }
 0x18e   :  { %v13653_v5 = vpack.c.bf16 %v721_v63, %v721_v63  ;;  %v11437_v63 = vld [vmem:[#allocation8 + $0x124] ss:$16 sps:$4 sm:$0xff]  }
 0x190   :  { %1163 = vmatmul.mubr.bf16.vlgmr.msra.gmra.mrb[4].mxu0 %v13653_v5  ;;  %1204 = vmatmul.mubr.bf16.vlgmr.msra.gmra.mrb[36].mxu1 %v13653_v5 }
 0x191   :  { %1644 = vmatpush1.bf16.msra.mxu0 %v11381_v52  ;;  %1685 = vmatpush1.bf16.msra.mxu1 %v11384_v62  ;;  %v11429_v52 = vld [vmem:[#allocation8 + $0x100] ss:$16 sps:$4 sm:$0xff]   ;;  %v11432_v62 = vld [vmem:[#allocation8 + $0x108] ss:$16 sps:$4 sm:$0xff]  }
 0x192   :  { %1645 = vmatprep.subr.bf16.mxu0 %v11389_v1  ;;  %1686 = vmatprep.subr.bf16.mxu1 %v11392_v3  ;;  %v11440_v1 = vld [vmem:[#allocation8 + $0x12c] ss:$16 sps:$4 sm:$0xff]   ;;  %v11435_v3 = vld [vmem:[#allocation8 + $0x120] ss:$16 sps:$4 sm:$0xff]  }
 0x193   :  { %1675 = vmatprep.mubr.bf16.mxu0 %v13365_v61  ;;  %1716 = vmatprep.mubr.bf16.mxu1 %v13365_v61  ;;  %v11413_v61 = vld [vmem:[#allocation8 + $0xa4] ss:$16 sps:$4 sm:$0xff]  }
 0x195   :  { %1646 = vmatpush1.bf16.msra.mxu0 %v11387_v7  ;;  %1687 = vmatpush1.bf16.msra.mxu1 %v11390_v11  ;;  %v11438_v7 = vld [vmem:[#allocation8 + $0x128] ss:$16 sps:$4 sm:$0xff]   ;;  %v11443_v11 = vld [vmem:[#allocation8 + $0x144] ss:$16 sps:$4 sm:$0xff]  }
 0x196   :  { %1647 = vmatprep.subr.bf16.mxu0 %v11395_v13  ;;  %1688 = vmatprep.subr.bf16.mxu1 %v11398_v17  ;;  %v11446_v13 = vld [vmem:[#allocation8 + $0x14c] ss:$16 sps:$4 sm:$0xff]   ;;  %v11441_v17 = vld [vmem:[#allocation8 + $0x140] ss:$16 sps:$4 sm:$0xff]  }
 0x199   :  { %1648 = vmatpush1.bf16.msra.mxu0 %v11393_v19  ;;  %1689 = vmatpush1.bf16.msra.mxu1 %v11396_v22  ;;  %v11444_v19 = vld [vmem:[#allocation8 + $0x148] ss:$16 sps:$4 sm:$0xff]   ;;  %v11449_v22 = vld [vmem:[#allocation8 + $0x164] ss:$16 sps:$4 sm:$0xff]  }
 0x19a   :  { %1649 = vmatprep.subr.bf16.mxu0 %v11401_v23  ;;  %1690 = vmatprep.subr.bf16.mxu1 %v11404_v26  ;;  %v11452_v23 = vld [vmem:[#allocation8 + $0x16c] ss:$16 sps:$4 sm:$0xff]   ;;  %v11447_v26 = vld [vmem:[#allocation8 + $0x160] ss:$16 sps:$4 sm:$0xff]  }
 0x19d   :  { %1650 = vmatpush1.bf16.msra.mxu0 %v11399_v27  ;;  %1691 = vmatpush1.bf16.msra.mxu1 %v11402_v28  ;;  %v11450_v27 = vld [vmem:[#allocation8 + $0x168] ss:$16 sps:$4 sm:$0xff]   ;;  %v11455_v28 = vld [vmem:[#allocation8 + $0x184] ss:$16 sps:$4 sm:$0xff]  }
 0x19e   :  { %1651 = vmatprep.subr.bf16.mxu0 %v11407_v30  ;;  %1692 = vmatprep.subr.bf16.mxu1 %v11410_v31  ;;  %v11458_v30 = vld [vmem:[#allocation8 + $0x18c] ss:$16 sps:$4 sm:$0xff]   ;;  %v11453_v31 = vld [vmem:[#allocation8 + $0x180] ss:$16 sps:$4 sm:$0xff]  }
 0x1a1   :  { %1652 = vmatpush1.bf16.msra.mxu0 %v11405_v32  ;;  %1693 = vmatpush1.bf16.msra.mxu1 %v11408_v34  ;;  %v11456_v32 = vld [vmem:[#allocation8 + $0x188] ss:$16 sps:$4 sm:$0xff]   ;;  %v11459_v34 = vld [vmem:[#allocation8 + $0x1a0] ss:$16 sps:$4 sm:$0xff]  }
 0x1a2   :  { %1653 = vmatprep.subr.bf16.mxu0 %v11413_v61  ;;  %1694 = vmatprep.subr.bf16.mxu1 %v11416_v35  ;;  %v11461_v61 = vld [vmem:[#allocation8 + $0x1a4] ss:$16 sps:$4 sm:$0xff]   ;;  %v11462_v35 = vld [vmem:[#allocation8 + $0x1a8] ss:$16 sps:$4 sm:$0xff]  }
 0x1a5   :  { %1654 = vmatpush1.bf16.msra.mxu0 %v11411_v37  ;;  %1695 = vmatpush1.bf16.msra.mxu1 %v11414_v39  ;;  %v11464_v37 = vld [vmem:[#allocation8 + $0x1ac] ss:$16 sps:$4 sm:$0xff]   ;;  %v11467_v39 = vld [vmem:[#allocation8 + $0x1c4] ss:$16 sps:$4 sm:$0xff]  }
 0x1a6   :  { %1655 = vmatprep.subr.bf16.mxu0 %v11419_v41  ;;  %1696 = vmatprep.subr.bf16.mxu1 %v11422_v43  ;;  %v11470_v41 = vld [vmem:[#allocation8 + $0x1cc] ss:$16 sps:$4 sm:$0xff]   ;;  %v11465_v43 = vld [vmem:[#allocation8 + $0x1c0] ss:$16 sps:$4 sm:$0xff]  }
 0x1a9   :  { %1656 = vmatpush1.bf16.msra.mxu0 %v11417_v45  ;;  %1697 = vmatpush1.bf16.msra.mxu1 %v11420_v46  ;;  %v11468_v45 = vld [vmem:[#allocation8 + $0x1c8] ss:$16 sps:$4 sm:$0xff]   ;;  %v11473_v46 = vld [vmem:[#allocation8 + $0x1e4] ss:$16 sps:$4 sm:$0xff]  }
 0x1aa   :  { %1657 = vmatprep.subr.bf16.mxu0 %v11425_v53  ;;  %1698 = vmatprep.subr.bf16.mxu1 %v11428_v55  ;;  %v11476_v53 = vld [vmem:[#allocation8 + $0x1ec] ss:$16 sps:$4 sm:$0xff]   ;;  %v11471_v55 = vld [vmem:[#allocation8 + $0x1e0] ss:$16 sps:$4 sm:$0xff]  }
 0x1ad   :  { %1658 = vmatpush1.bf16.msra.mxu0 %v11423_v57  ;;  %1699 = vmatpush1.bf16.msra.mxu1 %v11426_v59  ;;  %v11474_v57 = vld [vmem:[#allocation8 + $0x1e8] ss:$16 sps:$4 sm:$0xff]   ;;  %v11479_v59 = vld [vmem:[#allocation4 + $0x4] ss:$16 sps:$4 sm:$0xff]  }
 0x1ae   :  { %1659 = vmatprep.subr.bf16.mxu0 %v11431_v49  ;;  %1700 = vmatprep.subr.bf16.mxu1 %v11434_v51  ;;  %v11482_v49 = vld [vmem:[#allocation4 + $0xc] ss:$16 sps:$4 sm:$0xff]   ;;  %v788_v51 = vld [vmem:[%s13995_s5] sm:$0xf] }
 0x1b1   :  { %1660 = vmatpush1.bf16.msra.mxu0 %v11429_v52  ;;  %1701 = vmatpush1.bf16.msra.mxu1 %v11432_v62  ;;  %v793_v52 = vrot.slane %v788_v51, %v13590_v8  ;;  %v797_v62 = vrot.slane %v788_v51, %v13592_v10 }
 0x1b2   :  { %1661 = vmatprep.subr.bf16.mxu0 %v11437_v63  ;;  %1702 = vmatprep.subr.bf16.mxu1 %v11440_v1 }
 0x1b5   :  { %1662 = vmatpush1.bf16.msra.mxu0 %v11435_v3  ;;  %1703 = vmatpush1.bf16.msra.mxu1 %v11438_v7 }
 0x1b6   :  { %1663 = vmatprep.subr.bf16.mxu0 %v11443_v11  ;;  %1704 = vmatprep.subr.bf16.mxu1 %v11446_v13 }
 0x1b9   :  { %1664 = vmatpush1.bf16.msra.mxu0 %v11441_v17  ;;  %1705 = vmatpush1.bf16.msra.mxu1 %v11444_v19 }
 0x1ba   :  { %1665 = vmatprep.subr.bf16.mxu0 %v11449_v22  ;;  %1706 = vmatprep.subr.bf16.mxu1 %v11452_v23 }
 0x1bd   :  { %1666 = vmatpush1.bf16.msra.mxu0 %v11447_v26  ;;  %1707 = vmatpush1.bf16.msra.mxu1 %v11450_v27 }
 0x1be   :  { %1667 = vmatprep.subr.bf16.mxu0 %v11455_v28  ;;  %1708 = vmatprep.subr.bf16.mxu1 %v11458_v30  ;;  %v801_v28 = vrot.slane %v788_v51, %v13620_v48  ;;  %v805_v30 = vrot.slane %v788_v51, %v13622_v50 }
 0x1c1   :  { %1668 = vmatpush1.bf16.msra.mxu0 %v11453_v31  ;;  %1709 = vmatpush1.bf16.msra.mxu1 %v11456_v32 }
 0x1c2   :  { %1669 = vmatprep.subr.bf16.mxu0 %v11461_v61  ;;  %1710 = vmatprep.subr.bf16.mxu1 %v11464_v37 }
 0x1c5   :  { %1670 = vmatpush1.bf16.msra.mxu0 %v11459_v34  ;;  %1711 = vmatpush1.bf16.msra.mxu1 %v11462_v35 }
 0x1c6   :  { %1671 = vmatprep.subr.bf16.mxu0 %v11467_v39  ;;  %1712 = vmatprep.subr.bf16.mxu1 %v11470_v41 }
 0x1c9   :  { %1672 = vmatpush1.bf16.msra.mxu0 %v11465_v43  ;;  %1713 = vmatpush1.bf16.msra.mxu1 %v11468_v45 }
 0x1ca   :  { %1673 = vmatprep.subr.bf16.mxu0 %v11473_v46  ;;  %1714 = vmatprep.subr.bf16.mxu1 %v11476_v53 }
 0x1cd   :  { %1674 = vmatpush1.bf16.msra.mxu0 %v11471_v55  ;;  %1715 = vmatpush1.bf16.msra.mxu1 %v11474_v57 }
 0x1ce   :  { %1950 = vmatprep.subr.bf16.mxu0 %v11479_v59  ;;  %1991 = vmatprep.subr.bf16.mxu1 %v11482_v49 }
 0x263   :  { %v1164_v63 = vpop.f32.mrb[4].mxu0  ;;  %v1205_v1 = vpop.f32.mrb[36].mxu1 }
 0x264   :  { %v1165_v3 = vadd.f32 %v1164_v63, %v793_v52  ;;  %v1166_v7 = vpop.f32.mrb[5].mxu0  ;;  %v1207_v11 = vpop.f32.mrb[37].mxu1  ;;  %v1206_v31 = vadd.f32 %v1205_v1, %v801_v28  ;;  %v11480_v63 = vld [vmem:[#allocation4 + $0x8] ss:$16 sps:$4 sm:$0xff]   ;;  %v11495_v28 = vld [vmem:[#allocation4 + $0x60] ss:$16 sps:$4 sm:$0xff]  }
 0x265   :  { %v1167_v13 = vadd.f32 %v1166_v7, %v797_v62  ;;  %v1168_v17 = vpop.f32.mrb[6].mxu0  ;;  %v1209_v19 = vpop.f32.mrb[38].mxu1  ;;  %v1208_v32 = vadd.f32 %v1207_v11, %v805_v30  ;;  %v11477_v62 = vld [vmem:[#allocation4] ss:$16 sps:$4 sm:$0xff]   ;;  %v11488_v7 = vld [vmem:[#allocation4 + $0x2c] ss:$16 sps:$4 sm:$0xff]  }
 0x266   :  { %v10073_v22 = vmul.f32 -1.442695, %v1165_v3  ;;  %v1169_v23 = vpop.f32.mrb[7].mxu0  ;;  %v1210_v26 = vpop.f32.mrb[39].mxu1  ;;  %v10075_v34 = vmul.f32 -1.442695, %v1206_v31 }
 0x267   :  { %v10074_v27 = vmul.f32 -1.442695, %v1167_v13  ;;  %v11485_v3 = vld [vmem:[#allocation4 + $0x24] ss:$16 sps:$4 sm:$0xff]   ;;  %v11483_v11 = vld [vmem:[#allocation4 + $0x20] ss:$16 sps:$4 sm:$0xff]  }
 0x268   :  { %12941 = vpow2.f32 %v10073_v22  ;;  %v11486_v13 = vld [vmem:[#allocation4 + $0x28] ss:$16 sps:$4 sm:$0xff]   ;;  %v11491_v17 = vld [vmem:[#allocation4 + $0x44] ss:$16 sps:$4 sm:$0xff]   ;;  %v11494_v19 = vld [vmem:[#allocation4 + $0x4c] ss:$16 sps:$4 sm:$0xff]  }
 0x269   :  { %12943 = vpow2.f32 %v10074_v27  ;;  %v11489_v22 = vld [vmem:[#allocation4 + $0x40] ss:$16 sps:$4 sm:$0xff]   ;;  %v11492_v23 = vld [vmem:[#allocation4 + $0x48] ss:$16 sps:$4 sm:$0xff]   ;;  %v11497_v26 = vld [vmem:[#allocation4 + $0x64] ss:$16 sps:$4 sm:$0xff]  }
 0x26a   :  { %12945 = vtanh.f32 %v1208_v32  ;;  %v11500_v27 = vld [vmem:[#allocation4 + $0x6c] ss:$16 sps:$4 sm:$0xff]   ;;  %v11498_v30 = vld [vmem:[#allocation4 + $0x68] ss:$16 sps:$4 sm:$0xff]   ;;  %v11503_v31 = vld [vmem:[#allocation4 + $0x84] ss:$16 sps:$4 sm:$0xff]  }
 0x26b   :  { %12947 = vpow2.f32 %v10075_v34  ;;  %v11506_v32 = vld [vmem:[#allocation4 + $0x8c] ss:$16 sps:$4 sm:$0xff]   ;;  %v11501_v34 = vld [vmem:[#allocation4 + $0x80] ss:$16 sps:$4 sm:$0xff]  }
 0x272   :  { %v12942_v61 = vpop.eup %12941 }
 0x273   :  { %v1221_v35 = vadd.f32 1.0, %v12942_v61  ;;  %v12944_v37 = vpop.eup %12943  ;;  %v11504_v61 = vld [vmem:[#allocation4 + $0x88] ss:$16 sps:$4 sm:$0xff]  }
 0x274   :  { %v1222_v39 = vadd.f32 1.0, %v12944_v37  ;;  %v12946_v41 = vpop.eup %12945  ;;  %v11512_v37 = vld [vmem:[#allocation4 + $0xac] ss:$16 sps:$4 sm:$0xff]  }
 0x275   :  { %12949 = vrcp.f32 %v1221_v35  ;;  %v12948_v43 = vpop.eup %12947  ;;  %v11509_v35 = vld [vmem:[#allocation4 + $0xa4] ss:$16 sps:$4 sm:$0xff]  }
 0x276   :  { %12951 = vrcp.f32 %v1222_v39  ;;  %v1223_v55 = vadd.f32 1.0, %v12948_v43  ;;  %v11507_v39 = vld [vmem:[#allocation4 + $0xa0] ss:$16 sps:$4 sm:$0xff]   ;;  %v11515_v43 = vld [vmem:[#allocation4 + $0xc4] ss:$16 sps:$4 sm:$0xff]  }
 0x278   :  { %12953 = vrcp.f32 %v1223_v55  ;;  %v11521_v55 = vld [vmem:[#allocation4 + $0xe4] ss:$16 sps:$4 sm:$0xff]  }
 0x27f   :  { %v12950_v45 = vpop.eup %12949 }
 0x280   :  { %v1232_v46 = vmul.f32 %v12950_v45, %v12946_v41  ;;  %v12952_v53 = vpop.eup %12951  ;;  %v11510_v41 = vld [vmem:[#allocation4 + $0xa8] ss:$16 sps:$4 sm:$0xff]   ;;  %v11518_v45 = vld [vmem:[#allocation4 + $0xcc] ss:$16 sps:$4 sm:$0xff]  }
 0x281   :  { %v1231_v57 = vmul.f32 0.0, %v12952_v53  ;;  %v11516_v53 = vld [vmem:[#allocation4 + $0xc8] ss:$16 sps:$4 sm:$0xff]  }
 0x282   :  { %v12954_v49 = vpop.eup %12953 }
 0x283   :  { %v13666_v59 = vadd.f32 %v1232_v46, %v1231_v57  ;;  %v11513_v46 = vld [vmem:[#allocation4 + $0xc0] ss:$16 sps:$4 sm:$0xff]   ;;  %v11524_v57 = vld [vmem:[#allocation4 + $0xec] ss:$16 sps:$4 sm:$0xff]  }
 0x285   :  { %12955 = vtanh.f32 %v13666_v59 }
 0x28f   :  { %v12956_v51 = vpop.eup %12955 }
 0x290   :  { %v1235_v52 = vmul.f32 %v12956_v51, %v12954_v49  ;;  %v11519_v49 = vld [vmem:[#allocation4 + $0xe0] ss:$16 sps:$4 sm:$0xff]   ;;  %v11522_v51 = vld [vmem:[#allocation4 + $0xe8] ss:$16 sps:$4 sm:$0xff]  }
 0x292   :  { %v13669_v1 = vpack.c.bf16 %v1235_v52, %v1235_v52  ;;  %v11527_v52 = vld [vmem:[#allocation6 + $0x4] ss:$16 sps:$4 sm:$0xff]  }
 0x294   :  { %1676 = vmatmul.mubr.bf16.vlgmr.msra.gmra.mrb[8].mxu0 %v13669_v1  ;;  %1717 = vmatmul.mubr.bf16.vlgmr.msra.gmra.mrb[40].mxu1 %v13669_v1 }
 0x295   :  { %1951 = vmatpush1.bf16.msra.mxu0 %v11477_v62  ;;  %1992 = vmatpush1.bf16.msra.mxu1 %v11480_v63  ;;  %v11530_v62 = vld [vmem:[#allocation6 + $0xc] ss:$16 sps:$4 sm:$0xff]   ;;  %v11525_v63 = vld [vmem:[#allocation6] ss:$16 sps:$4 sm:$0xff]  }
 0x296   :  { %1952 = vmatprep.subr.bf16.mxu0 %v11485_v3  ;;  %1993 = vmatprep.subr.bf16.mxu1 %v11488_v7  ;;  %v11528_v3 = vld [vmem:[#allocation6 + $0x8] ss:$16 sps:$4 sm:$0xff]   ;;  %v11533_v7 = vld [vmem:[#allocation6 + $0x24] ss:$16 sps:$4 sm:$0xff]  }
 0x297   :  { %1982 = vmatprep.mubr.bf16.mxu0 %v13364_v0  ;;  %2023 = vmatprep.mubr.bf16.mxu1 %v13364_v0 }
 0x299   :  { %1953 = vmatpush1.bf16.msra.mxu0 %v11483_v11  ;;  %1994 = vmatpush1.bf16.msra.mxu1 %v11486_v13  ;;  %v11536_v11 = vld [vmem:[#allocation6 + $0x2c] ss:$16 sps:$4 sm:$0xff]   ;;  %v11531_v13 = vld [vmem:[#allocation6 + $0x20] ss:$16 sps:$4 sm:$0xff]  }
 0x29a   :  { %1954 = vmatprep.subr.bf16.mxu0 %v11491_v17  ;;  %1995 = vmatprep.subr.bf16.mxu1 %v11494_v19  ;;  %v11534_v17 = vld [vmem:[#allocation6 + $0x28] ss:$16 sps:$4 sm:$0xff]   ;;  %v11542_v19 = vld [vmem:[#allocation6 + $0x4c] ss:$16 sps:$4 sm:$0xff]  }
 0x29d   :  { %1955 = vmatpush1.bf16.msra.mxu0 %v11489_v22  ;;  %1996 = vmatpush1.bf16.msra.mxu1 %v11492_v23  ;;  %v11537_v22 = vld [vmem:[#allocation6 + $0x40] ss:$16 sps:$4 sm:$0xff]   ;;  %v11545_v23 = vld [vmem:[#allocation6 + $0x64] ss:$16 sps:$4 sm:$0xff]  }
 0x29e   :  { %1956 = vmatprep.subr.bf16.mxu0 %v11497_v26  ;;  %1997 = vmatprep.subr.bf16.mxu1 %v11500_v27  ;;  %v11548_v26 = vld [vmem:[#allocation6 + $0x6c] ss:$16 sps:$4 sm:$0xff]   ;;  %v11543_v27 = vld [vmem:[#allocation6 + $0x60] ss:$16 sps:$4 sm:$0xff]  }
 0x2a1   :  { %1957 = vmatpush1.bf16.msra.mxu0 %v11495_v28  ;;  %1998 = vmatpush1.bf16.msra.mxu1 %v11498_v30  ;;  %v11546_v28 = vld [vmem:[#allocation6 + $0x68] ss:$16 sps:$4 sm:$0xff]   ;;  %v11551_v30 = vld [vmem:[#allocation6 + $0x84] ss:$16 sps:$4 sm:$0xff]  }
 0x2a2   :  { %1958 = vmatprep.subr.bf16.mxu0 %v11503_v31  ;;  %1999 = vmatprep.subr.bf16.mxu1 %v11506_v32  ;;  %v11554_v31 = vld [vmem:[#allocation6 + $0x8c] ss:$16 sps:$4 sm:$0xff]   ;;  %v11549_v32 = vld [vmem:[#allocation6 + $0x80] ss:$16 sps:$4 sm:$0xff]  }
 0x2a5   :  { %1959 = vmatpush1.bf16.msra.mxu0 %v11501_v34  ;;  %2000 = vmatpush1.bf16.msra.mxu1 %v11504_v61  ;;  %v11552_v34 = vld [vmem:[#allocation6 + $0x88] ss:$16 sps:$4 sm:$0xff]   ;;  %v11557_v61 = vld [vmem:[#allocation6 + $0xa4] ss:$16 sps:$4 sm:$0xff]  }
 0x2a6   :  { %1960 = vmatprep.subr.bf16.mxu0 %v11509_v35  ;;  %2001 = vmatprep.subr.bf16.mxu1 %v11512_v37  ;;  %v11560_v35 = vld [vmem:[#allocation6 + $0xac] ss:$16 sps:$4 sm:$0xff]   ;;  %v11555_v37 = vld [vmem:[#allocation6 + $0xa0] ss:$16 sps:$4 sm:$0xff]  }
 0x2a9   :  { %1961 = vmatpush1.bf16.msra.mxu0 %v11507_v39  ;;  %2002 = vmatpush1.bf16.msra.mxu1 %v11510_v41  ;;  %v11558_v39 = vld [vmem:[#allocation6 + $0xa8] ss:$16 sps:$4 sm:$0xff]   ;;  %v11563_v41 = vld [vmem:[#allocation6 + $0xc4] ss:$16 sps:$4 sm:$0xff]  }
 0x2aa   :  { %1962 = vmatprep.subr.bf16.mxu0 %v11515_v43  ;;  %2003 = vmatprep.subr.bf16.mxu1 %v11518_v45  ;;  %v11566_v43 = vld [vmem:[#allocation6 + $0xcc] ss:$16 sps:$4 sm:$0xff]   ;;  %v11561_v45 = vld [vmem:[#allocation6 + $0xc0] ss:$16 sps:$4 sm:$0xff]  }
 0x2ad   :  { %1963 = vmatpush1.bf16.msra.mxu0 %v11513_v46  ;;  %2004 = vmatpush1.bf16.msra.mxu1 %v11516_v53  ;;  %v11564_v46 = vld [vmem:[#allocation6 + $0xc8] ss:$16 sps:$4 sm:$0xff]   ;;  %v11569_v53 = vld [vmem:[#allocation6 + $0xe4] ss:$16 sps:$4 sm:$0xff]  }
 0x2ae   :  { %1964 = vmatprep.subr.bf16.mxu0 %v11521_v55  ;;  %2005 = vmatprep.subr.bf16.mxu1 %v11524_v57  ;;  %v11572_v55 = vld [vmem:[#allocation6 + $0xec] ss:$16 sps:$4 sm:$0xff]   ;;  %v11567_v57 = vld [vmem:[#allocation6 + $0xe0] ss:$16 sps:$4 sm:$0xff]  }
 0x2b1   :  { %1965 = vmatpush1.bf16.msra.mxu0 %v11519_v49  ;;  %2006 = vmatpush1.bf16.msra.mxu1 %v11522_v51  ;;  %v11570_v49 = vld [vmem:[#allocation6 + $0xe8] ss:$16 sps:$4 sm:$0xff]   ;;  %v11575_v51 = vld [vmem:[#allocation6 + $0x104] ss:$16 sps:$4 sm:$0xff]  }
 0x2b2   :  { %2467 = vmatprep.subr.bf16.mxu0 %v11527_v52  ;;  %2508 = vmatprep.subr.bf16.mxu1 %v11530_v62  ;;  %v11578_v52 = vld [vmem:[#allocation6 + $0x10c] ss:$16 sps:$4 sm:$0xff]   ;;  %v11573_v62 = vld [vmem:[#allocation6 + $0x100] ss:$16 sps:$4 sm:$0xff]  }
 0x2b4   :  { %1983 = vmatmul.mubr.bf16.vlgmr.msra.gmra.mrb[12].mxu0 %v13653_v5  ;;  %2024 = vmatmul.mubr.bf16.vlgmr.msra.gmra.mrb[44].mxu1 %v13653_v5  ;;  %v11539_v5 = vld [vmem:[#allocation6 + $0x44] ss:$16 sps:$4 sm:$0xff]  }
 0x2b5   :  { %2499 = vmatprep.mubr.bf16.mxu0 %v13669_v1  ;;  %2540 = vmatprep.mubr.bf16.mxu1 %v13669_v1  ;;  %v11540_v1 = vld [vmem:[#allocation6 + $0x48] ss:$16 sps:$4 sm:$0xff]  }
 0x2b6   :  { %2468 = vmatpush1.bf16.msra.mxu0 %v11525_v63  ;;  %2509 = vmatpush1.bf16.msra.mxu1 %v11528_v3  ;;  %v11576_v63 = vld [vmem:[#allocation6 + $0x108] ss:$16 sps:$4 sm:$0xff]   ;;  %v11581_v3 = vld [vmem:[#allocation6 + $0x124] ss:$16 sps:$4 sm:$0xff]  }
 0x2b7   :  { %2469 = vmatprep.subr.bf16.mxu0 %v11533_v7  ;;  %2510 = vmatprep.subr.bf16.mxu1 %v11536_v11  ;;  %v11584_v7 = vld [vmem:[#allocation6 + $0x12c] ss:$16 sps:$4 sm:$0xff]   ;;  %v11579_v11 = vld [vmem:[#allocation6 + $0x120] ss:$16 sps:$4 sm:$0xff]  }
 0x2ba   :  { %2470 = vmatpush1.bf16.msra.mxu0 %v11531_v13  ;;  %2511 = vmatpush1.bf16.msra.mxu1 %v11534_v17  ;;  %v11582_v13 = vld [vmem:[#allocation6 + $0x128] ss:$16 sps:$4 sm:$0xff]   ;;  %v11587_v17 = vld [vmem:[#allocation6 + $0x144] ss:$16 sps:$4 sm:$0xff]  }
 0x2bb   :  { %2471 = vmatprep.subr.bf16.mxu0 %v11539_v5  ;;  %2512 = vmatprep.subr.bf16.mxu1 %v11542_v19  ;;  %v11590_v5 = vld [vmem:[#allocation6 + $0x14c] ss:$16 sps:$4 sm:$0xff]   ;;  %v11585_v19 = vld [vmem:[#allocation6 + $0x140] ss:$16 sps:$4 sm:$0xff]  }
 0x2be   :  { %2472 = vmatpush1.bf16.msra.mxu0 %v11537_v22  ;;  %2513 = vmatpush1.bf16.msra.mxu1 %v11540_v1  ;;  %v11588_v22 = vld [vmem:[#allocation6 + $0x148] ss:$16 sps:$4 sm:$0xff]   ;;  %v11593_v1 = vld [vmem:[#allocation6 + $0x164] ss:$16 sps:$4 sm:$0xff]  }
 0x2bf   :  { %2473 = vmatprep.subr.bf16.mxu0 %v11545_v23  ;;  %2514 = vmatprep.subr.bf16.mxu1 %v11548_v26  ;;  %v11596_v23 = vld [vmem:[#allocation6 + $0x16c] ss:$16 sps:$4 sm:$0xff]   ;;  %v11591_v26 = vld [vmem:[#allocation6 + $0x160] ss:$16 sps:$4 sm:$0xff]  }
 0x2c2   :  { %2474 = vmatpush1.bf16.msra.mxu0 %v11543_v27  ;;  %2515 = vmatpush1.bf16.msra.mxu1 %v11546_v28  ;;  %v11594_v27 = vld [vmem:[#allocation6 + $0x168] ss:$16 sps:$4 sm:$0xff]   ;;  %v11599_v28 = vld [vmem:[#allocation6 + $0x184] ss:$16 sps:$4 sm:$0xff]  }
 0x2c3   :  { %2475 = vmatprep.subr.bf16.mxu0 %v11551_v30  ;;  %2516 = vmatprep.subr.bf16.mxu1 %v11554_v31  ;;  %v11602_v30 = vld [vmem:[#allocation6 + $0x18c] ss:$16 sps:$4 sm:$0xff]   ;;  %v11597_v31 = vld [vmem:[#allocation6 + $0x180] ss:$16 sps:$4 sm:$0xff]  }
 0x2c6   :  { %2476 = vmatpush1.bf16.msra.mxu0 %v11549_v32  ;;  %2517 = vmatpush1.bf16.msra.mxu1 %v11552_v34  ;;  %v11600_v32 = vld [vmem:[#allocation6 + $0x188] ss:$16 sps:$4 sm:$0xff]   ;;  %v13366_v34 = vmov 0.0  }
 0x2c7   :  { %2477 = vmatprep.subr.bf16.mxu0 %v11557_v61  ;;  %2518 = vmatprep.subr.bf16.mxu1 %v11560_v35  ;;  %9935 = vst [vmem:[%s14000_s10] sm:$0xff] %v13366_v34  ;;  %v11603_v61 = vld [vmem:[#allocation6 + $0x1a0] ss:$16 sps:$4 sm:$0xff]   ;;  %v11605_v35 = vld [vmem:[#allocation6 + $0x1a4] ss:$16 sps:$4 sm:$0xff]  }
 0x2ca   :  { %2478 = vmatpush1.bf16.msra.mxu0 %v11555_v37  ;;  %2519 = vmatpush1.bf16.msra.mxu1 %v11558_v39  ;;  %v11606_v37 = vld [vmem:[#allocation6 + $0x1a8] ss:$16 sps:$4 sm:$0xff]   ;;  %v11608_v39 = vld [vmem:[#allocation6 + $0x1ac] ss:$16 sps:$4 sm:$0xff]  }
 0x2cb   :  { %2479 = vmatprep.subr.bf16.mxu0 %v11563_v41  ;;  %2520 = vmatprep.subr.bf16.mxu1 %v11566_v43  ;;  %v11611_v41 = vld [vmem:[#allocation6 + $0x1c4] ss:$16 sps:$4 sm:$0xff]   ;;  %v11614_v43 = vld [vmem:[#allocation6 + $0x1cc] ss:$16 sps:$4 sm:$0xff]  }
 0x2ce   :  { %2480 = vmatpush1.bf16.msra.mxu0 %v11561_v45  ;;  %2521 = vmatpush1.bf16.msra.mxu1 %v11564_v46  ;;  %v11609_v45 = vld [vmem:[#allocation6 + $0x1c0] ss:$16 sps:$4 sm:$0xff]   ;;  %v11612_v46 = vld [vmem:[#allocation6 + $0x1c8] ss:$16 sps:$4 sm:$0xff]  }
 0x2cf   :  { %2481 = vmatprep.subr.bf16.mxu0 %v11569_v53  ;;  %2522 = vmatprep.subr.bf16.mxu1 %v11572_v55  ;;  %v11617_v53 = vld [vmem:[#allocation6 + $0x1e4] ss:$16 sps:$4 sm:$0xff]   ;;  %v11620_v55 = vld [vmem:[#allocation6 + $0x1ec] ss:$16 sps:$4 sm:$0xff]  }
 0x2d2   :  { %2482 = vmatpush1.bf16.msra.mxu0 %v11567_v57  ;;  %2523 = vmatpush1.bf16.msra.mxu1 %v11570_v49  ;;  %v11615_v57 = vld [vmem:[#allocation6 + $0x1e0] ss:$16 sps:$4 sm:$0xff]   ;;  %v11618_v49 = vld [vmem:[#allocation6 + $0x1e8] ss:$16 sps:$4 sm:$0xff]  }
 0x2d3   :  { %2483 = vmatprep.subr.bf16.mxu0 %v11575_v51  ;;  %2524 = vmatprep.subr.bf16.mxu1 %v11578_v52  ;;  %v11623_v51 = vld [vmem:[#allocation8 + $0x4] ss:$16 sps:$4 sm:$0xff]   ;;  %v11626_v52 = vld [vmem:[#allocation8 + $0xc] ss:$16 sps:$4 sm:$0xff]  }
 0x2d6   :  { %2484 = vmatpush1.bf16.msra.mxu0 %v11573_v62  ;;  %2525 = vmatpush1.bf16.msra.mxu1 %v11576_v63  ;;  %v1301_v62 = vld [vmem:[%s13997_s7] sm:$0xf] }
 0x2d7   :  { %2485 = vmatprep.subr.bf16.mxu0 %v11581_v3  ;;  %2526 = vmatprep.subr.bf16.mxu1 %v11584_v7  ;;  %v1306_v63 = vrot.slane %v1301_v62, %v13590_v8  ;;  %v1310_v3 = vrot.slane %v1301_v62, %v13592_v10 }
 0x2da   :  { %2486 = vmatpush1.bf16.msra.mxu0 %v11579_v11  ;;  %2527 = vmatpush1.bf16.msra.mxu1 %v11582_v13 }
 0x2db   :  { %2487 = vmatprep.subr.bf16.mxu0 %v11587_v17  ;;  %2528 = vmatprep.subr.bf16.mxu1 %v11590_v5 }
 0x2de   :  { %2488 = vmatpush1.bf16.msra.mxu0 %v11585_v19  ;;  %2529 = vmatpush1.bf16.msra.mxu1 %v11588_v22 }
 0x2df   :  { %2489 = vmatprep.subr.bf16.mxu0 %v11593_v1  ;;  %2530 = vmatprep.subr.bf16.mxu1 %v11596_v23 }
 0x2e2   :  { %2490 = vmatpush1.bf16.msra.mxu0 %v11591_v26  ;;  %2531 = vmatpush1.bf16.msra.mxu1 %v11594_v27 }
 0x2e3   :  { %2491 = vmatprep.subr.bf16.mxu0 %v11599_v28  ;;  %2532 = vmatprep.subr.bf16.mxu1 %v11602_v30  ;;  %v1318_v30 = vrot.slane %v1301_v62, %v13622_v50 }
 0x2e6   :  { %2492 = vmatpush1.bf16.msra.mxu0 %v11597_v31  ;;  %2533 = vmatpush1.bf16.msra.mxu1 %v11600_v32 }
 0x2e7   :  { %2493 = vmatprep.subr.bf16.mxu0 %v11605_v35  ;;  %2534 = vmatprep.subr.bf16.mxu1 %v11608_v39 }
 0x2ea   :  { %2494 = vmatpush1.bf16.msra.mxu0 %v11603_v61  ;;  %2535 = vmatpush1.bf16.msra.mxu1 %v11606_v37 }
 0x2eb   :  { %2495 = vmatprep.subr.bf16.mxu0 %v11611_v41  ;;  %2536 = vmatprep.subr.bf16.mxu1 %v11614_v43 }
 0x2ee   :  { %2496 = vmatpush1.bf16.msra.mxu0 %v11609_v45  ;;  %2537 = vmatpush1.bf16.msra.mxu1 %v11612_v46 }
 0x2ef   :  { %2497 = vmatprep.subr.bf16.mxu0 %v11617_v53  ;;  %2538 = vmatprep.subr.bf16.mxu1 %v11620_v55 }
 0x2f2   :  { %2498 = vmatpush1.bf16.msra.mxu0 %v11615_v57  ;;  %2539 = vmatpush1.bf16.msra.mxu1 %v11618_v49 }
 0x2f3   :  { %2981 = vmatprep.subr.bf16.mxu0 %v11623_v51  ;;  %3022 = vmatprep.subr.bf16.mxu1 %v11626_v52 }
 0x367   :  { %v1677_v7 = vpop.f32.mrb[8].mxu0  ;;  %v1718_v11 = vpop.f32.mrb[40].mxu1 }
 0x368   :  { %v1678_v13 = vadd.f32 %v1677_v7, %v1306_v63  ;;  %v1679_v17 = vpop.f32.mrb[9].mxu0  ;;  %v1720_v5 = vpop.f32.mrb[41].mxu1 }
 0x369   :  { %v1680_v19 = vadd.f32 %v1679_v17, %v1310_v3  ;;  %v1681_v22 = vpop.f32.mrb[10].mxu0  ;;  %v1722_v1 = vpop.f32.mrb[42].mxu1  ;;  %v1721_v31 = vadd.f32 %v1720_v5, %v1318_v30  ;;  %v1314_v17 = vrot.slane %v1301_v62, %v13620_v48 }
 0x36a   :  { %v10140_v23 = vmul.f32 -1.442695, %v1678_v13  ;;  %v1682_v26 = vpop.f32.mrb[11].mxu0  ;;  %v1723_v27 = vpop.f32.mrb[43].mxu1 }
 0x36b   :  { %v10141_v28 = vmul.f32 -1.442695, %v1680_v19 }
 0x36c   :  { %12957 = vpow2.f32 %v10140_v23  ;;  %v1719_v23 = vadd.f32 %v1718_v11, %v1314_v17  ;;  %v11638_v17 = vld [vmem:[#allocation8 + $0x4c] ss:$16 sps:$4 sm:$0xff]  }
 0x36d   :  { %12959 = vpow2.f32 %v10141_v28 }
 0x36e   :  { %12961 = vtanh.f32 %v1721_v31 }
 0x376   :  { %v12958_v32 = vpop.eup %12957 }
 0x377   :  { %v1734_v34 = vadd.f32 1.0, %v12958_v32  ;;  %v12960_v61 = vpop.eup %12959 }
 0x378   :  { %v1735_v35 = vadd.f32 1.0, %v12960_v61  ;;  %v12962_v37 = vpop.eup %12961 }
 0x379   :  { %12963 = vrcp.f32 %v1734_v34 }
 0x37a   :  { %12965 = vrcp.f32 %v1735_v35 }
 0x383   :  { %v12964_v39 = vpop.eup %12963 }
 0x384   :  { %v1745_v41 = vmul.f32 %v12964_v39, %v12962_v37  ;;  %v12966_v43 = vpop.eup %12965 }
 0x385   :  { %v1744_v45 = vmul.f32 0.0, %v12966_v43 }
 0x387   :  { %v1984_v46 = vpop.f32.mrb[12].mxu0  ;;  %v2025_v53 = vpop.f32.mrb[44].mxu1  ;;  %v13688_v55 = vadd.f32 %v1745_v41, %v1744_v45 }
 0x388   :  { %v2032_v57 = vadd.f32 %v1984_v46, %v13596_v14  ;;  %v2034_v49 = vadd.f32 %v2025_v53, %v13626_v54  ;;  %v1986_v51 = vpop.f32.mrb[13].mxu0  ;;  %v2027_v52 = vpop.f32.mrb[45].mxu1  ;;  %v10142_v14 = vmul.f32 -1.442695, %v1719_v23  ;;  %v11639_v23 = vld [vmem:[#allocation8 + $0x60] ss:$16 sps:$4 sm:$0xff]  }
 0x389   :  { %v2033_v63 = vadd.f32 %v1986_v51, %v13598_v16  ;;  %v2035_v3 = vadd.f32 %v2027_v52, %v13628_v56  ;;  %v1988_v7 = vpop.f32.mrb[14].mxu0  ;;  %v2029_v13 = vpop.f32.mrb[46].mxu1  ;;  %v11624_v51 = vld [vmem:[#allocation8 + $0x8] ss:$16 sps:$4 sm:$0xff]   ;;  %v11629_v52 = vld [vmem:[#allocation8 + $0x24] ss:$16 sps:$4 sm:$0xff]  }
 0x38a   :  { %v10175_v5 = vmul.f32 -1.442695, %v2032_v57  ;;  %v1989_v19 = vpop.f32.mrb[15].mxu0  ;;  %v2030_v22 = vpop.f32.mrb[47].mxu1  ;;  %v10177_v26 = vmul.f32 -1.442695, %v2034_v49 }
 0x38b   :  { %v10176_v1 = vmul.f32 -1.442695, %v2033_v63  ;;  %v11621_v49 = vld [vmem:[#allocation8] ss:$16 sps:$4 sm:$0xff]   ;;  %v11632_v63 = vld [vmem:[#allocation8 + $0x2c] ss:$16 sps:$4 sm:$0xff]  }
 0x38c   :  { %12967 = vpow2.f32 %v10175_v5  ;;  %v11630_v7 = vld [vmem:[#allocation8 + $0x28] ss:$16 sps:$4 sm:$0xff]   ;;  %v11635_v13 = vld [vmem:[#allocation8 + $0x44] ss:$16 sps:$4 sm:$0xff]   ;;  %v11633_v5 = vld [vmem:[#allocation8 + $0x40] ss:$16 sps:$4 sm:$0xff]  }
 0x38d   :  { %12969 = vpow2.f32 %v10176_v1  ;;  %v11636_v19 = vld [vmem:[#allocation8 + $0x48] ss:$16 sps:$4 sm:$0xff]   ;;  %v11641_v22 = vld [vmem:[#allocation8 + $0x64] ss:$16 sps:$4 sm:$0xff]   ;;  %v11644_v1 = vld [vmem:[#allocation8 + $0x6c] ss:$16 sps:$4 sm:$0xff]  }
 0x38e   :  { %12971 = vpow2.f32 %v10142_v14  ;;  %v11642_v14 = vld [vmem:[#allocation8 + $0x68] ss:$16 sps:$4 sm:$0xff]  }
 0x38f   :  { %12973 = vtanh.f32 %v2035_v3  ;;  %v11627_v3 = vld [vmem:[#allocation8 + $0x20] ss:$16 sps:$4 sm:$0xff]  }
 0x390   :  { %12975 = vpow2.f32 %v10177_v26  ;;  %v11647_v26 = vld [vmem:[#allocation8 + $0x84] ss:$16 sps:$4 sm:$0xff]  }
 0x396   :  { %v12968_v54 = vpop.eup %12967 }
 0x397   :  { %v2045_v27 = vadd.f32 1.0, %v12968_v54  ;;  %v12970_v16 = vpop.eup %12969  ;;  %v11650_v54 = vld [vmem:[#allocation8 + $0x8c] ss:$16 sps:$4 sm:$0xff]  }
 0x398   :  { %v2046_v56 = vadd.f32 1.0, %v12970_v16  ;;  %v12972_v28 = vpop.eup %12971  ;;  %v11648_v16 = vld [vmem:[#allocation8 + $0x88] ss:$16 sps:$4 sm:$0xff]  }
 0x399   :  { %12977 = vrcp.f32 %v2045_v27  ;;  %v12974_v62 = vpop.eup %12973  ;;  %v1736_v32 = vadd.f32 1.0, %v12972_v28  ;;  %v11645_v27 = vld [vmem:[#allocation8 + $0x80] ss:$16 sps:$4 sm:$0xff]   ;;  %v11656_v28 = vld [vmem:[#allocation8 + $0xac] ss:$16 sps:$4 sm:$0xff]  }
 0x39a   :  { %12979 = vrcp.f32 %v2046_v56  ;;  %v12976_v30 = vpop.eup %12975  ;;  %v11653_v56 = vld [vmem:[#allocation8 + $0xa4] ss:$16 sps:$4 sm:$0xff]  }
 0x39b   :  { %v2047_v11 = vadd.f32 1.0, %v12976_v30  ;;  %12981 = vtanh.f32 %v13688_v55  ;;  %v11654_v30 = vld [vmem:[#allocation8 + $0xa8] ss:$16 sps:$4 sm:$0xff]  }
 0x39c   :  { %12983 = vrcp.f32 %v1736_v32  ;;  %v11662_v32 = vld [vmem:[#allocation8 + $0xcc] ss:$16 sps:$4 sm:$0xff]  }
 0x39d   :  { %12985 = vrcp.f32 %v2047_v11  ;;  %v11665_v11 = vld [vmem:[#allocation8 + $0xe4] ss:$16 sps:$4 sm:$0xff]  }
 0x3a3   :  { %v12978_v31 = vpop.eup %12977 }
 0x3a4   :  { %v2056_v34 = vmul.f32 %v12978_v31, %v12974_v62  ;;  %v12980_v61 = vpop.eup %12979  ;;  %v11651_v62 = vld [vmem:[#allocation8 + $0xa0] ss:$16 sps:$4 sm:$0xff]   ;;  %v11659_v31 = vld [vmem:[#allocation8 + $0xc4] ss:$16 sps:$4 sm:$0xff]  }
 0x3a5   :  { %v2055_v35 = vmul.f32 %v12980_v61, %v13650_v47  ;;  %v12982_v39 = vpop.eup %12981  ;;  %v11660_v61 = vld [vmem:[#allocation8 + $0xc8] ss:$16 sps:$4 sm:$0xff]  }
 0x3a6   :  { %v12984_v41 = vpop.eup %12983 }
 0x3a7   :  { %v13697_v37 = vadd.f32 %v2056_v34, %v2055_v35  ;;  %v12986_v43 = vpop.eup %12985  ;;  %v13700_v46 = vmul.f32 %v12984_v41, %v12982_v39  ;;  %v11657_v34 = vld [vmem:[#allocation8 + $0xc0] ss:$16 sps:$4 sm:$0xff]   ;;  %v11668_v35 = vld [vmem:[#allocation8 + $0xec] ss:$16 sps:$4 sm:$0xff]   ;;  %v11666_v41 = vld [vmem:[#allocation8 + $0xe8] ss:$16 sps:$4 sm:$0xff]  }
 0x3a8   :  { %v11663_v39 = vld [vmem:[#allocation8 + $0xe0] ss:$16 sps:$4 sm:$0xff]  }
 0x3a9   :  { %12987 = vtanh.f32 %v13697_v37  ;;  %v2574_v47 = vpack.c.bf16 %v13700_v46, %v13700_v46 }
 0x3b3   :  { %v12988_v45 = vpop.eup %12987 }
 0x3b4   :  { %v2059_v53 = vmul.f32 %v12988_v45, %v12986_v43  ;;  %v11671_v43 = vld [vmem:[#allocation8 + $0x104] ss:$16 sps:$4 sm:$0xff]   ;;  %v11674_v45 = vld [vmem:[#allocation8 + $0x10c] ss:$16 sps:$4 sm:$0xff]  }
 0x3b6   :  { %v13702_v57 = vpack.c.bf16 %v2059_v53, %v2059_v53  ;;  %v11669_v53 = vld [vmem:[#allocation8 + $0x100] ss:$16 sps:$4 sm:$0xff]  }
 0x3b8   :  { %2500 = vmatmul.mubr.bf16.vlgmr.msra.gmra.mrb[16].mxu0 %v13702_v57  ;;  %2541 = vmatmul.mubr.bf16.vlgmr.msra.gmra.mrb[48].mxu1 %v13702_v57 }
 0x3b9   :  { %3013 = vmatprep.mubr.bf16.mxu0 %v2574_v47  ;;  %3054 = vmatprep.mubr.bf16.mxu1 %v2574_v47  ;;  %v11680_v47 = vld [vmem:[#allocation8 + $0x12c] ss:$16 sps:$4 sm:$0xff]  }
 0x3ba   :  { %2982 = vmatpush1.bf16.msra.mxu0 %v11621_v49  ;;  %3023 = vmatpush1.bf16.msra.mxu1 %v11624_v51  ;;  %v11672_v49 = vld [vmem:[#allocation8 + $0x108] ss:$16 sps:$4 sm:$0xff]   ;;  %v11677_v51 = vld [vmem:[#allocation8 + $0x124] ss:$16 sps:$4 sm:$0xff]  }
 0x3bb   :  { %2983 = vmatprep.subr.bf16.mxu0 %v11629_v52  ;;  %3024 = vmatprep.subr.bf16.mxu1 %v11632_v63  ;;  %v11675_v52 = vld [vmem:[#allocation8 + $0x120] ss:$16 sps:$4 sm:$0xff]   ;;  %v11678_v63 = vld [vmem:[#allocation8 + $0x128] ss:$16 sps:$4 sm:$0xff]  }
 0x3be   :  { %2984 = vmatpush1.bf16.msra.mxu0 %v11627_v3  ;;  %3025 = vmatpush1.bf16.msra.mxu1 %v11630_v7  ;;  %v11683_v3 = vld [vmem:[#allocation8 + $0x144] ss:$16 sps:$4 sm:$0xff]   ;;  %v11686_v7 = vld [vmem:[#allocation8 + $0x14c] ss:$16 sps:$4 sm:$0xff]  }
 0x3bf   :  { %2985 = vmatprep.subr.bf16.mxu0 %v11635_v13  ;;  %3026 = vmatprep.subr.bf16.mxu1 %v11638_v17  ;;  %v11681_v13 = vld [vmem:[#allocation8 + $0x140] ss:$16 sps:$4 sm:$0xff]   ;;  %v11684_v17 = vld [vmem:[#allocation8 + $0x148] ss:$16 sps:$4 sm:$0xff]  }
 0x3c2   :  { %2986 = vmatpush1.bf16.msra.mxu0 %v11633_v5  ;;  %3027 = vmatpush1.bf16.msra.mxu1 %v11636_v19  ;;  %v11689_v5 = vld [vmem:[#allocation8 + $0x164] ss:$16 sps:$4 sm:$0xff]   ;;  %v11692_v19 = vld [vmem:[#allocation8 + $0x16c] ss:$16 sps:$4 sm:$0xff]  }
 0x3c3   :  { %2987 = vmatprep.subr.bf16.mxu0 %v11641_v22  ;;  %3028 = vmatprep.subr.bf16.mxu1 %v11644_v1  ;;  %v11687_v22 = vld [vmem:[#allocation8 + $0x160] ss:$16 sps:$4 sm:$0xff]   ;;  %v11690_v1 = vld [vmem:[#allocation8 + $0x168] ss:$16 sps:$4 sm:$0xff]  }
 0x3c6   :  { %2988 = vmatpush1.bf16.msra.mxu0 %v11639_v23  ;;  %3029 = vmatpush1.bf16.msra.mxu1 %v11642_v14  ;;  %v11695_v23 = vld [vmem:[#allocation8 + $0x184] ss:$16 sps:$4 sm:$0xff]   ;;  %v11698_v14 = vld [vmem:[#allocation8 + $0x18c] ss:$16 sps:$4 sm:$0xff]  }
 0x3c7   :  { %2989 = vmatprep.subr.bf16.mxu0 %v11647_v26  ;;  %3030 = vmatprep.subr.bf16.mxu1 %v11650_v54  ;;  %v11693_v26 = vld [vmem:[#allocation8 + $0x180] ss:$16 sps:$4 sm:$0xff]   ;;  %v11696_v54 = vld [vmem:[#allocation8 + $0x188] ss:$16 sps:$4 sm:$0xff]  }
 0x3ca   :  { %2990 = vmatpush1.bf16.msra.mxu0 %v11645_v27  ;;  %3031 = vmatpush1.bf16.msra.mxu1 %v11648_v16  ;;  %v11699_v27 = vld [vmem:[#allocation8 + $0x1a0] ss:$16 sps:$4 sm:$0xff]   ;;  %v11701_v16 = vld [vmem:[#allocation8 + $0x1a4] ss:$16 sps:$4 sm:$0xff]  }
 0x3cb   :  { %2991 = vmatprep.subr.bf16.mxu0 %v11653_v56  ;;  %3032 = vmatprep.subr.bf16.mxu1 %v11656_v28  ;;  %v11702_v56 = vld [vmem:[#allocation8 + $0x1a8] ss:$16 sps:$4 sm:$0xff]   ;;  %v11704_v28 = vld [vmem:[#allocation8 + $0x1ac] ss:$16 sps:$4 sm:$0xff]  }
 0x3ce   :  { %2992 = vmatpush1.bf16.msra.mxu0 %v11651_v62  ;;  %3033 = vmatpush1.bf16.msra.mxu1 %v11654_v30  ;;  %v11707_v62 = vld [vmem:[#allocation8 + $0x1c4] ss:$16 sps:$4 sm:$0xff]   ;;  %v11710_v30 = vld [vmem:[#allocation8 + $0x1cc] ss:$16 sps:$4 sm:$0xff]  }
 0x3cf   :  { %2993 = vmatprep.subr.bf16.mxu0 %v11659_v31  ;;  %3034 = vmatprep.subr.bf16.mxu1 %v11662_v32  ;;  %v11705_v31 = vld [vmem:[#allocation8 + $0x1c0] ss:$16 sps:$4 sm:$0xff]   ;;  %v11708_v32 = vld [vmem:[#allocation8 + $0x1c8] ss:$16 sps:$4 sm:$0xff]  }
 0x3d2   :  { %2994 = vmatpush1.bf16.msra.mxu0 %v11657_v34  ;;  %3035 = vmatpush1.bf16.msra.mxu1 %v11660_v61  ;;  %v11713_v34 = vld [vmem:[#allocation8 + $0x1e4] ss:$16 sps:$4 sm:$0xff]   ;;  %v11716_v61 = vld [vmem:[#allocation8 + $0x1ec] ss:$16 sps:$4 sm:$0xff]  }
 0x3d3   :  { %2995 = vmatprep.subr.bf16.mxu0 %v11665_v11  ;;  %3036 = vmatprep.subr.bf16.mxu1 %v11668_v35  ;;  %v11711_v11 = vld [vmem:[#allocation8 + $0x1e0] ss:$16 sps:$4 sm:$0xff]   ;;  %v11714_v35 = vld [vmem:[#allocation8 + $0x1e8] ss:$16 sps:$4 sm:$0xff]  }
 0x3d6   :  { %2996 = vmatpush1.bf16.msra.mxu0 %v11663_v39  ;;  %3037 = vmatpush1.bf16.msra.mxu1 %v11666_v41  ;;  %v11719_v39 = vld [vmem:[#allocation4 + $0x4] ss:$16 sps:$4 sm:$0xff]   ;;  %v11722_v41 = vld [vmem:[#allocation4 + $0xc] ss:$16 sps:$4 sm:$0xff]  }
 0x3d7   :  { %2997 = vmatprep.subr.bf16.mxu0 %v11671_v43  ;;  %3038 = vmatprep.subr.bf16.mxu1 %v11674_v45  ;;  %v2125_v43 = vld [vmem:[%s13995_s5] sm:$0xf] }
 0x3d8   :  { %v2130_v45 = vrot.slane %v2125_v43, %v13590_v8 }
 0x3da   :  { %2998 = vmatpush1.bf16.msra.mxu0 %v11669_v53  ;;  %3039 = vmatpush1.bf16.msra.mxu1 %v11672_v49  ;;  %v2134_v53 = vrot.slane %v2125_v43, %v13592_v10 }
 0x3db   :  { %2999 = vmatprep.subr.bf16.mxu0 %v11677_v51  ;;  %3040 = vmatprep.subr.bf16.mxu1 %v11680_v47 }
 0x3de   :  { %3000 = vmatpush1.bf16.msra.mxu0 %v11675_v52  ;;  %3041 = vmatpush1.bf16.msra.mxu1 %v11678_v63 }
 0x3df   :  { %3001 = vmatprep.subr.bf16.mxu0 %v11683_v3  ;;  %3042 = vmatprep.subr.bf16.mxu1 %v11686_v7 }
 0x3e2   :  { %3002 = vmatpush1.bf16.msra.mxu0 %v11681_v13  ;;  %3043 = vmatpush1.bf16.msra.mxu1 %v11684_v17 }
 0x3e3   :  { %3003 = vmatprep.subr.bf16.mxu0 %v11689_v5  ;;  %3044 = vmatprep.subr.bf16.mxu1 %v11692_v19 }
 0x3e6   :  { %3004 = vmatpush1.bf16.msra.mxu0 %v11687_v22  ;;  %3045 = vmatpush1.bf16.msra.mxu1 %v11690_v1  ;;  %v2138_v1 = vrot.slane %v2125_v43, %v13620_v48 }
 0x3e7   :  { %3005 = vmatprep.subr.bf16.mxu0 %v11695_v23  ;;  %3046 = vmatprep.subr.bf16.mxu1 %v11698_v14  ;;  %v2142_v23 = vrot.slane %v2125_v43, %v13622_v50 }
 0x3ea   :  { %3006 = vmatpush1.bf16.msra.mxu0 %v11693_v26  ;;  %3047 = vmatpush1.bf16.msra.mxu1 %v11696_v54 }
 0x3eb   :  { %3007 = vmatprep.subr.bf16.mxu0 %v11701_v16  ;;  %3048 = vmatprep.subr.bf16.mxu1 %v11704_v28 }
 0x3ee   :  { %3008 = vmatpush1.bf16.msra.mxu0 %v11699_v27  ;;  %3049 = vmatpush1.bf16.msra.mxu1 %v11702_v56 }
 0x3ef   :  { %3009 = vmatprep.subr.bf16.mxu0 %v11707_v62  ;;  %3050 = vmatprep.subr.bf16.mxu1 %v11710_v30 }
 0x3f2   :  { %3010 = vmatpush1.bf16.msra.mxu0 %v11705_v31  ;;  %3051 = vmatpush1.bf16.msra.mxu1 %v11708_v32 }
 0x3f3   :  { %3011 = vmatprep.subr.bf16.mxu0 %v11713_v34  ;;  %3052 = vmatprep.subr.bf16.mxu1 %v11716_v61 }
 0x3f6   :  { %3012 = vmatpush1.bf16.msra.mxu0 %v11711_v11  ;;  %3053 = vmatpush1.bf16.msra.mxu1 %v11714_v35 }
 0x3f7   :  { %3288 = vmatprep.subr.bf16.mxu0 %v11719_v39  ;;  %3329 = vmatprep.subr.bf16.mxu1 %v11722_v41 }
 0x48b   :  { %v2501_v49 = vpop.f32.mrb[16].mxu0  ;;  %v2542_v51 = vpop.f32.mrb[48].mxu1 }
 0x48c   :  { %v2502_v47 = vadd.f32 %v2501_v49, %v2130_v45  ;;  %v2503_v52 = vpop.f32.mrb[17].mxu0  ;;  %v2544_v63 = vpop.f32.mrb[49].mxu1  ;;  %v2543_v14 = vadd.f32 %v2542_v51, %v2138_v1  ;;  %v11717_v45 = vld [vmem:[#allocation4] ss:$16 sps:$4 sm:$0xff]   ;;  %v11725_v51 = vld [vmem:[#allocation4 + $0x24] ss:$16 sps:$4 sm:$0xff]  }
 0x48d   :  { %v2504_v3 = vadd.f32 %v2503_v52, %v2134_v53  ;;  %v2505_v7 = vpop.f32.mrb[18].mxu0  ;;  %v2546_v13 = vpop.f32.mrb[50].mxu1  ;;  %v2545_v26 = vadd.f32 %v2544_v63, %v2142_v23  ;;  %v11720_v53 = vld [vmem:[#allocation4 + $0x8] ss:$16 sps:$4 sm:$0xff]   ;;  %v11731_v63 = vld [vmem:[#allocation4 + $0x44] ss:$16 sps:$4 sm:$0xff]  }
 0x48e   :  { %v10242_v17 = vmul.f32 -1.442695, %v2502_v47  ;;  %v2506_v5 = vpop.f32.mrb[19].mxu0  ;;  %v2547_v19 = vpop.f32.mrb[51].mxu1  ;;  %v10244_v54 = vmul.f32 -1.442695, %v2543_v14 }
 0x48f   :  { %v10243_v22 = vmul.f32 -1.442695, %v2504_v3  ;;  %v11728_v47 = vld [vmem:[#allocation4 + $0x2c] ss:$16 sps:$4 sm:$0xff]   ;;  %v11726_v52 = vld [vmem:[#allocation4 + $0x28] ss:$16 sps:$4 sm:$0xff]  }
 0x490   :  { %12989 = vpow2.f32 %v10242_v17  ;;  %v11734_v3 = vld [vmem:[#allocation4 + $0x4c] ss:$16 sps:$4 sm:$0xff]   ;;  %v11729_v7 = vld [vmem:[#allocation4 + $0x40] ss:$16 sps:$4 sm:$0xff]   ;;  %v11732_v13 = vld [vmem:[#allocation4 + $0x48] ss:$16 sps:$4 sm:$0xff]  }
 0x491   :  { %12991 = vpow2.f32 %v10243_v22  ;;  %v11737_v17 = vld [vmem:[#allocation4 + $0x64] ss:$16 sps:$4 sm:$0xff]   ;;  %v11740_v5 = vld [vmem:[#allocation4 + $0x6c] ss:$16 sps:$4 sm:$0xff]   ;;  %v11735_v19 = vld [vmem:[#allocation4 + $0x60] ss:$16 sps:$4 sm:$0xff]  }
 0x492   :  { %12993 = vtanh.f32 %v2545_v26  ;;  %v11738_v22 = vld [vmem:[#allocation4 + $0x68] ss:$16 sps:$4 sm:$0xff]   ;;  %v11743_v1 = vld [vmem:[#allocation4 + $0x84] ss:$16 sps:$4 sm:$0xff]   ;;  %v11746_v23 = vld [vmem:[#allocation4 + $0x8c] ss:$16 sps:$4 sm:$0xff]  }
 0x493   :  { %12995 = vpow2.f32 %v10244_v54  ;;  %v11741_v14 = vld [vmem:[#allocation4 + $0x80] ss:$16 sps:$4 sm:$0xff]   ;;  %v11744_v26 = vld [vmem:[#allocation4 + $0x88] ss:$16 sps:$4 sm:$0xff]   ;;  %v11749_v54 = vld [vmem:[#allocation4 + $0xa4] ss:$16 sps:$4 sm:$0xff]  }
 0x49a   :  { %v12990_v27 = vpop.eup %12989 }
 0x49b   :  { %v2558_v16 = vadd.f32 1.0, %v12990_v27  ;;  %v12992_v56 = vpop.eup %12991  ;;  %v11752_v27 = vld [vmem:[#allocation4 + $0xac] ss:$16 sps:$4 sm:$0xff]  }
 0x49c   :  { %v2559_v28 = vadd.f32 1.0, %v12992_v56  ;;  %v12994_v62 = vpop.eup %12993  ;;  %v11750_v56 = vld [vmem:[#allocation4 + $0xa8] ss:$16 sps:$4 sm:$0xff]  }
 0x49d   :  { %12997 = vrcp.f32 %v2558_v16  ;;  %v12996_v30 = vpop.eup %12995  ;;  %v11747_v16 = vld [vmem:[#allocation4 + $0xa0] ss:$16 sps:$4 sm:$0xff]  }
 0x49e   :  { %12999 = vrcp.f32 %v2559_v28  ;;  %v2560_v61 = vadd.f32 1.0, %v12996_v30  ;;  %v11755_v28 = vld [vmem:[#allocation4 + $0xc4] ss:$16 sps:$4 sm:$0xff]   ;;  %v11753_v30 = vld [vmem:[#allocation4 + $0xc0] ss:$16 sps:$4 sm:$0xff]  }
 0x4a0   :  { %13001 = vrcp.f32 %v2560_v61  ;;  %v11759_v61 = vld [vmem:[#allocation4 + $0xe0] ss:$16 sps:$4 sm:$0xff]  }
 0x4a7   :  { %v12998_v31 = vpop.eup %12997 }
 0x4a8   :  { %v2569_v32 = vmul.f32 %v12998_v31, %v12994_v62  ;;  %v13000_v34 = vpop.eup %12999  ;;  %v11758_v62 = vld [vmem:[#allocation4 + $0xcc] ss:$16 sps:$4 sm:$0xff]   ;;  %v11756_v31 = vld [vmem:[#allocation4 + $0xc8] ss:$16 sps:$4 sm:$0xff]  }
 0x4a9   :  { %v2568_v11 = vmul.f32 %v13000_v34, %v13666_v59  ;;  %v11723_v59 = vld [vmem:[#allocation4 + $0x20] ss:$16 sps:$4 sm:$0xff]   ;;  %v11764_v34 = vld [vmem:[#allocation4 + $0xec] ss:$16 sps:$4 sm:$0xff]  }
 0x4aa   :  { %v13002_v39 = vpop.eup %13001 }
 0x4ab   :  { %v13716_v35 = vadd.f32 %v2569_v32, %v2568_v11  ;;  %v11761_v32 = vld [vmem:[#allocation4 + $0xe4] ss:$16 sps:$4 sm:$0xff]   ;;  %v11762_v11 = vld [vmem:[#allocation4 + $0xe8] ss:$16 sps:$4 sm:$0xff]  }
 0x4ad   :  { %13003 = vtanh.f32 %v13716_v35 }
 0x4b7   :  { %v13004_v41 = vpop.eup %13003 }
 0x4b8   :  { %v2572_v43 = vmul.f32 %v13004_v41, %v13002_v39  ;;  %v11767_v39 = vld [vmem:[#allocation6 + $0x4] ss:$16 sps:$4 sm:$0xff]   ;;  %v11770_v41 = vld [vmem:[#allocation6 + $0xc] ss:$16 sps:$4 sm:$0xff]  }
 0x4ba   :  { %v13719_v49 = vpack.c.bf16 %v2572_v43, %v2572_v43  ;;  %v11765_v43 = vld [vmem:[#allocation6] ss:$16 sps:$4 sm:$0xff]  }
 0x4bc   :  { %3014 = vmatmul.mubr.bf16.vlgmr.msra.gmra.mrb[20].mxu0 %v13719_v49  ;;  %3055 = vmatmul.mubr.bf16.vlgmr.msra.gmra.mrb[52].mxu1 %v13719_v49 }
 0x4bd   :  { %3289 = vmatpush1.bf16.msra.mxu0 %v11717_v45  ;;  %3330 = vmatpush1.bf16.msra.mxu1 %v11720_v53  ;;  %v11768_v45 = vld [vmem:[#allocation6 + $0x8] ss:$16 sps:$4 sm:$0xff]   ;;  %v11773_v53 = vld [vmem:[#allocation6 + $0x24] ss:$16 sps:$4 sm:$0xff]  }
 0x4be   :  { %3290 = vmatprep.subr.bf16.mxu0 %v11725_v51  ;;  %3331 = vmatprep.subr.bf16.mxu1 %v11728_v47  ;;  %v11776_v51 = vld [vmem:[#allocation6 + $0x2c] ss:$16 sps:$4 sm:$0xff]   ;;  %v11771_v47 = vld [vmem:[#allocation6 + $0x20] ss:$16 sps:$4 sm:$0xff]  }
 0x4bf   :  { %3320 = vmatprep.mubr.bf16.mxu0 %v13364_v0  ;;  %3361 = vmatprep.mubr.bf16.mxu1 %v13364_v0 }
 0x4c1   :  { %3291 = vmatpush1.bf16.msra.mxu0 %v11723_v59  ;;  %3332 = vmatpush1.bf16.msra.mxu1 %v11726_v52  ;;  %v11774_v59 = vld [vmem:[#allocation6 + $0x28] ss:$16 sps:$4 sm:$0xff]   ;;  %v11782_v52 = vld [vmem:[#allocation6 + $0x4c] ss:$16 sps:$4 sm:$0xff]  }
 0x4c2   :  { %3292 = vmatprep.subr.bf16.mxu0 %v11731_v63  ;;  %3333 = vmatprep.subr.bf16.mxu1 %v11734_v3  ;;  %v11777_v63 = vld [vmem:[#allocation6 + $0x40] ss:$16 sps:$4 sm:$0xff]   ;;  %v11785_v3 = vld [vmem:[#allocation6 + $0x64] ss:$16 sps:$4 sm:$0xff]  }
 0x4c5   :  { %3293 = vmatpush1.bf16.msra.mxu0 %v11729_v7  ;;  %3334 = vmatpush1.bf16.msra.mxu1 %v11732_v13  ;;  %v11788_v7 = vld [vmem:[#allocation6 + $0x6c] ss:$16 sps:$4 sm:$0xff]   ;;  %v11783_v13 = vld [vmem:[#allocation6 + $0x60] ss:$16 sps:$4 sm:$0xff]  }
 0x4c6   :  { %3294 = vmatprep.subr.bf16.mxu0 %v11737_v17  ;;  %3335 = vmatprep.subr.bf16.mxu1 %v11740_v5  ;;  %v11786_v17 = vld [vmem:[#allocation6 + $0x68] ss:$16 sps:$4 sm:$0xff]   ;;  %v11791_v5 = vld [vmem:[#allocation6 + $0x84] ss:$16 sps:$4 sm:$0xff]  }
 0x4c9   :  { %3295 = vmatpush1.bf16.msra.mxu0 %v11735_v19  ;;  %3336 = vmatpush1.bf16.msra.mxu1 %v11738_v22  ;;  %v11794_v19 = vld [vmem:[#allocation6 + $0x8c] ss:$16 sps:$4 sm:$0xff]   ;;  %v11789_v22 = vld [vmem:[#allocation6 + $0x80] ss:$16 sps:$4 sm:$0xff]  }
 0x4ca   :  { %3296 = vmatprep.subr.bf16.mxu0 %v11743_v1  ;;  %3337 = vmatprep.subr.bf16.mxu1 %v11746_v23  ;;  %v11792_v1 = vld [vmem:[#allocation6 + $0x88] ss:$16 sps:$4 sm:$0xff]   ;;  %v11797_v23 = vld [vmem:[#allocation6 + $0xa4] ss:$16 sps:$4 sm:$0xff]  }
 0x4cd   :  { %3297 = vmatpush1.bf16.msra.mxu0 %v11741_v14  ;;  %3338 = vmatpush1.bf16.msra.mxu1 %v11744_v26  ;;  %v11800_v14 = vld [vmem:[#allocation6 + $0xac] ss:$16 sps:$4 sm:$0xff]   ;;  %v11795_v26 = vld [vmem:[#allocation6 + $0xa0] ss:$16 sps:$4 sm:$0xff]  }
 0x4ce   :  { %3298 = vmatprep.subr.bf16.mxu0 %v11749_v54  ;;  %3339 = vmatprep.subr.bf16.mxu1 %v11752_v27  ;;  %v11798_v54 = vld [vmem:[#allocation6 + $0xa8] ss:$16 sps:$4 sm:$0xff]   ;;  %v11803_v27 = vld [vmem:[#allocation6 + $0xc4] ss:$16 sps:$4 sm:$0xff]  }
 0x4d1   :  { %3299 = vmatpush1.bf16.msra.mxu0 %v11747_v16  ;;  %3340 = vmatpush1.bf16.msra.mxu1 %v11750_v56  ;;  %v11806_v16 = vld [vmem:[#allocation6 + $0xcc] ss:$16 sps:$4 sm:$0xff]   ;;  %v11801_v56 = vld [vmem:[#allocation6 + $0xc0] ss:$16 sps:$4 sm:$0xff]  }
 0x4d2   :  { %3300 = vmatprep.subr.bf16.mxu0 %v11755_v28  ;;  %3341 = vmatprep.subr.bf16.mxu1 %v11758_v62  ;;  %v11804_v28 = vld [vmem:[#allocation6 + $0xc8] ss:$16 sps:$4 sm:$0xff]   ;;  %v11809_v62 = vld [vmem:[#allocation6 + $0xe4] ss:$16 sps:$4 sm:$0xff]  }
 0x4d5   :  { %3301 = vmatpush1.bf16.msra.mxu0 %v11753_v30  ;;  %3342 = vmatpush1.bf16.msra.mxu1 %v11756_v31  ;;  %v11812_v30 = vld [vmem:[#allocation6 + $0xec] ss:$16 sps:$4 sm:$0xff]   ;;  %v11807_v31 = vld [vmem:[#allocation6 + $0xe0] ss:$16 sps:$4 sm:$0xff]  }
 0x4d6   :  { %3302 = vmatprep.subr.bf16.mxu0 %v11761_v32  ;;  %3343 = vmatprep.subr.bf16.mxu1 %v11764_v34  ;;  %v11810_v32 = vld [vmem:[#allocation6 + $0xe8] ss:$16 sps:$4 sm:$0xff]   ;;  %v11815_v34 = vld [vmem:[#allocation6 + $0x104] ss:$16 sps:$4 sm:$0xff]  }
 0x4d9   :  { %3303 = vmatpush1.bf16.msra.mxu0 %v11759_v61  ;;  %3344 = vmatpush1.bf16.msra.mxu1 %v11762_v11  ;;  %v11818_v61 = vld [vmem:[#allocation6 + $0x10c] ss:$16 sps:$4 sm:$0xff]   ;;  %v11813_v11 = vld [vmem:[#allocation6 + $0x100] ss:$16 sps:$4 sm:$0xff]  }
 0x4da   :  { %3805 = vmatprep.subr.bf16.mxu0 %v11767_v39  ;;  %3846 = vmatprep.subr.bf16.mxu1 %v11770_v41  ;;  %v11816_v39 = vld [vmem:[#allocation6 + $0x108] ss:$16 sps:$4 sm:$0xff]   ;;  %v11821_v41 = vld [vmem:[#allocation6 + $0x124] ss:$16 sps:$4 sm:$0xff]  }
 0x4dc   :  { %3321 = vmatmul.mubr.bf16.vlgmr.msra.gmra.mrb[24].mxu0 %v13702_v57  ;;  %3362 = vmatmul.mubr.bf16.vlgmr.msra.gmra.mrb[56].mxu1 %v13702_v57  ;;  %v11779_v57 = vld [vmem:[#allocation6 + $0x44] ss:$16 sps:$4 sm:$0xff]  }
 0x4dd   :  { %3837 = vmatprep.mubr.bf16.mxu0 %v13719_v49  ;;  %3878 = vmatprep.mubr.bf16.mxu1 %v13719_v49  ;;  %v11780_v49 = vld [vmem:[#allocation6 + $0x48] ss:$16 sps:$4 sm:$0xff]  }
 0x4de   :  { %3806 = vmatpush1.bf16.msra.mxu0 %v11765_v43  ;;  %3847 = vmatpush1.bf16.msra.mxu1 %v11768_v45  ;;  %v11824_v43 = vld [vmem:[#allocation6 + $0x12c] ss:$16 sps:$4 sm:$0xff]   ;;  %v11819_v45 = vld [vmem:[#allocation6 + $0x120] ss:$16 sps:$4 sm:$0xff]  }
 0x4df   :  { %3807 = vmatprep.subr.bf16.mxu0 %v11773_v53  ;;  %3848 = vmatprep.subr.bf16.mxu1 %v11776_v51  ;;  %v11822_v53 = vld [vmem:[#allocation6 + $0x128] ss:$16 sps:$4 sm:$0xff]   ;;  %v11827_v51 = vld [vmem:[#allocation6 + $0x144] ss:$16 sps:$4 sm:$0xff]  }
 0x4e2   :  { %3808 = vmatpush1.bf16.msra.mxu0 %v11771_v47  ;;  %3849 = vmatpush1.bf16.msra.mxu1 %v11774_v59  ;;  %v11830_v47 = vld [vmem:[#allocation6 + $0x14c] ss:$16 sps:$4 sm:$0xff]   ;;  %v11825_v59 = vld [vmem:[#allocation6 + $0x140] ss:$16 sps:$4 sm:$0xff]  }
 0x4e3   :  { %3809 = vmatprep.subr.bf16.mxu0 %v11779_v57  ;;  %3850 = vmatprep.subr.bf16.mxu1 %v11782_v52  ;;  %v11828_v57 = vld [vmem:[#allocation6 + $0x148] ss:$16 sps:$4 sm:$0xff]   ;;  %v11833_v52 = vld [vmem:[#allocation6 + $0x164] ss:$16 sps:$4 sm:$0xff]  }
 0x4e6   :  { %3810 = vmatpush1.bf16.msra.mxu0 %v11777_v63  ;;  %3851 = vmatpush1.bf16.msra.mxu1 %v11780_v49  ;;  %v11836_v63 = vld [vmem:[#allocation6 + $0x16c] ss:$16 sps:$4 sm:$0xff]   ;;  %v11831_v49 = vld [vmem:[#allocation6 + $0x160] ss:$16 sps:$4 sm:$0xff]  }
 0x4e7   :  { %3811 = vmatprep.subr.bf16.mxu0 %v11785_v3  ;;  %3852 = vmatprep.subr.bf16.mxu1 %v11788_v7  ;;  %v11834_v3 = vld [vmem:[#allocation6 + $0x168] ss:$16 sps:$4 sm:$0xff]   ;;  %v11839_v7 = vld [vmem:[#allocation6 + $0x184] ss:$16 sps:$4 sm:$0xff]  }
 0x4ea   :  { %3812 = vmatpush1.bf16.msra.mxu0 %v11783_v13  ;;  %3853 = vmatpush1.bf16.msra.mxu1 %v11786_v17  ;;  %v11842_v13 = vld [vmem:[#allocation6 + $0x18c] ss:$16 sps:$4 sm:$0xff]   ;;  %v11837_v17 = vld [vmem:[#allocation6 + $0x180] ss:$16 sps:$4 sm:$0xff]  }
 0x4eb   :  { %3813 = vmatprep.subr.bf16.mxu0 %v11791_v5  ;;  %3854 = vmatprep.subr.bf16.mxu1 %v11794_v19  ;;  %v11840_v5 = vld [vmem:[#allocation6 + $0x188] ss:$16 sps:$4 sm:$0xff]   ;;  %v11843_v19 = vld [vmem:[#allocation6 + $0x1a0] ss:$16 sps:$4 sm:$0xff]  }
 0x4ee   :  { %3814 = vmatpush1.bf16.msra.mxu0 %v11789_v22  ;;  %3855 = vmatpush1.bf16.msra.mxu1 %v11792_v1  ;;  %v11845_v22 = vld [vmem:[#allocation6 + $0x1a4] ss:$16 sps:$4 sm:$0xff]   ;;  %v11846_v1 = vld [vmem:[#allocation6 + $0x1a8] ss:$16 sps:$4 sm:$0xff]  }
 0x4ef   :  { %3815 = vmatprep.subr.bf16.mxu0 %v11797_v23  ;;  %3856 = vmatprep.subr.bf16.mxu1 %v11800_v14  ;;  %v11848_v23 = vld [vmem:[#allocation6 + $0x1ac] ss:$16 sps:$4 sm:$0xff]   ;;  %v11851_v14 = vld [vmem:[#allocation6 + $0x1c4] ss:$16 sps:$4 sm:$0xff]  }
 0x4f2   :  { %3816 = vmatpush1.bf16.msra.mxu0 %v11795_v26  ;;  %3857 = vmatpush1.bf16.msra.mxu1 %v11798_v54  ;;  %v11854_v26 = vld [vmem:[#allocation6 + $0x1cc] ss:$16 sps:$4 sm:$0xff]   ;;  %v11849_v54 = vld [vmem:[#allocation6 + $0x1c0] ss:$16 sps:$4 sm:$0xff]  }
 0x4f3   :  { %3817 = vmatprep.subr.bf16.mxu0 %v11803_v27  ;;  %3858 = vmatprep.subr.bf16.mxu1 %v11806_v16  ;;  %v11852_v27 = vld [vmem:[#allocation6 + $0x1c8] ss:$16 sps:$4 sm:$0xff]   ;;  %v11857_v16 = vld [vmem:[#allocation6 + $0x1e4] ss:$16 sps:$4 sm:$0xff]  }
 0x4f6   :  { %3818 = vmatpush1.bf16.msra.mxu0 %v11801_v56  ;;  %3859 = vmatpush1.bf16.msra.mxu1 %v11804_v28  ;;  %v11860_v56 = vld [vmem:[#allocation6 + $0x1ec] ss:$16 sps:$4 sm:$0xff]   ;;  %v11855_v28 = vld [vmem:[#allocation6 + $0x1e0] ss:$16 sps:$4 sm:$0xff]  }
 0x4f7   :  { %3819 = vmatprep.subr.bf16.mxu0 %v11809_v62  ;;  %3860 = vmatprep.subr.bf16.mxu1 %v11812_v30  ;;  %v11858_v62 = vld [vmem:[#allocation6 + $0x1e8] ss:$16 sps:$4 sm:$0xff]   ;;  %v11863_v30 = vld [vmem:[#allocation8 + $0x4] ss:$16 sps:$4 sm:$0xff]  }
 0x4fa   :  { %3820 = vmatpush1.bf16.msra.mxu0 %v11807_v31  ;;  %3861 = vmatpush1.bf16.msra.mxu1 %v11810_v32  ;;  %v11866_v31 = vld [vmem:[#allocation8 + $0xc] ss:$16 sps:$4 sm:$0xff]   ;;  %v2639_v32 = vld [vmem:[%s13997_s7] sm:$0xf] }
 0x4fb   :  { %3821 = vmatprep.subr.bf16.mxu0 %v11815_v34  ;;  %3862 = vmatprep.subr.bf16.mxu1 %v11818_v61  ;;  %v2644_v34 = vrot.slane %v2639_v32, %v13590_v8  ;;  %v2648_v61 = vrot.slane %v2639_v32, %v13592_v10 }
 0x4fe   :  { %3822 = vmatpush1.bf16.msra.mxu0 %v11813_v11  ;;  %3863 = vmatpush1.bf16.msra.mxu1 %v11816_v39 }
 0x4ff   :  { %3823 = vmatprep.subr.bf16.mxu0 %v11821_v41  ;;  %3864 = vmatprep.subr.bf16.mxu1 %v11824_v43 }
 0x502   :  { %3824 = vmatpush1.bf16.msra.mxu0 %v11819_v45  ;;  %3865 = vmatpush1.bf16.msra.mxu1 %v11822_v53 }
 0x503   :  { %3825 = vmatprep.subr.bf16.mxu0 %v11827_v51  ;;  %3866 = vmatprep.subr.bf16.mxu1 %v11830_v47 }
 0x506   :  { %3826 = vmatpush1.bf16.msra.mxu0 %v11825_v59  ;;  %3867 = vmatpush1.bf16.msra.mxu1 %v11828_v57 }
 0x507   :  { %3827 = vmatprep.subr.bf16.mxu0 %v11833_v52  ;;  %3868 = vmatprep.subr.bf16.mxu1 %v11836_v63 }
 0x50a   :  { %3828 = vmatpush1.bf16.msra.mxu0 %v11831_v49  ;;  %3869 = vmatpush1.bf16.msra.mxu1 %v11834_v3  ;;  %v2656_v49 = vrot.slane %v2639_v32, %v13622_v50 }
 0x50b   :  { %3829 = vmatprep.subr.bf16.mxu0 %v11839_v7  ;;  %3870 = vmatprep.subr.bf16.mxu1 %v11842_v13 }
 0x50e   :  { %3830 = vmatpush1.bf16.msra.mxu0 %v11837_v17  ;;  %3871 = vmatpush1.bf16.msra.mxu1 %v11840_v5 }
 0x50f   :  { %3831 = vmatprep.subr.bf16.mxu0 %v11845_v22  ;;  %3872 = vmatprep.subr.bf16.mxu1 %v11848_v23 }
 0x512   :  { %3832 = vmatpush1.bf16.msra.mxu0 %v11843_v19  ;;  %3873 = vmatpush1.bf16.msra.mxu1 %v11846_v1 }
 0x513   :  { %3833 = vmatprep.subr.bf16.mxu0 %v11851_v14  ;;  %3874 = vmatprep.subr.bf16.mxu1 %v11854_v26 }
 0x516   :  { %3834 = vmatpush1.bf16.msra.mxu0 %v11849_v54  ;;  %3875 = vmatpush1.bf16.msra.mxu1 %v11852_v27 }
 0x517   :  { %3835 = vmatprep.subr.bf16.mxu0 %v11857_v16  ;;  %3876 = vmatprep.subr.bf16.mxu1 %v11860_v56 }
 0x51a   :  { %3836 = vmatpush1.bf16.msra.mxu0 %v11855_v28  ;;  %3877 = vmatpush1.bf16.msra.mxu1 %v11858_v62 }
 0x51b   :  { %4319 = vmatprep.subr.bf16.mxu0 %v11863_v30  ;;  %4360 = vmatprep.subr.bf16.mxu1 %v11866_v31 }
 0x58f   :  { %v3015_v11 = vpop.f32.mrb[20].mxu0  ;;  %v3056_v39 = vpop.f32.mrb[52].mxu1 }
 0x590   :  { %v3016_v41 = vadd.f32 %v3015_v11, %v2644_v34  ;;  %v3017_v43 = vpop.f32.mrb[21].mxu0  ;;  %v3058_v45 = vpop.f32.mrb[53].mxu1  ;;  %v2652_v11 = vrot.slane %v2639_v32, %v13620_v48 }
 0x591   :  { %v3018_v53 = vadd.f32 %v3017_v43, %v2648_v61  ;;  %v3019_v51 = vpop.f32.mrb[22].mxu0  ;;  %v3060_v47 = vpop.f32.mrb[54].mxu1  ;;  %v3059_v3 = vadd.f32 %v3058_v45, %v2656_v49 }
 0x592   :  { %v10309_v59 = vmul.f32 -1.442695, %v3016_v41  ;;  %v3020_v57 = vpop.f32.mrb[23].mxu0  ;;  %v3061_v52 = vpop.f32.mrb[55].mxu1 }
 0x593   :  { %v10310_v63 = vmul.f32 -1.442695, %v3018_v53  ;;  %v3057_v53 = vadd.f32 %v3056_v39, %v2652_v11  ;;  %v11881_v11 = vld [vmem:[#allocation8 + $0x64] ss:$16 sps:$4 sm:$0xff]  }
 0x594   :  { %13005 = vpow2.f32 %v10309_v59 }
 0x595   :  { %13007 = vpow2.f32 %v10310_v63 }
 0x596   :  { %13009 = vtanh.f32 %v3059_v3 }
 0x59e   :  { %v13006_v7 = vpop.eup %13005 }
 0x59f   :  { %v3072_v13 = vadd.f32 1.0, %v13006_v7  ;;  %v13008_v17 = vpop.eup %13007 }
 0x5a0   :  { %v3073_v5 = vadd.f32 1.0, %v13008_v17  ;;  %v13010_v19 = vpop.eup %13009 }
 0x5a1   :  { %13011 = vrcp.f32 %v3072_v13 }
 0x5a2   :  { %13013 = vrcp.f32 %v3073_v5 }
 0x5ab   :  { %v13012_v22 = vpop.eup %13011 }
 0x5ac   :  { %v3083_v1 = vmul.f32 %v13012_v22, %v13010_v19  ;;  %v13014_v23 = vpop.eup %13013 }
 0x5ad   :  { %v3082_v14 = vmul.f32 %v13014_v23, %v13688_v55 }
 0x5af   :  { %v3322_v26 = vpop.f32.mrb[24].mxu0  ;;  %v3363_v54 = vpop.f32.mrb[56].mxu1  ;;  %v13736_v27 = vadd.f32 %v3083_v1, %v3082_v14 }
 0x5b0   :  { %v3370_v16 = vadd.f32 %v3322_v26, %v13600_v18  ;;  %v3372_v56 = vadd.f32 %v3363_v54, %v13630_v58  ;;  %v3324_v28 = vpop.f32.mrb[25].mxu0  ;;  %v3365_v62 = vpop.f32.mrb[57].mxu1  ;;  %v10311_v18 = vmul.f32 -1.442695, %v3057_v53  ;;  %v11861_v26 = vld [vmem:[#allocation8] ss:$16 sps:$4 sm:$0xff]  }
 0x5b1   :  { %v3371_v30 = vadd.f32 %v3324_v28, %v13602_v20  ;;  %v3373_v31 = vadd.f32 %v3365_v62, %v13632_v60  ;;  %v3326_v34 = vpop.f32.mrb[26].mxu0  ;;  %v3367_v61 = vpop.f32.mrb[58].mxu1  ;;  %v11864_v54 = vld [vmem:[#allocation8 + $0x8] ss:$16 sps:$4 sm:$0xff]   ;;  %v11867_v28 = vld [vmem:[#allocation8 + $0x20] ss:$16 sps:$4 sm:$0xff]  }
 0x5b2   :  { %v10344_v41 = vmul.f32 -1.442695, %v3370_v16  ;;  %v3327_v55 = vpop.f32.mrb[27].mxu0  ;;  %v3368_v43 = vpop.f32.mrb[59].mxu1  ;;  %v10346_v51 = vmul.f32 -1.442695, %v3372_v56 }
 0x5b3   :  { %v10345_v45 = vmul.f32 -1.442695, %v3371_v30  ;;  %v11869_v16 = vld [vmem:[#allocation8 + $0x24] ss:$16 sps:$4 sm:$0xff]   ;;  %v11872_v56 = vld [vmem:[#allocation8 + $0x2c] ss:$16 sps:$4 sm:$0xff]  }
 0x5b4   :  { %13015 = vpow2.f32 %v10344_v41  ;;  %v11870_v62 = vld [vmem:[#allocation8 + $0x28] ss:$16 sps:$4 sm:$0xff]   ;;  %v11875_v30 = vld [vmem:[#allocation8 + $0x44] ss:$16 sps:$4 sm:$0xff]   ;;  %v11873_v34 = vld [vmem:[#allocation8 + $0x40] ss:$16 sps:$4 sm:$0xff]  }
 0x5b5   :  { %13017 = vpow2.f32 %v10345_v45  ;;  %v11876_v61 = vld [vmem:[#allocation8 + $0x48] ss:$16 sps:$4 sm:$0xff]   ;;  %v11884_v41 = vld [vmem:[#allocation8 + $0x6c] ss:$16 sps:$4 sm:$0xff]   ;;  %v11879_v55 = vld [vmem:[#allocation8 + $0x60] ss:$16 sps:$4 sm:$0xff]  }
 0x5b6   :  { %13019 = vpow2.f32 %v10311_v18  ;;  %v11882_v43 = vld [vmem:[#allocation8 + $0x68] ss:$16 sps:$4 sm:$0xff]   ;;  %v11887_v45 = vld [vmem:[#allocation8 + $0x84] ss:$16 sps:$4 sm:$0xff]   ;;  %v11890_v53 = vld [vmem:[#allocation8 + $0x8c] ss:$16 sps:$4 sm:$0xff]  }
 0x5b7   :  { %13021 = vtanh.f32 %v3373_v31  ;;  %v11878_v31 = vld [vmem:[#allocation8 + $0x4c] ss:$16 sps:$4 sm:$0xff]   ;;  %v11885_v18 = vld [vmem:[#allocation8 + $0x80] ss:$16 sps:$4 sm:$0xff]  }
 0x5b8   :  { %13023 = vpow2.f32 %v10346_v51  ;;  %v11888_v51 = vld [vmem:[#allocation8 + $0x88] ss:$16 sps:$4 sm:$0xff]  }
 0x5be   :  { %v13016_v58 = vpop.eup %13015 }
 0x5bf   :  { %v3383_v47 = vadd.f32 1.0, %v13016_v58  ;;  %v13018_v20 = vpop.eup %13017  ;;  %v11893_v58 = vld [vmem:[#allocation8 + $0xa4] ss:$16 sps:$4 sm:$0xff]  }
 0x5c0   :  { %v3384_v60 = vadd.f32 1.0, %v13018_v20  ;;  %v13020_v59 = vpop.eup %13019  ;;  %v11891_v20 = vld [vmem:[#allocation8 + $0xa0] ss:$16 sps:$4 sm:$0xff]  }
 0x5c1   :  { %13025 = vrcp.f32 %v3383_v47  ;;  %v13022_v32 = vpop.eup %13021  ;;  %v3074_v63 = vadd.f32 1.0, %v13020_v59  ;;  %v11896_v47 = vld [vmem:[#allocation8 + $0xac] ss:$16 sps:$4 sm:$0xff]   ;;  %v11899_v59 = vld [vmem:[#allocation8 + $0xc4] ss:$16 sps:$4 sm:$0xff]  }
 0x5c2   :  { %13027 = vrcp.f32 %v3384_v60  ;;  %v13024_v57 = vpop.eup %13023  ;;  %v11894_v60 = vld [vmem:[#allocation8 + $0xa8] ss:$16 sps:$4 sm:$0xff]  }
 0x5c3   :  { %v3385_v39 = vadd.f32 1.0, %v13024_v57  ;;  %13029 = vtanh.f32 %v13736_v27  ;;  %v11897_v57 = vld [vmem:[#allocation8 + $0xc0] ss:$16 sps:$4 sm:$0xff]  }
 0x5c4   :  { %13031 = vrcp.f32 %v3074_v63  ;;  %v11905_v63 = vld [vmem:[#allocation8 + $0xe4] ss:$16 sps:$4 sm:$0xff]  }
 0x5c5   :  { %13033 = vrcp.f32 %v3385_v39  ;;  %v11906_v39 = vld [vmem:[#allocation8 + $0xe8] ss:$16 sps:$4 sm:$0xff]  }
 0x5cb   :  { %v13026_v52 = vpop.eup %13025 }
 0x5cc   :  { %v3394_v49 = vmul.f32 %v13026_v52, %v13022_v32  ;;  %v13028_v3 = vpop.eup %13027  ;;  %v11902_v32 = vld [vmem:[#allocation8 + $0xcc] ss:$16 sps:$4 sm:$0xff]   ;;  %v11900_v52 = vld [vmem:[#allocation8 + $0xc8] ss:$16 sps:$4 sm:$0xff]  }
 0x5cd   :  { %v3393_v7 = vmul.f32 %v13028_v3, %v13697_v37  ;;  %v13030_v17 = vpop.eup %13029  ;;  %v11903_v3 = vld [vmem:[#allocation8 + $0xe0] ss:$16 sps:$4 sm:$0xff]  }
 0x5ce   :  { %v13032_v5 = vpop.eup %13031 }
 0x5cf   :  { %v13745_v13 = vadd.f32 %v3394_v49, %v3393_v7  ;;  %v13034_v19 = vpop.eup %13033  ;;  %v13748_v1 = vmul.f32 %v13032_v5, %v13030_v17  ;;  %v11908_v49 = vld [vmem:[#allocation8 + $0xec] ss:$16 sps:$4 sm:$0xff]   ;;  %v11911_v7 = vld [vmem:[#allocation8 + $0x104] ss:$16 sps:$4 sm:$0xff]   ;;  %v11909_v5 = vld [vmem:[#allocation8 + $0x100] ss:$16 sps:$4 sm:$0xff]  }
 0x5d0   :  { %v11914_v17 = vld [vmem:[#allocation8 + $0x10c] ss:$16 sps:$4 sm:$0xff]  }
 0x5d1   :  { %13035 = vtanh.f32 %v13745_v13  ;;  %v3912_v37 = vpack.c.bf16 %v13748_v1, %v13748_v1 }
 0x5db   :  { %v13036_v22 = vpop.eup %13035 }
 0x5dc   :  { %v3397_v23 = vmul.f32 %v13036_v22, %v13034_v19  ;;  %v11912_v19 = vld [vmem:[#allocation8 + $0x108] ss:$16 sps:$4 sm:$0xff]   ;;  %v11917_v22 = vld [vmem:[#allocation8 + $0x124] ss:$16 sps:$4 sm:$0xff]  }
 0x5de   :  { %v13750_v14 = vpack.c.bf16 %v3397_v23, %v3397_v23  ;;  %v11920_v23 = vld [vmem:[#allocation8 + $0x12c] ss:$16 sps:$4 sm:$0xff]  }
 0x5e0   :  { %3838 = vmatmul.mubr.bf16.vlgmr.msra.gmra.mrb[28].mxu0 %v13750_v14  ;;  %3879 = vmatmul.mubr.bf16.vlgmr.msra.gmra.mrb[60].mxu1 %v13750_v14 }
 0x5e1   :  { %4351 = vmatprep.mubr.bf16.mxu0 %v3912_v37  ;;  %4392 = vmatprep.mubr.bf16.mxu1 %v3912_v37  ;;  %v11923_v37 = vld [vmem:[#allocation8 + $0x144] ss:$16 sps:$4 sm:$0xff]  }
 0x5e2   :  { %4320 = vmatpush1.bf16.msra.mxu0 %v11861_v26  ;;  %4361 = vmatpush1.bf16.msra.mxu1 %v11864_v54  ;;  %v11915_v26 = vld [vmem:[#allocation8 + $0x120] ss:$16 sps:$4 sm:$0xff]   ;;  %v11918_v54 = vld [vmem:[#allocation8 + $0x128] ss:$16 sps:$4 sm:$0xff]  }
 0x5e3   :  { %4321 = vmatprep.subr.bf16.mxu0 %v11869_v16  ;;  %4362 = vmatprep.subr.bf16.mxu1 %v11872_v56  ;;  %v11926_v16 = vld [vmem:[#allocation8 + $0x14c] ss:$16 sps:$4 sm:$0xff]   ;;  %v11921_v56 = vld [vmem:[#allocation8 + $0x140] ss:$16 sps:$4 sm:$0xff]  }
 0x5e6   :  { %4322 = vmatpush1.bf16.msra.mxu0 %v11867_v28  ;;  %4363 = vmatpush1.bf16.msra.mxu1 %v11870_v62  ;;  %v11924_v28 = vld [vmem:[#allocation8 + $0x148] ss:$16 sps:$4 sm:$0xff]   ;;  %v11929_v62 = vld [vmem:[#allocation8 + $0x164] ss:$16 sps:$4 sm:$0xff]  }
 0x5e7   :  { %4323 = vmatprep.subr.bf16.mxu0 %v11875_v30  ;;  %4364 = vmatprep.subr.bf16.mxu1 %v11878_v31  ;;  %v11932_v30 = vld [vmem:[#allocation8 + $0x16c] ss:$16 sps:$4 sm:$0xff]   ;;  %v11927_v31 = vld [vmem:[#allocation8 + $0x160] ss:$16 sps:$4 sm:$0xff]  }
 0x5ea   :  { %4324 = vmatpush1.bf16.msra.mxu0 %v11873_v34  ;;  %4365 = vmatpush1.bf16.msra.mxu1 %v11876_v61  ;;  %v11930_v34 = vld [vmem:[#allocation8 + $0x168] ss:$16 sps:$4 sm:$0xff]   ;;  %v11935_v61 = vld [vmem:[#allocation8 + $0x184] ss:$16 sps:$4 sm:$0xff]  }
 0x5eb   :  { %4325 = vmatprep.subr.bf16.mxu0 %v11881_v11  ;;  %4366 = vmatprep.subr.bf16.mxu1 %v11884_v41  ;;  %v11938_v11 = vld [vmem:[#allocation8 + $0x18c] ss:$16 sps:$4 sm:$0xff]   ;;  %v11933_v41 = vld [vmem:[#allocation8 + $0x180] ss:$16 sps:$4 sm:$0xff]  }
 0x5ee   :  { %4326 = vmatpush1.bf16.msra.mxu0 %v11879_v55  ;;  %4367 = vmatpush1.bf16.msra.mxu1 %v11882_v43  ;;  %v11936_v55 = vld [vmem:[#allocation8 + $0x188] ss:$16 sps:$4 sm:$0xff]   ;;  %v11939_v43 = vld [vmem:[#allocation8 + $0x1a0] ss:$16 sps:$4 sm:$0xff]  }
 0x5ef   :  { %4327 = vmatprep.subr.bf16.mxu0 %v11887_v45  ;;  %4368 = vmatprep.subr.bf16.mxu1 %v11890_v53  ;;  %v11941_v45 = vld [vmem:[#allocation8 + $0x1a4] ss:$16 sps:$4 sm:$0xff]   ;;  %v11942_v53 = vld [vmem:[#allocation8 + $0x1a8] ss:$16 sps:$4 sm:$0xff]  }
 0x5f2   :  { %4328 = vmatpush1.bf16.msra.mxu0 %v11885_v18  ;;  %4369 = vmatpush1.bf16.msra.mxu1 %v11888_v51  ;;  %v11944_v18 = vld [vmem:[#allocation8 + $0x1ac] ss:$16 sps:$4 sm:$0xff]   ;;  %v11947_v51 = vld [vmem:[#allocation8 + $0x1c4] ss:$16 sps:$4 sm:$0xff]  }
 0x5f3   :  { %4329 = vmatprep.subr.bf16.mxu0 %v11893_v58  ;;  %4370 = vmatprep.subr.bf16.mxu1 %v11896_v47  ;;  %v11950_v58 = vld [vmem:[#allocation8 + $0x1cc] ss:$16 sps:$4 sm:$0xff]   ;;  %v11945_v47 = vld [vmem:[#allocation8 + $0x1c0] ss:$16 sps:$4 sm:$0xff]  }
 0x5f6   :  { %4330 = vmatpush1.bf16.msra.mxu0 %v11891_v20  ;;  %4371 = vmatpush1.bf16.msra.mxu1 %v11894_v60  ;;  %v11948_v20 = vld [vmem:[#allocation8 + $0x1c8] ss:$16 sps:$4 sm:$0xff]   ;;  %v11953_v60 = vld [vmem:[#allocation8 + $0x1e4] ss:$16 sps:$4 sm:$0xff]  }
 0x5f7   :  { %4331 = vmatprep.subr.bf16.mxu0 %v11899_v59  ;;  %4372 = vmatprep.subr.bf16.mxu1 %v11902_v32  ;;  %v11956_v59 = vld [vmem:[#allocation8 + $0x1ec] ss:$16 sps:$4 sm:$0xff]   ;;  %v11951_v32 = vld [vmem:[#allocation8 + $0x1e0] ss:$16 sps:$4 sm:$0xff]  }
 0x5fa   :  { %4332 = vmatpush1.bf16.msra.mxu0 %v11897_v57  ;;  %4373 = vmatpush1.bf16.msra.mxu1 %v11900_v52  ;;  %v11954_v57 = vld [vmem:[#allocation8 + $0x1e8] ss:$16 sps:$4 sm:$0xff]   ;;  %v11959_v52 = vld [vmem:[#allocation4 + $0x4] ss:$16 sps:$4 sm:$0xff]  }
 0x5fb   :  { %4333 = vmatprep.subr.bf16.mxu0 %v11905_v63  ;;  %4374 = vmatprep.subr.bf16.mxu1 %v11908_v49  ;;  %v11962_v63 = vld [vmem:[#allocation4 + $0xc] ss:$16 sps:$4 sm:$0xff]   ;;  %v3463_v49 = vld [vmem:[%s13995_s5] sm:$0xf] }
 0x5fe   :  { %4334 = vmatpush1.bf16.msra.mxu0 %v11903_v3  ;;  %4375 = vmatpush1.bf16.msra.mxu1 %v11906_v39  ;;  %v3468_v3 = vrot.slane %v3463_v49, %v13590_v8  ;;  %v3472_v39 = vrot.slane %v3463_v49, %v13592_v10 }
 0x5ff   :  { %4335 = vmatprep.subr.bf16.mxu0 %v11911_v7  ;;  %4376 = vmatprep.subr.bf16.mxu1 %v11914_v17 }
 0x602   :  { %4336 = vmatpush1.bf16.msra.mxu0 %v11909_v5  ;;  %4377 = vmatpush1.bf16.msra.mxu1 %v11912_v19 }
 0x603   :  { %4337 = vmatprep.subr.bf16.mxu0 %v11917_v22  ;;  %4378 = vmatprep.subr.bf16.mxu1 %v11920_v23 }
 0x606   :  { %4338 = vmatpush1.bf16.msra.mxu0 %v11915_v26  ;;  %4379 = vmatpush1.bf16.msra.mxu1 %v11918_v54 }
 0x607   :  { %4339 = vmatprep.subr.bf16.mxu0 %v11923_v37  ;;  %4380 = vmatprep.subr.bf16.mxu1 %v11926_v16 }
 0x60a   :  { %4340 = vmatpush1.bf16.msra.mxu0 %v11921_v56  ;;  %4381 = vmatpush1.bf16.msra.mxu1 %v11924_v28 }
 0x60b   :  { %4341 = vmatprep.subr.bf16.mxu0 %v11929_v62  ;;  %4382 = vmatprep.subr.bf16.mxu1 %v11932_v30  ;;  %v3476_v62 = vrot.slane %v3463_v49, %v13620_v48  ;;  %v3480_v30 = vrot.slane %v3463_v49, %v13622_v50 }
 0x60e   :  { %4342 = vmatpush1.bf16.msra.mxu0 %v11927_v31  ;;  %4383 = vmatpush1.bf16.msra.mxu1 %v11930_v34 }
 0x60f   :  { %4343 = vmatprep.subr.bf16.mxu0 %v11935_v61  ;;  %4384 = vmatprep.subr.bf16.mxu1 %v11938_v11 }
 0x612   :  { %4344 = vmatpush1.bf16.msra.mxu0 %v11933_v41  ;;  %4385 = vmatpush1.bf16.msra.mxu1 %v11936_v55 }
 0x613   :  { %4345 = vmatprep.subr.bf16.mxu0 %v11941_v45  ;;  %4386 = vmatprep.subr.bf16.mxu1 %v11944_v18 }
 0x616   :  { %4346 = vmatpush1.bf16.msra.mxu0 %v11939_v43  ;;  %4387 = vmatpush1.bf16.msra.mxu1 %v11942_v53 }
 0x617   :  { %4347 = vmatprep.subr.bf16.mxu0 %v11947_v51  ;;  %4388 = vmatprep.subr.bf16.mxu1 %v11950_v58 }
 0x61a   :  { %4348 = vmatpush1.bf16.msra.mxu0 %v11945_v47  ;;  %4389 = vmatpush1.bf16.msra.mxu1 %v11948_v20 }
 0x61b   :  { %4349 = vmatprep.subr.bf16.mxu0 %v11953_v60  ;;  %4390 = vmatprep.subr.bf16.mxu1 %v11956_v59 }
 0x61e   :  { %4350 = vmatpush1.bf16.msra.mxu0 %v11951_v32  ;;  %4391 = vmatpush1.bf16.msra.mxu1 %v11954_v57 }
 0x61f   :  { %4626 = vmatprep.subr.bf16.mxu0 %v11959_v52  ;;  %4667 = vmatprep.subr.bf16.mxu1 %v11962_v63  ;;  %v11957_v52 = vld [vmem:[#allocation4] ss:$16 sps:$4 sm:$0xff]   ;;  %v11960_v63 = vld [vmem:[#allocation4 + $0x8] ss:$16 sps:$4 sm:$0xff]  }
 0x6b3   :  { %v3839_v7 = vpop.f32.mrb[28].mxu0  ;;  %v3880_v17 = vpop.f32.mrb[60].mxu1 }
 0x6b4   :  { %v3840_v5 = vadd.f32 %v3839_v7, %v3468_v3  ;;  %v3841_v19 = vpop.f32.mrb[29].mxu0  ;;  %v3882_v22 = vpop.f32.mrb[61].mxu1  ;;  %v3881_v31 = vadd.f32 %v3880_v17, %v3476_v62  ;;  %v11965_v3 = vld [vmem:[#allocation4 + $0x24] ss:$16 sps:$4 sm:$0xff]   ;;  %v11966_v7 = vld [vmem:[#allocation4 + $0x28] ss:$16 sps:$4 sm:$0xff]  }
 0x6b5   :  { %v3842_v23 = vadd.f32 %v3841_v19, %v3472_v39  ;;  %v3843_v26 = vpop.f32.mrb[30].mxu0  ;;  %v3884_v54 = vpop.f32.mrb[62].mxu1  ;;  %v3883_v34 = vadd.f32 %v3882_v22, %v3480_v30  ;;  %v11968_v39 = vld [vmem:[#allocation4 + $0x2c] ss:$16 sps:$4 sm:$0xff]   ;;  %v11971_v17 = vld [vmem:[#allocation4 + $0x44] ss:$16 sps:$4 sm:$0xff]  }
 0x6b6   :  { %v10411_v37 = vmul.f32 -1.442695, %v3840_v5  ;;  %v3844_v16 = vpop.f32.mrb[31].mxu0  ;;  %v3885_v56 = vpop.f32.mrb[63].mxu1  ;;  %v10413_v61 = vmul.f32 -1.442695, %v3881_v31 }
 0x6b7   :  { %v10412_v28 = vmul.f32 -1.442695, %v3842_v23  ;;  %v11974_v5 = vld [vmem:[#allocation4 + $0x4c] ss:$16 sps:$4 sm:$0xff]   ;;  %v11969_v19 = vld [vmem:[#allocation4 + $0x40] ss:$16 sps:$4 sm:$0xff]  }
 0x6b8   :  { %13037 = vpow2.f32 %v10411_v37  ;;  %v11972_v22 = vld [vmem:[#allocation4 + $0x48] ss:$16 sps:$4 sm:$0xff]   ;;  %v11977_v23 = vld [vmem:[#allocation4 + $0x64] ss:$16 sps:$4 sm:$0xff]   ;;  %v11980_v26 = vld [vmem:[#allocation4 + $0x6c] ss:$16 sps:$4 sm:$0xff]  }
 0x6b9   :  { %13039 = vpow2.f32 %v10412_v28  ;;  %v11975_v54 = vld [vmem:[#allocation4 + $0x60] ss:$16 sps:$4 sm:$0xff]   ;;  %v11978_v37 = vld [vmem:[#allocation4 + $0x68] ss:$16 sps:$4 sm:$0xff]   ;;  %v11983_v16 = vld [vmem:[#allocation4 + $0x84] ss:$16 sps:$4 sm:$0xff]  }
 0x6ba   :  { %13041 = vtanh.f32 %v3883_v34  ;;  %v11986_v56 = vld [vmem:[#allocation4 + $0x8c] ss:$16 sps:$4 sm:$0xff]   ;;  %v11981_v28 = vld [vmem:[#allocation4 + $0x80] ss:$16 sps:$4 sm:$0xff]   ;;  %v11984_v62 = vld [vmem:[#allocation4 + $0x88] ss:$16 sps:$4 sm:$0xff]  }
 0x6bb   :  { %13043 = vpow2.f32 %v10413_v61  ;;  %v11989_v30 = vld [vmem:[#allocation4 + $0xa4] ss:$16 sps:$4 sm:$0xff]   ;;  %v11992_v31 = vld [vmem:[#allocation4 + $0xac] ss:$16 sps:$4 sm:$0xff]   ;;  %v11987_v34 = vld [vmem:[#allocation4 + $0xa0] ss:$16 sps:$4 sm:$0xff]  }
 0x6bc   :  { %v11990_v61 = vld [vmem:[#allocation4 + $0xa8] ss:$16 sps:$4 sm:$0xff]  }
 0x6c2   :  { %v13038_v11 = vpop.eup %13037 }
 0x6c3   :  { %v3896_v41 = vadd.f32 1.0, %v13038_v11  ;;  %v13040_v55 = vpop.eup %13039  ;;  %v11995_v11 = vld [vmem:[#allocation4 + $0xc4] ss:$16 sps:$4 sm:$0xff]  }
 0x6c4   :  { %v3897_v43 = vadd.f32 1.0, %v13040_v55  ;;  %v13042_v45 = vpop.eup %13041  ;;  %v11993_v55 = vld [vmem:[#allocation4 + $0xc0] ss:$16 sps:$4 sm:$0xff]  }
 0x6c5   :  { %13045 = vrcp.f32 %v3896_v41  ;;  %v13044_v53 = vpop.eup %13043  ;;  %v11998_v41 = vld [vmem:[#allocation4 + $0xcc] ss:$16 sps:$4 sm:$0xff]  }
 0x6c6   :  { %13047 = vrcp.f32 %v3897_v43  ;;  %v3898_v47 = vadd.f32 1.0, %v13044_v53  ;;  %v11996_v43 = vld [vmem:[#allocation4 + $0xc8] ss:$16 sps:$4 sm:$0xff]   ;;  %v12004_v53 = vld [vmem:[#allocation4 + $0xec] ss:$16 sps:$4 sm:$0xff]  }
 0x6c8   :  { %13049 = vrcp.f32 %v3898_v47  ;;  %v12010_v47 = vld [vmem:[#allocation6 + $0xc] ss:$16 sps:$4 sm:$0xff]  }
 0x6cf   :  { %v13046_v18 = vpop.eup %13045 }
 0x6d0   :  { %v3907_v51 = vmul.f32 %v13046_v18, %v13042_v45  ;;  %v13048_v58 = vpop.eup %13047  ;;  %v12001_v45 = vld [vmem:[#allocation4 + $0xe4] ss:$16 sps:$4 sm:$0xff]   ;;  %v11999_v18 = vld [vmem:[#allocation4 + $0xe0] ss:$16 sps:$4 sm:$0xff]  }
 0x6d1   :  { %v3906_v20 = vmul.f32 %v13048_v58, %v13716_v35  ;;  %v11963_v35 = vld [vmem:[#allocation4 + $0x20] ss:$16 sps:$4 sm:$0xff]   ;;  %v12007_v58 = vld [vmem:[#allocation6 + $0x4] ss:$16 sps:$4 sm:$0xff]  }
 0x6d2   :  { %v13050_v59 = vpop.eup %13049 }
 0x6d3   :  { %v13764_v60 = vadd.f32 %v3907_v51, %v3906_v20  ;;  %v12002_v51 = vld [vmem:[#allocation4 + $0xe8] ss:$16 sps:$4 sm:$0xff]   ;;  %v12005_v20 = vld [vmem:[#allocation6] ss:$16 sps:$4 sm:$0xff]  }
 0x6d5   :  { %13051 = vtanh.f32 %v13764_v60 }
 0x6df   :  { %v13052_v32 = vpop.eup %13051 }
 0x6e0   :  { %v3910_v57 = vmul.f32 %v13052_v32, %v13050_v59  ;;  %v12008_v59 = vld [vmem:[#allocation6 + $0x8] ss:$16 sps:$4 sm:$0xff]   ;;  %v12013_v32 = vld [vmem:[#allocation6 + $0x24] ss:$16 sps:$4 sm:$0xff]  }
 0x6e2   :  { %v13767_v49 = vpack.c.bf16 %v3910_v57, %v3910_v57  ;;  %v12016_v57 = vld [vmem:[#allocation6 + $0x2c] ss:$16 sps:$4 sm:$0xff]  }
 0x6e4   :  { %4352 = vmatmul.mubr.bf16.vlgmr.msra.gmra.mrb[32].mxu0 %v13767_v49  ;;  %4393 = vmatmul.mubr.bf16.vlgmr.msra.gmra.mrb[64].mxu1 %v13767_v49 }
 0x6e5   :  { %4627 = vmatpush1.bf16.msra.mxu0 %v11957_v52  ;;  %4668 = vmatpush1.bf16.msra.mxu1 %v11960_v63  ;;  %v12011_v52 = vld [vmem:[#allocation6 + $0x20] ss:$16 sps:$4 sm:$0xff]   ;;  %v12014_v63 = vld [vmem:[#allocation6 + $0x28] ss:$16 sps:$4 sm:$0xff]  }
 0x6e6   :  { %4628 = vmatprep.subr.bf16.mxu0 %v11965_v3  ;;  %4669 = vmatprep.subr.bf16.mxu1 %v11968_v39  ;;  %v12022_v3 = vld [vmem:[#allocation6 + $0x4c] ss:$16 sps:$4 sm:$0xff]   ;;  %v12017_v39 = vld [vmem:[#allocation6 + $0x40] ss:$16 sps:$4 sm:$0xff]  }
 0x6e7   :  { %4658 = vmatprep.mubr.bf16.mxu0 %v13364_v0  ;;  %4699 = vmatprep.mubr.bf16.mxu1 %v13364_v0 }
 0x6e9   :  { %4629 = vmatpush1.bf16.msra.mxu0 %v11963_v35  ;;  %4670 = vmatpush1.bf16.msra.mxu1 %v11966_v7  ;;  %v12025_v35 = vld [vmem:[#allocation6 + $0x64] ss:$16 sps:$4 sm:$0xff]   ;;  %v12028_v7 = vld [vmem:[#allocation6 + $0x6c] ss:$16 sps:$4 sm:$0xff]  }
 0x6ea   :  { %4630 = vmatprep.subr.bf16.mxu0 %v11971_v17  ;;  %4671 = vmatprep.subr.bf16.mxu1 %v11974_v5  ;;  %v12023_v17 = vld [vmem:[#allocation6 + $0x60] ss:$16 sps:$4 sm:$0xff]   ;;  %v12026_v5 = vld [vmem:[#allocation6 + $0x68] ss:$16 sps:$4 sm:$0xff]  }
 0x6ed   :  { %4631 = vmatpush1.bf16.msra.mxu0 %v11969_v19  ;;  %4672 = vmatpush1.bf16.msra.mxu1 %v11972_v22  ;;  %v12031_v19 = vld [vmem:[#allocation6 + $0x84] ss:$16 sps:$4 sm:$0xff]   ;;  %v12034_v22 = vld [vmem:[#allocation6 + $0x8c] ss:$16 sps:$4 sm:$0xff]  }
 0x6ee   :  { %4632 = vmatprep.subr.bf16.mxu0 %v11977_v23  ;;  %4673 = vmatprep.subr.bf16.mxu1 %v11980_v26  ;;  %v12029_v23 = vld [vmem:[#allocation6 + $0x80] ss:$16 sps:$4 sm:$0xff]   ;;  %v12032_v26 = vld [vmem:[#allocation6 + $0x88] ss:$16 sps:$4 sm:$0xff]  }
 0x6f1   :  { %4633 = vmatpush1.bf16.msra.mxu0 %v11975_v54  ;;  %4674 = vmatpush1.bf16.msra.mxu1 %v11978_v37  ;;  %v12037_v54 = vld [vmem:[#allocation6 + $0xa4] ss:$16 sps:$4 sm:$0xff]   ;;  %v12040_v37 = vld [vmem:[#allocation6 + $0xac] ss:$16 sps:$4 sm:$0xff]  }
 0x6f2   :  { %4634 = vmatprep.subr.bf16.mxu0 %v11983_v16  ;;  %4675 = vmatprep.subr.bf16.mxu1 %v11986_v56  ;;  %v12035_v16 = vld [vmem:[#allocation6 + $0xa0] ss:$16 sps:$4 sm:$0xff]   ;;  %v12038_v56 = vld [vmem:[#allocation6 + $0xa8] ss:$16 sps:$4 sm:$0xff]  }
 0x6f5   :  { %4635 = vmatpush1.bf16.msra.mxu0 %v11981_v28  ;;  %4676 = vmatpush1.bf16.msra.mxu1 %v11984_v62  ;;  %v12043_v28 = vld [vmem:[#allocation6 + $0xc4] ss:$16 sps:$4 sm:$0xff]   ;;  %v12046_v62 = vld [vmem:[#allocation6 + $0xcc] ss:$16 sps:$4 sm:$0xff]  }
 0x6f6   :  { %4636 = vmatprep.subr.bf16.mxu0 %v11989_v30  ;;  %4677 = vmatprep.subr.bf16.mxu1 %v11992_v31  ;;  %v12041_v30 = vld [vmem:[#allocation6 + $0xc0] ss:$16 sps:$4 sm:$0xff]   ;;  %v12044_v31 = vld [vmem:[#allocation6 + $0xc8] ss:$16 sps:$4 sm:$0xff]  }
 0x6f9   :  { %4637 = vmatpush1.bf16.msra.mxu0 %v11987_v34  ;;  %4678 = vmatpush1.bf16.msra.mxu1 %v11990_v61  ;;  %v12049_v34 = vld [vmem:[#allocation6 + $0xe4] ss:$16 sps:$4 sm:$0xff]   ;;  %v12052_v61 = vld [vmem:[#allocation6 + $0xec] ss:$16 sps:$4 sm:$0xff]  }
 0x6fa   :  { %4638 = vmatprep.subr.bf16.mxu0 %v11995_v11  ;;  %4679 = vmatprep.subr.bf16.mxu1 %v11998_v41  ;;  %v12047_v11 = vld [vmem:[#allocation6 + $0xe0] ss:$16 sps:$4 sm:$0xff]   ;;  %v12050_v41 = vld [vmem:[#allocation6 + $0xe8] ss:$16 sps:$4 sm:$0xff]  }
 0x6fd   :  { %4639 = vmatpush1.bf16.msra.mxu0 %v11993_v55  ;;  %4680 = vmatpush1.bf16.msra.mxu1 %v11996_v43  ;;  %v12055_v55 = vld [vmem:[#allocation6 + $0x104] ss:$16 sps:$4 sm:$0xff]   ;;  %v12058_v43 = vld [vmem:[#allocation6 + $0x10c] ss:$16 sps:$4 sm:$0xff]  }
 0x6fe   :  { %4640 = vmatprep.subr.bf16.mxu0 %v12001_v45  ;;  %4681 = vmatprep.subr.bf16.mxu1 %v12004_v53  ;;  %v12053_v45 = vld [vmem:[#allocation6 + $0x100] ss:$16 sps:$4 sm:$0xff]   ;;  %v12056_v53 = vld [vmem:[#allocation6 + $0x108] ss:$16 sps:$4 sm:$0xff]  }
 0x701   :  { %4641 = vmatpush1.bf16.msra.mxu0 %v11999_v18  ;;  %4682 = vmatpush1.bf16.msra.mxu1 %v12002_v51  ;;  %v12061_v18 = vld [vmem:[#allocation6 + $0x124] ss:$16 sps:$4 sm:$0xff]   ;;  %v12064_v51 = vld [vmem:[#allocation6 + $0x12c] ss:$16 sps:$4 sm:$0xff]  }
 0x702   :  { %5143 = vmatprep.subr.bf16.mxu0 %v12007_v58  ;;  %5184 = vmatprep.subr.bf16.mxu1 %v12010_v47  ;;  %v12059_v58 = vld [vmem:[#allocation6 + $0x120] ss:$16 sps:$4 sm:$0xff]   ;;  %v12062_v47 = vld [vmem:[#allocation6 + $0x128] ss:$16 sps:$4 sm:$0xff]  }
 0x704   :  { %4659 = vmatmul.mubr.bf16.vlgmr.msra.gmra.mrb[36].mxu0 %v13750_v14  ;;  %4700 = vmatmul.mubr.bf16.vlgmr.msra.gmra.mrb[68].mxu1 %v13750_v14  ;;  %v12019_v14 = vld [vmem:[#allocation6 + $0x44] ss:$16 sps:$4 sm:$0xff]  }
 0x705   :  { %5175 = vmatprep.mubr.bf16.mxu0 %v13767_v49  ;;  %5216 = vmatprep.mubr.bf16.mxu1 %v13767_v49  ;;  %v12020_v49 = vld [vmem:[#allocation6 + $0x48] ss:$16 sps:$4 sm:$0xff]  }
 0x706   :  { %5144 = vmatpush1.bf16.msra.mxu0 %v12005_v20  ;;  %5185 = vmatpush1.bf16.msra.mxu1 %v12008_v59  ;;  %v12067_v20 = vld [vmem:[#allocation6 + $0x144] ss:$16 sps:$4 sm:$0xff]   ;;  %v12070_v59 = vld [vmem:[#allocation6 + $0x14c] ss:$16 sps:$4 sm:$0xff]  }
 0x707   :  { %5145 = vmatprep.subr.bf16.mxu0 %v12013_v32  ;;  %5186 = vmatprep.subr.bf16.mxu1 %v12016_v57  ;;  %v12065_v32 = vld [vmem:[#allocation6 + $0x140] ss:$16 sps:$4 sm:$0xff]   ;;  %v12068_v57 = vld [vmem:[#allocation6 + $0x148] ss:$16 sps:$4 sm:$0xff]  }
 0x70a   :  { %5146 = vmatpush1.bf16.msra.mxu0 %v12011_v52  ;;  %5187 = vmatpush1.bf16.msra.mxu1 %v12014_v63  ;;  %v12073_v52 = vld [vmem:[#allocation6 + $0x164] ss:$16 sps:$4 sm:$0xff]   ;;  %v12076_v63 = vld [vmem:[#allocation6 + $0x16c] ss:$16 sps:$4 sm:$0xff]  }
 0x70b   :  { %5147 = vmatprep.subr.bf16.mxu0 %v12019_v14  ;;  %5188 = vmatprep.subr.bf16.mxu1 %v12022_v3  ;;  %v12071_v14 = vld [vmem:[#allocation6 + $0x160] ss:$16 sps:$4 sm:$0xff]   ;;  %v12074_v3 = vld [vmem:[#allocation6 + $0x168] ss:$16 sps:$4 sm:$0xff]  }
 0x70e   :  { %5148 = vmatpush1.bf16.msra.mxu0 %v12017_v39  ;;  %5189 = vmatpush1.bf16.msra.mxu1 %v12020_v49  ;;  %v12079_v39 = vld [vmem:[#allocation6 + $0x184] ss:$16 sps:$4 sm:$0xff]   ;;  %v12082_v49 = vld [vmem:[#allocation6 + $0x18c] ss:$16 sps:$4 sm:$0xff]  }
 0x70f   :  { %5149 = vmatprep.subr.bf16.mxu0 %v12025_v35  ;;  %5190 = vmatprep.subr.bf16.mxu1 %v12028_v7  ;;  %v12077_v35 = vld [vmem:[#allocation6 + $0x180] ss:$16 sps:$4 sm:$0xff]   ;;  %v12080_v7 = vld [vmem:[#allocation6 + $0x188] ss:$16 sps:$4 sm:$0xff]  }
 0x712   :  { %5150 = vmatpush1.bf16.msra.mxu0 %v12023_v17  ;;  %5191 = vmatpush1.bf16.msra.mxu1 %v12026_v5  ;;  %v12083_v17 = vld [vmem:[#allocation6 + $0x1a0] ss:$16 sps:$4 sm:$0xff]   ;;  %v12085_v5 = vld [vmem:[#allocation6 + $0x1a4] ss:$16 sps:$4 sm:$0xff]  }
 0x713   :  { %5151 = vmatprep.subr.bf16.mxu0 %v12031_v19  ;;  %5192 = vmatprep.subr.bf16.mxu1 %v12034_v22  ;;  %v12086_v19 = vld [vmem:[#allocation6 + $0x1a8] ss:$16 sps:$4 sm:$0xff]   ;;  %v12088_v22 = vld [vmem:[#allocation6 + $0x1ac] ss:$16 sps:$4 sm:$0xff]  }
 0x716   :  { %5152 = vmatpush1.bf16.msra.mxu0 %v12029_v23  ;;  %5193 = vmatpush1.bf16.msra.mxu1 %v12032_v26  ;;  %v12091_v23 = vld [vmem:[#allocation6 + $0x1c4] ss:$16 sps:$4 sm:$0xff]   ;;  %v12094_v26 = vld [vmem:[#allocation6 + $0x1cc] ss:$16 sps:$4 sm:$0xff]  }
 0x717   :  { %5153 = vmatprep.subr.bf16.mxu0 %v12037_v54  ;;  %5194 = vmatprep.subr.bf16.mxu1 %v12040_v37  ;;  %v12089_v54 = vld [vmem:[#allocation6 + $0x1c0] ss:$16 sps:$4 sm:$0xff]   ;;  %v12092_v37 = vld [vmem:[#allocation6 + $0x1c8] ss:$16 sps:$4 sm:$0xff]  }
 0x71a   :  { %5154 = vmatpush1.bf16.msra.mxu0 %v12035_v16  ;;  %5195 = vmatpush1.bf16.msra.mxu1 %v12038_v56  ;;  %v12097_v16 = vld [vmem:[#allocation6 + $0x1e4] ss:$16 sps:$4 sm:$0xff]   ;;  %v12100_v56 = vld [vmem:[#allocation6 + $0x1ec] ss:$16 sps:$4 sm:$0xff]  }
 0x71b   :  { %5155 = vmatprep.subr.bf16.mxu0 %v12043_v28  ;;  %5196 = vmatprep.subr.bf16.mxu1 %v12046_v62  ;;  %v12095_v28 = vld [vmem:[#allocation6 + $0x1e0] ss:$16 sps:$4 sm:$0xff]   ;;  %v12098_v62 = vld [vmem:[#allocation6 + $0x1e8] ss:$16 sps:$4 sm:$0xff]  }
 0x71e   :  { %5156 = vmatpush1.bf16.msra.mxu0 %v12041_v30  ;;  %5197 = vmatpush1.bf16.msra.mxu1 %v12044_v31  ;;  %v12103_v30 = vld [vmem:[#allocation8 + $0x4] ss:$16 sps:$4 sm:$0xff]   ;;  %v12106_v31 = vld [vmem:[#allocation8 + $0xc] ss:$16 sps:$4 sm:$0xff]  }
 0x71f   :  { %5157 = vmatprep.subr.bf16.mxu0 %v12049_v34  ;;  %5198 = vmatprep.subr.bf16.mxu1 %v12052_v61  ;;  %v3977_v34 = vld [vmem:[%s13997_s7] sm:$0xf] }
 0x720   :  { %v3982_v61 = vrot.slane %v3977_v34, %v13590_v8 }
 0x722   :  { %5158 = vmatpush1.bf16.msra.mxu0 %v12047_v11  ;;  %5199 = vmatpush1.bf16.msra.mxu1 %v12050_v41  ;;  %v3986_v11 = vrot.slane %v3977_v34, %v13592_v10 }
 0x723   :  { %5159 = vmatprep.subr.bf16.mxu0 %v12055_v55  ;;  %5200 = vmatprep.subr.bf16.mxu1 %v12058_v43 }
 0x726   :  { %5160 = vmatpush1.bf16.msra.mxu0 %v12053_v45  ;;  %5201 = vmatpush1.bf16.msra.mxu1 %v12056_v53 }
 0x727   :  { %5161 = vmatprep.subr.bf16.mxu0 %v12061_v18  ;;  %5202 = vmatprep.subr.bf16.mxu1 %v12064_v51 }
 0x72a   :  { %5162 = vmatpush1.bf16.msra.mxu0 %v12059_v58  ;;  %5203 = vmatpush1.bf16.msra.mxu1 %v12062_v47 }
 0x72b   :  { %5163 = vmatprep.subr.bf16.mxu0 %v12067_v20  ;;  %5204 = vmatprep.subr.bf16.mxu1 %v12070_v59 }
 0x72e   :  { %5164 = vmatpush1.bf16.msra.mxu0 %v12065_v32  ;;  %5205 = vmatpush1.bf16.msra.mxu1 %v12068_v57  ;;  %v3994_v57 = vrot.slane %v3977_v34, %v13622_v50 }
 0x72f   :  { %5165 = vmatprep.subr.bf16.mxu0 %v12073_v52  ;;  %5206 = vmatprep.subr.bf16.mxu1 %v12076_v63 }
 0x732   :  { %5166 = vmatpush1.bf16.msra.mxu0 %v12071_v14  ;;  %5207 = vmatpush1.bf16.msra.mxu1 %v12074_v3 }
 0x733   :  { %5167 = vmatprep.subr.bf16.mxu0 %v12079_v39  ;;  %5208 = vmatprep.subr.bf16.mxu1 %v12082_v49 }
 0x736   :  { %5168 = vmatpush1.bf16.msra.mxu0 %v12077_v35  ;;  %5209 = vmatpush1.bf16.msra.mxu1 %v12080_v7 }
 0x737   :  { %5169 = vmatprep.subr.bf16.mxu0 %v12085_v5  ;;  %5210 = vmatprep.subr.bf16.mxu1 %v12088_v22 }
 0x73a   :  { %5170 = vmatpush1.bf16.msra.mxu0 %v12083_v17  ;;  %5211 = vmatpush1.bf16.msra.mxu1 %v12086_v19 }
 0x73b   :  { %5171 = vmatprep.subr.bf16.mxu0 %v12091_v23  ;;  %5212 = vmatprep.subr.bf16.mxu1 %v12094_v26 }
 0x73e   :  { %5172 = vmatpush1.bf16.msra.mxu0 %v12089_v54  ;;  %5213 = vmatpush1.bf16.msra.mxu1 %v12092_v37 }
 0x73f   :  { %5173 = vmatprep.subr.bf16.mxu0 %v12097_v16  ;;  %5214 = vmatprep.subr.bf16.mxu1 %v12100_v56 }
 0x742   :  { %5174 = vmatpush1.bf16.msra.mxu0 %v12095_v28  ;;  %5215 = vmatpush1.bf16.msra.mxu1 %v12098_v62 }
 0x743   :  { %5657 = vmatprep.subr.bf16.mxu0 %v12103_v30  ;;  %5698 = vmatprep.subr.bf16.mxu1 %v12106_v31  ;;  %v3990_v31 = vrot.slane %v3977_v34, %v13620_v48 }
 0x7b7   :  { %v4353_v41 = vpop.f32.mrb[32].mxu0  ;;  %v4394_v55 = vpop.f32.mrb[64].mxu1 }
 0x7b8   :  { %v4354_v43 = vadd.f32 %v4353_v41, %v3982_v61  ;;  %v4355_v45 = vpop.f32.mrb[33].mxu0  ;;  %v4396_v53 = vpop.f32.mrb[65].mxu1 }
 0x7b9   :  { %v4356_v18 = vadd.f32 %v4355_v45, %v3986_v11  ;;  %v4357_v51 = vpop.f32.mrb[34].mxu0  ;;  %v4398_v58 = vpop.f32.mrb[66].mxu1  ;;  %v4397_v52 = vadd.f32 %v4396_v53, %v3994_v57 }
 0x7ba   :  { %v10478_v47 = vmul.f32 -1.442695, %v4354_v43  ;;  %v4358_v20 = vpop.f32.mrb[35].mxu0  ;;  %v4399_v59 = vpop.f32.mrb[67].mxu1  ;;  %v4395_v43 = vadd.f32 %v4394_v55, %v3990_v31  ;;  %v12122_v31 = vld [vmem:[#allocation8 + $0x68] ss:$16 sps:$4 sm:$0xff]  }
 0x7bb   :  { %v10479_v32 = vmul.f32 -1.442695, %v4356_v18 }
 0x7bc   :  { %13053 = vpow2.f32 %v10478_v47 }
 0x7bd   :  { %13055 = vpow2.f32 %v10479_v32 }
 0x7be   :  { %13057 = vtanh.f32 %v4397_v52 }
 0x7c6   :  { %v13054_v63 = vpop.eup %13053 }
 0x7c7   :  { %v4410_v14 = vadd.f32 1.0, %v13054_v63  ;;  %v13056_v3 = vpop.eup %13055 }
 0x7c8   :  { %v4411_v39 = vadd.f32 1.0, %v13056_v3  ;;  %v13058_v49 = vpop.eup %13057 }
 0x7c9   :  { %13059 = vrcp.f32 %v4410_v14 }
 0x7ca   :  { %13061 = vrcp.f32 %v4411_v39 }
 0x7d3   :  { %v13060_v35 = vpop.eup %13059 }
 0x7d4   :  { %v4421_v7 = vmul.f32 %v13060_v35, %v13058_v49  ;;  %v13062_v17 = vpop.eup %13061 }
 0x7d5   :  { %v4420_v5 = vmul.f32 %v13062_v17, %v13736_v27  ;;  %v12104_v17 = vld [vmem:[#allocation8 + $0x8] ss:$16 sps:$4 sm:$0xff]  }
 0x7d7   :  { %v4660_v19 = vpop.f32.mrb[36].mxu0  ;;  %v4701_v22 = vpop.f32.mrb[68].mxu1  ;;  %v13784_v23 = vadd.f32 %v4421_v7, %v4420_v5  ;;  %v12101_v7 = vld [vmem:[#allocation8] ss:$16 sps:$4 sm:$0xff]   ;;  %v12109_v5 = vld [vmem:[#allocation8 + $0x24] ss:$16 sps:$4 sm:$0xff]  }
 0x7d8   :  { %v4708_v26 = vadd.f32 %v4660_v19, %v13604_v25  ;;  %v4710_v54 = vadd.f32 %v4701_v22, %v13634_v2  ;;  %v4662_v37 = vpop.f32.mrb[37].mxu0  ;;  %v4703_v16 = vpop.f32.mrb[69].mxu1  ;;  %v10480_v25 = vmul.f32 -1.442695, %v4395_v43  ;;  %v12112_v19 = vld [vmem:[#allocation8 + $0x2c] ss:$16 sps:$4 sm:$0xff]  }
 0x7d9   :  { %v4709_v56 = vadd.f32 %v4662_v37, %v13606_v29  ;;  %v4711_v28 = vadd.f32 %v4703_v16, %v13636_v4  ;;  %v4664_v62 = vpop.f32.mrb[38].mxu0  ;;  %v4705_v30 = vpop.f32.mrb[70].mxu1  ;;  %v12107_v22 = vld [vmem:[#allocation8 + $0x20] ss:$16 sps:$4 sm:$0xff]   ;;  %v12118_v37 = vld [vmem:[#allocation8 + $0x4c] ss:$16 sps:$4 sm:$0xff]  }
 0x7da   :  { %v10513_v61 = vmul.f32 -1.442695, %v4708_v26  ;;  %v4665_v27 = vpop.f32.mrb[39].mxu0  ;;  %v4706_v11 = vpop.f32.mrb[71].mxu1  ;;  %v10515_v45 = vmul.f32 -1.442695, %v4710_v54 }
 0x7db   :  { %v10514_v41 = vmul.f32 -1.442695, %v4709_v56  ;;  %v12110_v26 = vld [vmem:[#allocation8 + $0x28] ss:$16 sps:$4 sm:$0xff]   ;;  %v12115_v54 = vld [vmem:[#allocation8 + $0x44] ss:$16 sps:$4 sm:$0xff]  }
 0x7dc   :  { %13063 = vpow2.f32 %v10513_v61  ;;  %v12113_v16 = vld [vmem:[#allocation8 + $0x40] ss:$16 sps:$4 sm:$0xff]   ;;  %v12116_v56 = vld [vmem:[#allocation8 + $0x48] ss:$16 sps:$4 sm:$0xff]   ;;  %v12124_v62 = vld [vmem:[#allocation8 + $0x6c] ss:$16 sps:$4 sm:$0xff]  }
 0x7dd   :  { %13065 = vpow2.f32 %v10514_v41  ;;  %v12119_v30 = vld [vmem:[#allocation8 + $0x60] ss:$16 sps:$4 sm:$0xff]   ;;  %v12127_v61 = vld [vmem:[#allocation8 + $0x84] ss:$16 sps:$4 sm:$0xff]   ;;  %v12130_v27 = vld [vmem:[#allocation8 + $0x8c] ss:$16 sps:$4 sm:$0xff]  }
 0x7de   :  { %13067 = vpow2.f32 %v10480_v25  ;;  %v12125_v11 = vld [vmem:[#allocation8 + $0x80] ss:$16 sps:$4 sm:$0xff]   ;;  %v12128_v41 = vld [vmem:[#allocation8 + $0x88] ss:$16 sps:$4 sm:$0xff]   ;;  %v12133_v43 = vld [vmem:[#allocation8 + $0xa4] ss:$16 sps:$4 sm:$0xff]  }
 0x7df   :  { %13069 = vtanh.f32 %v4711_v28  ;;  %v12121_v28 = vld [vmem:[#allocation8 + $0x64] ss:$16 sps:$4 sm:$0xff]   ;;  %v12136_v25 = vld [vmem:[#allocation8 + $0xac] ss:$16 sps:$4 sm:$0xff]  }
 0x7e0   :  { %13071 = vpow2.f32 %v10515_v45  ;;  %v12131_v45 = vld [vmem:[#allocation8 + $0xa0] ss:$16 sps:$4 sm:$0xff]  }
 0x7e6   :  { %v13064_v2 = vpop.eup %13063 }
 0x7e7   :  { %v4721_v53 = vadd.f32 1.0, %v13064_v2  ;;  %v13066_v29 = vpop.eup %13065  ;;  %v12134_v2 = vld [vmem:[#allocation8 + $0xa8] ss:$16 sps:$4 sm:$0xff]  }
 0x7e8   :  { %v4722_v4 = vadd.f32 1.0, %v13066_v29  ;;  %v13068_v18 = vpop.eup %13067  ;;  %v12142_v29 = vld [vmem:[#allocation8 + $0xcc] ss:$16 sps:$4 sm:$0xff]  }
 0x7e9   :  { %13073 = vrcp.f32 %v4721_v53  ;;  %v13070_v34 = vpop.eup %13069  ;;  %v4412_v47 = vadd.f32 1.0, %v13068_v18  ;;  %v12139_v53 = vld [vmem:[#allocation8 + $0xc4] ss:$16 sps:$4 sm:$0xff]   ;;  %v12140_v18 = vld [vmem:[#allocation8 + $0xc8] ss:$16 sps:$4 sm:$0xff]  }
 0x7ea   :  { %13075 = vrcp.f32 %v4722_v4  ;;  %v13072_v51 = vpop.eup %13071  ;;  %v12137_v4 = vld [vmem:[#allocation8 + $0xc0] ss:$16 sps:$4 sm:$0xff]  }
 0x7eb   :  { %v4723_v55 = vadd.f32 1.0, %v13072_v51  ;;  %13077 = vtanh.f32 %v13784_v23  ;;  %v12148_v51 = vld [vmem:[#allocation8 + $0xec] ss:$16 sps:$4 sm:$0xff]  }
 0x7ec   :  { %13079 = vrcp.f32 %v4412_v47  ;;  %v12146_v47 = vld [vmem:[#allocation8 + $0xe8] ss:$16 sps:$4 sm:$0xff]  }
 0x7ed   :  { %13081 = vrcp.f32 %v4723_v55  ;;  %v12149_v55 = vld [vmem:[#allocation8 + $0x100] ss:$16 sps:$4 sm:$0xff]  }
 0x7f3   :  { %v13074_v58 = vpop.eup %13073 }
 0x7f4   :  { %v4732_v20 = vmul.f32 %v13074_v58, %v13070_v34  ;;  %v13076_v59 = vpop.eup %13075  ;;  %v12145_v34 = vld [vmem:[#allocation8 + $0xe4] ss:$16 sps:$4 sm:$0xff]   ;;  %v12143_v58 = vld [vmem:[#allocation8 + $0xe0] ss:$16 sps:$4 sm:$0xff]  }
 0x7f5   :  { %v4731_v32 = vmul.f32 %v13076_v59, %v13745_v13  ;;  %v13078_v52 = vpop.eup %13077  ;;  %v12154_v59 = vld [vmem:[#allocation8 + $0x10c] ss:$16 sps:$4 sm:$0xff]  }
 0x7f6   :  { %v13080_v63 = vpop.eup %13079 }
 0x7f7   :  { %v13793_v57 = vadd.f32 %v4732_v20, %v4731_v32  ;;  %v13082_v14 = vpop.eup %13081  ;;  %v13796_v39 = vmul.f32 %v13080_v63, %v13078_v52  ;;  %v12151_v20 = vld [vmem:[#allocation8 + $0x104] ss:$16 sps:$4 sm:$0xff]   ;;  %v12152_v32 = vld [vmem:[#allocation8 + $0x108] ss:$16 sps:$4 sm:$0xff]   ;;  %v12160_v63 = vld [vmem:[#allocation8 + $0x12c] ss:$16 sps:$4 sm:$0xff]  }
 0x7f8   :  { %v12157_v52 = vld [vmem:[#allocation8 + $0x124] ss:$16 sps:$4 sm:$0xff]  }
 0x7f9   :  { %13083 = vtanh.f32 %v13793_v57  ;;  %v5250_v13 = vpack.c.bf16 %v13796_v39, %v13796_v39 }
 0x803   :  { %v13084_v3 = vpop.eup %13083 }
 0x804   :  { %v4735_v49 = vmul.f32 %v13084_v3, %v13082_v14  ;;  %v12155_v14 = vld [vmem:[#allocation8 + $0x120] ss:$16 sps:$4 sm:$0xff]   ;;  %v12158_v3 = vld [vmem:[#allocation8 + $0x128] ss:$16 sps:$4 sm:$0xff]  }
 0x806   :  { %v13798_v35 = vpack.c.bf16 %v4735_v49, %v4735_v49  ;;  %v12163_v49 = vld [vmem:[#allocation8 + $0x144] ss:$16 sps:$4 sm:$0xff]  }
 0x808   :  { %5176 = vmatmul.mubr.bf16.vlgmr.msra.gmra.mrb[40].mxu0 %v13798_v35  ;;  %5217 = vmatmul.mubr.bf16.vlgmr.msra.gmra.mrb[72].mxu1 %v13798_v35 }
 0x809   :  { %5689 = vmatprep.mubr.bf16.mxu0 %v5250_v13  ;;  %5730 = vmatprep.mubr.bf16.mxu1 %v5250_v13  ;;  %v12164_v13 = vld [vmem:[#allocation8 + $0x148] ss:$16 sps:$4 sm:$0xff]  }
 0x80a   :  { %5658 = vmatpush1.bf16.msra.mxu0 %v12101_v7  ;;  %5699 = vmatpush1.bf16.msra.mxu1 %v12104_v17  ;;  %v12166_v7 = vld [vmem:[#allocation8 + $0x14c] ss:$16 sps:$4 sm:$0xff]   ;;  %v12161_v17 = vld [vmem:[#allocation8 + $0x140] ss:$16 sps:$4 sm:$0xff]  }
 0x80b   :  { %5659 = vmatprep.subr.bf16.mxu0 %v12109_v5  ;;  %5700 = vmatprep.subr.bf16.mxu1 %v12112_v19  ;;  %v12169_v5 = vld [vmem:[#allocation8 + $0x164] ss:$16 sps:$4 sm:$0xff]   ;;  %v12172_v19 = vld [vmem:[#allocation8 + $0x16c] ss:$16 sps:$4 sm:$0xff]  }
 0x80e   :  { %5660 = vmatpush1.bf16.msra.mxu0 %v12107_v22  ;;  %5701 = vmatpush1.bf16.msra.mxu1 %v12110_v26  ;;  %v12167_v22 = vld [vmem:[#allocation8 + $0x160] ss:$16 sps:$4 sm:$0xff]   ;;  %v12170_v26 = vld [vmem:[#allocation8 + $0x168] ss:$16 sps:$4 sm:$0xff]  }
 0x80f   :  { %5661 = vmatprep.subr.bf16.mxu0 %v12115_v54  ;;  %5702 = vmatprep.subr.bf16.mxu1 %v12118_v37  ;;  %v12175_v54 = vld [vmem:[#allocation8 + $0x184] ss:$16 sps:$4 sm:$0xff]   ;;  %v12178_v37 = vld [vmem:[#allocation8 + $0x18c] ss:$16 sps:$4 sm:$0xff]  }
 0x812   :  { %5662 = vmatpush1.bf16.msra.mxu0 %v12113_v16  ;;  %5703 = vmatpush1.bf16.msra.mxu1 %v12116_v56  ;;  %v12173_v16 = vld [vmem:[#allocation8 + $0x180] ss:$16 sps:$4 sm:$0xff]   ;;  %v12176_v56 = vld [vmem:[#allocation8 + $0x188] ss:$16 sps:$4 sm:$0xff]  }
 0x813   :  { %5663 = vmatprep.subr.bf16.mxu0 %v12121_v28  ;;  %5704 = vmatprep.subr.bf16.mxu1 %v12124_v62  ;;  %v12179_v28 = vld [vmem:[#allocation8 + $0x1a0] ss:$16 sps:$4 sm:$0xff]   ;;  %v12181_v62 = vld [vmem:[#allocation8 + $0x1a4] ss:$16 sps:$4 sm:$0xff]  }
 0x816   :  { %5664 = vmatpush1.bf16.msra.mxu0 %v12119_v30  ;;  %5705 = vmatpush1.bf16.msra.mxu1 %v12122_v31  ;;  %v12182_v30 = vld [vmem:[#allocation8 + $0x1a8] ss:$16 sps:$4 sm:$0xff]   ;;  %v12184_v31 = vld [vmem:[#allocation8 + $0x1ac] ss:$16 sps:$4 sm:$0xff]  }
 0x817   :  { %5665 = vmatprep.subr.bf16.mxu0 %v12127_v61  ;;  %5706 = vmatprep.subr.bf16.mxu1 %v12130_v27  ;;  %v12187_v61 = vld [vmem:[#allocation8 + $0x1c4] ss:$16 sps:$4 sm:$0xff]   ;;  %v12190_v27 = vld [vmem:[#allocation8 + $0x1cc] ss:$16 sps:$4 sm:$0xff]  }
 0x81a   :  { %5666 = vmatpush1.bf16.msra.mxu0 %v12125_v11  ;;  %5707 = vmatpush1.bf16.msra.mxu1 %v12128_v41  ;;  %v12185_v11 = vld [vmem:[#allocation8 + $0x1c0] ss:$16 sps:$4 sm:$0xff]   ;;  %v12188_v41 = vld [vmem:[#allocation8 + $0x1c8] ss:$16 sps:$4 sm:$0xff]  }
 0x81b   :  { %5667 = vmatprep.subr.bf16.mxu0 %v12133_v43  ;;  %5708 = vmatprep.subr.bf16.mxu1 %v12136_v25  ;;  %v12193_v43 = vld [vmem:[#allocation8 + $0x1e4] ss:$16 sps:$4 sm:$0xff]   ;;  %v12196_v25 = vld [vmem:[#allocation8 + $0x1ec] ss:$16 sps:$4 sm:$0xff]  }
 0x81e   :  { %5668 = vmatpush1.bf16.msra.mxu0 %v12131_v45  ;;  %5709 = vmatpush1.bf16.msra.mxu1 %v12134_v2  ;;  %v12191_v45 = vld [vmem:[#allocation8 + $0x1e0] ss:$16 sps:$4 sm:$0xff]   ;;  %v12194_v2 = vld [vmem:[#allocation8 + $0x1e8] ss:$16 sps:$4 sm:$0xff]  }
 0x81f   :  { %5669 = vmatprep.subr.bf16.mxu0 %v12139_v53  ;;  %5710 = vmatprep.subr.bf16.mxu1 %v12142_v29  ;;  %v12199_v53 = vld [vmem:[#allocation4 + $0x4] ss:$16 sps:$4 sm:$0xff]   ;;  %v12202_v29 = vld [vmem:[#allocation4 + $0xc] ss:$16 sps:$4 sm:$0xff]  }
 0x822   :  { %5670 = vmatpush1.bf16.msra.mxu0 %v12137_v4  ;;  %5711 = vmatpush1.bf16.msra.mxu1 %v12140_v18  ;;  %v4801_v4 = vld [vmem:[%s13995_s5] sm:$0xf] }
 0x823   :  { %5671 = vmatprep.subr.bf16.mxu0 %v12145_v34  ;;  %5712 = vmatprep.subr.bf16.mxu1 %v12148_v51  ;;  %v4806_v18 = vrot.slane %v4801_v4, %v13590_v8  ;;  %v4810_v34 = vrot.slane %v4801_v4, %v13592_v10 }
 0x826   :  { %5672 = vmatpush1.bf16.msra.mxu0 %v12143_v58  ;;  %5713 = vmatpush1.bf16.msra.mxu1 %v12146_v47 }
 0x827   :  { %5673 = vmatprep.subr.bf16.mxu0 %v12151_v20  ;;  %5714 = vmatprep.subr.bf16.mxu1 %v12154_v59 }
 0x82a   :  { %5674 = vmatpush1.bf16.msra.mxu0 %v12149_v55  ;;  %5715 = vmatpush1.bf16.msra.mxu1 %v12152_v32 }
 0x82b   :  { %5675 = vmatprep.subr.bf16.mxu0 %v12157_v52  ;;  %5716 = vmatprep.subr.bf16.mxu1 %v12160_v63 }
 0x82e   :  { %5676 = vmatpush1.bf16.msra.mxu0 %v12155_v14  ;;  %5717 = vmatpush1.bf16.msra.mxu1 %v12158_v3 }
 0x82f   :  { %5677 = vmatprep.subr.bf16.mxu0 %v12163_v49  ;;  %5718 = vmatprep.subr.bf16.mxu1 %v12166_v7  ;;  %v4814_v7 = vrot.slane %v4801_v4, %v13620_v48 }
 0x832   :  { %5678 = vmatpush1.bf16.msra.mxu0 %v12161_v17  ;;  %5719 = vmatpush1.bf16.msra.mxu1 %v12164_v13  ;;  %v4818_v17 = vrot.slane %v4801_v4, %v13622_v50  ;;  %v12206_v4 = vld [vmem:[#allocation4 + $0x28] ss:$16 sps:$4 sm:$0xff]  }
 0x833   :  { %5679 = vmatprep.subr.bf16.mxu0 %v12169_v5  ;;  %5720 = vmatprep.subr.bf16.mxu1 %v12172_v19 }
 0x836   :  { %5680 = vmatpush1.bf16.msra.mxu0 %v12167_v22  ;;  %5721 = vmatpush1.bf16.msra.mxu1 %v12170_v26 }
 0x837   :  { %5681 = vmatprep.subr.bf16.mxu0 %v12175_v54  ;;  %5722 = vmatprep.subr.bf16.mxu1 %v12178_v37 }
 0x83a   :  { %5682 = vmatpush1.bf16.msra.mxu0 %v12173_v16  ;;  %5723 = vmatpush1.bf16.msra.mxu1 %v12176_v56 }
 0x83b   :  { %5683 = vmatprep.subr.bf16.mxu0 %v12181_v62  ;;  %5724 = vmatprep.subr.bf16.mxu1 %v12184_v31 }
 0x83e   :  { %5684 = vmatpush1.bf16.msra.mxu0 %v12179_v28  ;;  %5725 = vmatpush1.bf16.msra.mxu1 %v12182_v30 }
 0x83f   :  { %5685 = vmatprep.subr.bf16.mxu0 %v12187_v61  ;;  %5726 = vmatprep.subr.bf16.mxu1 %v12190_v27 }
 0x842   :  { %5686 = vmatpush1.bf16.msra.mxu0 %v12185_v11  ;;  %5727 = vmatpush1.bf16.msra.mxu1 %v12188_v41 }
 0x843   :  { %5687 = vmatprep.subr.bf16.mxu0 %v12193_v43  ;;  %5728 = vmatprep.subr.bf16.mxu1 %v12196_v25  ;;  %v12197_v25 = vld [vmem:[#allocation4] ss:$16 sps:$4 sm:$0xff]  }
 0x846   :  { %5688 = vmatpush1.bf16.msra.mxu0 %v12191_v45  ;;  %5729 = vmatpush1.bf16.msra.mxu1 %v12194_v2  ;;  %v12200_v45 = vld [vmem:[#allocation4 + $0x8] ss:$16 sps:$4 sm:$0xff]  }
 0x847   :  { %5964 = vmatprep.subr.bf16.mxu0 %v12199_v53  ;;  %6005 = vmatprep.subr.bf16.mxu1 %v12202_v29  ;;  %v12205_v53 = vld [vmem:[#allocation4 + $0x24] ss:$16 sps:$4 sm:$0xff]   ;;  %v12208_v29 = vld [vmem:[#allocation4 + $0x2c] ss:$16 sps:$4 sm:$0xff]  }
 0x8db   :  { %v5177_v51 = vpop.f32.mrb[40].mxu0  ;;  %v5218_v58 = vpop.f32.mrb[72].mxu1 }
 0x8dc   :  { %v5178_v47 = vadd.f32 %v5177_v51, %v4806_v18  ;;  %v5179_v20 = vpop.f32.mrb[41].mxu0  ;;  %v5220_v59 = vpop.f32.mrb[73].mxu1  ;;  %v5219_v13 = vadd.f32 %v5218_v58, %v4814_v7  ;;  %v12211_v18 = vld [vmem:[#allocation4 + $0x44] ss:$16 sps:$4 sm:$0xff]   ;;  %v12209_v51 = vld [vmem:[#allocation4 + $0x40] ss:$16 sps:$4 sm:$0xff]  }
 0x8dd   :  { %v5180_v55 = vadd.f32 %v5179_v20, %v4810_v34  ;;  %v5181_v32 = vpop.f32.mrb[42].mxu0  ;;  %v5222_v52 = vpop.f32.mrb[74].mxu1  ;;  %v5221_v5 = vadd.f32 %v5220_v59, %v4818_v17  ;;  %v12214_v34 = vld [vmem:[#allocation4 + $0x4c] ss:$16 sps:$4 sm:$0xff]   ;;  %v12212_v58 = vld [vmem:[#allocation4 + $0x48] ss:$16 sps:$4 sm:$0xff]  }
 0x8de   :  { %v10580_v63 = vmul.f32 -1.442695, %v5178_v47  ;;  %v5182_v14 = vpop.f32.mrb[43].mxu0  ;;  %v5223_v3 = vpop.f32.mrb[75].mxu1  ;;  %v10582_v19 = vmul.f32 -1.442695, %v5219_v13 }
 0x8df   :  { %v10581_v49 = vmul.f32 -1.442695, %v5180_v55  ;;  %v12217_v47 = vld [vmem:[#allocation4 + $0x64] ss:$16 sps:$4 sm:$0xff]   ;;  %v12220_v20 = vld [vmem:[#allocation4 + $0x6c] ss:$16 sps:$4 sm:$0xff]  }
 0x8e0   :  { %13085 = vpow2.f32 %v10580_v63  ;;  %v12215_v59 = vld [vmem:[#allocation4 + $0x60] ss:$16 sps:$4 sm:$0xff]   ;;  %v12218_v55 = vld [vmem:[#allocation4 + $0x68] ss:$16 sps:$4 sm:$0xff]   ;;  %v12223_v32 = vld [vmem:[#allocation4 + $0x84] ss:$16 sps:$4 sm:$0xff]  }
 0x8e1   :  { %13087 = vpow2.f32 %v10581_v49  ;;  %v12226_v52 = vld [vmem:[#allocation4 + $0x8c] ss:$16 sps:$4 sm:$0xff]   ;;  %v12221_v63 = vld [vmem:[#allocation4 + $0x80] ss:$16 sps:$4 sm:$0xff]   ;;  %v12224_v14 = vld [vmem:[#allocation4 + $0x88] ss:$16 sps:$4 sm:$0xff]  }
 0x8e2   :  { %13089 = vtanh.f32 %v5221_v5  ;;  %v12229_v3 = vld [vmem:[#allocation4 + $0xa4] ss:$16 sps:$4 sm:$0xff]   ;;  %v12232_v49 = vld [vmem:[#allocation4 + $0xac] ss:$16 sps:$4 sm:$0xff]   ;;  %v12227_v7 = vld [vmem:[#allocation4 + $0xa0] ss:$16 sps:$4 sm:$0xff]  }
 0x8e3   :  { %13091 = vpow2.f32 %v10582_v19  ;;  %v12230_v17 = vld [vmem:[#allocation4 + $0xa8] ss:$16 sps:$4 sm:$0xff]   ;;  %v12235_v13 = vld [vmem:[#allocation4 + $0xc4] ss:$16 sps:$4 sm:$0xff]   ;;  %v12238_v5 = vld [vmem:[#allocation4 + $0xcc] ss:$16 sps:$4 sm:$0xff]  }
 0x8e4   :  { %v12233_v19 = vld [vmem:[#allocation4 + $0xc0] ss:$16 sps:$4 sm:$0xff]  }
 0x8ea   :  { %v13086_v22 = vpop.eup %13085 }
 0x8eb   :  { %v5234_v26 = vadd.f32 1.0, %v13086_v22  ;;  %v13088_v54 = vpop.eup %13087  ;;  %v12236_v22 = vld [vmem:[#allocation4 + $0xc8] ss:$16 sps:$4 sm:$0xff]  }
 0x8ec   :  { %v5235_v37 = vadd.f32 1.0, %v13088_v54  ;;  %v13090_v16 = vpop.eup %13089  ;;  %v12244_v54 = vld [vmem:[#allocation4 + $0xec] ss:$16 sps:$4 sm:$0xff]  }
 0x8ed   :  { %13093 = vrcp.f32 %v5234_v26  ;;  %v13092_v56 = vpop.eup %13091  ;;  %v12241_v26 = vld [vmem:[#allocation4 + $0xe4] ss:$16 sps:$4 sm:$0xff]  }
 0x8ee   :  { %13095 = vrcp.f32 %v5235_v37  ;;  %v5236_v31 = vadd.f32 1.0, %v13092_v56  ;;  %v12239_v37 = vld [vmem:[#allocation4 + $0xe0] ss:$16 sps:$4 sm:$0xff]   ;;  %v12247_v56 = vld [vmem:[#allocation6 + $0x4] ss:$16 sps:$4 sm:$0xff]  }
 0x8f0   :  { %13097 = vrcp.f32 %v5236_v31  ;;  %v12253_v31 = vld [vmem:[#allocation6 + $0x24] ss:$16 sps:$4 sm:$0xff]  }
 0x8f7   :  { %v13094_v28 = vpop.eup %13093 }
 0x8f8   :  { %v5245_v62 = vmul.f32 %v13094_v28, %v13090_v16  ;;  %v13096_v30 = vpop.eup %13095  ;;  %v12242_v16 = vld [vmem:[#allocation4 + $0xe8] ss:$16 sps:$4 sm:$0xff]   ;;  %v12250_v28 = vld [vmem:[#allocation6 + $0xc] ss:$16 sps:$4 sm:$0xff]  }
 0x8f9   :  { %v5244_v61 = vmul.f32 %v13096_v30, %v13764_v60  ;;  %v12203_v60 = vld [vmem:[#allocation4 + $0x20] ss:$16 sps:$4 sm:$0xff]   ;;  %v12248_v30 = vld [vmem:[#allocation6 + $0x8] ss:$16 sps:$4 sm:$0xff]  }
 0x8fa   :  { %v13098_v11 = vpop.eup %13097 }
 0x8fb   :  { %v13812_v27 = vadd.f32 %v5245_v62, %v5244_v61  ;;  %v12245_v62 = vld [vmem:[#allocation6] ss:$16 sps:$4 sm:$0xff]   ;;  %v12256_v61 = vld [vmem:[#allocation6 + $0x2c] ss:$16 sps:$4 sm:$0xff]  }
 0x8fd   :  { %13099 = vtanh.f32 %v13812_v27 }
 0x907   :  { %v13100_v41 = vpop.eup %13099 }
 0x908   :  { %v5248_v43 = vmul.f32 %v13100_v41, %v13098_v11  ;;  %v12251_v11 = vld [vmem:[#allocation6 + $0x20] ss:$16 sps:$4 sm:$0xff]   ;;  %v12254_v41 = vld [vmem:[#allocation6 + $0x28] ss:$16 sps:$4 sm:$0xff]  }
 0x90a   :  { %v13815_v2 = vpack.c.bf16 %v5248_v43, %v5248_v43  ;;  %v12262_v43 = vld [vmem:[#allocation6 + $0x4c] ss:$16 sps:$4 sm:$0xff]  }
 0x90c   :  { %5690 = vmatmul.mubr.bf16.vlgmr.msra.gmra.mrb[44].mxu0 %v13815_v2  ;;  %5731 = vmatmul.mubr.bf16.vlgmr.msra.gmra.mrb[76].mxu1 %v13815_v2 }
 0x90d   :  { %5965 = vmatpush1.bf16.msra.mxu0 %v12197_v25  ;;  %6006 = vmatpush1.bf16.msra.mxu1 %v12200_v45  ;;  %v12257_v25 = vld [vmem:[#allocation6 + $0x40] ss:$16 sps:$4 sm:$0xff]   ;;  %v12260_v45 = vld [vmem:[#allocation6 + $0x48] ss:$16 sps:$4 sm:$0xff]  }
 0x90e   :  { %5966 = vmatprep.subr.bf16.mxu0 %v12205_v53  ;;  %6007 = vmatprep.subr.bf16.mxu1 %v12208_v29  ;;  %v12268_v53 = vld [vmem:[#allocation6 + $0x6c] ss:$16 sps:$4 sm:$0xff]   ;;  %v12263_v29 = vld [vmem:[#allocation6 + $0x60] ss:$16 sps:$4 sm:$0xff]  }
 0x90f   :  { %5996 = vmatprep.mubr.bf16.mxu0 %v13364_v0  ;;  %6037 = vmatprep.mubr.bf16.mxu1 %v13364_v0 }
 0x911   :  { %5967 = vmatpush1.bf16.msra.mxu0 %v12203_v60  ;;  %6008 = vmatpush1.bf16.msra.mxu1 %v12206_v4  ;;  %v12266_v60 = vld [vmem:[#allocation6 + $0x68] ss:$16 sps:$4 sm:$0xff]   ;;  %v12271_v4 = vld [vmem:[#allocation6 + $0x84] ss:$16 sps:$4 sm:$0xff]  }
 0x912   :  { %5968 = vmatprep.subr.bf16.mxu0 %v12211_v18  ;;  %6009 = vmatprep.subr.bf16.mxu1 %v12214_v34  ;;  %v12274_v18 = vld [vmem:[#allocation6 + $0x8c] ss:$16 sps:$4 sm:$0xff]   ;;  %v12269_v34 = vld [vmem:[#allocation6 + $0x80] ss:$16 sps:$4 sm:$0xff]  }
 0x915   :  { %5969 = vmatpush1.bf16.msra.mxu0 %v12209_v51  ;;  %6010 = vmatpush1.bf16.msra.mxu1 %v12212_v58  ;;  %v12272_v51 = vld [vmem:[#allocation6 + $0x88] ss:$16 sps:$4 sm:$0xff]   ;;  %v12277_v58 = vld [vmem:[#allocation6 + $0xa4] ss:$16 sps:$4 sm:$0xff]  }
 0x916   :  { %5970 = vmatprep.subr.bf16.mxu0 %v12217_v47  ;;  %6011 = vmatprep.subr.bf16.mxu1 %v12220_v20  ;;  %v12280_v47 = vld [vmem:[#allocation6 + $0xac] ss:$16 sps:$4 sm:$0xff]   ;;  %v12275_v20 = vld [vmem:[#allocation6 + $0xa0] ss:$16 sps:$4 sm:$0xff]  }
 0x919   :  { %5971 = vmatpush1.bf16.msra.mxu0 %v12215_v59  ;;  %6012 = vmatpush1.bf16.msra.mxu1 %v12218_v55  ;;  %v12278_v59 = vld [vmem:[#allocation6 + $0xa8] ss:$16 sps:$4 sm:$0xff]   ;;  %v12283_v55 = vld [vmem:[#allocation6 + $0xc4] ss:$16 sps:$4 sm:$0xff]  }
 0x91a   :  { %5972 = vmatprep.subr.bf16.mxu0 %v12223_v32  ;;  %6013 = vmatprep.subr.bf16.mxu1 %v12226_v52  ;;  %v12286_v32 = vld [vmem:[#allocation6 + $0xcc] ss:$16 sps:$4 sm:$0xff]   ;;  %v12281_v52 = vld [vmem:[#allocation6 + $0xc0] ss:$16 sps:$4 sm:$0xff]  }
 0x91d   :  { %5973 = vmatpush1.bf16.msra.mxu0 %v12221_v63  ;;  %6014 = vmatpush1.bf16.msra.mxu1 %v12224_v14  ;;  %v12284_v63 = vld [vmem:[#allocation6 + $0xc8] ss:$16 sps:$4 sm:$0xff]   ;;  %v12289_v14 = vld [vmem:[#allocation6 + $0xe4] ss:$16 sps:$4 sm:$0xff]  }
 0x91e   :  { %5974 = vmatprep.subr.bf16.mxu0 %v12229_v3  ;;  %6015 = vmatprep.subr.bf16.mxu1 %v12232_v49  ;;  %v12292_v3 = vld [vmem:[#allocation6 + $0xec] ss:$16 sps:$4 sm:$0xff]   ;;  %v12287_v49 = vld [vmem:[#allocation6 + $0xe0] ss:$16 sps:$4 sm:$0xff]  }
 0x921   :  { %5975 = vmatpush1.bf16.msra.mxu0 %v12227_v7  ;;  %6016 = vmatpush1.bf16.msra.mxu1 %v12230_v17  ;;  %v12290_v7 = vld [vmem:[#allocation6 + $0xe8] ss:$16 sps:$4 sm:$0xff]   ;;  %v12295_v17 = vld [vmem:[#allocation6 + $0x104] ss:$16 sps:$4 sm:$0xff]  }
 0x922   :  { %5976 = vmatprep.subr.bf16.mxu0 %v12235_v13  ;;  %6017 = vmatprep.subr.bf16.mxu1 %v12238_v5  ;;  %v12298_v13 = vld [vmem:[#allocation6 + $0x10c] ss:$16 sps:$4 sm:$0xff]   ;;  %v12293_v5 = vld [vmem:[#allocation6 + $0x100] ss:$16 sps:$4 sm:$0xff]  }
 0x925   :  { %5977 = vmatpush1.bf16.msra.mxu0 %v12233_v19  ;;  %6018 = vmatpush1.bf16.msra.mxu1 %v12236_v22  ;;  %v12296_v19 = vld [vmem:[#allocation6 + $0x108] ss:$16 sps:$4 sm:$0xff]   ;;  %v12301_v22 = vld [vmem:[#allocation6 + $0x124] ss:$16 sps:$4 sm:$0xff]  }
 0x926   :  { %5978 = vmatprep.subr.bf16.mxu0 %v12241_v26  ;;  %6019 = vmatprep.subr.bf16.mxu1 %v12244_v54  ;;  %v12304_v26 = vld [vmem:[#allocation6 + $0x12c] ss:$16 sps:$4 sm:$0xff]   ;;  %v12299_v54 = vld [vmem:[#allocation6 + $0x120] ss:$16 sps:$4 sm:$0xff]  }
 0x929   :  { %5979 = vmatpush1.bf16.msra.mxu0 %v12239_v37  ;;  %6020 = vmatpush1.bf16.msra.mxu1 %v12242_v16  ;;  %v12302_v37 = vld [vmem:[#allocation6 + $0x128] ss:$16 sps:$4 sm:$0xff]   ;;  %v12307_v16 = vld [vmem:[#allocation6 + $0x144] ss:$16 sps:$4 sm:$0xff]  }
 0x92a   :  { %6481 = vmatprep.subr.bf16.mxu0 %v12247_v56  ;;  %6522 = vmatprep.subr.bf16.mxu1 %v12250_v28  ;;  %v12310_v56 = vld [vmem:[#allocation6 + $0x14c] ss:$16 sps:$4 sm:$0xff]   ;;  %v12305_v28 = vld [vmem:[#allocation6 + $0x140] ss:$16 sps:$4 sm:$0xff]  }
 0x92c   :  { %5997 = vmatmul.mubr.bf16.vlgmr.msra.gmra.mrb[48].mxu0 %v13798_v35  ;;  %6038 = vmatmul.mubr.bf16.vlgmr.msra.gmra.mrb[80].mxu1 %v13798_v35  ;;  %v12259_v35 = vld [vmem:[#allocation6 + $0x44] ss:$16 sps:$4 sm:$0xff]  }
 0x92d   :  { %6513 = vmatprep.mubr.bf16.mxu0 %v13815_v2  ;;  %6554 = vmatprep.mubr.bf16.mxu1 %v13815_v2  ;;  %v12265_v2 = vld [vmem:[#allocation6 + $0x64] ss:$16 sps:$4 sm:$0xff]  }
 0x92e   :  { %6482 = vmatpush1.bf16.msra.mxu0 %v12245_v62  ;;  %6523 = vmatpush1.bf16.msra.mxu1 %v12248_v30  ;;  %v12308_v62 = vld [vmem:[#allocation6 + $0x148] ss:$16 sps:$4 sm:$0xff]   ;;  %v12313_v30 = vld [vmem:[#allocation6 + $0x164] ss:$16 sps:$4 sm:$0xff]  }
 0x92f   :  { %6483 = vmatprep.subr.bf16.mxu0 %v12253_v31  ;;  %6524 = vmatprep.subr.bf16.mxu1 %v12256_v61  ;;  %v12316_v31 = vld [vmem:[#allocation6 + $0x16c] ss:$16 sps:$4 sm:$0xff]   ;;  %v12311_v61 = vld [vmem:[#allocation6 + $0x160] ss:$16 sps:$4 sm:$0xff]  }
 0x932   :  { %6484 = vmatpush1.bf16.msra.mxu0 %v12251_v11  ;;  %6525 = vmatpush1.bf16.msra.mxu1 %v12254_v41  ;;  %v12314_v11 = vld [vmem:[#allocation6 + $0x168] ss:$16 sps:$4 sm:$0xff]   ;;  %v12319_v41 = vld [vmem:[#allocation6 + $0x184] ss:$16 sps:$4 sm:$0xff]  }
 0x933   :  { %6485 = vmatprep.subr.bf16.mxu0 %v12259_v35  ;;  %6526 = vmatprep.subr.bf16.mxu1 %v12262_v43  ;;  %v12322_v35 = vld [vmem:[#allocation6 + $0x18c] ss:$16 sps:$4 sm:$0xff]   ;;  %v12317_v43 = vld [vmem:[#allocation6 + $0x180] ss:$16 sps:$4 sm:$0xff]  }
 0x936   :  { %6486 = vmatpush1.bf16.msra.mxu0 %v12257_v25  ;;  %6527 = vmatpush1.bf16.msra.mxu1 %v12260_v45  ;;  %v12320_v25 = vld [vmem:[#allocation6 + $0x188] ss:$16 sps:$4 sm:$0xff]   ;;  %v12323_v45 = vld [vmem:[#allocation6 + $0x1a0] ss:$16 sps:$4 sm:$0xff]  }
 0x937   :  { %6487 = vmatprep.subr.bf16.mxu0 %v12265_v2  ;;  %6528 = vmatprep.subr.bf16.mxu1 %v12268_v53  ;;  %v12325_v2 = vld [vmem:[#allocation6 + $0x1a4] ss:$16 sps:$4 sm:$0xff]   ;;  %v12326_v53 = vld [vmem:[#allocation6 + $0x1a8] ss:$16 sps:$4 sm:$0xff]  }
 0x93a   :  { %6488 = vmatpush1.bf16.msra.mxu0 %v12263_v29  ;;  %6529 = vmatpush1.bf16.msra.mxu1 %v12266_v60  ;;  %v12328_v29 = vld [vmem:[#allocation6 + $0x1ac] ss:$16 sps:$4 sm:$0xff]   ;;  %v12331_v60 = vld [vmem:[#allocation6 + $0x1c4] ss:$16 sps:$4 sm:$0xff]  }
 0x93b   :  { %6489 = vmatprep.subr.bf16.mxu0 %v12271_v4  ;;  %6530 = vmatprep.subr.bf16.mxu1 %v12274_v18  ;;  %v12334_v4 = vld [vmem:[#allocation6 + $0x1cc] ss:$16 sps:$4 sm:$0xff]   ;;  %v12329_v18 = vld [vmem:[#allocation6 + $0x1c0] ss:$16 sps:$4 sm:$0xff]  }
 0x93e   :  { %6490 = vmatpush1.bf16.msra.mxu0 %v12269_v34  ;;  %6531 = vmatpush1.bf16.msra.mxu1 %v12272_v51  ;;  %v12332_v34 = vld [vmem:[#allocation6 + $0x1c8] ss:$16 sps:$4 sm:$0xff]   ;;  %v12337_v51 = vld [vmem:[#allocation6 + $0x1e4] ss:$16 sps:$4 sm:$0xff]  }
 0x93f   :  { %6491 = vmatprep.subr.bf16.mxu0 %v12277_v58  ;;  %6532 = vmatprep.subr.bf16.mxu1 %v12280_v47  ;;  %v12340_v58 = vld [vmem:[#allocation6 + $0x1ec] ss:$16 sps:$4 sm:$0xff]   ;;  %v12335_v47 = vld [vmem:[#allocation6 + $0x1e0] ss:$16 sps:$4 sm:$0xff]  }
 0x942   :  { %6492 = vmatpush1.bf16.msra.mxu0 %v12275_v20  ;;  %6533 = vmatpush1.bf16.msra.mxu1 %v12278_v59  ;;  %v12338_v20 = vld [vmem:[#allocation6 + $0x1e8] ss:$16 sps:$4 sm:$0xff]   ;;  %v12343_v59 = vld [vmem:[#allocation8 + $0x4] ss:$16 sps:$4 sm:$0xff]  }
 0x943   :  { %6493 = vmatprep.subr.bf16.mxu0 %v12283_v55  ;;  %6534 = vmatprep.subr.bf16.mxu1 %v12286_v32  ;;  %v12346_v55 = vld [vmem:[#allocation8 + $0xc] ss:$16 sps:$4 sm:$0xff]   ;;  %v5315_v32 = vld [vmem:[%s13997_s7] sm:$0xf] }
 0x946   :  { %6494 = vmatpush1.bf16.msra.mxu0 %v12281_v52  ;;  %6535 = vmatpush1.bf16.msra.mxu1 %v12284_v63  ;;  %v5320_v52 = vrot.slane %v5315_v32, %v13590_v8  ;;  %v5324_v63 = vrot.slane %v5315_v32, %v13592_v10 }
 0x947   :  { %6495 = vmatprep.subr.bf16.mxu0 %v12289_v14  ;;  %6536 = vmatprep.subr.bf16.mxu1 %v12292_v3 }
 0x94a   :  { %6496 = vmatpush1.bf16.msra.mxu0 %v12287_v49  ;;  %6537 = vmatpush1.bf16.msra.mxu1 %v12290_v7 }
 0x94b   :  { %6497 = vmatprep.subr.bf16.mxu0 %v12295_v17  ;;  %6538 = vmatprep.subr.bf16.mxu1 %v12298_v13 }
 0x94e   :  { %6498 = vmatpush1.bf16.msra.mxu0 %v12293_v5  ;;  %6539 = vmatpush1.bf16.msra.mxu1 %v12296_v19 }
 0x94f   :  { %6499 = vmatprep.subr.bf16.mxu0 %v12301_v22  ;;  %6540 = vmatprep.subr.bf16.mxu1 %v12304_v26 }
 0x952   :  { %6500 = vmatpush1.bf16.msra.mxu0 %v12299_v54  ;;  %6541 = vmatpush1.bf16.msra.mxu1 %v12302_v37 }
 0x953   :  { %6501 = vmatprep.subr.bf16.mxu0 %v12307_v16  ;;  %6542 = vmatprep.subr.bf16.mxu1 %v12310_v56  ;;  %v5332_v16 = vrot.slane %v5315_v32, %v13622_v50 }
 0x956   :  { %6502 = vmatpush1.bf16.msra.mxu0 %v12305_v28  ;;  %6543 = vmatpush1.bf16.msra.mxu1 %v12308_v62 }
 0x957   :  { %6503 = vmatprep.subr.bf16.mxu0 %v12313_v30  ;;  %6544 = vmatprep.subr.bf16.mxu1 %v12316_v31 }
 0x95a   :  { %6504 = vmatpush1.bf16.msra.mxu0 %v12311_v61  ;;  %6545 = vmatpush1.bf16.msra.mxu1 %v12314_v11 }
 0x95b   :  { %6505 = vmatprep.subr.bf16.mxu0 %v12319_v41  ;;  %6546 = vmatprep.subr.bf16.mxu1 %v12322_v35 }
 0x95e   :  { %6506 = vmatpush1.bf16.msra.mxu0 %v12317_v43  ;;  %6547 = vmatpush1.bf16.msra.mxu1 %v12320_v25 }
 0x95f   :  { %6507 = vmatprep.subr.bf16.mxu0 %v12325_v2  ;;  %6548 = vmatprep.subr.bf16.mxu1 %v12328_v29 }
 0x962   :  { %6508 = vmatpush1.bf16.msra.mxu0 %v12323_v45  ;;  %6549 = vmatpush1.bf16.msra.mxu1 %v12326_v53 }
 0x963   :  { %6509 = vmatprep.subr.bf16.mxu0 %v12331_v60  ;;  %6550 = vmatprep.subr.bf16.mxu1 %v12334_v4 }
 0x966   :  { %6510 = vmatpush1.bf16.msra.mxu0 %v12329_v18  ;;  %6551 = vmatpush1.bf16.msra.mxu1 %v12332_v34 }
 0x967   :  { %6511 = vmatprep.subr.bf16.mxu0 %v12337_v51  ;;  %6552 = vmatprep.subr.bf16.mxu1 %v12340_v58 }
 0x96a   :  { %6512 = vmatpush1.bf16.msra.mxu0 %v12335_v47  ;;  %6553 = vmatpush1.bf16.msra.mxu1 %v12338_v20  ;;  %v5328_v47 = vrot.slane %v5315_v32, %v13620_v48 }
 0x96b   :  { %6995 = vmatprep.subr.bf16.mxu0 %v12343_v59  ;;  %7036 = vmatprep.subr.bf16.mxu1 %v12346_v55 }
 0x9df   :  { %v5691_v14 = vpop.f32.mrb[44].mxu0  ;;  %v5732_v3 = vpop.f32.mrb[76].mxu1 }
 0x9e0   :  { %v5692_v49 = vadd.f32 %v5691_v14, %v5320_v52  ;;  %v5693_v7 = vpop.f32.mrb[45].mxu0  ;;  %v5734_v17 = vpop.f32.mrb[77].mxu1  ;;  %v5733_v52 = vadd.f32 %v5732_v3, %v5328_v47  ;;  %v12365_v47 = vld [vmem:[#allocation8 + $0x80] ss:$16 sps:$4 sm:$0xff]  }
 0x9e1   :  { %v5694_v13 = vadd.f32 %v5693_v7, %v5324_v63  ;;  %v5695_v5 = vpop.f32.mrb[46].mxu0  ;;  %v5736_v19 = vpop.f32.mrb[78].mxu1  ;;  %v5735_v56 = vadd.f32 %v5734_v17, %v5332_v16 }
 0x9e2   :  { %v10647_v22 = vmul.f32 -1.442695, %v5692_v49  ;;  %v5696_v26 = vpop.f32.mrb[47].mxu0  ;;  %v5737_v54 = vpop.f32.mrb[79].mxu1 }
 0x9e3   :  { %v10648_v37 = vmul.f32 -1.442695, %v5694_v13 }
 0x9e4   :  { %13101 = vpow2.f32 %v10647_v22 }
 0x9e5   :  { %13103 = vpow2.f32 %v10648_v37 }
 0x9e6   :  { %13105 = vtanh.f32 %v5735_v56 }
 0x9ee   :  { %v13102_v28 = vpop.eup %13101 }
 0x9ef   :  { %v5748_v62 = vadd.f32 1.0, %v13102_v28  ;;  %v13104_v30 = vpop.eup %13103 }
 0x9f0   :  { %v5749_v31 = vadd.f32 1.0, %v13104_v30  ;;  %v13106_v61 = vpop.eup %13105 }
 0x9f1   :  { %13107 = vrcp.f32 %v5748_v62 }
 0x9f2   :  { %13109 = vrcp.f32 %v5749_v31  ;;  %v12341_v31 = vld [vmem:[#allocation8] ss:$16 sps:$4 sm:$0xff]  }
 0x9fb   :  { %v13108_v11 = vpop.eup %13107 }
 0x9fc   :  { %v5759_v41 = vmul.f32 %v13108_v11, %v13106_v61  ;;  %v13110_v35 = vpop.eup %13109  ;;  %v12344_v61 = vld [vmem:[#allocation8 + $0x8] ss:$16 sps:$4 sm:$0xff]   ;;  %v12349_v11 = vld [vmem:[#allocation8 + $0x24] ss:$16 sps:$4 sm:$0xff]  }
 0x9fd   :  { %v5758_v43 = vmul.f32 %v13110_v35, %v13784_v23  ;;  %v12347_v35 = vld [vmem:[#allocation8 + $0x20] ss:$16 sps:$4 sm:$0xff]  }
 0x9ff   :  { %v5998_v25 = vpop.f32.mrb[48].mxu0  ;;  %v6039_v45 = vpop.f32.mrb[80].mxu1  ;;  %v13832_v2 = vadd.f32 %v5759_v41, %v5758_v43  ;;  %v12352_v41 = vld [vmem:[#allocation8 + $0x2c] ss:$16 sps:$4 sm:$0xff]   ;;  %v12350_v43 = vld [vmem:[#allocation8 + $0x28] ss:$16 sps:$4 sm:$0xff]  }
 0xa00   :  { %v6046_v53 = vadd.f32 %v5998_v25, %v13608_v33  ;;  %v6048_v29 = vadd.f32 %v6039_v45, %v13638_v6  ;;  %v6000_v60 = vpop.f32.mrb[49].mxu0  ;;  %v6041_v4 = vpop.f32.mrb[81].mxu1  ;;  %v10649_v33 = vmul.f32 -1.442695, %v5733_v52  ;;  %v12355_v25 = vld [vmem:[#allocation8 + $0x44] ss:$16 sps:$4 sm:$0xff]  }
 0xa01   :  { %v6047_v18 = vadd.f32 %v6000_v60, %v13610_v36  ;;  %v6049_v34 = vadd.f32 %v6041_v4, %v13640_v9  ;;  %v6002_v51 = vpop.f32.mrb[50].mxu0  ;;  %v6043_v58 = vpop.f32.mrb[82].mxu1  ;;  %v12358_v45 = vld [vmem:[#allocation8 + $0x4c] ss:$16 sps:$4 sm:$0xff]   ;;  %v12361_v60 = vld [vmem:[#allocation8 + $0x64] ss:$16 sps:$4 sm:$0xff]  }
 0xa02   :  { %v10682_v20 = vmul.f32 -1.442695, %v6046_v53  ;;  %v6003_v23 = vpop.f32.mrb[51].mxu0  ;;  %v6044_v59 = vpop.f32.mrb[83].mxu1  ;;  %v10684_v63 = vmul.f32 -1.442695, %v6048_v29 }
 0xa03   :  { %v10683_v55 = vmul.f32 -1.442695, %v6047_v18  ;;  %v12353_v53 = vld [vmem:[#allocation8 + $0x40] ss:$16 sps:$4 sm:$0xff]   ;;  %v12356_v29 = vld [vmem:[#allocation8 + $0x48] ss:$16 sps:$4 sm:$0xff]  }
 0xa04   :  { %13111 = vpow2.f32 %v10682_v20  ;;  %v12364_v4 = vld [vmem:[#allocation8 + $0x6c] ss:$16 sps:$4 sm:$0xff]   ;;  %v12359_v18 = vld [vmem:[#allocation8 + $0x60] ss:$16 sps:$4 sm:$0xff]   ;;  %v12367_v51 = vld [vmem:[#allocation8 + $0x84] ss:$16 sps:$4 sm:$0xff]  }
 0xa05   :  { %13113 = vpow2.f32 %v10683_v55  ;;  %v12370_v58 = vld [vmem:[#allocation8 + $0x8c] ss:$16 sps:$4 sm:$0xff]   ;;  %v12368_v20 = vld [vmem:[#allocation8 + $0x88] ss:$16 sps:$4 sm:$0xff]   ;;  %v12373_v23 = vld [vmem:[#allocation8 + $0xa4] ss:$16 sps:$4 sm:$0xff]  }
 0xa06   :  { %13115 = vpow2.f32 %v10649_v33  ;;  %v12376_v59 = vld [vmem:[#allocation8 + $0xac] ss:$16 sps:$4 sm:$0xff]   ;;  %v12371_v55 = vld [vmem:[#allocation8 + $0xa0] ss:$16 sps:$4 sm:$0xff]   ;;  %v12374_v52 = vld [vmem:[#allocation8 + $0xa8] ss:$16 sps:$4 sm:$0xff]  }
 0xa07   :  { %13117 = vtanh.f32 %v6049_v34  ;;  %v12362_v34 = vld [vmem:[#allocation8 + $0x68] ss:$16 sps:$4 sm:$0xff]   ;;  %v12379_v33 = vld [vmem:[#allocation8 + $0xc4] ss:$16 sps:$4 sm:$0xff]  }
 0xa08   :  { %13119 = vpow2.f32 %v10684_v63  ;;  %v12382_v63 = vld [vmem:[#allocation8 + $0xcc] ss:$16 sps:$4 sm:$0xff]  }
 0xa0e   :  { %v13112_v6 = vpop.eup %13111 }
 0xa0f   :  { %v6059_v14 = vadd.f32 1.0, %v13112_v6  ;;  %v13114_v36 = vpop.eup %13113  ;;  %v12377_v6 = vld [vmem:[#allocation8 + $0xc0] ss:$16 sps:$4 sm:$0xff]  }
 0xa10   :  { %v6060_v9 = vadd.f32 1.0, %v13114_v36  ;;  %v13116_v49 = vpop.eup %13115  ;;  %v12385_v36 = vld [vmem:[#allocation8 + $0xe4] ss:$16 sps:$4 sm:$0xff]  }
 0xa11   :  { %13121 = vrcp.f32 %v6059_v14  ;;  %v13118_v32 = vpop.eup %13117  ;;  %v5750_v13 = vadd.f32 1.0, %v13116_v49  ;;  %v12380_v14 = vld [vmem:[#allocation8 + $0xc8] ss:$16 sps:$4 sm:$0xff]   ;;  %v12383_v49 = vld [vmem:[#allocation8 + $0xe0] ss:$16 sps:$4 sm:$0xff]  }
 0xa12   :  { %13123 = vrcp.f32 %v6060_v9  ;;  %v13120_v7 = vpop.eup %13119  ;;  %v12388_v9 = vld [vmem:[#allocation8 + $0xec] ss:$16 sps:$4 sm:$0xff]  }
 0xa13   :  { %v6061_v3 = vadd.f32 1.0, %v13120_v7  ;;  %13125 = vtanh.f32 %v13832_v2  ;;  %v12391_v7 = vld [vmem:[#allocation8 + $0x104] ss:$16 sps:$4 sm:$0xff]  }
 0xa14   :  { %13127 = vrcp.f32 %v5750_v13  ;;  %v12389_v13 = vld [vmem:[#allocation8 + $0x100] ss:$16 sps:$4 sm:$0xff]  }
 0xa15   :  { %13129 = vrcp.f32 %v6061_v3  ;;  %v12400_v3 = vld [vmem:[#allocation8 + $0x12c] ss:$16 sps:$4 sm:$0xff]  }
 0xa1b   :  { %v13122_v17 = vpop.eup %13121 }
 0xa1c   :  { %v6070_v5 = vmul.f32 %v13122_v17, %v13118_v32  ;;  %v13124_v19 = vpop.eup %13123  ;;  %v12386_v32 = vld [vmem:[#allocation8 + $0xe8] ss:$16 sps:$4 sm:$0xff]   ;;  %v12394_v17 = vld [vmem:[#allocation8 + $0x10c] ss:$16 sps:$4 sm:$0xff]  }
 0xa1d   :  { %v6069_v22 = vmul.f32 %v13124_v19, %v13793_v57  ;;  %v13126_v54 = vpop.eup %13125  ;;  %v12397_v19 = vld [vmem:[#allocation8 + $0x124] ss:$16 sps:$4 sm:$0xff]  }
 0xa1e   :  { %v13128_v37 = vpop.eup %13127 }
 0xa1f   :  { %v13841_v26 = vadd.f32 %v6070_v5, %v6069_v22  ;;  %v13130_v16 = vpop.eup %13129  ;;  %v13844_v28 = vmul.f32 %v13128_v37, %v13126_v54  ;;  %v12392_v5 = vld [vmem:[#allocation8 + $0x108] ss:$16 sps:$4 sm:$0xff]   ;;  %v12395_v22 = vld [vmem:[#allocation8 + $0x120] ss:$16 sps:$4 sm:$0xff]   ;;  %v12403_v37 = vld [vmem:[#allocation8 + $0x144] ss:$16 sps:$4 sm:$0xff]  }
 0xa20   :  { %v12398_v54 = vld [vmem:[#allocation8 + $0x128] ss:$16 sps:$4 sm:$0xff]  }
 0xa21   :  { %13131 = vtanh.f32 %v13841_v26  ;;  %v6588_v57 = vpack.c.bf16 %v13844_v28, %v13844_v28 }
 0xa2b   :  { %v13132_v56 = vpop.eup %13131 }
 0xa2c   :  { %v6073_v62 = vmul.f32 %v13132_v56, %v13130_v16  ;;  %v12406_v16 = vld [vmem:[#allocation8 + $0x14c] ss:$16 sps:$4 sm:$0xff]   ;;  %v12401_v56 = vld [vmem:[#allocation8 + $0x140] ss:$16 sps:$4 sm:$0xff]  }
 0xa2e   :  { %v13846_v30 = vpack.c.bf16 %v6073_v62, %v6073_v62  ;;  %v12404_v62 = vld [vmem:[#allocation8 + $0x148] ss:$16 sps:$4 sm:$0xff]  }
 0xa30   :  { %6514 = vmatmul.mubr.bf16.vlgmr.msra.gmra.mrb[52].mxu0 %v13846_v30  ;;  %6555 = vmatmul.mubr.bf16.vlgmr.msra.gmra.mrb[84].mxu1 %v13846_v30 }
 0xa31   :  { %7027 = vmatprep.mubr.bf16.mxu0 %v6588_v57  ;;  %7068 = vmatprep.mubr.bf16.mxu1 %v6588_v57  ;;  %v12407_v57 = vld [vmem:[#allocation8 + $0x160] ss:$16 sps:$4 sm:$0xff]  }
 0xa32   :  { %6996 = vmatpush1.bf16.msra.mxu0 %v12341_v31  ;;  %7037 = vmatpush1.bf16.msra.mxu1 %v12344_v61  ;;  %v12409_v31 = vld [vmem:[#allocation8 + $0x164] ss:$16 sps:$4 sm:$0xff]   ;;  %v12412_v61 = vld [vmem:[#allocation8 + $0x16c] ss:$16 sps:$4 sm:$0xff]  }
 0xa33   :  { %6997 = vmatprep.subr.bf16.mxu0 %v12349_v11  ;;  %7038 = vmatprep.subr.bf16.mxu1 %v12352_v41  ;;  %v12410_v11 = vld [vmem:[#allocation8 + $0x168] ss:$16 sps:$4 sm:$0xff]   ;;  %v12415_v41 = vld [vmem:[#allocation8 + $0x184] ss:$16 sps:$4 sm:$0xff]  }
 0xa36   :  { %6998 = vmatpush1.bf16.msra.mxu0 %v12347_v35  ;;  %7039 = vmatpush1.bf16.msra.mxu1 %v12350_v43  ;;  %v12418_v35 = vld [vmem:[#allocation8 + $0x18c] ss:$16 sps:$4 sm:$0xff]   ;;  %v12413_v43 = vld [vmem:[#allocation8 + $0x180] ss:$16 sps:$4 sm:$0xff]  }
 0xa37   :  { %6999 = vmatprep.subr.bf16.mxu0 %v12355_v25  ;;  %7040 = vmatprep.subr.bf16.mxu1 %v12358_v45  ;;  %v12416_v25 = vld [vmem:[#allocation8 + $0x188] ss:$16 sps:$4 sm:$0xff]   ;;  %v12419_v45 = vld [vmem:[#allocation8 + $0x1a0] ss:$16 sps:$4 sm:$0xff]  }
 0xa3a   :  { %7000 = vmatpush1.bf16.msra.mxu0 %v12353_v53  ;;  %7041 = vmatpush1.bf16.msra.mxu1 %v12356_v29  ;;  %v12421_v53 = vld [vmem:[#allocation8 + $0x1a4] ss:$16 sps:$4 sm:$0xff]   ;;  %v12422_v29 = vld [vmem:[#allocation8 + $0x1a8] ss:$16 sps:$4 sm:$0xff]  }
 0xa3b   :  { %7001 = vmatprep.subr.bf16.mxu0 %v12361_v60  ;;  %7042 = vmatprep.subr.bf16.mxu1 %v12364_v4  ;;  %v12424_v60 = vld [vmem:[#allocation8 + $0x1ac] ss:$16 sps:$4 sm:$0xff]   ;;  %v12427_v4 = vld [vmem:[#allocation8 + $0x1c4] ss:$16 sps:$4 sm:$0xff]  }
 0xa3e   :  { %7002 = vmatpush1.bf16.msra.mxu0 %v12359_v18  ;;  %7043 = vmatpush1.bf16.msra.mxu1 %v12362_v34  ;;  %v12430_v18 = vld [vmem:[#allocation8 + $0x1cc] ss:$16 sps:$4 sm:$0xff]   ;;  %v12425_v34 = vld [vmem:[#allocation8 + $0x1c0] ss:$16 sps:$4 sm:$0xff]  }
 0xa3f   :  { %7003 = vmatprep.subr.bf16.mxu0 %v12367_v51  ;;  %7044 = vmatprep.subr.bf16.mxu1 %v12370_v58  ;;  %v12428_v51 = vld [vmem:[#allocation8 + $0x1c8] ss:$16 sps:$4 sm:$0xff]   ;;  %v12433_v58 = vld [vmem:[#allocation8 + $0x1e4] ss:$16 sps:$4 sm:$0xff]  }
 0xa42   :  { %7004 = vmatpush1.bf16.msra.mxu0 %v12365_v47  ;;  %7045 = vmatpush1.bf16.msra.mxu1 %v12368_v20  ;;  %v12436_v47 = vld [vmem:[#allocation8 + $0x1ec] ss:$16 sps:$4 sm:$0xff]   ;;  %v12431_v20 = vld [vmem:[#allocation8 + $0x1e0] ss:$16 sps:$4 sm:$0xff]  }
 0xa43   :  { %7005 = vmatprep.subr.bf16.mxu0 %v12373_v23  ;;  %7046 = vmatprep.subr.bf16.mxu1 %v12376_v59  ;;  %v12434_v23 = vld [vmem:[#allocation8 + $0x1e8] ss:$16 sps:$4 sm:$0xff]   ;;  %v12439_v59 = vld [vmem:[#allocation4 + $0x4] ss:$16 sps:$4 sm:$0xff]  }
 0xa46   :  { %7006 = vmatpush1.bf16.msra.mxu0 %v12371_v55  ;;  %7047 = vmatpush1.bf16.msra.mxu1 %v12374_v52  ;;  %v12442_v55 = vld [vmem:[#allocation4 + $0xc] ss:$16 sps:$4 sm:$0xff]   ;;  %v6139_v52 = vld [vmem:[%s13995_s5] sm:$0xf] }
 0xa47   :  { %7007 = vmatprep.subr.bf16.mxu0 %v12379_v33  ;;  %7048 = vmatprep.subr.bf16.mxu1 %v12382_v63  ;;  %v6144_v33 = vrot.slane %v6139_v52, %v13590_v8  ;;  %v6148_v63 = vrot.slane %v6139_v52, %v13592_v10 }
 0xa4a   :  { %7008 = vmatpush1.bf16.msra.mxu0 %v12377_v6  ;;  %7049 = vmatpush1.bf16.msra.mxu1 %v12380_v14 }
 0xa4b   :  { %7009 = vmatprep.subr.bf16.mxu0 %v12385_v36  ;;  %7050 = vmatprep.subr.bf16.mxu1 %v12388_v9 }
 0xa4e   :  { %7010 = vmatpush1.bf16.msra.mxu0 %v12383_v49  ;;  %7051 = vmatpush1.bf16.msra.mxu1 %v12386_v32 }
 0xa4f   :  { %7011 = vmatprep.subr.bf16.mxu0 %v12391_v7  ;;  %7052 = vmatprep.subr.bf16.mxu1 %v12394_v17 }
 0xa52   :  { %7012 = vmatpush1.bf16.msra.mxu0 %v12389_v13  ;;  %7053 = vmatpush1.bf16.msra.mxu1 %v12392_v5 }
 0xa53   :  { %7013 = vmatprep.subr.bf16.mxu0 %v12397_v19  ;;  %7054 = vmatprep.subr.bf16.mxu1 %v12400_v3 }
 0xa56   :  { %7014 = vmatpush1.bf16.msra.mxu0 %v12395_v22  ;;  %7055 = vmatpush1.bf16.msra.mxu1 %v12398_v54  ;;  %v6152_v22 = vrot.slane %v6139_v52, %v13620_v48  ;;  %v6156_v54 = vrot.slane %v6139_v52, %v13622_v50  ;;  %v12449_v52 = vld [vmem:[#allocation4 + $0x40] ss:$16 sps:$4 sm:$0xff]  }
 0xa57   :  { %7015 = vmatprep.subr.bf16.mxu0 %v12403_v37  ;;  %7056 = vmatprep.subr.bf16.mxu1 %v12406_v16 }
 0xa5a   :  { %7016 = vmatpush1.bf16.msra.mxu0 %v12401_v56  ;;  %7057 = vmatpush1.bf16.msra.mxu1 %v12404_v62 }
 0xa5b   :  { %7017 = vmatprep.subr.bf16.mxu0 %v12409_v31  ;;  %7058 = vmatprep.subr.bf16.mxu1 %v12412_v61 }
 0xa5e   :  { %7018 = vmatpush1.bf16.msra.mxu0 %v12407_v57  ;;  %7059 = vmatpush1.bf16.msra.mxu1 %v12410_v11 }
 0xa5f   :  { %7019 = vmatprep.subr.bf16.mxu0 %v12415_v41  ;;  %7060 = vmatprep.subr.bf16.mxu1 %v12418_v35 }
 0xa62   :  { %7020 = vmatpush1.bf16.msra.mxu0 %v12413_v43  ;;  %7061 = vmatpush1.bf16.msra.mxu1 %v12416_v25 }
 0xa63   :  { %7021 = vmatprep.subr.bf16.mxu0 %v12421_v53  ;;  %7062 = vmatprep.subr.bf16.mxu1 %v12424_v60 }
 0xa66   :  { %7022 = vmatpush1.bf16.msra.mxu0 %v12419_v45  ;;  %7063 = vmatpush1.bf16.msra.mxu1 %v12422_v29 }
 0xa67   :  { %7023 = vmatprep.subr.bf16.mxu0 %v12427_v4  ;;  %7064 = vmatprep.subr.bf16.mxu1 %v12430_v18 }
 0xa6a   :  { %7024 = vmatpush1.bf16.msra.mxu0 %v12425_v34  ;;  %7065 = vmatpush1.bf16.msra.mxu1 %v12428_v51  ;;  %v12437_v34 = vld [vmem:[#allocation4] ss:$16 sps:$4 sm:$0xff]   ;;  %v12440_v51 = vld [vmem:[#allocation4 + $0x8] ss:$16 sps:$4 sm:$0xff]  }
 0xa6b   :  { %7025 = vmatprep.subr.bf16.mxu0 %v12433_v58  ;;  %7066 = vmatprep.subr.bf16.mxu1 %v12436_v47  ;;  %v12445_v47 = vld [vmem:[#allocation4 + $0x24] ss:$16 sps:$4 sm:$0xff]  }
 0xa6e   :  { %7026 = vmatpush1.bf16.msra.mxu0 %v12431_v20  ;;  %7067 = vmatpush1.bf16.msra.mxu1 %v12434_v23  ;;  %v12448_v20 = vld [vmem:[#allocation4 + $0x2c] ss:$16 sps:$4 sm:$0xff]   ;;  %v12446_v23 = vld [vmem:[#allocation4 + $0x28] ss:$16 sps:$4 sm:$0xff]  }
 0xa6f   :  { %7302 = vmatprep.subr.bf16.mxu0 %v12439_v59  ;;  %7343 = vmatprep.subr.bf16.mxu1 %v12442_v55  ;;  %v12451_v59 = vld [vmem:[#allocation4 + $0x44] ss:$16 sps:$4 sm:$0xff]   ;;  %v12454_v55 = vld [vmem:[#allocation4 + $0x4c] ss:$16 sps:$4 sm:$0xff]  }
 0xb03   :  { %v6515_v6 = vpop.f32.mrb[52].mxu0  ;;  %v6556_v14 = vpop.f32.mrb[84].mxu1 }
 0xb04   :  { %v6516_v36 = vadd.f32 %v6515_v6, %v6144_v33  ;;  %v6517_v9 = vpop.f32.mrb[53].mxu0  ;;  %v6558_v49 = vpop.f32.mrb[85].mxu1  ;;  %v6557_v37 = vadd.f32 %v6556_v14, %v6152_v22  ;;  %v12452_v33 = vld [vmem:[#allocation4 + $0x48] ss:$16 sps:$4 sm:$0xff]   ;;  %v12460_v6 = vld [vmem:[#allocation4 + $0x6c] ss:$16 sps:$4 sm:$0xff]  }
 0xb05   :  { %v6518_v32 = vadd.f32 %v6517_v9, %v6148_v63  ;;  %v6519_v7 = vpop.f32.mrb[54].mxu0  ;;  %v6560_v17 = vpop.f32.mrb[86].mxu1  ;;  %v6559_v16 = vadd.f32 %v6558_v49, %v6156_v54  ;;  %v12457_v63 = vld [vmem:[#allocation4 + $0x64] ss:$16 sps:$4 sm:$0xff]   ;;  %v12455_v14 = vld [vmem:[#allocation4 + $0x60] ss:$16 sps:$4 sm:$0xff]  }
 0xb06   :  { %v10749_v13 = vmul.f32 -1.442695, %v6516_v36  ;;  %v6520_v5 = vpop.f32.mrb[55].mxu0  ;;  %v6561_v19 = vpop.f32.mrb[87].mxu1  ;;  %v10751_v56 = vmul.f32 -1.442695, %v6557_v37 }
 0xb07   :  { %v10750_v3 = vmul.f32 -1.442695, %v6518_v32  ;;  %v12458_v36 = vld [vmem:[#allocation4 + $0x68] ss:$16 sps:$4 sm:$0xff]   ;;  %v12463_v9 = vld [vmem:[#allocation4 + $0x84] ss:$16 sps:$4 sm:$0xff]  }
 0xb08   :  { %13133 = vpow2.f32 %v10749_v13  ;;  %v12466_v49 = vld [vmem:[#allocation4 + $0x8c] ss:$16 sps:$4 sm:$0xff]   ;;  %v12461_v32 = vld [vmem:[#allocation4 + $0x80] ss:$16 sps:$4 sm:$0xff]   ;;  %v12464_v7 = vld [vmem:[#allocation4 + $0x88] ss:$16 sps:$4 sm:$0xff]  }
 0xb09   :  { %13135 = vpow2.f32 %v10750_v3  ;;  %v12469_v17 = vld [vmem:[#allocation4 + $0xa4] ss:$16 sps:$4 sm:$0xff]   ;;  %v12472_v13 = vld [vmem:[#allocation4 + $0xac] ss:$16 sps:$4 sm:$0xff]   ;;  %v12467_v5 = vld [vmem:[#allocation4 + $0xa0] ss:$16 sps:$4 sm:$0xff]  }
 0xb0a   :  { %13137 = vtanh.f32 %v6559_v16  ;;  %v12470_v19 = vld [vmem:[#allocation4 + $0xa8] ss:$16 sps:$4 sm:$0xff]   ;;  %v12475_v3 = vld [vmem:[#allocation4 + $0xc4] ss:$16 sps:$4 sm:$0xff]   ;;  %v12478_v22 = vld [vmem:[#allocation4 + $0xcc] ss:$16 sps:$4 sm:$0xff]  }
 0xb0b   :  { %13139 = vpow2.f32 %v10751_v56  ;;  %v12473_v54 = vld [vmem:[#allocation4 + $0xc0] ss:$16 sps:$4 sm:$0xff]   ;;  %v12476_v37 = vld [vmem:[#allocation4 + $0xc8] ss:$16 sps:$4 sm:$0xff]   ;;  %v12481_v16 = vld [vmem:[#allocation4 + $0xe4] ss:$16 sps:$4 sm:$0xff]  }
 0xb0c   :  { %v12484_v56 = vld [vmem:[#allocation4 + $0xec] ss:$16 sps:$4 sm:$0xff]  }
 0xb12   :  { %v13134_v62 = vpop.eup %13133 }
 0xb13   :  { %v6572_v31 = vadd.f32 1.0, %v13134_v62  ;;  %v13136_v61 = vpop.eup %13135  ;;  %v12479_v62 = vld [vmem:[#allocation4 + $0xe0] ss:$16 sps:$4 sm:$0xff]  }
 0xb14   :  { %v6573_v57 = vadd.f32 1.0, %v13136_v61  ;;  %v13138_v11 = vpop.eup %13137  ;;  %v12487_v61 = vld [vmem:[#allocation6 + $0x4] ss:$16 sps:$4 sm:$0xff]  }
 0xb15   :  { %13141 = vrcp.f32 %v6572_v31  ;;  %v13140_v41 = vpop.eup %13139  ;;  %v12482_v31 = vld [vmem:[#allocation4 + $0xe8] ss:$16 sps:$4 sm:$0xff]  }
 0xb16   :  { %13143 = vrcp.f32 %v6573_v57  ;;  %v6574_v45 = vadd.f32 1.0, %v13140_v41  ;;  %v12490_v57 = vld [vmem:[#allocation6 + $0xc] ss:$16 sps:$4 sm:$0xff]   ;;  %v12488_v41 = vld [vmem:[#allocation6 + $0x8] ss:$16 sps:$4 sm:$0xff]  }
 0xb18   :  { %13145 = vrcp.f32 %v6574_v45  ;;  %v12494_v45 = vld [vmem:[#allocation6 + $0x28] ss:$16 sps:$4 sm:$0xff]  }
 0xb1f   :  { %v13142_v35 = vpop.eup %13141 }
 0xb20   :  { %v6583_v43 = vmul.f32 %v13142_v35, %v13138_v11  ;;  %v13144_v25 = vpop.eup %13143  ;;  %v12485_v11 = vld [vmem:[#allocation6] ss:$16 sps:$4 sm:$0xff]   ;;  %v12493_v35 = vld [vmem:[#allocation6 + $0x24] ss:$16 sps:$4 sm:$0xff]  }
 0xb21   :  { %v6582_v53 = vmul.f32 %v13144_v25, %v13812_v27  ;;  %v12443_v27 = vld [vmem:[#allocation4 + $0x20] ss:$16 sps:$4 sm:$0xff]  }
 0xb22   :  { %v13146_v60 = vpop.eup %13145  ;;  %v12491_v25 = vld [vmem:[#allocation6 + $0x20] ss:$16 sps:$4 sm:$0xff]  }
 0xb23   :  { %v13860_v29 = vadd.f32 %v6583_v43, %v6582_v53  ;;  %v12496_v43 = vld [vmem:[#allocation6 + $0x2c] ss:$16 sps:$4 sm:$0xff]  }
 0xb24   :  { %v12502_v53 = vld [vmem:[#allocation6 + $0x4c] ss:$16 sps:$4 sm:$0xff]  }
 0xb25   :  { %13147 = vtanh.f32 %v13860_v29 }
 0xb2f   :  { %v13148_v4 = vpop.eup %13147 }
 0xb30   :  { %v6586_v18 = vmul.f32 %v13148_v4, %v13146_v60  ;;  %v12497_v60 = vld [vmem:[#allocation6 + $0x40] ss:$16 sps:$4 sm:$0xff]   ;;  %v12500_v4 = vld [vmem:[#allocation6 + $0x48] ss:$16 sps:$4 sm:$0xff]  }
 0xb32   :  { %v13863_v58 = vpack.c.bf16 %v6586_v18, %v6586_v18  ;;  %v12505_v18 = vld [vmem:[#allocation6 + $0x64] ss:$16 sps:$4 sm:$0xff]  }
 0xb34   :  { %7028 = vmatmul.mubr.bf16.vlgmr.msra.gmra.mrb[56].mxu0 %v13863_v58  ;;  %7069 = vmatmul.mubr.bf16.vlgmr.msra.gmra.mrb[88].mxu1 %v13863_v58 }
 0xb35   :  { %7303 = vmatpush1.bf16.msra.mxu0 %v12437_v34  ;;  %7344 = vmatpush1.bf16.msra.mxu1 %v12440_v51  ;;  %v12508_v34 = vld [vmem:[#allocation6 + $0x6c] ss:$16 sps:$4 sm:$0xff]   ;;  %v12503_v51 = vld [vmem:[#allocation6 + $0x60] ss:$16 sps:$4 sm:$0xff]  }
 0xb36   :  { %7304 = vmatprep.subr.bf16.mxu0 %v12445_v47  ;;  %7345 = vmatprep.subr.bf16.mxu1 %v12448_v20  ;;  %v12511_v47 = vld [vmem:[#allocation6 + $0x84] ss:$16 sps:$4 sm:$0xff]   ;;  %v12514_v20 = vld [vmem:[#allocation6 + $0x8c] ss:$16 sps:$4 sm:$0xff]  }
 0xb37   :  { %7334 = vmatprep.mubr.bf16.mxu0 %v13364_v0  ;;  %7375 = vmatprep.mubr.bf16.mxu1 %v13364_v0 }
 0xb39   :  { %7305 = vmatpush1.bf16.msra.mxu0 %v12443_v27  ;;  %7346 = vmatpush1.bf16.msra.mxu1 %v12446_v23  ;;  %v12509_v27 = vld [vmem:[#allocation6 + $0x80] ss:$16 sps:$4 sm:$0xff]   ;;  %v12512_v23 = vld [vmem:[#allocation6 + $0x88] ss:$16 sps:$4 sm:$0xff]  }
 0xb3a   :  { %7306 = vmatprep.subr.bf16.mxu0 %v12451_v59  ;;  %7347 = vmatprep.subr.bf16.mxu1 %v12454_v55  ;;  %v12517_v59 = vld [vmem:[#allocation6 + $0xa4] ss:$16 sps:$4 sm:$0xff]   ;;  %v12520_v55 = vld [vmem:[#allocation6 + $0xac] ss:$16 sps:$4 sm:$0xff]  }
 0xb3d   :  { %7307 = vmatpush1.bf16.msra.mxu0 %v12449_v52  ;;  %7348 = vmatpush1.bf16.msra.mxu1 %v12452_v33  ;;  %v12515_v52 = vld [vmem:[#allocation6 + $0xa0] ss:$16 sps:$4 sm:$0xff]   ;;  %v12518_v33 = vld [vmem:[#allocation6 + $0xa8] ss:$16 sps:$4 sm:$0xff]  }
 0xb3e   :  { %7308 = vmatprep.subr.bf16.mxu0 %v12457_v63  ;;  %7349 = vmatprep.subr.bf16.mxu1 %v12460_v6  ;;  %v12523_v63 = vld [vmem:[#allocation6 + $0xc4] ss:$16 sps:$4 sm:$0xff]   ;;  %v12526_v6 = vld [vmem:[#allocation6 + $0xcc] ss:$16 sps:$4 sm:$0xff]  }
 0xb41   :  { %7309 = vmatpush1.bf16.msra.mxu0 %v12455_v14  ;;  %7350 = vmatpush1.bf16.msra.mxu1 %v12458_v36  ;;  %v12521_v14 = vld [vmem:[#allocation6 + $0xc0] ss:$16 sps:$4 sm:$0xff]   ;;  %v12524_v36 = vld [vmem:[#allocation6 + $0xc8] ss:$16 sps:$4 sm:$0xff]  }
 0xb42   :  { %7310 = vmatprep.subr.bf16.mxu0 %v12463_v9  ;;  %7351 = vmatprep.subr.bf16.mxu1 %v12466_v49  ;;  %v12529_v9 = vld [vmem:[#allocation6 + $0xe4] ss:$16 sps:$4 sm:$0xff]   ;;  %v12532_v49 = vld [vmem:[#allocation6 + $0xec] ss:$16 sps:$4 sm:$0xff]  }
 0xb45   :  { %7311 = vmatpush1.bf16.msra.mxu0 %v12461_v32  ;;  %7352 = vmatpush1.bf16.msra.mxu1 %v12464_v7  ;;  %v12527_v32 = vld [vmem:[#allocation6 + $0xe0] ss:$16 sps:$4 sm:$0xff]   ;;  %v12530_v7 = vld [vmem:[#allocation6 + $0xe8] ss:$16 sps:$4 sm:$0xff]  }
 0xb46   :  { %7312 = vmatprep.subr.bf16.mxu0 %v12469_v17  ;;  %7353 = vmatprep.subr.bf16.mxu1 %v12472_v13  ;;  %v12535_v17 = vld [vmem:[#allocation6 + $0x104] ss:$16 sps:$4 sm:$0xff]   ;;  %v12538_v13 = vld [vmem:[#allocation6 + $0x10c] ss:$16 sps:$4 sm:$0xff]  }
 0xb49   :  { %7313 = vmatpush1.bf16.msra.mxu0 %v12467_v5  ;;  %7354 = vmatpush1.bf16.msra.mxu1 %v12470_v19  ;;  %v12533_v5 = vld [vmem:[#allocation6 + $0x100] ss:$16 sps:$4 sm:$0xff]   ;;  %v12536_v19 = vld [vmem:[#allocation6 + $0x108] ss:$16 sps:$4 sm:$0xff]  }
 0xb4a   :  { %7314 = vmatprep.subr.bf16.mxu0 %v12475_v3  ;;  %7355 = vmatprep.subr.bf16.mxu1 %v12478_v22  ;;  %v12541_v3 = vld [vmem:[#allocation6 + $0x124] ss:$16 sps:$4 sm:$0xff]   ;;  %v12544_v22 = vld [vmem:[#allocation6 + $0x12c] ss:$16 sps:$4 sm:$0xff]  }
 0xb4d   :  { %7315 = vmatpush1.bf16.msra.mxu0 %v12473_v54  ;;  %7356 = vmatpush1.bf16.msra.mxu1 %v12476_v37  ;;  %v12539_v54 = vld [vmem:[#allocation6 + $0x120] ss:$16 sps:$4 sm:$0xff]   ;;  %v12542_v37 = vld [vmem:[#allocation6 + $0x128] ss:$16 sps:$4 sm:$0xff]  }
 0xb4e   :  { %7316 = vmatprep.subr.bf16.mxu0 %v12481_v16  ;;  %7357 = vmatprep.subr.bf16.mxu1 %v12484_v56  ;;  %v12547_v16 = vld [vmem:[#allocation6 + $0x144] ss:$16 sps:$4 sm:$0xff]   ;;  %v12550_v56 = vld [vmem:[#allocation6 + $0x14c] ss:$16 sps:$4 sm:$0xff]  }
 0xb51   :  { %7317 = vmatpush1.bf16.msra.mxu0 %v12479_v62  ;;  %7358 = vmatpush1.bf16.msra.mxu1 %v12482_v31  ;;  %v12545_v62 = vld [vmem:[#allocation6 + $0x140] ss:$16 sps:$4 sm:$0xff]   ;;  %v12548_v31 = vld [vmem:[#allocation6 + $0x148] ss:$16 sps:$4 sm:$0xff]  }
 0xb52   :  { %7819 = vmatprep.subr.bf16.mxu0 %v12487_v61  ;;  %7860 = vmatprep.subr.bf16.mxu1 %v12490_v57  ;;  %v12553_v61 = vld [vmem:[#allocation6 + $0x164] ss:$16 sps:$4 sm:$0xff]   ;;  %v12556_v57 = vld [vmem:[#allocation6 + $0x16c] ss:$16 sps:$4 sm:$0xff]  }
 0xb54   :  { %7335 = vmatmul.mubr.bf16.vlgmr.msra.gmra.mrb[60].mxu0 %v13846_v30  ;;  %7376 = vmatmul.mubr.bf16.vlgmr.msra.gmra.mrb[92].mxu1 %v13846_v30  ;;  %v12499_v30 = vld [vmem:[#allocation6 + $0x44] ss:$16 sps:$4 sm:$0xff]  }
 0xb55   :  { %7851 = vmatprep.mubr.bf16.mxu0 %v13863_v58  ;;  %7892 = vmatprep.mubr.bf16.mxu1 %v13863_v58  ;;  %v12506_v58 = vld [vmem:[#allocation6 + $0x68] ss:$16 sps:$4 sm:$0xff]  }
 0xb56   :  { %7820 = vmatpush1.bf16.msra.mxu0 %v12485_v11  ;;  %7861 = vmatpush1.bf16.msra.mxu1 %v12488_v41  ;;  %v12551_v11 = vld [vmem:[#allocation6 + $0x160] ss:$16 sps:$4 sm:$0xff]   ;;  %v12554_v41 = vld [vmem:[#allocation6 + $0x168] ss:$16 sps:$4 sm:$0xff]  }
 0xb57   :  { %7821 = vmatprep.subr.bf16.mxu0 %v12493_v35  ;;  %7862 = vmatprep.subr.bf16.mxu1 %v12496_v43  ;;  %v12559_v35 = vld [vmem:[#allocation6 + $0x184] ss:$16 sps:$4 sm:$0xff]   ;;  %v12562_v43 = vld [vmem:[#allocation6 + $0x18c] ss:$16 sps:$4 sm:$0xff]  }
 0xb5a   :  { %7822 = vmatpush1.bf16.msra.mxu0 %v12491_v25  ;;  %7863 = vmatpush1.bf16.msra.mxu1 %v12494_v45  ;;  %v12557_v25 = vld [vmem:[#allocation6 + $0x180] ss:$16 sps:$4 sm:$0xff]   ;;  %v12560_v45 = vld [vmem:[#allocation6 + $0x188] ss:$16 sps:$4 sm:$0xff]  }
 0xb5b   :  { %7823 = vmatprep.subr.bf16.mxu0 %v12499_v30  ;;  %7864 = vmatprep.subr.bf16.mxu1 %v12502_v53  ;;  %v12563_v30 = vld [vmem:[#allocation6 + $0x1a0] ss:$16 sps:$4 sm:$0xff]   ;;  %v12565_v53 = vld [vmem:[#allocation6 + $0x1a4] ss:$16 sps:$4 sm:$0xff]  }
 0xb5e   :  { %7824 = vmatpush1.bf16.msra.mxu0 %v12497_v60  ;;  %7865 = vmatpush1.bf16.msra.mxu1 %v12500_v4  ;;  %v12566_v60 = vld [vmem:[#allocation6 + $0x1a8] ss:$16 sps:$4 sm:$0xff]   ;;  %v12568_v4 = vld [vmem:[#allocation6 + $0x1ac] ss:$16 sps:$4 sm:$0xff]  }
 0xb5f   :  { %7825 = vmatprep.subr.bf16.mxu0 %v12505_v18  ;;  %7866 = vmatprep.subr.bf16.mxu1 %v12508_v34  ;;  %v12571_v18 = vld [vmem:[#allocation6 + $0x1c4] ss:$16 sps:$4 sm:$0xff]   ;;  %v12574_v34 = vld [vmem:[#allocation6 + $0x1cc] ss:$16 sps:$4 sm:$0xff]  }
 0xb62   :  { %7826 = vmatpush1.bf16.msra.mxu0 %v12503_v51  ;;  %7867 = vmatpush1.bf16.msra.mxu1 %v12506_v58  ;;  %v12569_v51 = vld [vmem:[#allocation6 + $0x1c0] ss:$16 sps:$4 sm:$0xff]   ;;  %v12572_v58 = vld [vmem:[#allocation6 + $0x1c8] ss:$16 sps:$4 sm:$0xff]  }
 0xb63   :  { %7827 = vmatprep.subr.bf16.mxu0 %v12511_v47  ;;  %7868 = vmatprep.subr.bf16.mxu1 %v12514_v20  ;;  %v12577_v47 = vld [vmem:[#allocation6 + $0x1e4] ss:$16 sps:$4 sm:$0xff]   ;;  %v12580_v20 = vld [vmem:[#allocation6 + $0x1ec] ss:$16 sps:$4 sm:$0xff]  }
 0xb66   :  { %7828 = vmatpush1.bf16.msra.mxu0 %v12509_v27  ;;  %7869 = vmatpush1.bf16.msra.mxu1 %v12512_v23  ;;  %v12575_v27 = vld [vmem:[#allocation6 + $0x1e0] ss:$16 sps:$4 sm:$0xff]   ;;  %v12578_v23 = vld [vmem:[#allocation6 + $0x1e8] ss:$16 sps:$4 sm:$0xff]  }
 0xb67   :  { %7829 = vmatprep.subr.bf16.mxu0 %v12517_v59  ;;  %7870 = vmatprep.subr.bf16.mxu1 %v12520_v55  ;;  %v12583_v59 = vld [vmem:[#allocation8 + $0x4] ss:$16 sps:$4 sm:$0xff]   ;;  %v12586_v55 = vld [vmem:[#allocation8 + $0xc] ss:$16 sps:$4 sm:$0xff]  }
 0xb6a   :  { %7830 = vmatpush1.bf16.msra.mxu0 %v12515_v52  ;;  %7871 = vmatpush1.bf16.msra.mxu1 %v12518_v33  ;;  %v6653_v52 = vld [vmem:[%s13997_s7] sm:$0xf] }
 0xb6b   :  { %7831 = vmatprep.subr.bf16.mxu0 %v12523_v63  ;;  %7872 = vmatprep.subr.bf16.mxu1 %v12526_v6  ;;  %v6658_v33 = vrot.slane %v6653_v52, %v13590_v8  ;;  %v6662_v63 = vrot.slane %v6653_v52, %v13592_v10 }
 0xb6e   :  { %7832 = vmatpush1.bf16.msra.mxu0 %v12521_v14  ;;  %7873 = vmatpush1.bf16.msra.mxu1 %v12524_v36 }
 0xb6f   :  { %7833 = vmatprep.subr.bf16.mxu0 %v12529_v9  ;;  %7874 = vmatprep.subr.bf16.mxu1 %v12532_v49 }
 0xb72   :  { %7834 = vmatpush1.bf16.msra.mxu0 %v12527_v32  ;;  %7875 = vmatpush1.bf16.msra.mxu1 %v12530_v7 }
 0xb73   :  { %7835 = vmatprep.subr.bf16.mxu0 %v12535_v17  ;;  %7876 = vmatprep.subr.bf16.mxu1 %v12538_v13 }
 0xb76   :  { %7836 = vmatpush1.bf16.msra.mxu0 %v12533_v5  ;;  %7877 = vmatpush1.bf16.msra.mxu1 %v12536_v19 }
 0xb77   :  { %7837 = vmatprep.subr.bf16.mxu0 %v12541_v3  ;;  %7878 = vmatprep.subr.bf16.mxu1 %v12544_v22  ;;  %v6670_v22 = vrot.slane %v6653_v52, %v13622_v50 }
 0xb7a   :  { %7838 = vmatpush1.bf16.msra.mxu0 %v12539_v54  ;;  %7879 = vmatpush1.bf16.msra.mxu1 %v12542_v37 }
 0xb7b   :  { %7839 = vmatprep.subr.bf16.mxu0 %v12547_v16  ;;  %7880 = vmatprep.subr.bf16.mxu1 %v12550_v56 }
 0xb7e   :  { %7840 = vmatpush1.bf16.msra.mxu0 %v12545_v62  ;;  %7881 = vmatpush1.bf16.msra.mxu1 %v12548_v31 }
 0xb7f   :  { %7841 = vmatprep.subr.bf16.mxu0 %v12553_v61  ;;  %7882 = vmatprep.subr.bf16.mxu1 %v12556_v57 }
 0xb82   :  { %7842 = vmatpush1.bf16.msra.mxu0 %v12551_v11  ;;  %7883 = vmatpush1.bf16.msra.mxu1 %v12554_v41 }
 0xb83   :  { %7843 = vmatprep.subr.bf16.mxu0 %v12559_v35  ;;  %7884 = vmatprep.subr.bf16.mxu1 %v12562_v43 }
 0xb86   :  { %7844 = vmatpush1.bf16.msra.mxu0 %v12557_v25  ;;  %7885 = vmatpush1.bf16.msra.mxu1 %v12560_v45 }
 0xb87   :  { %7845 = vmatprep.subr.bf16.mxu0 %v12565_v53  ;;  %7886 = vmatprep.subr.bf16.mxu1 %v12568_v4 }
 0xb8a   :  { %7846 = vmatpush1.bf16.msra.mxu0 %v12563_v30  ;;  %7887 = vmatpush1.bf16.msra.mxu1 %v12566_v60 }
 0xb8b   :  { %7847 = vmatprep.subr.bf16.mxu0 %v12571_v18  ;;  %7888 = vmatprep.subr.bf16.mxu1 %v12574_v34 }
 0xb8e   :  { %7848 = vmatpush1.bf16.msra.mxu0 %v12569_v51  ;;  %7889 = vmatpush1.bf16.msra.mxu1 %v12572_v58  ;;  %v6666_v58 = vrot.slane %v6653_v52, %v13620_v48 }
 0xb8f   :  { %7849 = vmatprep.subr.bf16.mxu0 %v12577_v47  ;;  %7890 = vmatprep.subr.bf16.mxu1 %v12580_v20 }
 0xb92   :  { %7850 = vmatpush1.bf16.msra.mxu0 %v12575_v27  ;;  %7891 = vmatpush1.bf16.msra.mxu1 %v12578_v23 }
 0xb93   :  { %8333 = vmatprep.subr.bf16.mxu0 %v12583_v59  ;;  %8374 = vmatprep.subr.bf16.mxu1 %v12586_v55 }
 0xc07   :  { %v7029_v6 = vpop.f32.mrb[56].mxu0  ;;  %v7070_v14 = vpop.f32.mrb[88].mxu1 }
 0xc08   :  { %v7030_v36 = vadd.f32 %v7029_v6, %v6658_v33  ;;  %v7031_v9 = vpop.f32.mrb[57].mxu0  ;;  %v7072_v49 = vpop.f32.mrb[89].mxu1  ;;  %v7071_v23 = vadd.f32 %v7070_v14, %v6666_v58  ;;  %v12616_v58 = vld [vmem:[#allocation8 + $0xac] ss:$16 sps:$4 sm:$0xff]  }
 0xc09   :  { %v7032_v32 = vadd.f32 %v7031_v9, %v6662_v63  ;;  %v7033_v7 = vpop.f32.mrb[58].mxu0  ;;  %v7074_v17 = vpop.f32.mrb[90].mxu1  ;;  %v7073_v54 = vadd.f32 %v7072_v49, %v6670_v22 }
 0xc0a   :  { %v10816_v13 = vmul.f32 -1.442695, %v7030_v36  ;;  %v7034_v5 = vpop.f32.mrb[59].mxu0  ;;  %v7075_v19 = vpop.f32.mrb[91].mxu1 }
 0xc0b   :  { %v10817_v3 = vmul.f32 -1.442695, %v7032_v32 }
 0xc0c   :  { %13149 = vpow2.f32 %v10816_v13 }
 0xc0d   :  { %13151 = vpow2.f32 %v10817_v3 }
 0xc0e   :  { %13153 = vtanh.f32 %v7073_v54 }
 0xc16   :  { %v13150_v37 = vpop.eup %13149 }
 0xc17   :  { %v7086_v16 = vadd.f32 1.0, %v13150_v37  ;;  %v13152_v56 = vpop.eup %13151  ;;  %v12581_v37 = vld [vmem:[#allocation8] ss:$16 sps:$4 sm:$0xff]  }
 0xc18   :  { %v7087_v62 = vadd.f32 1.0, %v13152_v56  ;;  %v13154_v31 = vpop.eup %13153  ;;  %v12589_v56 = vld [vmem:[#allocation8 + $0x24] ss:$16 sps:$4 sm:$0xff]  }
 0xc19   :  { %13155 = vrcp.f32 %v7086_v16  ;;  %v12584_v16 = vld [vmem:[#allocation8 + $0x8] ss:$16 sps:$4 sm:$0xff]  }
 0xc1a   :  { %13157 = vrcp.f32 %v7087_v62  ;;  %v12592_v62 = vld [vmem:[#allocation8 + $0x2c] ss:$16 sps:$4 sm:$0xff]  }
 0xc23   :  { %v13156_v61 = vpop.eup %13155 }
 0xc24   :  { %v7097_v57 = vmul.f32 %v13156_v61, %v13154_v31  ;;  %v13158_v11 = vpop.eup %13157  ;;  %v12587_v31 = vld [vmem:[#allocation8 + $0x20] ss:$16 sps:$4 sm:$0xff]   ;;  %v12590_v61 = vld [vmem:[#allocation8 + $0x28] ss:$16 sps:$4 sm:$0xff]  }
 0xc25   :  { %v7096_v41 = vmul.f32 %v13158_v11, %v13832_v2  ;;  %v12598_v11 = vld [vmem:[#allocation8 + $0x4c] ss:$16 sps:$4 sm:$0xff]  }
 0xc27   :  { %v7336_v35 = vpop.f32.mrb[60].mxu0  ;;  %v7377_v43 = vpop.f32.mrb[92].mxu1  ;;  %v13880_v25 = vadd.f32 %v7097_v57, %v7096_v41  ;;  %v12595_v57 = vld [vmem:[#allocation8 + $0x44] ss:$16 sps:$4 sm:$0xff]   ;;  %v12593_v41 = vld [vmem:[#allocation8 + $0x40] ss:$16 sps:$4 sm:$0xff]  }
 0xc28   :  { %v7384_v45 = vadd.f32 %v7336_v35, %v13612_v38  ;;  %v7386_v30 = vadd.f32 %v7377_v43, %v13642_v12  ;;  %v7338_v53 = vpop.f32.mrb[61].mxu0  ;;  %v7379_v60 = vpop.f32.mrb[93].mxu1  ;;  %v10818_v38 = vmul.f32 -1.442695, %v7071_v23  ;;  %v12596_v35 = vld [vmem:[#allocation8 + $0x48] ss:$16 sps:$4 sm:$0xff]  }
 0xc29   :  { %v7385_v4 = vadd.f32 %v7338_v53, %v13614_v40  ;;  %v7387_v18 = vadd.f32 %v7379_v60, %v13644_v15  ;;  %v7340_v34 = vpop.f32.mrb[62].mxu0  ;;  %v7381_v51 = vpop.f32.mrb[94].mxu1  ;;  %v12601_v43 = vld [vmem:[#allocation8 + $0x64] ss:$16 sps:$4 sm:$0xff]   ;;  %v12602_v53 = vld [vmem:[#allocation8 + $0x68] ss:$16 sps:$4 sm:$0xff]  }
 0xc2a   :  { %v10851_v47 = vmul.f32 -1.442695, %v7384_v45  ;;  %v7341_v2 = vpop.f32.mrb[63].mxu0  ;;  %v7382_v20 = vpop.f32.mrb[95].mxu1  ;;  %v10853_v59 = vmul.f32 -1.442695, %v7386_v30 }
 0xc2b   :  { %v10852_v27 = vmul.f32 -1.442695, %v7385_v4  ;;  %v12604_v45 = vld [vmem:[#allocation8 + $0x6c] ss:$16 sps:$4 sm:$0xff]   ;;  %v12599_v30 = vld [vmem:[#allocation8 + $0x60] ss:$16 sps:$4 sm:$0xff]  }
 0xc2c   :  { %13159 = vpow2.f32 %v10851_v47  ;;  %v12607_v60 = vld [vmem:[#allocation8 + $0x84] ss:$16 sps:$4 sm:$0xff]   ;;  %v12610_v4 = vld [vmem:[#allocation8 + $0x8c] ss:$16 sps:$4 sm:$0xff]   ;;  %v12608_v34 = vld [vmem:[#allocation8 + $0x88] ss:$16 sps:$4 sm:$0xff]  }
 0xc2d   :  { %13161 = vpow2.f32 %v10852_v27  ;;  %v12613_v51 = vld [vmem:[#allocation8 + $0xa4] ss:$16 sps:$4 sm:$0xff]   ;;  %v12611_v47 = vld [vmem:[#allocation8 + $0xa0] ss:$16 sps:$4 sm:$0xff]   ;;  %v12614_v2 = vld [vmem:[#allocation8 + $0xa8] ss:$16 sps:$4 sm:$0xff]  }
 0xc2e   :  { %13163 = vpow2.f32 %v10818_v38  ;;  %v12619_v20 = vld [vmem:[#allocation8 + $0xc4] ss:$16 sps:$4 sm:$0xff]   ;;  %v12622_v27 = vld [vmem:[#allocation8 + $0xcc] ss:$16 sps:$4 sm:$0xff]   ;;  %v12617_v23 = vld [vmem:[#allocation8 + $0xc0] ss:$16 sps:$4 sm:$0xff]  }
 0xc2f   :  { %13165 = vtanh.f32 %v7387_v18  ;;  %v12605_v18 = vld [vmem:[#allocation8 + $0x80] ss:$16 sps:$4 sm:$0xff]   ;;  %v12620_v38 = vld [vmem:[#allocation8 + $0xc8] ss:$16 sps:$4 sm:$0xff]  }
 0xc30   :  { %13167 = vpow2.f32 %v10853_v59  ;;  %v12625_v59 = vld [vmem:[#allocation8 + $0xe4] ss:$16 sps:$4 sm:$0xff]  }
 0xc36   :  { %v13160_v12 = vpop.eup %13159 }
 0xc37   :  { %v7397_v55 = vadd.f32 1.0, %v13160_v12  ;;  %v13162_v40 = vpop.eup %13161  ;;  %v12628_v12 = vld [vmem:[#allocation8 + $0xec] ss:$16 sps:$4 sm:$0xff]  }
 0xc38   :  { %v7398_v15 = vadd.f32 1.0, %v13162_v40  ;;  %v13164_v33 = vpop.eup %13163  ;;  %v12626_v40 = vld [vmem:[#allocation8 + $0xe8] ss:$16 sps:$4 sm:$0xff]  }
 0xc39   :  { %13169 = vrcp.f32 %v7397_v55  ;;  %v13166_v52 = vpop.eup %13165  ;;  %v7088_v36 = vadd.f32 1.0, %v13164_v33  ;;  %v12623_v55 = vld [vmem:[#allocation8 + $0xe0] ss:$16 sps:$4 sm:$0xff]   ;;  %v12634_v33 = vld [vmem:[#allocation8 + $0x10c] ss:$16 sps:$4 sm:$0xff]  }
 0xc3a   :  { %13171 = vrcp.f32 %v7398_v15  ;;  %v13168_v63 = vpop.eup %13167  ;;  %v12631_v15 = vld [vmem:[#allocation8 + $0x104] ss:$16 sps:$4 sm:$0xff]  }
 0xc3b   :  { %v7399_v14 = vadd.f32 1.0, %v13168_v63  ;;  %13173 = vtanh.f32 %v13880_v25  ;;  %v12632_v63 = vld [vmem:[#allocation8 + $0x108] ss:$16 sps:$4 sm:$0xff]  }
 0xc3c   :  { %13175 = vrcp.f32 %v7088_v36  ;;  %v12640_v36 = vld [vmem:[#allocation8 + $0x12c] ss:$16 sps:$4 sm:$0xff]  }
 0xc3d   :  { %13177 = vrcp.f32 %v7399_v14  ;;  %v12643_v14 = vld [vmem:[#allocation8 + $0x144] ss:$16 sps:$4 sm:$0xff]  }
 0xc43   :  { %v13170_v6 = vpop.eup %13169 }
 0xc44   :  { %v7408_v9 = vmul.f32 %v13170_v6, %v13166_v52  ;;  %v13172_v49 = vpop.eup %13171  ;;  %v12629_v52 = vld [vmem:[#allocation8 + $0x100] ss:$16 sps:$4 sm:$0xff]   ;;  %v12637_v6 = vld [vmem:[#allocation8 + $0x124] ss:$16 sps:$4 sm:$0xff]  }
 0xc45   :  { %v7407_v32 = vmul.f32 %v13172_v49, %v13841_v26  ;;  %v13174_v17 = vpop.eup %13173  ;;  %v12638_v49 = vld [vmem:[#allocation8 + $0x128] ss:$16 sps:$4 sm:$0xff]  }
 0xc46   :  { %v13176_v13 = vpop.eup %13175 }
 0xc47   :  { %v13889_v7 = vadd.f32 %v7408_v9, %v7407_v32  ;;  %v13178_v5 = vpop.eup %13177  ;;  %v13892_v3 = vmul.f32 %v13176_v13, %v13174_v17  ;;  %v12635_v9 = vld [vmem:[#allocation8 + $0x120] ss:$16 sps:$4 sm:$0xff]   ;;  %v12646_v32 = vld [vmem:[#allocation8 + $0x14c] ss:$16 sps:$4 sm:$0xff]   ;;  %v12644_v13 = vld [vmem:[#allocation8 + $0x148] ss:$16 sps:$4 sm:$0xff]  }
 0xc48   :  { %v12641_v17 = vld [vmem:[#allocation8 + $0x140] ss:$16 sps:$4 sm:$0xff]  }
 0xc49   :  { %13179 = vtanh.f32 %v13889_v7  ;;  %v7926_v26 = vpack.c.bf16 %v13892_v3, %v13892_v3 }
 0xc53   :  { %v13180_v19 = vpop.eup %13179 }
 0xc54   :  { %v7411_v22 = vmul.f32 %v13180_v19, %v13178_v5  ;;  %v12649_v5 = vld [vmem:[#allocation8 + $0x164] ss:$16 sps:$4 sm:$0xff]   ;;  %v12652_v19 = vld [vmem:[#allocation8 + $0x16c] ss:$16 sps:$4 sm:$0xff]  }
 0xc56   :  { %v13894_v54 = vpack.c.bf16 %v7411_v22, %v7411_v22  ;;  %v12647_v22 = vld [vmem:[#allocation8 + $0x160] ss:$16 sps:$4 sm:$0xff]  }
 0xc58   :  { %7852 = vmatmul.mubr.bf16.vlgmr.msra.gmra.mrb[64].mxu0 %v13894_v54  ;;  %7893 = vmatmul.mubr.bf16.vlgmr.msra.gmra.mrb[96].mxu1 %v13894_v54 }
 0xc59   :  { %8365 = vmatprep.mubr.bf16.mxu0 %v7926_v26  ;;  %8406 = vmatprep.mubr.bf16.mxu1 %v7926_v26  ;;  %v12658_v26 = vld [vmem:[#allocation8 + $0x18c] ss:$16 sps:$4 sm:$0xff]  }
 0xc5a   :  { %8334 = vmatpush1.bf16.msra.mxu0 %v12581_v37  ;;  %8375 = vmatpush1.bf16.msra.mxu1 %v12584_v16  ;;  %v12650_v37 = vld [vmem:[#allocation8 + $0x168] ss:$16 sps:$4 sm:$0xff]   ;;  %v12655_v16 = vld [vmem:[#allocation8 + $0x184] ss:$16 sps:$4 sm:$0xff]  }
 0xc5b   :  { %8335 = vmatprep.subr.bf16.mxu0 %v12589_v56  ;;  %8376 = vmatprep.subr.bf16.mxu1 %v12592_v62  ;;  %v12653_v56 = vld [vmem:[#allocation8 + $0x180] ss:$16 sps:$4 sm:$0xff]   ;;  %v12656_v62 = vld [vmem:[#allocation8 + $0x188] ss:$16 sps:$4 sm:$0xff]  }
 0xc5e   :  { %8336 = vmatpush1.bf16.msra.mxu0 %v12587_v31  ;;  %8377 = vmatpush1.bf16.msra.mxu1 %v12590_v61  ;;  %v12659_v31 = vld [vmem:[#allocation8 + $0x1a0] ss:$16 sps:$4 sm:$0xff]   ;;  %v12661_v61 = vld [vmem:[#allocation8 + $0x1a4] ss:$16 sps:$4 sm:$0xff]  }
 0xc5f   :  { %8337 = vmatprep.subr.bf16.mxu0 %v12595_v57  ;;  %8378 = vmatprep.subr.bf16.mxu1 %v12598_v11  ;;  %v12662_v57 = vld [vmem:[#allocation8 + $0x1a8] ss:$16 sps:$4 sm:$0xff]   ;;  %v12664_v11 = vld [vmem:[#allocation8 + $0x1ac] ss:$16 sps:$4 sm:$0xff]  }
 0xc62   :  { %8338 = vmatpush1.bf16.msra.mxu0 %v12593_v41  ;;  %8379 = vmatpush1.bf16.msra.mxu1 %v12596_v35  ;;  %v12667_v41 = vld [vmem:[#allocation8 + $0x1c4] ss:$16 sps:$4 sm:$0xff]   ;;  %v12670_v35 = vld [vmem:[#allocation8 + $0x1cc] ss:$16 sps:$4 sm:$0xff]  }
 0xc63   :  { %8339 = vmatprep.subr.bf16.mxu0 %v12601_v43  ;;  %8380 = vmatprep.subr.bf16.mxu1 %v12604_v45  ;;  %v12665_v43 = vld [vmem:[#allocation8 + $0x1c0] ss:$16 sps:$4 sm:$0xff]   ;;  %v12668_v45 = vld [vmem:[#allocation8 + $0x1c8] ss:$16 sps:$4 sm:$0xff]  }
 0xc66   :  { %8340 = vmatpush1.bf16.msra.mxu0 %v12599_v30  ;;  %8381 = vmatpush1.bf16.msra.mxu1 %v12602_v53  ;;  %v12673_v30 = vld [vmem:[#allocation8 + $0x1e4] ss:$16 sps:$4 sm:$0xff]   ;;  %v12676_v53 = vld [vmem:[#allocation8 + $0x1ec] ss:$16 sps:$4 sm:$0xff]  }
 0xc67   :  { %8341 = vmatprep.subr.bf16.mxu0 %v12607_v60  ;;  %8382 = vmatprep.subr.bf16.mxu1 %v12610_v4  ;;  %v12671_v60 = vld [vmem:[#allocation8 + $0x1e0] ss:$16 sps:$4 sm:$0xff]   ;;  %v12674_v4 = vld [vmem:[#allocation8 + $0x1e8] ss:$16 sps:$4 sm:$0xff]  }
 0xc6a   :  { %8342 = vmatpush1.bf16.msra.mxu0 %v12605_v18  ;;  %8383 = vmatpush1.bf16.msra.mxu1 %v12608_v34  ;;  %v12679_v18 = vld [vmem:[#allocation4 + $0x4] ss:$16 sps:$4 sm:$0xff]   ;;  %v12682_v34 = vld [vmem:[#allocation4 + $0xc] ss:$16 sps:$4 sm:$0xff]  }
 0xc6b   :  { %8343 = vmatprep.subr.bf16.mxu0 %v12613_v51  ;;  %8384 = vmatprep.subr.bf16.mxu1 %v12616_v58  ;;  %v7477_v51 = vld [vmem:[%s13995_s5] sm:$0xf] }
 0xc6c   :  { %v7482_v58 = vrot.slane %v7477_v51, %v13590_v8 }
 0xc6e   :  { %8344 = vmatpush1.bf16.msra.mxu0 %v12611_v47  ;;  %8385 = vmatpush1.bf16.msra.mxu1 %v12614_v2  ;;  %v7486_v47 = vrot.slane %v7477_v51, %v13592_v10 }
 0xc6f   :  { %8345 = vmatprep.subr.bf16.mxu0 %v12619_v20  ;;  %8386 = vmatprep.subr.bf16.mxu1 %v12622_v27 }
 0xc72   :  { %8346 = vmatpush1.bf16.msra.mxu0 %v12617_v23  ;;  %8387 = vmatpush1.bf16.msra.mxu1 %v12620_v38 }
 0xc73   :  { %8347 = vmatprep.subr.bf16.mxu0 %v12625_v59  ;;  %8388 = vmatprep.subr.bf16.mxu1 %v12628_v12 }
 0xc76   :  { %8348 = vmatpush1.bf16.msra.mxu0 %v12623_v55  ;;  %8389 = vmatpush1.bf16.msra.mxu1 %v12626_v40 }
 0xc77   :  { %8349 = vmatprep.subr.bf16.mxu0 %v12631_v15  ;;  %8390 = vmatprep.subr.bf16.mxu1 %v12634_v33 }
 0xc7a   :  { %8350 = vmatpush1.bf16.msra.mxu0 %v12629_v52  ;;  %8391 = vmatpush1.bf16.msra.mxu1 %v12632_v63  ;;  %v7490_v63 = vrot.slane %v7477_v51, %v13620_v48 }
 0xc7b   :  { %8351 = vmatprep.subr.bf16.mxu0 %v12637_v6  ;;  %8392 = vmatprep.subr.bf16.mxu1 %v12640_v36  ;;  %v7494_v6 = vrot.slane %v7477_v51, %v13622_v50  ;;  %v12700_v51 = vld [vmem:[#allocation4 + $0x6c] ss:$16 sps:$4 sm:$0xff]  }
 0xc7e   :  { %8352 = vmatpush1.bf16.msra.mxu0 %v12635_v9  ;;  %8393 = vmatpush1.bf16.msra.mxu1 %v12638_v49 }
 0xc7f   :  { %8353 = vmatprep.subr.bf16.mxu0 %v12643_v14  ;;  %8394 = vmatprep.subr.bf16.mxu1 %v12646_v32 }
 0xc82   :  { %8354 = vmatpush1.bf16.msra.mxu0 %v12641_v17  ;;  %8395 = vmatpush1.bf16.msra.mxu1 %v12644_v13 }
 0xc83   :  { %8355 = vmatprep.subr.bf16.mxu0 %v12649_v5  ;;  %8396 = vmatprep.subr.bf16.mxu1 %v12652_v19 }
 0xc86   :  { %8356 = vmatpush1.bf16.msra.mxu0 %v12647_v22  ;;  %8397 = vmatpush1.bf16.msra.mxu1 %v12650_v37 }
 0xc87   :  { %8357 = vmatprep.subr.bf16.mxu0 %v12655_v16  ;;  %8398 = vmatprep.subr.bf16.mxu1 %v12658_v26 }
 0xc8a   :  { %8358 = vmatpush1.bf16.msra.mxu0 %v12653_v56  ;;  %8399 = vmatpush1.bf16.msra.mxu1 %v12656_v62 }
 0xc8b   :  { %8359 = vmatprep.subr.bf16.mxu0 %v12661_v61  ;;  %8400 = vmatprep.subr.bf16.mxu1 %v12664_v11  ;;  %v12677_v11 = vld [vmem:[#allocation4] ss:$16 sps:$4 sm:$0xff]  }
 0xc8e   :  { %8360 = vmatpush1.bf16.msra.mxu0 %v12659_v31  ;;  %8401 = vmatpush1.bf16.msra.mxu1 %v12662_v57 }
 0xc8f   :  { %8361 = vmatprep.subr.bf16.mxu0 %v12667_v41  ;;  %8402 = vmatprep.subr.bf16.mxu1 %v12670_v35  ;;  %v12680_v41 = vld [vmem:[#allocation4 + $0x8] ss:$16 sps:$4 sm:$0xff]  }
 0xc92   :  { %8362 = vmatpush1.bf16.msra.mxu0 %v12665_v43  ;;  %8403 = vmatpush1.bf16.msra.mxu1 %v12668_v45  ;;  %v12685_v43 = vld [vmem:[#allocation4 + $0x24] ss:$16 sps:$4 sm:$0xff]   ;;  %v12688_v45 = vld [vmem:[#allocation4 + $0x2c] ss:$16 sps:$4 sm:$0xff]  }
 0xc93   :  { %8363 = vmatprep.subr.bf16.mxu0 %v12673_v30  ;;  %8404 = vmatprep.subr.bf16.mxu1 %v12676_v53  ;;  %v12686_v30 = vld [vmem:[#allocation4 + $0x28] ss:$16 sps:$4 sm:$0xff]   ;;  %v12691_v53 = vld [vmem:[#allocation4 + $0x44] ss:$16 sps:$4 sm:$0xff]  }
 0xc96   :  { %8364 = vmatpush1.bf16.msra.mxu0 %v12671_v60  ;;  %8405 = vmatpush1.bf16.msra.mxu1 %v12674_v4  ;;  %v12694_v60 = vld [vmem:[#allocation4 + $0x4c] ss:$16 sps:$4 sm:$0xff]   ;;  %v12689_v4 = vld [vmem:[#allocation4 + $0x40] ss:$16 sps:$4 sm:$0xff]  }
 0xc97   :  { %8640 = vmatprep.subr.bf16.mxu0 %v12679_v18  ;;  %8681 = vmatprep.subr.bf16.mxu1 %v12682_v34  ;;  %v12692_v18 = vld [vmem:[#allocation4 + $0x48] ss:$16 sps:$4 sm:$0xff]   ;;  %v12697_v34 = vld [vmem:[#allocation4 + $0x64] ss:$16 sps:$4 sm:$0xff]  }
 0xd2b   :  { %v7853_v2 = vpop.f32.mrb[64].mxu0  ;;  %v7894_v20 = vpop.f32.mrb[96].mxu1 }
 0xd2c   :  { %v7854_v27 = vadd.f32 %v7853_v2, %v7482_v58  ;;  %v7855_v23 = vpop.f32.mrb[65].mxu0  ;;  %v7896_v38 = vpop.f32.mrb[97].mxu1  ;;  %v7895_v36 = vadd.f32 %v7894_v20, %v7490_v63  ;;  %v12695_v58 = vld [vmem:[#allocation4 + $0x60] ss:$16 sps:$4 sm:$0xff]   ;;  %v12703_v2 = vld [vmem:[#allocation4 + $0x84] ss:$16 sps:$4 sm:$0xff]  }
 0xd2d   :  { %v7856_v59 = vadd.f32 %v7855_v23, %v7486_v47  ;;  %v7857_v12 = vpop.f32.mrb[66].mxu0  ;;  %v7898_v55 = vpop.f32.mrb[98].mxu1  ;;  %v7897_v9 = vadd.f32 %v7896_v38, %v7494_v6  ;;  %v12698_v47 = vld [vmem:[#allocation4 + $0x68] ss:$16 sps:$4 sm:$0xff]   ;;  %v12706_v20 = vld [vmem:[#allocation4 + $0x8c] ss:$16 sps:$4 sm:$0xff]  }
 0xd2e   :  { %v10918_v40 = vmul.f32 -1.442695, %v7854_v27  ;;  %v7858_v15 = vpop.f32.mrb[67].mxu0  ;;  %v7899_v33 = vpop.f32.mrb[99].mxu1  ;;  %v10920_v49 = vmul.f32 -1.442695, %v7895_v36 }
 0xd2f   :  { %v10919_v52 = vmul.f32 -1.442695, %v7856_v59  ;;  %v12701_v27 = vld [vmem:[#allocation4 + $0x80] ss:$16 sps:$4 sm:$0xff]   ;;  %v12709_v23 = vld [vmem:[#allocation4 + $0xa4] ss:$16 sps:$4 sm:$0xff]  }
 0xd30   :  { %13181 = vpow2.f32 %v10918_v40  ;;  %v12712_v38 = vld [vmem:[#allocation4 + $0xac] ss:$16 sps:$4 sm:$0xff]   ;;  %v12707_v59 = vld [vmem:[#allocation4 + $0xa0] ss:$16 sps:$4 sm:$0xff]   ;;  %v12710_v12 = vld [vmem:[#allocation4 + $0xa8] ss:$16 sps:$4 sm:$0xff]  }
 0xd31   :  { %13183 = vpow2.f32 %v10919_v52  ;;  %v12715_v55 = vld [vmem:[#allocation4 + $0xc4] ss:$16 sps:$4 sm:$0xff]   ;;  %v12718_v40 = vld [vmem:[#allocation4 + $0xcc] ss:$16 sps:$4 sm:$0xff]   ;;  %v12713_v15 = vld [vmem:[#allocation4 + $0xc0] ss:$16 sps:$4 sm:$0xff]  }
 0xd32   :  { %13185 = vtanh.f32 %v7897_v9  ;;  %v12716_v33 = vld [vmem:[#allocation4 + $0xc8] ss:$16 sps:$4 sm:$0xff]   ;;  %v12721_v52 = vld [vmem:[#allocation4 + $0xe4] ss:$16 sps:$4 sm:$0xff]   ;;  %v12724_v63 = vld [vmem:[#allocation4 + $0xec] ss:$16 sps:$4 sm:$0xff]  }
 0xd33   :  { %13187 = vpow2.f32 %v10920_v49  ;;  %v12719_v6 = vld [vmem:[#allocation4 + $0xe0] ss:$16 sps:$4 sm:$0xff]   ;;  %v12722_v36 = vld [vmem:[#allocation4 + $0xe8] ss:$16 sps:$4 sm:$0xff]   ;;  %v12727_v9 = vld [vmem:[#allocation6 + $0x4] ss:$16 sps:$4 sm:$0xff]  }
 0xd34   :  { %v12730_v49 = vld [vmem:[#allocation6 + $0xc] ss:$16 sps:$4 sm:$0xff]  }
 0xd3a   :  { %v13182_v14 = vpop.eup %13181 }
 0xd3b   :  { %v7910_v32 = vadd.f32 1.0, %v13182_v14  ;;  %v13184_v17 = vpop.eup %13183  ;;  %v12725_v14 = vld [vmem:[#allocation6] ss:$16 sps:$4 sm:$0xff]  }
 0xd3c   :  { %v7911_v13 = vadd.f32 1.0, %v13184_v17  ;;  %v13186_v5 = vpop.eup %13185  ;;  %v12733_v17 = vld [vmem:[#allocation6 + $0x24] ss:$16 sps:$4 sm:$0xff]  }
 0xd3d   :  { %13189 = vrcp.f32 %v7910_v32  ;;  %v13188_v19 = vpop.eup %13187  ;;  %v12728_v32 = vld [vmem:[#allocation6 + $0x8] ss:$16 sps:$4 sm:$0xff]  }
 0xd3e   :  { %13191 = vrcp.f32 %v7911_v13  ;;  %v7912_v26 = vadd.f32 1.0, %v13188_v19  ;;  %v12736_v13 = vld [vmem:[#allocation6 + $0x2c] ss:$16 sps:$4 sm:$0xff]   ;;  %v12734_v19 = vld [vmem:[#allocation6 + $0x28] ss:$16 sps:$4 sm:$0xff]  }
 0xd40   :  { %13193 = vrcp.f32 %v7912_v26  ;;  %v12745_v26 = vld [vmem:[#allocation6 + $0x64] ss:$16 sps:$4 sm:$0xff]  }
 0xd47   :  { %v13190_v22 = vpop.eup %13189 }
 0xd48   :  { %v7921_v37 = vmul.f32 %v13190_v22, %v13186_v5  ;;  %v13192_v16 = vpop.eup %13191  ;;  %v12731_v5 = vld [vmem:[#allocation6 + $0x20] ss:$16 sps:$4 sm:$0xff]   ;;  %v12742_v22 = vld [vmem:[#allocation6 + $0x4c] ss:$16 sps:$4 sm:$0xff]  }
 0xd49   :  { %v7920_v56 = vmul.f32 %v13192_v16, %v13860_v29  ;;  %v12683_v29 = vld [vmem:[#allocation4 + $0x20] ss:$16 sps:$4 sm:$0xff]   ;;  %v12740_v16 = vld [vmem:[#allocation6 + $0x48] ss:$16 sps:$4 sm:$0xff]  }
 0xd4a   :  { %v13194_v31 = vpop.eup %13193 }
 0xd4b   :  { %v13908_v62 = vadd.f32 %v7921_v37, %v7920_v56  ;;  %v12737_v37 = vld [vmem:[#allocation6 + $0x40] ss:$16 sps:$4 sm:$0xff]   ;;  %v12748_v56 = vld [vmem:[#allocation6 + $0x6c] ss:$16 sps:$4 sm:$0xff]  }
 0xd4d   :  { %13195 = vtanh.f32 %v13908_v62 }
 0xd57   :  { %v13196_v61 = vpop.eup %13195 }
 0xd58   :  { %v7924_v57 = vmul.f32 %v13196_v61, %v13194_v31  ;;  %v12743_v31 = vld [vmem:[#allocation6 + $0x60] ss:$16 sps:$4 sm:$0xff]   ;;  %v12746_v61 = vld [vmem:[#allocation6 + $0x68] ss:$16 sps:$4 sm:$0xff]  }
 0xd5a   :  { %v13911_v35 = vpack.c.bf16 %v7924_v57, %v7924_v57  ;;  %v12751_v57 = vld [vmem:[#allocation6 + $0x84] ss:$16 sps:$4 sm:$0xff]  }
 0xd5c   :  { %8366 = vmatmul.mubr.bf16.vlgmr.msra.gmra.mrb[68].mxu0 %v13911_v35  ;;  %8407 = vmatmul.mubr.bf16.vlgmr.msra.gmra.mrb[100].mxu1 %v13911_v35 }
 0xd5d   :  { %8641 = vmatpush1.bf16.msra.mxu0 %v12677_v11  ;;  %8682 = vmatpush1.bf16.msra.mxu1 %v12680_v41  ;;  %v12754_v11 = vld [vmem:[#allocation6 + $0x8c] ss:$16 sps:$4 sm:$0xff]   ;;  %v12749_v41 = vld [vmem:[#allocation6 + $0x80] ss:$16 sps:$4 sm:$0xff]  }
 0xd5e   :  { %8642 = vmatprep.subr.bf16.mxu0 %v12685_v43  ;;  %8683 = vmatprep.subr.bf16.mxu1 %v12688_v45  ;;  %v12757_v43 = vld [vmem:[#allocation6 + $0xa4] ss:$16 sps:$4 sm:$0xff]   ;;  %v12760_v45 = vld [vmem:[#allocation6 + $0xac] ss:$16 sps:$4 sm:$0xff]  }
 0xd5f   :  { %8672 = vmatprep.mubr.bf16.mxu0 %v13364_v0  ;;  %8713 = vmatprep.mubr.bf16.mxu1 %v13364_v0  ;;  %v12704_v0 = vld [vmem:[#allocation4 + $0x88] ss:$16 sps:$4 sm:$0xff]  }
 0xd61   :  { %8643 = vmatpush1.bf16.msra.mxu0 %v12683_v29  ;;  %8684 = vmatpush1.bf16.msra.mxu1 %v12686_v30  ;;  %v12755_v29 = vld [vmem:[#allocation6 + $0xa0] ss:$16 sps:$4 sm:$0xff]   ;;  %v12758_v30 = vld [vmem:[#allocation6 + $0xa8] ss:$16 sps:$4 sm:$0xff]  }
 0xd62   :  { %8644 = vmatprep.subr.bf16.mxu0 %v12691_v53  ;;  %8685 = vmatprep.subr.bf16.mxu1 %v12694_v60  ;;  %v12763_v53 = vld [vmem:[#allocation6 + $0xc4] ss:$16 sps:$4 sm:$0xff]   ;;  %v12766_v60 = vld [vmem:[#allocation6 + $0xcc] ss:$16 sps:$4 sm:$0xff]  }
 0xd65   :  { %8645 = vmatpush1.bf16.msra.mxu0 %v12689_v4  ;;  %8686 = vmatpush1.bf16.msra.mxu1 %v12692_v18  ;;  %v12761_v4 = vld [vmem:[#allocation6 + $0xc0] ss:$16 sps:$4 sm:$0xff]   ;;  %v12764_v18 = vld [vmem:[#allocation6 + $0xc8] ss:$16 sps:$4 sm:$0xff]  }
 0xd66   :  { %8646 = vmatprep.subr.bf16.mxu0 %v12697_v34  ;;  %8687 = vmatprep.subr.bf16.mxu1 %v12700_v51  ;;  %v12769_v34 = vld [vmem:[#allocation6 + $0xe4] ss:$16 sps:$4 sm:$0xff]   ;;  %v12772_v51 = vld [vmem:[#allocation6 + $0xec] ss:$16 sps:$4 sm:$0xff]  }
 0xd69   :  { %8647 = vmatpush1.bf16.msra.mxu0 %v12695_v58  ;;  %8688 = vmatpush1.bf16.msra.mxu1 %v12698_v47  ;;  %v12767_v58 = vld [vmem:[#allocation6 + $0xe0] ss:$16 sps:$4 sm:$0xff]   ;;  %v12770_v47 = vld [vmem:[#allocation6 + $0xe8] ss:$16 sps:$4 sm:$0xff]  }
 0xd6a   :  { %8648 = vmatprep.subr.bf16.mxu0 %v12703_v2  ;;  %8689 = vmatprep.subr.bf16.mxu1 %v12706_v20  ;;  %v12775_v2 = vld [vmem:[#allocation6 + $0x104] ss:$16 sps:$4 sm:$0xff]   ;;  %v12778_v20 = vld [vmem:[#allocation6 + $0x10c] ss:$16 sps:$4 sm:$0xff]  }
 0xd6d   :  { %8649 = vmatpush1.bf16.msra.mxu0 %v12701_v27  ;;  %8690 = vmatpush1.bf16.msra.mxu1 %v12704_v0  ;;  %v12773_v27 = vld [vmem:[#allocation6 + $0x100] ss:$16 sps:$4 sm:$0xff]   ;;  %v12776_v0 = vld [vmem:[#allocation6 + $0x108] ss:$16 sps:$4 sm:$0xff]  }
 0xd6e   :  { %8650 = vmatprep.subr.bf16.mxu0 %v12709_v23  ;;  %8691 = vmatprep.subr.bf16.mxu1 %v12712_v38  ;;  %v12781_v23 = vld [vmem:[#allocation6 + $0x124] ss:$16 sps:$4 sm:$0xff]   ;;  %v12784_v38 = vld [vmem:[#allocation6 + $0x12c] ss:$16 sps:$4 sm:$0xff]  }
 0xd71   :  { %8651 = vmatpush1.bf16.msra.mxu0 %v12707_v59  ;;  %8692 = vmatpush1.bf16.msra.mxu1 %v12710_v12  ;;  %v12779_v59 = vld [vmem:[#allocation6 + $0x120] ss:$16 sps:$4 sm:$0xff]   ;;  %v12782_v12 = vld [vmem:[#allocation6 + $0x128] ss:$16 sps:$4 sm:$0xff]  }
 0xd72   :  { %8652 = vmatprep.subr.bf16.mxu0 %v12715_v55  ;;  %8693 = vmatprep.subr.bf16.mxu1 %v12718_v40  ;;  %v12787_v55 = vld [vmem:[#allocation6 + $0x144] ss:$16 sps:$4 sm:$0xff]   ;;  %v12790_v40 = vld [vmem:[#allocation6 + $0x14c] ss:$16 sps:$4 sm:$0xff]  }
 0xd75   :  { %8653 = vmatpush1.bf16.msra.mxu0 %v12713_v15  ;;  %8694 = vmatpush1.bf16.msra.mxu1 %v12716_v33  ;;  %v12785_v15 = vld [vmem:[#allocation6 + $0x140] ss:$16 sps:$4 sm:$0xff]   ;;  %v12788_v33 = vld [vmem:[#allocation6 + $0x148] ss:$16 sps:$4 sm:$0xff]  }
 0xd76   :  { %8654 = vmatprep.subr.bf16.mxu0 %v12721_v52  ;;  %8695 = vmatprep.subr.bf16.mxu1 %v12724_v63  ;;  %v12793_v52 = vld [vmem:[#allocation6 + $0x164] ss:$16 sps:$4 sm:$0xff]   ;;  %v12796_v63 = vld [vmem:[#allocation6 + $0x16c] ss:$16 sps:$4 sm:$0xff]  }
 0xd79   :  { %8655 = vmatpush1.bf16.msra.mxu0 %v12719_v6  ;;  %8696 = vmatpush1.bf16.msra.mxu1 %v12722_v36  ;;  %v12791_v6 = vld [vmem:[#allocation6 + $0x160] ss:$16 sps:$4 sm:$0xff]   ;;  %v12794_v36 = vld [vmem:[#allocation6 + $0x168] ss:$16 sps:$4 sm:$0xff]  }
 0xd7a   :  { %9157 = vmatprep.subr.bf16.mxu0 %v12727_v9  ;;  %9198 = vmatprep.subr.bf16.mxu1 %v12730_v49  ;;  %v12799_v9 = vld [vmem:[#allocation6 + $0x184] ss:$16 sps:$4 sm:$0xff]   ;;  %v12802_v49 = vld [vmem:[#allocation6 + $0x18c] ss:$16 sps:$4 sm:$0xff]  }
 0xd7c   :  { %8673 = vmatmul.mubr.bf16.vlgmr.msra.gmra.mrb[72].mxu0 %v13894_v54  ;;  %8714 = vmatmul.mubr.bf16.vlgmr.msra.gmra.mrb[104].mxu1 %v13894_v54  ;;  %v12739_v54 = vld [vmem:[#allocation6 + $0x44] ss:$16 sps:$4 sm:$0xff]  }
 0xd7d   :  { %9189 = vmatprep.mubr.bf16.mxu0 %v13911_v35  ;;  %9230 = vmatprep.mubr.bf16.mxu1 %v13911_v35  ;;  %v12752_v35 = vld [vmem:[#allocation6 + $0x88] ss:$16 sps:$4 sm:$0xff]  }
 0xd7e   :  { %9158 = vmatpush1.bf16.msra.mxu0 %v12725_v14  ;;  %9199 = vmatpush1.bf16.msra.mxu1 %v12728_v32  ;;  %v12797_v14 = vld [vmem:[#allocation6 + $0x180] ss:$16 sps:$4 sm:$0xff]   ;;  %v12800_v32 = vld [vmem:[#allocation6 + $0x188] ss:$16 sps:$4 sm:$0xff]  }
 0xd7f   :  { %9159 = vmatprep.subr.bf16.mxu0 %v12733_v17  ;;  %9200 = vmatprep.subr.bf16.mxu1 %v12736_v13  ;;  %v12803_v17 = vld [vmem:[#allocation6 + $0x1a0] ss:$16 sps:$4 sm:$0xff]   ;;  %v12805_v13 = vld [vmem:[#allocation6 + $0x1a4] ss:$16 sps:$4 sm:$0xff]  }
 0xd82   :  { %9160 = vmatpush1.bf16.msra.mxu0 %v12731_v5  ;;  %9201 = vmatpush1.bf16.msra.mxu1 %v12734_v19  ;;  %v12806_v5 = vld [vmem:[#allocation6 + $0x1a8] ss:$16 sps:$4 sm:$0xff]   ;;  %v12808_v19 = vld [vmem:[#allocation6 + $0x1ac] ss:$16 sps:$4 sm:$0xff]  }
 0xd83   :  { %9161 = vmatprep.subr.bf16.mxu0 %v12739_v54  ;;  %9202 = vmatprep.subr.bf16.mxu1 %v12742_v22  ;;  %v12811_v54 = vld [vmem:[#allocation6 + $0x1c4] ss:$16 sps:$4 sm:$0xff]   ;;  %v12814_v22 = vld [vmem:[#allocation6 + $0x1cc] ss:$16 sps:$4 sm:$0xff]  }
 0xd86   :  { %9162 = vmatpush1.bf16.msra.mxu0 %v12737_v37  ;;  %9203 = vmatpush1.bf16.msra.mxu1 %v12740_v16  ;;  %v12809_v37 = vld [vmem:[#allocation6 + $0x1c0] ss:$16 sps:$4 sm:$0xff]   ;;  %v12812_v16 = vld [vmem:[#allocation6 + $0x1c8] ss:$16 sps:$4 sm:$0xff]  }
 0xd87   :  { %9163 = vmatprep.subr.bf16.mxu0 %v12745_v26  ;;  %9204 = vmatprep.subr.bf16.mxu1 %v12748_v56  ;;  %v12817_v26 = vld [vmem:[#allocation6 + $0x1e4] ss:$16 sps:$4 sm:$0xff]   ;;  %v12820_v56 = vld [vmem:[#allocation6 + $0x1ec] ss:$16 sps:$4 sm:$0xff]  }
 0xd8a   :  { %9164 = vmatpush1.bf16.msra.mxu0 %v12743_v31  ;;  %9205 = vmatpush1.bf16.msra.mxu1 %v12746_v61  ;;  %v12815_v31 = vld [vmem:[#allocation6 + $0x1e0] ss:$16 sps:$4 sm:$0xff]   ;;  %v12818_v61 = vld [vmem:[#allocation6 + $0x1e8] ss:$16 sps:$4 sm:$0xff]  }
 0xd8b   :  { %9165 = vmatprep.subr.bf16.mxu0 %v12751_v57  ;;  %9206 = vmatprep.subr.bf16.mxu1 %v12754_v11  ;;  %v12823_v57 = vld [vmem:[#allocation8 + $0x4] ss:$16 sps:$4 sm:$0xff]   ;;  %v12826_v11 = vld [vmem:[#allocation8 + $0xc] ss:$16 sps:$4 sm:$0xff]  }
 0xd8e   :  { %9166 = vmatpush1.bf16.msra.mxu0 %v12749_v41  ;;  %9207 = vmatpush1.bf16.msra.mxu1 %v12752_v35  ;;  %v7991_v41 = vld [vmem:[%s13997_s7] sm:$0xf] }
 0xd8f   :  { %9167 = vmatprep.subr.bf16.mxu0 %v12757_v43  ;;  %9208 = vmatprep.subr.bf16.mxu1 %v12760_v45  ;;  %v7996_v35 = vrot.slane %v7991_v41, %v13590_v8  ;;  %v8000_v43 = vrot.slane %v7991_v41, %v13592_v10 }
 0xd92   :  { %9168 = vmatpush1.bf16.msra.mxu0 %v12755_v29  ;;  %9209 = vmatpush1.bf16.msra.mxu1 %v12758_v30 }
 0xd93   :  { %9169 = vmatprep.subr.bf16.mxu0 %v12763_v53  ;;  %9210 = vmatprep.subr.bf16.mxu1 %v12766_v60 }
 0xd96   :  { %9170 = vmatpush1.bf16.msra.mxu0 %v12761_v4  ;;  %9211 = vmatpush1.bf16.msra.mxu1 %v12764_v18 }
 0xd97   :  { %9171 = vmatprep.subr.bf16.mxu0 %v12769_v34  ;;  %9212 = vmatprep.subr.bf16.mxu1 %v12772_v51 }
 0xd9a   :  { %9172 = vmatpush1.bf16.msra.mxu0 %v12767_v58  ;;  %9213 = vmatpush1.bf16.msra.mxu1 %v12770_v47 }
 0xd9b   :  { %9173 = vmatprep.subr.bf16.mxu0 %v12775_v2  ;;  %9214 = vmatprep.subr.bf16.mxu1 %v12778_v20  ;;  %v8008_v20 = vrot.slane %v7991_v41, %v13622_v50 }
 0xd9e   :  { %9174 = vmatpush1.bf16.msra.mxu0 %v12773_v27  ;;  %9215 = vmatpush1.bf16.msra.mxu1 %v12776_v0 }
 0xd9f   :  { %9175 = vmatprep.subr.bf16.mxu0 %v12781_v23  ;;  %9216 = vmatprep.subr.bf16.mxu1 %v12784_v38 }
 0xda2   :  { %9176 = vmatpush1.bf16.msra.mxu0 %v12779_v59  ;;  %9217 = vmatpush1.bf16.msra.mxu1 %v12782_v12 }
 0xda3   :  { %9177 = vmatprep.subr.bf16.mxu0 %v12787_v55  ;;  %9218 = vmatprep.subr.bf16.mxu1 %v12790_v40 }
 0xda6   :  { %9178 = vmatpush1.bf16.msra.mxu0 %v12785_v15  ;;  %9219 = vmatpush1.bf16.msra.mxu1 %v12788_v33 }
 0xda7   :  { %9179 = vmatprep.subr.bf16.mxu0 %v12793_v52  ;;  %9220 = vmatprep.subr.bf16.mxu1 %v12796_v63 }
 0xdaa   :  { %9180 = vmatpush1.bf16.msra.mxu0 %v12791_v6  ;;  %9221 = vmatpush1.bf16.msra.mxu1 %v12794_v36 }
 0xdab   :  { %9181 = vmatprep.subr.bf16.mxu0 %v12799_v9  ;;  %9222 = vmatprep.subr.bf16.mxu1 %v12802_v49 }
 0xdae   :  { %9182 = vmatpush1.bf16.msra.mxu0 %v12797_v14  ;;  %9223 = vmatpush1.bf16.msra.mxu1 %v12800_v32 }
 0xdaf   :  { %9183 = vmatprep.subr.bf16.mxu0 %v12805_v13  ;;  %9224 = vmatprep.subr.bf16.mxu1 %v12808_v19  ;;  %v8004_v19 = vrot.slane %v7991_v41, %v13620_v48 }
 0xdb2   :  { %9184 = vmatpush1.bf16.msra.mxu0 %v12803_v17  ;;  %9225 = vmatpush1.bf16.msra.mxu1 %v12806_v5 }
 0xdb3   :  { %9185 = vmatprep.subr.bf16.mxu0 %v12811_v54  ;;  %9226 = vmatprep.subr.bf16.mxu1 %v12814_v22 }
 0xdb6   :  { %9186 = vmatpush1.bf16.msra.mxu0 %v12809_v37  ;;  %9227 = vmatpush1.bf16.msra.mxu1 %v12812_v16 }
 0xdb7   :  { %9187 = vmatprep.subr.bf16.mxu0 %v12817_v26  ;;  %9228 = vmatprep.subr.bf16.mxu1 %v12820_v56 }
 0xdba   :  { %9188 = vmatpush1.bf16.msra.mxu0 %v12815_v31  ;;  %9229 = vmatpush1.bf16.msra.mxu1 %v12818_v61 }
 0xdbb   :  { %9671 = vmatprep.subr.bf16.mxu0 %v12823_v57  ;;  %9712 = vmatprep.subr.bf16.mxu1 %v12826_v11 }
 0xe2f   :  { %v8367_v45 = vpop.f32.mrb[68].mxu0  ;;  %v8408_v29 = vpop.f32.mrb[100].mxu1 }
 0xe30   :  { %v8368_v30 = vadd.f32 %v8367_v45, %v7996_v35  ;;  %v8369_v53 = vpop.f32.mrb[69].mxu0  ;;  %v8410_v60 = vpop.f32.mrb[101].mxu1  ;;  %v8409_v16 = vadd.f32 %v8408_v29, %v8004_v19  ;;  %v12857_v19 = vld [vmem:[#allocation8 + $0xc0] ss:$16 sps:$4 sm:$0xff]  }
 0xe31   :  { %v8370_v4 = vadd.f32 %v8369_v53, %v8000_v43  ;;  %v8371_v18 = vpop.f32.mrb[70].mxu0  ;;  %v8412_v34 = vpop.f32.mrb[102].mxu1  ;;  %v8411_v27 = vadd.f32 %v8410_v60, %v8008_v20 }
 0xe32   :  { %v10985_v51 = vmul.f32 -1.442695, %v8368_v30  ;;  %v8372_v58 = vpop.f32.mrb[71].mxu0  ;;  %v8413_v47 = vpop.f32.mrb[103].mxu1 }
 0xe33   :  { %v10986_v2 = vmul.f32 -1.442695, %v8370_v4  ;;  %v12821_v47 = vld [vmem:[#allocation8] ss:$16 sps:$4 sm:$0xff]  }
 0xe34   :  { %13197 = vpow2.f32 %v10985_v51 }
 0xe35   :  { %13199 = vpow2.f32 %v10986_v2  ;;  %v12824_v2 = vld [vmem:[#allocation8 + $0x8] ss:$16 sps:$4 sm:$0xff]  }
 0xe36   :  { %13201 = vtanh.f32 %v8411_v27  ;;  %v12832_v27 = vld [vmem:[#allocation8 + $0x2c] ss:$16 sps:$4 sm:$0xff]  }
 0xe3e   :  { %v13198_v0 = vpop.eup %13197 }
 0xe3f   :  { %v8424_v23 = vadd.f32 1.0, %v13198_v0  ;;  %v13200_v38 = vpop.eup %13199  ;;  %v12827_v0 = vld [vmem:[#allocation8 + $0x20] ss:$16 sps:$4 sm:$0xff]  }
 0xe40   :  { %v8425_v59 = vadd.f32 1.0, %v13200_v38  ;;  %v13202_v12 = vpop.eup %13201  ;;  %v12835_v38 = vld [vmem:[#allocation8 + $0x44] ss:$16 sps:$4 sm:$0xff]  }
 0xe41   :  { %13203 = vrcp.f32 %v8424_v23  ;;  %v12830_v23 = vld [vmem:[#allocation8 + $0x28] ss:$16 sps:$4 sm:$0xff]  }
 0xe42   :  { %13205 = vrcp.f32 %v8425_v59  ;;  %v12838_v59 = vld [vmem:[#allocation8 + $0x4c] ss:$16 sps:$4 sm:$0xff]  }
 0xe4b   :  { %v13204_v55 = vpop.eup %13203 }
 0xe4c   :  { %v8435_v40 = vmul.f32 %v13204_v55, %v13202_v12  ;;  %v13206_v15 = vpop.eup %13205  ;;  %v12833_v12 = vld [vmem:[#allocation8 + $0x40] ss:$16 sps:$4 sm:$0xff]   ;;  %v12836_v55 = vld [vmem:[#allocation8 + $0x48] ss:$16 sps:$4 sm:$0xff]  }
 0xe4d   :  { %v8434_v33 = vmul.f32 %v13206_v15, %v13880_v25  ;;  %v12844_v15 = vld [vmem:[#allocation8 + $0x6c] ss:$16 sps:$4 sm:$0xff]  }
 0xe4f   :  { %v8674_v52 = vpop.f32.mrb[72].mxu0  ;;  %v8715_v63 = vpop.f32.mrb[104].mxu1  ;;  %v13928_v6 = vadd.f32 %v8435_v40, %v8434_v33  ;;  %v12841_v40 = vld [vmem:[#allocation8 + $0x64] ss:$16 sps:$4 sm:$0xff]   ;;  %v12839_v33 = vld [vmem:[#allocation8 + $0x60] ss:$16 sps:$4 sm:$0xff]  }
 0xe50   :  { %v8722_v36 = vadd.f32 %v8674_v52, %v13616_v42  ;;  %v8724_v9 = vadd.f32 %v8715_v63, %v13646_v21  ;;  %v8676_v49 = vpop.f32.mrb[73].mxu0  ;;  %v8717_v14 = vpop.f32.mrb[105].mxu1  ;;  %v10987_v42 = vmul.f32 -1.442695, %v8409_v16  ;;  %v12842_v52 = vld [vmem:[#allocation8 + $0x68] ss:$16 sps:$4 sm:$0xff]  }
 0xe51   :  { %v8723_v32 = vadd.f32 %v8676_v49, %v13618_v44  ;;  %v8725_v17 = vadd.f32 %v8717_v14, %v13648_v24  ;;  %v8678_v13 = vpop.f32.mrb[74].mxu0  ;;  %v8719_v5 = vpop.f32.mrb[106].mxu1  ;;  %v12847_v63 = vld [vmem:[#allocation8 + $0x84] ss:$16 sps:$4 sm:$0xff]   ;;  %v12848_v49 = vld [vmem:[#allocation8 + $0x88] ss:$16 sps:$4 sm:$0xff]  }
 0xe52   :  { %v11020_v54 = vmul.f32 -1.442695, %v8722_v36  ;;  %v8679_v25 = vpop.f32.mrb[75].mxu0  ;;  %v8720_v22 = vpop.f32.mrb[107].mxu1  ;;  %v11022_v26 = vmul.f32 -1.442695, %v8724_v9 }
 0xe53   :  { %v11021_v37 = vmul.f32 -1.442695, %v8723_v32  ;;  %v12845_v36 = vld [vmem:[#allocation8 + $0x80] ss:$16 sps:$4 sm:$0xff]   ;;  %v12850_v9 = vld [vmem:[#allocation8 + $0x8c] ss:$16 sps:$4 sm:$0xff]  }
 0xe54   :  { %13207 = vpow2.f32 %v11020_v54  ;;  %v12853_v14 = vld [vmem:[#allocation8 + $0xa4] ss:$16 sps:$4 sm:$0xff]   ;;  %v12851_v32 = vld [vmem:[#allocation8 + $0xa0] ss:$16 sps:$4 sm:$0xff]   ;;  %v12854_v13 = vld [vmem:[#allocation8 + $0xa8] ss:$16 sps:$4 sm:$0xff]  }
 0xe55   :  { %13209 = vpow2.f32 %v11021_v37  ;;  %v12859_v5 = vld [vmem:[#allocation8 + $0xc4] ss:$16 sps:$4 sm:$0xff]   ;;  %v12862_v54 = vld [vmem:[#allocation8 + $0xcc] ss:$16 sps:$4 sm:$0xff]   ;;  %v12860_v25 = vld [vmem:[#allocation8 + $0xc8] ss:$16 sps:$4 sm:$0xff]  }
 0xe56   :  { %13211 = vpow2.f32 %v10987_v42  ;;  %v12865_v22 = vld [vmem:[#allocation8 + $0xe4] ss:$16 sps:$4 sm:$0xff]   ;;  %v12863_v37 = vld [vmem:[#allocation8 + $0xe0] ss:$16 sps:$4 sm:$0xff]   ;;  %v12868_v16 = vld [vmem:[#allocation8 + $0xec] ss:$16 sps:$4 sm:$0xff]  }
 0xe57   :  { %13213 = vtanh.f32 %v8725_v17  ;;  %v12856_v17 = vld [vmem:[#allocation8 + $0xac] ss:$16 sps:$4 sm:$0xff]   ;;  %v12866_v42 = vld [vmem:[#allocation8 + $0xe8] ss:$16 sps:$4 sm:$0xff]  }
 0xe58   :  { %13215 = vpow2.f32 %v11022_v26  ;;  %v12871_v26 = vld [vmem:[#allocation8 + $0x104] ss:$16 sps:$4 sm:$0xff]  }
 0xe5e   :  { %v13208_v21 = vpop.eup %13207 }
 0xe5f   :  { %v8735_v56 = vadd.f32 1.0, %v13208_v21  ;;  %v13210_v44 = vpop.eup %13209  ;;  %v12869_v21 = vld [vmem:[#allocation8 + $0x100] ss:$16 sps:$4 sm:$0xff]  }
 0xe60   :  { %v8736_v24 = vadd.f32 1.0, %v13210_v44  ;;  %v13212_v31 = vpop.eup %13211  ;;  %v12872_v44 = vld [vmem:[#allocation8 + $0x108] ss:$16 sps:$4 sm:$0xff]  }
 0xe61   :  { %13217 = vrcp.f32 %v8735_v56  ;;  %v13214_v61 = vpop.eup %13213  ;;  %v8426_v41 = vadd.f32 1.0, %v13212_v31  ;;  %v12874_v56 = vld [vmem:[#allocation8 + $0x10c] ss:$16 sps:$4 sm:$0xff]   ;;  %v12875_v31 = vld [vmem:[#allocation8 + $0x120] ss:$16 sps:$4 sm:$0xff]  }
 0xe62   :  { %13219 = vrcp.f32 %v8736_v24  ;;  %v13216_v57 = vpop.eup %13215  ;;  %v12877_v24 = vld [vmem:[#allocation8 + $0x124] ss:$16 sps:$4 sm:$0xff]  }
 0xe63   :  { %v8737_v45 = vadd.f32 1.0, %v13216_v57  ;;  %13221 = vtanh.f32 %v13928_v6  ;;  %v12878_v57 = vld [vmem:[#allocation8 + $0x128] ss:$16 sps:$4 sm:$0xff]  }
 0xe64   :  { %13223 = vrcp.f32 %v8426_v41  ;;  %v12881_v41 = vld [vmem:[#allocation8 + $0x140] ss:$16 sps:$4 sm:$0xff]  }
 0xe65   :  { %13225 = vrcp.f32 %v8737_v45  ;;  %v12889_v45 = vld [vmem:[#allocation8 + $0x164] ss:$16 sps:$4 sm:$0xff]  }
 0xe6b   :  { %v13218_v11 = vpop.eup %13217 }
 0xe6c   :  { %v8746_v35 = vmul.f32 %v13218_v11, %v13214_v61  ;;  %v13220_v43 = vpop.eup %13219  ;;  %v12880_v61 = vld [vmem:[#allocation8 + $0x12c] ss:$16 sps:$4 sm:$0xff]   ;;  %v12883_v11 = vld [vmem:[#allocation8 + $0x144] ss:$16 sps:$4 sm:$0xff]  }
 0xe6d   :  { %v8745_v29 = vmul.f32 %v13220_v43, %v13889_v7  ;;  %v13222_v53 = vpop.eup %13221  ;;  %v12829_v7 = vld [vmem:[#allocation8 + $0x24] ss:$16 sps:$4 sm:$0xff]   ;;  %v12884_v43 = vld [vmem:[#allocation8 + $0x148] ss:$16 sps:$4 sm:$0xff]  }
 0xe6e   :  { %v13224_v60 = vpop.eup %13223 }
 0xe6f   :  { %v8747_v30 = vadd.f32 %v8746_v35, %v8745_v29  ;;  %v13226_v4 = vpop.eup %13225  ;;  %v13937_v34 = vmul.f32 %v13224_v60, %v13222_v53  ;;  %v12886_v35 = vld [vmem:[#allocation8 + $0x14c] ss:$16 sps:$4 sm:$0xff]   ;;  %v12887_v29 = vld [vmem:[#allocation8 + $0x160] ss:$16 sps:$4 sm:$0xff]   ;;  %v12890_v53 = vld [vmem:[#allocation8 + $0x168] ss:$16 sps:$4 sm:$0xff]  }
 0xe70   :  { %v12895_v60 = vld [vmem:[#allocation8 + $0x184] ss:$16 sps:$4 sm:$0xff]  }
 0xe71   :  { %13227 = vtanh.f32 %v8747_v30  ;;  %v9264_v20 = vpack.c.bf16 %v13937_v34, %v13937_v34  ;;  %v12892_v30 = vld [vmem:[#allocation8 + $0x16c] ss:$16 sps:$4 sm:$0xff]  }
 0xe7b   :  { %v13228_v18 = vpop.eup %13227 }
 0xe7c   :  { %v8749_v51 = vmul.f32 %v13228_v18, %v13226_v4  ;;  %v12893_v4 = vld [vmem:[#allocation8 + $0x180] ss:$16 sps:$4 sm:$0xff]   ;;  %v12898_v18 = vld [vmem:[#allocation8 + $0x18c] ss:$16 sps:$4 sm:$0xff]  }
 0xe7e   :  { %v8750_v58 = vpack.c.bf16 %v8749_v51, %v8749_v51  ;;  %v12896_v51 = vld [vmem:[#allocation8 + $0x188] ss:$16 sps:$4 sm:$0xff]  }
 0xe80   :  { %9190 = vmatmul.mubr.bf16.vlgmr.msra.gmra.mrb[76].mxu0 %v8750_v58  ;;  %9231 = vmatmul.mubr.bf16.vlgmr.msra.gmra.mrb[108].mxu1 %v8750_v58  ;;  %v12899_v58 = vld [vmem:[#allocation8 + $0x1a0] ss:$16 sps:$4 sm:$0xff]  }
 0xe81   :  { %9703 = vmatprep.mubr.bf16.mxu0 %v9264_v20  ;;  %9744 = vmatprep.mubr.bf16.mxu1 %v9264_v20  ;;  %v12904_v20 = vld [vmem:[#allocation8 + $0x1ac] ss:$16 sps:$4 sm:$0xff]  }
 0xe82   :  { %9672 = vmatpush1.bf16.msra.mxu0 %v12821_v47  ;;  %9713 = vmatpush1.bf16.msra.mxu1 %v12824_v2  ;;  %v12901_v47 = vld [vmem:[#allocation8 + $0x1a4] ss:$16 sps:$4 sm:$0xff]   ;;  %v12902_v2 = vld [vmem:[#allocation8 + $0x1a8] ss:$16 sps:$4 sm:$0xff]  }
 0xe83   :  { %9673 = vmatprep.subr.bf16.mxu0 %v12829_v7  ;;  %9714 = vmatprep.subr.bf16.mxu1 %v12832_v27  ;;  %v12907_v7 = vld [vmem:[#allocation8 + $0x1c4] ss:$16 sps:$4 sm:$0xff]   ;;  %v12910_v27 = vld [vmem:[#allocation8 + $0x1cc] ss:$16 sps:$4 sm:$0xff]  }
 0xe86   :  { %9674 = vmatpush1.bf16.msra.mxu0 %v12827_v0  ;;  %9715 = vmatpush1.bf16.msra.mxu1 %v12830_v23  ;;  %v12905_v0 = vld [vmem:[#allocation8 + $0x1c0] ss:$16 sps:$4 sm:$0xff]   ;;  %v12908_v23 = vld [vmem:[#allocation8 + $0x1c8] ss:$16 sps:$4 sm:$0xff]  }
 0xe87   :  { %9675 = vmatprep.subr.bf16.mxu0 %v12835_v38  ;;  %9716 = vmatprep.subr.bf16.mxu1 %v12838_v59  ;;  %v12913_v38 = vld [vmem:[#allocation8 + $0x1e4] ss:$16 sps:$4 sm:$0xff]   ;;  %v12916_v59 = vld [vmem:[#allocation8 + $0x1ec] ss:$16 sps:$4 sm:$0xff]  }
 0xe8a   :  { %9676 = vmatpush1.bf16.msra.mxu0 %v12833_v12  ;;  %9717 = vmatpush1.bf16.msra.mxu1 %v12836_v55  ;;  %v12911_v12 = vld [vmem:[#allocation8 + $0x1e0] ss:$16 sps:$4 sm:$0xff]   ;;  %v12914_v55 = vld [vmem:[#allocation8 + $0x1e8] ss:$16 sps:$4 sm:$0xff]  }
 0xe8b   :  { %9677 = vmatprep.subr.bf16.mxu0 %v12841_v40  ;;  %9718 = vmatprep.subr.bf16.mxu1 %v12844_v15  ;;  %v12917_v40 = vld [vmem:[#allocation9] sm:$0xff]  }
 0xe8c   :  { %v8815_v15 = vld [vmem:[%s13995_s5] sm:$0xf] }
 0xe8e   :  { %9678 = vmatpush1.bf16.msra.mxu0 %v12839_v33  ;;  %9719 = vmatpush1.bf16.msra.mxu1 %v12842_v52  ;;  %v8820_v33 = vrot.slane %v8815_v15, %v13590_v8  ;;  %v8824_v52 = vrot.slane %v8815_v15, %v13592_v10 }
 0xe8f   :  { %9679 = vmatprep.subr.bf16.mxu0 %v12847_v63  ;;  %9720 = vmatprep.subr.bf16.mxu1 %v12850_v9 }
 0xe92   :  { %9680 = vmatpush1.bf16.msra.mxu0 %v12845_v36  ;;  %9721 = vmatpush1.bf16.msra.mxu1 %v12848_v49 }
 0xe93   :  { %9681 = vmatprep.subr.bf16.mxu0 %v12853_v14  ;;  %9722 = vmatprep.subr.bf16.mxu1 %v12856_v17 }
 0xe96   :  { %9682 = vmatpush1.bf16.msra.mxu0 %v12851_v32  ;;  %9723 = vmatpush1.bf16.msra.mxu1 %v12854_v13 }
 0xe97   :  { %9683 = vmatprep.subr.bf16.mxu0 %v12859_v5  ;;  %9724 = vmatprep.subr.bf16.mxu1 %v12862_v54 }
 0xe9a   :  { %9684 = vmatpush1.bf16.msra.mxu0 %v12857_v19  ;;  %9725 = vmatpush1.bf16.msra.mxu1 %v12860_v25 }
 0xe9b   :  { %9685 = vmatprep.subr.bf16.mxu0 %v12865_v22  ;;  %9726 = vmatprep.subr.bf16.mxu1 %v12868_v16  ;;  %v8828_v22 = vrot.slane %v8815_v15, %v13620_v48 }
 0xe9e   :  { %9686 = vmatpush1.bf16.msra.mxu0 %v12863_v37  ;;  %9727 = vmatpush1.bf16.msra.mxu1 %v12866_v42  ;;  %v8832_v37 = vrot.slane %v8815_v15, %v13622_v50 }
 0xe9f   :  { %9687 = vmatprep.subr.bf16.mxu0 %v12871_v26  ;;  %9728 = vmatprep.subr.bf16.mxu1 %v12874_v56 }
 0xea2   :  { %9688 = vmatpush1.bf16.msra.mxu0 %v12869_v21  ;;  %9729 = vmatpush1.bf16.msra.mxu1 %v12872_v44 }
 0xea3   :  { %9689 = vmatprep.subr.bf16.mxu0 %v12877_v24  ;;  %9730 = vmatprep.subr.bf16.mxu1 %v12880_v61 }
 0xea6   :  { %9690 = vmatpush1.bf16.msra.mxu0 %v12875_v31  ;;  %9731 = vmatpush1.bf16.msra.mxu1 %v12878_v57 }
 0xea7   :  { %9691 = vmatprep.subr.bf16.mxu0 %v12883_v11  ;;  %9732 = vmatprep.subr.bf16.mxu1 %v12886_v35 }
 0xeaa   :  { %9692 = vmatpush1.bf16.msra.mxu0 %v12881_v41  ;;  %9733 = vmatpush1.bf16.msra.mxu1 %v12884_v43 }
 0xeab   :  { %9693 = vmatprep.subr.bf16.mxu0 %v12889_v45  ;;  %9734 = vmatprep.subr.bf16.mxu1 %v12892_v30 }
 0xeae   :  { %9694 = vmatpush1.bf16.msra.mxu0 %v12887_v29  ;;  %9735 = vmatpush1.bf16.msra.mxu1 %v12890_v53 }
 0xeaf   :  { %9695 = vmatprep.subr.bf16.mxu0 %v12895_v60  ;;  %9736 = vmatprep.subr.bf16.mxu1 %v12898_v18  ;;  %v13261_v18 = vld [vmem:[%s14000_s10] sm:$0xff] }
 0xeb2   :  { %9696 = vmatpush1.bf16.msra.mxu0 %v12893_v4  ;;  %9737 = vmatpush1.bf16.msra.mxu1 %v12896_v51  ;;  %v12918_v4 = vld [vmem:[#allocation9 + $0x8] sm:$0xff]   ;;  %v9787_v51 = vpack.c.bf16 %v13700_v46, %v13261_v18  ;;  %v12924_v46 = vld [vmem:[#allocation9 + $0x38] sm:$0xff]  }
 0xeb3   :  { %9697 = vmatprep.subr.bf16.mxu0 %v12901_v47  ;;  %9738 = vmatprep.subr.bf16.mxu1 %v12904_v20  ;;  %v12921_v47 = vld [vmem:[#allocation9 + $0x20] sm:$0xff]   ;;  %v12923_v20 = vld [vmem:[#allocation9 + $0x30] sm:$0xff]  }
 0xeb6   :  { %9698 = vmatpush1.bf16.msra.mxu0 %v12899_v58  ;;  %9739 = vmatpush1.bf16.msra.mxu1 %v12902_v2  ;;  %v12920_v58 = vld [vmem:[#allocation9 + $0x18] sm:$0xff]   ;;  %v12922_v2 = vld [vmem:[#allocation9 + $0x28] sm:$0xff]  }
 0xeb7   :  { %9699 = vmatprep.subr.bf16.mxu0 %v12907_v7  ;;  %9740 = vmatprep.subr.bf16.mxu1 %v12910_v27  ;;  %v9788_v7 = vpack.c.bf16 %v13796_v39, %v13748_v1  ;;  %v9789_v27 = vpack.c.bf16 %v13892_v3, %v13844_v28 }
 0xeba   :  { %9700 = vmatpush1.bf16.msra.mxu0 %v12905_v0  ;;  %9741 = vmatpush1.bf16.msra.mxu1 %v12908_v23  ;;  %v9329_v0 = vld [vmem:[%s13997_s7] sm:$0xf] }
 0xebb   :  { %9701 = vmatprep.subr.bf16.mxu0 %v12913_v38  ;;  %9742 = vmatprep.subr.bf16.mxu1 %v12916_v59  ;;  %v9334_v23 = vrot.slane %v9329_v0, %v13590_v8  ;;  %v9338_v38 = vrot.slane %v9329_v0, %v13592_v10  ;;  %v9346_v8 = vrot.slane %v9329_v0, %v13622_v50  ;;  %v11157_v50 = vld [vmem:[%s13999_s9] ss:$0 sm:$0xff] }
 0xebe   :  { %9702 = vmatpush1.bf16.msra.mxu0 %v12911_v12  ;;  %9743 = vmatpush1.bf16.msra.mxu1 %v12914_v55 }
 0xebf   :  { %11178 = vmatprep.subr.bf16.mxu0 %v12917_v40 }
 0xf53   :  { %v9191_v63 = vpop.f32.mrb[76].mxu0  ;;  %v9232_v36 = vpop.f32.mrb[108].mxu1 }
 0xf54   :  { %v9192_v9 = vadd.f32 %v9191_v63, %v8820_v33  ;;  %v9193_v49 = vpop.f32.mrb[77].mxu0  ;;  %v9234_v14 = vpop.f32.mrb[109].mxu1  ;;  %v9233_v16 = vadd.f32 %v9232_v36, %v8828_v22  ;;  %v9342_v36 = vrot.slane %v9329_v0, %v13620_v48 }
 0xf55   :  { %v9194_v32 = vadd.f32 %v9193_v49, %v8824_v52  ;;  %v9195_v17 = vpop.f32.mrb[78].mxu0  ;;  %v9236_v13 = vpop.f32.mrb[110].mxu1  ;;  %v9235_v42 = vadd.f32 %v9234_v14, %v8832_v37 }
 0xf56   :  { %v11087_v5 = vmul.f32 -1.442695, %v9192_v9  ;;  %v9196_v19 = vpop.f32.mrb[79].mxu0  ;;  %v9237_v54 = vpop.f32.mrb[111].mxu1  ;;  %v11089_v26 = vmul.f32 -1.442695, %v9233_v16 }
 0xf57   :  { %v11088_v25 = vmul.f32 -1.442695, %v9194_v32 }
 0xf58   :  { %13229 = vpow2.f32 %v11087_v5 }
 0xf59   :  { %13231 = vpow2.f32 %v11088_v25 }
 0xf5a   :  { %13233 = vtanh.f32 %v9235_v42 }
 0xf5b   :  { %13235 = vpow2.f32 %v11089_v26 }
 0xf62   :  { %v13230_v21 = vpop.eup %13229 }
 0xf63   :  { %v9248_v56 = vadd.f32 1.0, %v13230_v21  ;;  %v13232_v44 = vpop.eup %13231 }
 0xf64   :  { %v9249_v24 = vadd.f32 1.0, %v13232_v44  ;;  %v13234_v31 = vpop.eup %13233 }
 0xf65   :  { %13237 = vrcp.f32 %v9248_v56  ;;  %v13236_v61 = vpop.eup %13235 }
 0xf66   :  { %13239 = vrcp.f32 %v9249_v24  ;;  %v9250_v35 = vadd.f32 1.0, %v13236_v61 }
 0xf68   :  { %13241 = vrcp.f32 %v9250_v35 }
 0xf6f   :  { %v13238_v57 = vpop.eup %13237 }
 0xf70   :  { %v9259_v11 = vmul.f32 %v13238_v57, %v13234_v31  ;;  %v13240_v41 = vpop.eup %13239 }
 0xf71   :  { %v9258_v43 = vmul.f32 %v13240_v41, %v13908_v62  ;;  %v12919_v62 = vld [vmem:[#allocation9 + $0x10] sm:$0xff]  }
 0xf72   :  { %v13242_v29 = vpop.eup %13241 }
 0xf73   :  { %v9260_v45 = vadd.f32 %v9259_v11, %v9258_v43 }
 0xf75   :  { %13243 = vtanh.f32 %v9260_v45 }
 0xf7f   :  { %v13244_v30 = vpop.eup %13243 }
 0xf80   :  { %v9262_v53 = vmul.f32 %v13244_v30, %v13242_v29 }
 0xf82   :  { %v9263_v60 = vpack.c.bf16 %v9262_v53, %v9262_v53 }
 0xf84   :  { %9704 = vmatmul.mubr.bf16.vlgmr.msra.gmra.mrb[80].mxu0 %v9263_v60  ;;  %9745 = vmatmul.mubr.bf16.vlgmr.msra.gmra.mrb[112].mxu1 %v9263_v60 }
 0xf85   :  { %11179 = vmatpush3.bf16.msra.mxu0 %v12917_v40  ;;  %11194 = vmatprep.mubr.bf16.mxu0 %v9787_v51 }
 0xf86   :  { %11180 = vmatprep.subr.bf16.mxu0 %v12918_v4 }
 0xf89   :  { %11181 = vmatpush3.bf16.msra.mxu0 %v12918_v4 }
 0xf8a   :  { %11182 = vmatprep.subr.bf16.mxu0 %v12919_v62 }
 0xf8d   :  { %11183 = vmatpush3.bf16.msra.mxu0 %v12919_v62 }
 0xf8e   :  { %11184 = vmatprep.subr.bf16.mxu0 %v12920_v58 }
 0xf91   :  { %11185 = vmatpush3.bf16.msra.mxu0 %v12920_v58 }
 0xf92   :  { %11186 = vmatprep.subr.bf16.mxu0 %v12921_v47 }
 0xf95   :  { %11187 = vmatpush3.bf16.msra.mxu0 %v12921_v47 }
 0xf96   :  { %11188 = vmatprep.subr.bf16.mxu0 %v12922_v2 }
 0xf99   :  { %11189 = vmatpush3.bf16.msra.mxu0 %v12922_v2 }
 0xf9a   :  { %11190 = vmatprep.subr.bf16.mxu0 %v12923_v20 }
 0xf9d   :  { %11191 = vmatpush3.bf16.msra.mxu0 %v12923_v20 }
 0xf9e   :  { %11192 = vmatprep.subr.bf16.mxu0 %v12924_v46 }
 0xfa1   :  { %11193 = vmatpush3.bf16.msra.mxu0 %v12924_v46 }
 0xfa4   :  { %11195 = vmatmul.mubr.bf16.vlgmr.msra.gmra.mrb[84].mxu0 %v9788_v7 }
 0xfa5   :  { %11198 = vmatprep.mubr.bf16.mxu0 %v9789_v27 }
0x1057   :  { %v9705_v59 = vpop.f32.mrb[80].mxu0  ;;  %v9746_v12 = vpop.f32.mrb[112].mxu1 }
0x1058   :  { %v9706_v55 = vadd.f32 %v9705_v59, %v9334_v23  ;;  %v9707_v40 = vpop.f32.mrb[81].mxu0  ;;  %v9748_v15 = vpop.f32.mrb[113].mxu1  ;;  %v9747_v9 = vadd.f32 %v9746_v12, %v9342_v36 }
0x1059   :  { %v9708_v33 = vadd.f32 %v9707_v40, %v9338_v38  ;;  %v9709_v1 = vpop.f32.mrb[82].mxu0  ;;  %v9750_v39 = vpop.f32.mrb[114].mxu1  ;;  %v9749_v10 = vadd.f32 %v9748_v15, %v9346_v8 }
0x105a   :  { %v11154_v52 = vmul.f32 -1.442695, %v9706_v55  ;;  %v9710_v28 = vpop.f32.mrb[83].mxu0  ;;  %v9751_v3 = vpop.f32.mrb[115].mxu1  ;;  %v11156_v49 = vmul.f32 -1.442695, %v9747_v9 }
0x105b   :  { %v11155_v63 = vmul.f32 -1.442695, %v9708_v33 }
0x105c   :  { %13245 = vpow2.f32 %v11154_v52 }
0x105d   :  { %13247 = vpow2.f32 %v11155_v63 }
0x105e   :  { %13249 = vtanh.f32 %v9749_v10 }
0x105f   :  { %13251 = vpow2.f32 %v11156_v49 }
0x1066   :  { %v13246_v14 = vpop.eup %13245 }
0x1067   :  { %v9762_v32 = vadd.f32 1.0, %v13246_v14  ;;  %v13248_v17 = vpop.eup %13247 }
0x1068   :  { %v9763_v13 = vadd.f32 1.0, %v13248_v17  ;;  %v13250_v5 = vpop.eup %13249 }
0x1069   :  { %13253 = vrcp.f32 %v9762_v32  ;;  %v13252_v19 = vpop.eup %13251 }
0x106a   :  { %13255 = vrcp.f32 %v9763_v13  ;;  %v9764_v48 = vadd.f32 1.0, %v13252_v19 }
0x106c   :  { %13257 = vrcp.f32 %v9764_v48 }
0x1073   :  { %v13254_v54 = vpop.eup %13253 }
0x1074   :  { %v9773_v25 = vmul.f32 %v13254_v54, %v13250_v5  ;;  %v13256_v22 = vpop.eup %13255 }
0x1075   :  { %v9772_v37 = vmul.f32 %v13256_v22, %v13928_v6 }
0x1076   :  { %v13258_v6 = vpop.eup %13257 }
0x1077   :  { %v11196_v16 = vpop.f32.mrb[84].mxu0  ;;  %v9774_v42 = vadd.f32 %v9773_v25, %v9772_v37 }
0x1078   :  { %v9905_v26 = vadd.f32 %v11196_v16, %v11157_v50  ;;  %v9896_v21 = vpop.f32.mrb[85].mxu0 }
0x1079   :  { %v11197_v56 = vpop.f32.mrb[86].mxu0  ;;  %13259 = vtanh.f32 %v9774_v42 }
0x107a   :  { %9929 = vst [vmem:[%s14000_s10 + $0x10] sm:$0xff] %v9905_v26  ;;  %v9908_v44 = vadd.f32 %v11197_v56, %v11157_v50  ;;  %v9899_v24 = vpop.f32.mrb[87].mxu0 }
0x107b   :  { %v9900_v31 = vadd.f32 %v11157_v50, %v9899_v24 }
0x107c   :  { %9930 = vst [vmem:[%s14000_s10 + $0x18] sm:$0xff] %v9908_v44 }
0x107d   :  { %9928 = vst [vmem:[%s14000_s10 + $0x8] sm:$0xff] %v9900_v31 }
0x1083   :  { %v13260_v61 = vpop.eup %13259 }
0x1084   :  { %v9776_v57 = vmul.f32 %v13260_v61, %v13258_v6 }
0x1086   :  { %v9790_v11 = vpack.c.bf16 %v9776_v57, %v13937_v34 }
0x1088   :  { %11199 = vmatmul.mubr.bf16.gmra.mrb[88].mxu0 %v9790_v11 }
0x115b   :  { %v11200_v41 = vpop.f32.mrb[88].mxu0 }
0x115c   :  { %v9921_v35 = vadd.f32 %v11200_v41, %v11157_v50  ;;  %v9912_v43 = vpop.f32.mrb[89].mxu0 }
0x115d   :  { %v9913_v45 = vadd.f32 %v11157_v50, %v9912_v43  ;;  %v11201_v29 = vpop.f32.mrb[90].mxu0 }
0x115e   :  { %9933 = vst [vmem:[%s14000_s10 + $0x30] sm:$0xff] %v9921_v35  ;;  %v9924_v30 = vadd.f32 %v11201_v29, %v11157_v50  ;;  %v9915_v53 = vpop.f32.mrb[91].mxu0 }
0x115f   :  { %9931 = vst [vmem:[%s14000_s10 + $0x20] sm:$0xff] %v9913_v45  ;;  %v9916_v60 = vadd.f32 %v11157_v50, %v9915_v53 }
0x1160   :  { %9934 = vst [vmem:[%s14000_s10 + $0x38] sm:$0xff] %v9924_v30 }
0x1161   :  { %9932 = vst [vmem:[%s14000_s10 + $0x28] sm:$0xff] %v9916_v60 }
0x1162   :  { %9940 = vsyncpa [#allocation5], 1 }
0x1163   :  { %9941 = vsyncpa [#allocation7], 1 }
0x1164   :  { %9942 = vsyncpa [#allocation10], 1 }

</bundles_post_ra>
